<compile_context>
chip_gen: v7x
topology: tpu7x:2x2x1
jax: 0.10.0
libtpu: 0.0.40
codegen_flags: <defaults>
</compile_context>

<pallas_src>
import jax
import jax.numpy as jnp
import numpy as np
from jax.experimental import pallas as pl
from jax.experimental.pallas import tpu as pltpu


def residual_block_kernel(x_ref, w1_ref, t1_ref, w2_ref, t2_ref, o_ref,
                          pad_ref):
    """One grid step = B_tile batch elements (NHWC).

    x_ref  : (B, H, W, C)        input tile (f32)
    wK_ref : (9*C, C)            im2col conv weights, BN scale pre-folded
    tK_ref : (1, C)              folded shift (conv bias + BN stats + beta), f32
    o_ref  : (B, H, W, C)        output tile (f32)
    pad_ref: VMEM (B, H+2, W+2, C) zero-padded image in matmul dtype
    """
    B, H, W, C = x_ref.shape
    cdt = pad_ref.dtype                      # dtype fed to the MXU

    # Zero ONLY the 1-pixel spatial border; the interior is fully overwritten.
    pad_ref[:, 0:1, :, :] = jnp.zeros((B, 1, W + 2, C), cdt)
    pad_ref[:, H + 1:H + 2, :, :] = jnp.zeros((B, 1, W + 2, C), cdt)
    pad_ref[:, :, 0:1, :] = jnp.zeros((B, H + 2, 1, C), cdt)
    pad_ref[:, :, W + 1:W + 2, :] = jnp.zeros((B, H + 2, 1, C), cdt)

    def patch(k):
        dy, dx = k // 3, k % 3
        return pad_ref[:, dy:dy + H, dx:dx + W, :].reshape(B * H * W, C)

    def conv3x3(w_ref):
        if C >= 128:
            # Production path: K=C already fills the systolic array; skip the
            # 9x-image im2col materialization and accumulate 9 matmuls in f32.
            acc = jnp.zeros((B * H * W, C), jnp.float32)
            for k in range(9):                              # static unroll
                acc = acc + jnp.dot(patch(k), w_ref[k * C:(k + 1) * C, :],
                                    preferred_element_type=jnp.float32)
            return acc
        # Small-C path: one big matmul with K = 9*C; im2col built in registers
        # (no masked column-strip stores to a VMEM scratch, no reload).
        col = jnp.concatenate([patch(k) for k in range(9)], axis=-1)
        return jnp.dot(col, w_ref[...], preferred_element_type=jnp.float32)

    # Conv1 + folded BN1 + ReLU.  Single cast of x into the compute dtype.
    pad_ref[:, 1:H + 1, 1:W + 1, :] = x_ref[...].astype(cdt)
    h = jnp.maximum(conv3x3(w1_ref) + t1_ref[...], 0.0)

    # ReLU result straight into the pad interior for Conv2 (single cast).
    pad_ref[:, 1:H + 1, 1:W + 1, :] = h.reshape(B, H, W, C).astype(cdt)

    # Conv2 + folded BN2, residual add in f32.
    h = conv3x3(w2_ref) + t2_ref[...]
    out = x_ref[...].astype(jnp.float32) + h.reshape(B, H, W, C)
    o_ref[...] = out.astype(o_ref.dtype)


def _pick_vmem_limit():
    # Generation-aware scoped-VMEM limit: ~half of physical VMEM
    # (128 MiB on v5e/v6e -> 64 MiB; 64 MiB on v7x -> 32 MiB).
    try:
        cap = getattr(pltpu.get_tpu_info(), "vmem_capacity_bytes", None)
        if cap:
            return int(max(32 * 1024 * 1024, min(100 * 1024 * 1024, cap // 2)))
    except Exception:
        pass
    return 32 * 1024 * 1024


def _pick_b_tile(n, h, w, c, compute_bytes, budget_bytes=8 * 1024 * 1024):
    # Largest divisor of n whose per-step working set (pad scratch in compute
    # dtype + double-buffered f32 in/out blocks) stays under the budget.
    per_img = ((h + 2) * (w + 2) * c * compute_bytes
               + 2 * 2 * h * w * c * 4)
    b = 1
    for d in range(1, n + 1):
        if n % d == 0 and d * per_img <= budget_bytes:
            b = d
    return b


def residual_block(x_nchw, params, eps=1e-5, matmul_dtype=jnp.bfloat16):
    """NCHW in / NCHW out, params in PyTorch layouts.

    matmul_dtype: dtype of the MXU operands (padded activations + weights).
    bf16 (default) gives the native MXU rate and halves scratch traffic; pass
    jnp.float32 for strict numerical comparison against an f32 reference.
    """
    x = jnp.transpose(x_nchw, (0, 2, 3, 1)).astype(jnp.float32)   # -> NHWC
    N, H, W, C = x.shape

    def fold(w, cb, gamma, beta, mean, var):
        # torch conv weight (Cout, Cin, 3, 3) -> (ky, kx, Cin, Cout) -> (9*Cin, Cout)
        wk = jnp.transpose(w, (2, 3, 1, 0)).reshape(9 * C, C)
        scale = gamma / jnp.sqrt(var + eps)               # (Cout,)
        wk = wk * scale[None, :]                          # fold BN scale into weights
        shift = (cb - mean) * scale + beta                # conv bias + BN shift
        return wk.astype(matmul_dtype), shift.reshape(1, C).astype(jnp.float32)

    w1k, t1 = fold(params["w1"], params["cb1"], params["g1"],
                   params["b1"], params["m1"], params["v1"])
    w2k, t2 = fold(params["w2"], params["cb2"], params["g2"],
                   params["b2"], params["m2"], params["v2"])

    compute_bytes = jnp.dtype(matmul_dtype).itemsize
    b_tile = _pick_b_tile(N, H, W, C, compute_bytes)

    out = pl.pallas_call(
        residual_block_kernel,
        out_shape=jax.ShapeDtypeStruct((N, H, W, C), jnp.float32),
        grid_spec=pltpu.PrefetchScalarGridSpec(
            num_scalar_prefetch=0,
            grid=(N // b_tile,),
            in_specs=[
                pl.BlockSpec((b_tile, H, W, C), lambda n: (n, 0, 0, 0)),
                pl.BlockSpec((9 * C, C), lambda n: (0, 0)),
                pl.BlockSpec((1, C), lambda n: (0, 0)),
                pl.BlockSpec((9 * C, C), lambda n: (0, 0)),
                pl.BlockSpec((1, C), lambda n: (0, 0)),
            ],
            out_specs=pl.BlockSpec((b_tile, H, W, C), lambda n: (n, 0, 0, 0)),
            scratch_shapes=[
                pltpu.VMEM((b_tile, H + 2, W + 2, C), matmul_dtype),
            ],
        ),
        compiler_params=pltpu.CompilerParams(
            dimension_semantics=("parallel",),
            vmem_limit_bytes=_pick_vmem_limit(),
        ),
    )(x, w1k, t1, w2k, t2)
    return jnp.transpose(out, (0, 3, 1, 2))               # -> NCHW


def reference_forward(x, p, eps=1e-5):
    """Pure-JAX reference of the PyTorch module (eval-mode BN)."""
    def conv(h, w, b):
        y = jax.lax.conv_general_dilated(
            h, w, window_strides=(1, 1), padding=((1, 1), (1, 1)),
            dimension_numbers=("NCHW", "OIHW", "NCHW"),
            precision=jax.lax.Precision.HIGHEST)
        return y + b[None, :, None, None]

    def bn(h, g, b, m, v):
        return ((h - m[None, :, None, None]) /
                jnp.sqrt(v[None, :, None, None] + eps)) * g[None, :, None, None] \
               + b[None, :, None, None]

    h = conv(x, p["w1"], p["cb1"])
    h = bn(h, p["g1"], p["b1"], p["m1"], p["v1"])
    h = jax.nn.relu(h)
    h = conv(h, p["w2"], p["cb2"])
    h = bn(h, p["g2"], p["b2"], p["m2"], p["v2"])
    return x + h


if __name__ == "__main__":
    N, C, H, W = 2, 8, 16, 16
    key = jax.random.PRNGKey(0)
    ks = jax.random.split(key, 13)

    params = {
        # conv1 / bn1
        "w1": 0.1 * jax.random.normal(ks[0], (C, C, 3, 3), jnp.float32),
        "cb1": 0.1 * jax.random.normal(ks[1], (C,), jnp.float32),
        "g1": 1.0 + 0.1 * jax.random.normal(ks[2], (C,), jnp.float32),
        "b1": 0.1 * jax.random.normal(ks[3], (C,), jnp.float32),
        "m1": 0.1 * jax.random.normal(ks[4], (C,), jnp.float32),
        "v1": 1.0 + 0.5 * jax.random.uniform(ks[5], (C,), jnp.float32),
        # conv2 / bn2
        "w2": 0.1 * jax.random.normal(ks[6], (C, C, 3, 3), jnp.float32),
        "cb2": 0.1 * jax.random.normal(ks[7], (C,), jnp.float32),
        "g2": 1.0 + 0.1 * jax.random.normal(ks[8], (C,), jnp.float32),
        "b2": 0.1 * jax.random.normal(ks[9], (C,), jnp.float32),
        "m2": 0.1 * jax.random.normal(ks[10], (C,), jnp.float32),
        "v2": 1.0 + 0.5 * jax.random.uniform(ks[11], (C,), jnp.float32),
    }
    x = jax.random.normal(ks[12], (N, C, H, W), jnp.float32)

    ref = jax.block_until_ready(reference_forward(x, params))

    # Strict check: f32 operands on the MXU.
    out_f32 = jax.block_until_ready(
        residual_block(x, params, matmul_dtype=jnp.float32))
    assert out_f32.shape == x.shape and out_f32.dtype == x.dtype
    np.testing.assert_allclose(np.asarray(out_f32), np.asarray(ref),
                               rtol=1e-3, atol=1e-3)

    # Production path: bf16 operands (default), f32 accumulation / residual.
    out_bf16 = jax.block_until_ready(residual_block(x, params))
    assert out_bf16.shape == x.shape and out_bf16.dtype == x.dtype
    np.testing.assert_allclose(np.asarray(out_bf16), np.asarray(ref),
                               rtol=1e-1, atol=1e-1)

    print("KERNEL_OK")
</pallas_src>

<mosaic_0001>
module attributes {stable_mosaic.version = 11 : i64} {
  func.func @residual_block_kernel(%arg0: i32, %arg1: memref<2x16x16x8xf32, #tpu.memory_space<vmem>>, %arg2: memref<72x8xf32, #tpu.memory_space<vmem>>, %arg3: memref<1x8xf32, #tpu.memory_space<vmem>>, %arg4: memref<72x8xf32, #tpu.memory_space<vmem>>, %arg5: memref<1x8xf32, #tpu.memory_space<vmem>>, %arg6: memref<2x16x16x8xf32, #tpu.memory_space<vmem>>, %arg7: memref<2x18x18x8xf32, #tpu.memory_space<vmem>>) attributes {dimension_semantics = [#tpu.dimension_semantics<parallel>], iteration_bounds = array<i64: 1>, scalar_prefetch = 0 : i64, scratch_operands = 1 : i64, tpu.core_type = #tpu.core_type<tc>, window_params = [{transform_indices = @transform_0, window_bounds = array<i64: 2, 16, 16, 8>}, {pipeline_mode = #tpu.pipeline_mode<synchronous>, transform_indices = @transform_1, window_bounds = array<i64: 72, 8>}, {pipeline_mode = #tpu.pipeline_mode<synchronous>, transform_indices = @transform_2, window_bounds = array<i64: 1, 8>}, {pipeline_mode = #tpu.pipeline_mode<synchronous>, transform_indices = @transform_3, window_bounds = array<i64: 72, 8>}, {pipeline_mode = #tpu.pipeline_mode<synchronous>, transform_indices = @transform_4, window_bounds = array<i64: 1, 8>}, {transform_indices = @transform_5, window_bounds = array<i64: 2, 16, 16, 8>}]} {
    %cst = arith.constant 0.000000e+00 : f32
    %0 = vector.broadcast %cst : f32 to vector<2x1x18x8xf32>
    %c0 = arith.constant 0 : index
    %c0_0 = arith.constant 0 : index
    %c0_1 = arith.constant 0 : index
    %c0_2 = arith.constant 0 : index
    %1 = vector.load %arg7[%c0, %c0_0, %c0_1, %c0_2] : memref<2x18x18x8xf32, #tpu.memory_space<vmem>>, vector<2x1x18x8xf32>
    tpu.vector_store %arg7[%c0, %c0_0, %c0_1, %c0_2], %0 {strides = array<i32>} : memref<2x18x18x8xf32, #tpu.memory_space<vmem>>, vector<2x1x18x8xf32>,
    %cst_3 = arith.constant 0.000000e+00 : f32
    %2 = vector.broadcast %cst_3 : f32 to vector<2x1x18x8xf32>
    %c0_4 = arith.constant 0 : index
    %c17 = arith.constant 17 : index
    %c0_5 = arith.constant 0 : index
    %c0_6 = arith.constant 0 : index
    %3 = vector.load %arg7[%c0_4, %c17, %c0_5, %c0_6] : memref<2x18x18x8xf32, #tpu.memory_space<vmem>>, vector<2x1x18x8xf32>
    tpu.vector_store %arg7[%c0_4, %c17, %c0_5, %c0_6], %2 {strides = array<i32>} : memref<2x18x18x8xf32, #tpu.memory_space<vmem>>, vector<2x1x18x8xf32>,
    %cst_7 = arith.constant 0.000000e+00 : f32
    %4 = vector.broadcast %cst_7 : f32 to vector<2x18x1x8xf32>
    %c0_8 = arith.constant 0 : index
    %c0_9 = arith.constant 0 : index
    %c0_10 = arith.constant 0 : index
    %c0_11 = arith.constant 0 : index
    %5 = vector.load %arg7[%c0_8, %c0_9, %c0_10, %c0_11] : memref<2x18x18x8xf32, #tpu.memory_space<vmem>>, vector<2x18x1x8xf32>
    tpu.vector_store %arg7[%c0_8, %c0_9, %c0_10, %c0_11], %4 {strides = array<i32>} : memref<2x18x18x8xf32, #tpu.memory_space<vmem>>, vector<2x18x1x8xf32>,
    %cst_12 = arith.constant 0.000000e+00 : f32
    %6 = vector.broadcast %cst_12 : f32 to vector<2x18x1x8xf32>
    %c0_13 = arith.constant 0 : index
    %c0_14 = arith.constant 0 : index
    %c17_15 = arith.constant 17 : index
    %c0_16 = arith.constant 0 : index
    %7 = vector.load %arg7[%c0_13, %c0_14, %c17_15, %c0_16] : memref<2x18x18x8xf32, #tpu.memory_space<vmem>>, vector<2x18x1x8xf32>
    tpu.vector_store %arg7[%c0_13, %c0_14, %c17_15, %c0_16], %6 {strides = array<i32>} : memref<2x18x18x8xf32, #tpu.memory_space<vmem>>, vector<2x18x1x8xf32>,
    %c0_17 = arith.constant 0 : index
    %c0_18 = arith.constant 0 : index
    %c0_19 = arith.constant 0 : index
    %c0_20 = arith.constant 0 : index
    %8 = vector.load %arg1[%c0_17, %c0_18, %c0_19, %c0_20] : memref<2x16x16x8xf32, #tpu.memory_space<vmem>>, vector<2x16x16x8xf32>
    %c0_21 = arith.constant 0 : index
    %c1 = arith.constant 1 : index
    %c1_22 = arith.constant 1 : index
    %c0_23 = arith.constant 0 : index
    %9 = vector.load %arg7[%c0_21, %c1, %c1_22, %c0_23] : memref<2x18x18x8xf32, #tpu.memory_space<vmem>>, vector<2x16x16x8xf32>
    tpu.vector_store %arg7[%c0_21, %c1, %c1_22, %c0_23], %8 {strides = array<i32>} : memref<2x18x18x8xf32, #tpu.memory_space<vmem>>, vector<2x16x16x8xf32>,
    %c0_24 = arith.constant 0 : index
    %c0_25 = arith.constant 0 : index
    %c0_26 = arith.constant 0 : index
    %c0_27 = arith.constant 0 : index
    %10 = vector.load %arg7[%c0_24, %c0_25, %c0_26, %c0_27] : memref<2x18x18x8xf32, #tpu.memory_space<vmem>>, vector<2x16x16x8xf32>
    %11 = vector.shape_cast %10 : vector<2x16x16x8xf32> to vector<512x8xf32>
    %c0_28 = arith.constant 0 : index
    %c0_29 = arith.constant 0 : index
    %c1_30 = arith.constant 1 : index
    %c0_31 = arith.constant 0 : index
    %12 = vector.load %arg7[%c0_28, %c0_29, %c1_30, %c0_31] : memref<2x18x18x8xf32, #tpu.memory_space<vmem>>, vector<2x16x16x8xf32>
    %13 = vector.shape_cast %12 : vector<2x16x16x8xf32> to vector<512x8xf32>
    %c0_32 = arith.constant 0 : index
    %c0_33 = arith.constant 0 : index
    %c2 = arith.constant 2 : index
    %c0_34 = arith.constant 0 : index
    %14 = vector.load %arg7[%c0_32, %c0_33, %c2, %c0_34] : memref<2x18x18x8xf32, #tpu.memory_space<vmem>>, vector<2x16x16x8xf32>
    %15 = vector.shape_cast %14 : vector<2x16x16x8xf32> to vector<512x8xf32>
    %c0_35 = arith.constant 0 : index
    %c1_36 = arith.constant 1 : index
    %c0_37 = arith.constant 0 : index
    %c0_38 = arith.constant 0 : index
    %16 = vector.load %arg7[%c0_35, %c1_36, %c0_37, %c0_38] : memref<2x18x18x8xf32, #tpu.memory_space<vmem>>, vector<2x16x16x8xf32>
    %17 = vector.shape_cast %16 : vector<2x16x16x8xf32> to vector<512x8xf32>
    %c0_39 = arith.constant 0 : index
    %c1_40 = arith.constant 1 : index
    %c1_41 = arith.constant 1 : index
    %c0_42 = arith.constant 0 : index
    %18 = vector.load %arg7[%c0_39, %c1_40, %c1_41, %c0_42] : memref<2x18x18x8xf32, #tpu.memory_space<vmem>>, vector<2x16x16x8xf32>
    %19 = vector.shape_cast %18 : vector<2x16x16x8xf32> to vector<512x8xf32>
    %c0_43 = arith.constant 0 : index
    %c1_44 = arith.constant 1 : index
    %c2_45 = arith.constant 2 : index
    %c0_46 = arith.constant 0 : index
    %20 = vector.load %arg7[%c0_43, %c1_44, %c2_45, %c0_46] : memref<2x18x18x8xf32, #tpu.memory_space<vmem>>, vector<2x16x16x8xf32>
    %21 = vector.shape_cast %20 : vector<2x16x16x8xf32> to vector<512x8xf32>
    %c0_47 = arith.constant 0 : index
    %c2_48 = arith.constant 2 : index
    %c0_49 = arith.constant 0 : index
    %c0_50 = arith.constant 0 : index
    %22 = vector.load %arg7[%c0_47, %c2_48, %c0_49, %c0_50] : memref<2x18x18x8xf32, #tpu.memory_space<vmem>>, vector<2x16x16x8xf32>
    %23 = vector.shape_cast %22 : vector<2x16x16x8xf32> to vector<512x8xf32>
    %c0_51 = arith.constant 0 : index
    %c2_52 = arith.constant 2 : index
    %c1_53 = arith.constant 1 : index
    %c0_54 = arith.constant 0 : index
    %24 = vector.load %arg7[%c0_51, %c2_52, %c1_53, %c0_54] : memref<2x18x18x8xf32, #tpu.memory_space<vmem>>, vector<2x16x16x8xf32>
    %25 = vector.shape_cast %24 : vector<2x16x16x8xf32> to vector<512x8xf32>
    %c0_55 = arith.constant 0 : index
    %c2_56 = arith.constant 2 : index
    %c2_57 = arith.constant 2 : index
    %c0_58 = arith.constant 0 : index
    %26 = vector.load %arg7[%c0_55, %c2_56, %c2_57, %c0_58] : memref<2x18x18x8xf32, #tpu.memory_space<vmem>>, vector<2x16x16x8xf32>
    %27 = vector.shape_cast %26 : vector<2x16x16x8xf32> to vector<512x8xf32>
    %28 = tpu.concatenate %11, %13, %15, %17, %19, %21, %23, %25, %27 in 1 : vector<512x8xf32>, vector<512x8xf32>, vector<512x8xf32>, vector<512x8xf32>, vector<512x8xf32>, vector<512x8xf32>, vector<512x8xf32>, vector<512x8xf32>, vector<512x8xf32> -> vector<512x72xf32>
    %c0_59 = arith.constant 0 : index
    %c0_60 = arith.constant 0 : index
    %29 = vector.load %arg2[%c0_59, %c0_60] : memref<72x8xf32, #tpu.memory_space<vmem>>, vector<72x8xf32>
    %cst_61 = arith.constant dense<0.000000e+00> : vector<512x8xf32>
    %30 = tpu.matmul %28, %29, %cst_61 {dimension_numbers = #tpu.dot_dimension_numbers<[1], [0], [0], [1], [0, 0, 1, 1], [], []>} : vector<512x72xf32>, vector<72x8xf32>, vector<512x8xf32> -> vector<512x8xf32>
    %c0_62 = arith.constant 0 : index
    %c0_63 = arith.constant 0 : index
    %31 = vector.load %arg3[%c0_62, %c0_63] : memref<1x8xf32, #tpu.memory_space<vmem>>, vector<1x8xf32>
    %32 = vector.broadcast %31 : vector<1x8xf32> to vector<512x8xf32>
    %33 = arith.addf %30, %32 : vector<512x8xf32>
    %cst_64 = arith.constant 0.000000e+00 : f32
    %34 = vector.broadcast %cst_64 : f32 to vector<512x8xf32>
    %35 = arith.maximumf %33, %34 : vector<512x8xf32>
    %36 = vector.shape_cast %35 : vector<512x8xf32> to vector<2x16x16x8xf32>
    %c0_65 = arith.constant 0 : index
    %c1_66 = arith.constant 1 : index
    %c1_67 = arith.constant 1 : index
    %c0_68 = arith.constant 0 : index
    %37 = vector.load %arg7[%c0_65, %c1_66, %c1_67, %c0_68] : memref<2x18x18x8xf32, #tpu.memory_space<vmem>>, vector<2x16x16x8xf32>
    tpu.vector_store %arg7[%c0_65, %c1_66, %c1_67, %c0_68], %36 {strides = array<i32>} : memref<2x18x18x8xf32, #tpu.memory_space<vmem>>, vector<2x16x16x8xf32>,
    %c0_69 = arith.constant 0 : index
    %c0_70 = arith.constant 0 : index
    %c0_71 = arith.constant 0 : index
    %c0_72 = arith.constant 0 : index
    %38 = vector.load %arg7[%c0_69, %c0_70, %c0_71, %c0_72] : memref<2x18x18x8xf32, #tpu.memory_space<vmem>>, vector<2x16x16x8xf32>
    %39 = vector.shape_cast %38 : vector<2x16x16x8xf32> to vector<512x8xf32>
    %c0_73 = arith.constant 0 : index
    %c0_74 = arith.constant 0 : index
    %c1_75 = arith.constant 1 : index
    %c0_76 = arith.constant 0 : index
    %40 = vector.load %arg7[%c0_73, %c0_74, %c1_75, %c0_76] : memref<2x18x18x8xf32, #tpu.memory_space<vmem>>, vector<2x16x16x8xf32>
    %41 = vector.shape_cast %40 : vector<2x16x16x8xf32> to vector<512x8xf32>
    %c0_77 = arith.constant 0 : index
    %c0_78 = arith.constant 0 : index
    %c2_79 = arith.constant 2 : index
    %c0_80 = arith.constant 0 : index
    %42 = vector.load %arg7[%c0_77, %c0_78, %c2_79, %c0_80] : memref<2x18x18x8xf32, #tpu.memory_space<vmem>>, vector<2x16x16x8xf32>
    %43 = vector.shape_cast %42 : vector<2x16x16x8xf32> to vector<512x8xf32>
    %c0_81 = arith.constant 0 : index
    %c1_82 = arith.constant 1 : index
    %c0_83 = arith.constant 0 : index
    %c0_84 = arith.constant 0 : index
    %44 = vector.load %arg7[%c0_81, %c1_82, %c0_83, %c0_84] : memref<2x18x18x8xf32, #tpu.memory_space<vmem>>, vector<2x16x16x8xf32>
    %45 = vector.shape_cast %44 : vector<2x16x16x8xf32> to vector<512x8xf32>
    %c0_85 = arith.constant 0 : index
    %c1_86 = arith.constant 1 : index
    %c1_87 = arith.constant 1 : index
    %c0_88 = arith.constant 0 : index
    %46 = vector.load %arg7[%c0_85, %c1_86, %c1_87, %c0_88] : memref<2x18x18x8xf32, #tpu.memory_space<vmem>>, vector<2x16x16x8xf32>
    %47 = vector.shape_cast %46 : vector<2x16x16x8xf32> to vector<512x8xf32>
    %c0_89 = arith.constant 0 : index
    %c1_90 = arith.constant 1 : index
    %c2_91 = arith.constant 2 : index
    %c0_92 = arith.constant 0 : index
    %48 = vector.load %arg7[%c0_89, %c1_90, %c2_91, %c0_92] : memref<2x18x18x8xf32, #tpu.memory_space<vmem>>, vector<2x16x16x8xf32>
    %49 = vector.shape_cast %48 : vector<2x16x16x8xf32> to vector<512x8xf32>
    %c0_93 = arith.constant 0 : index
    %c2_94 = arith.constant 2 : index
    %c0_95 = arith.constant 0 : index
    %c0_96 = arith.constant 0 : index
    %50 = vector.load %arg7[%c0_93, %c2_94, %c0_95, %c0_96] : memref<2x18x18x8xf32, #tpu.memory_space<vmem>>, vector<2x16x16x8xf32>
    %51 = vector.shape_cast %50 : vector<2x16x16x8xf32> to vector<512x8xf32>
    %c0_97 = arith.constant 0 : index
    %c2_98 = arith.constant 2 : index
    %c1_99 = arith.constant 1 : index
    %c0_100 = arith.constant 0 : index
    %52 = vector.load %arg7[%c0_97, %c2_98, %c1_99, %c0_100] : memref<2x18x18x8xf32, #tpu.memory_space<vmem>>, vector<2x16x16x8xf32>
    %53 = vector.shape_cast %52 : vector<2x16x16x8xf32> to vector<512x8xf32>
    %c0_101 = arith.constant 0 : index
    %c2_102 = arith.constant 2 : index
    %c2_103 = arith.constant 2 : index
    %c0_104 = arith.constant 0 : index
    %54 = vector.load %arg7[%c0_101, %c2_102, %c2_103, %c0_104] : memref<2x18x18x8xf32, #tpu.memory_space<vmem>>, vector<2x16x16x8xf32>
    %55 = vector.shape_cast %54 : vector<2x16x16x8xf32> to vector<512x8xf32>
    %56 = tpu.concatenate %39, %41, %43, %45, %47, %49, %51, %53, %55 in 1 : vector<512x8xf32>, vector<512x8xf32>, vector<512x8xf32>, vector<512x8xf32>, vector<512x8xf32>, vector<512x8xf32>, vector<512x8xf32>, vector<512x8xf32>, vector<512x8xf32> -> vector<512x72xf32>
    %c0_105 = arith.constant 0 : index
    %c0_106 = arith.constant 0 : index
    %57 = vector.load %arg4[%c0_105, %c0_106] : memref<72x8xf32, #tpu.memory_space<vmem>>, vector<72x8xf32>
    %cst_107 = arith.constant dense<0.000000e+00> : vector<512x8xf32>
    %58 = tpu.matmul %56, %57, %cst_107 {dimension_numbers = #tpu.dot_dimension_numbers<[1], [0], [0], [1], [0, 0, 1, 1], [], []>} : vector<512x72xf32>, vector<72x8xf32>, vector<512x8xf32> -> vector<512x8xf32>
    %c0_108 = arith.constant 0 : index
    %c0_109 = arith.constant 0 : index
    %59 = vector.load %arg5[%c0_108, %c0_109] : memref<1x8xf32, #tpu.memory_space<vmem>>, vector<1x8xf32>
    %60 = vector.broadcast %59 : vector<1x8xf32> to vector<512x8xf32>
    %61 = arith.addf %58, %60 : vector<512x8xf32>
    %c0_110 = arith.constant 0 : index
    %c0_111 = arith.constant 0 : index
    %c0_112 = arith.constant 0 : index
    %c0_113 = arith.constant 0 : index
    %62 = vector.load %arg1[%c0_110, %c0_111, %c0_112, %c0_113] : memref<2x16x16x8xf32, #tpu.memory_space<vmem>>, vector<2x16x16x8xf32>
    %63 = vector.shape_cast %61 : vector<512x8xf32> to vector<2x16x16x8xf32>
    %64 = arith.addf %62, %63 : vector<2x16x16x8xf32>
    %c0_114 = arith.constant 0 : index
    %c0_115 = arith.constant 0 : index
    %c0_116 = arith.constant 0 : index
    %c0_117 = arith.constant 0 : index
    %65 = vector.load %arg6[%c0_114, %c0_115, %c0_116, %c0_117] : memref<2x16x16x8xf32, #tpu.memory_space<vmem>>, vector<2x16x16x8xf32>
    tpu.vector_store %arg6[%c0_114, %c0_115, %c0_116, %c0_117], %64 {strides = array<i32>} : memref<2x16x16x8xf32, #tpu.memory_space<vmem>>, vector<2x16x16x8xf32>,
    return
  }
  func.func @transform_0(%arg0: i32) -> (i32, i32, i32, i32) {
    %c0_i32 = arith.constant 0 : i32
    %c0_i32_0 = arith.constant 0 : i32
    %c0_i32_1 = arith.constant 0 : i32
    %c0_i32_2 = arith.constant 0 : i32
    return %arg0, %c0_i32, %c0_i32_0, %c0_i32_1 : i32, i32, i32, i32
  }
  func.func @transform_1(%arg0: i32) -> (i32, i32) {
    %c0_i32 = arith.constant 0 : i32
    %c0_i32_0 = arith.constant 0 : i32
    %c0_i32_1 = arith.constant 0 : i32
    return %c0_i32, %c0_i32_0 : i32, i32
  }
  func.func @transform_2(%arg0: i32) -> (i32, i32) {
    %c0_i32 = arith.constant 0 : i32
    %c0_i32_0 = arith.constant 0 : i32
    %c0_i32_1 = arith.constant 0 : i32
    return %c0_i32, %c0_i32_0 : i32, i32
  }
  func.func @transform_3(%arg0: i32) -> (i32, i32) {
    %c0_i32 = arith.constant 0 : i32
    %c0_i32_0 = arith.constant 0 : i32
    %c0_i32_1 = arith.constant 0 : i32
    return %c0_i32, %c0_i32_0 : i32, i32
  }
  func.func @transform_4(%arg0: i32) -> (i32, i32) {
    %c0_i32 = arith.constant 0 : i32
    %c0_i32_0 = arith.constant 0 : i32
    %c0_i32_1 = arith.constant 0 : i32
    return %c0_i32, %c0_i32_0 : i32, i32
  }
  func.func @transform_5(%arg0: i32) -> (i32, i32, i32, i32) {
    %c0_i32 = arith.constant 0 : i32
    %c0_i32_0 = arith.constant 0 : i32
    %c0_i32_1 = arith.constant 0 : i32
    %c0_i32_2 = arith.constant 0 : i32
    return %arg0, %c0_i32, %c0_i32_0, %c0_i32_1 : i32, i32, i32, i32
  }
}

</mosaic_0001>

<bundles_post_ra>
// kernel: tpu_custom_call.1
= control target key start
LH: loop header
LB: loop body
LE: loop exit
PB: predicated region body
PF: predicated region fallthrough
CT: control target
= control target key end

     0   :  { %vm20_vm0 = vcmask 64512   ;;  %vm23_vm1 = vcmask 58368   ;;  %vm35_vm2 = vcmask 57344   ;;  %v8694_v0 = vmov 0.0   ;;  %s8695_s12 = smov 8   ;;  %s8696_s17 = smov 16   ;;  %s14479_s0 = inlined_call_operand.vmem [shape: f32[2,16,16,8], index: 0, kind: input, shape index: {}]   ;;  %s14480_s1 = inlined_call_operand.vmem [shape: f32[72,8], index: 1, kind: input, shape index: {}]   ;;  %s14481_s2 = inlined_call_operand.vmem [shape: f32[1,8], index: 2, kind: input, shape index: {}]   ;;  %s14482_s3 = inlined_call_operand.vmem [shape: f32[72,8], index: 3, kind: input, shape index: {}]   ;;  %s14483_s4 = inlined_call_operand.vmem [shape: f32[1,8], index: 4, kind: input, shape index: {}]   ;;  %s14484_s5 = inlined_call_operand.vmem [shape: f32[2,16,16,8], index: 5, kind: output, shape index: {}]  }
   0x1   :  { %21 = vst.msk [vmem:[#allocation2] sm:$0xff] %vm20_vm0, %v8694_v0  ;;  %22 = vst.msk [vmem:[#allocation2 + $0x8] sm:$0xff] %vm20_vm0, %v8694_v0  ;;  %v8752_v1 = vld [vmem:[%s14479_s0] sm:$0xff]  ;;  %v8761_v2 = vld [vmem:[%s14479_s0 + $0x8] sm:$0xff]  ;;  %s8697_s26 = smov 24   ;;  %s8698_s27 = smov 32  }
   0x2   :  { %25 = vst.msk [vmem:[#allocation2 + $0x1b0] sm:$0xff] %vm20_vm0, %v8694_v0  ;;  %26 = vst.msk [vmem:[#allocation2 + $0x1b8] sm:$0xff] %vm20_vm0, %v8694_v0  ;;  %v8766_v3 = vld [vmem:[%s14479_s0 + $0x10] sm:$0xff]  ;;  %v111_v4 = vld [vmem:[%s14479_s0 + $0x18] sm:$0xff]  ;;  %s8699_s28 = smov 40   ;;  %s8700_s29 = smov 48  }
   0x3   :  { %29 = vst.msk [vmem:[#allocation2 + $0x198] sm:$0xff] %vm20_vm0, %v8694_v0  ;;  %30 = vst.msk [vmem:[#allocation2 + $0x1a0] sm:$0xff] %vm20_vm0, %v8694_v0  ;;  %v112_v5 = vld [vmem:[%s14479_s0 + $0x20] sm:$0xff]  ;;  %v113_v6 = vld [vmem:[%s14479_s0 + $0x28] sm:$0xff]  ;;  %s8701_s30 = smov 56   ;;  %vm2926_vm3 = vcmask 130048  }
   0x4   :  { %32 = vst.msk [vmem:[#allocation2 + $0x348] sm:$0xff] %vm20_vm0, %v8694_v0  ;;  %33 = vst.msk [vmem:[#allocation2 + $0x350] sm:$0xff] %vm20_vm0, %v8694_v0  ;;  %v114_v7 = vld [vmem:[%s14479_s0 + $0x30] sm:$0xff]  ;;  %v115_v8 = vld [vmem:[%s14479_s0 + $0x38] sm:$0xff]  ;;  %vm2991_vm4 = vcmask 195584   ;;  %vm3056_vm5 = vcmask 261120  }
   0x5   :  { %24 = vst.msk [vmem:[#allocation2 + $0x10] sm:$0x3] %vm23_vm1, %v8694_v0  ;;  %27 = vst.msk [vmem:[#allocation2 + $0x1c0] sm:$0x3] %vm23_vm1, %v8694_v0  ;;  %v116_v9 = vld [vmem:[%s14479_s0 + $0x40] sm:$0xff]  ;;  %v117_v10 = vld [vmem:[%s14479_s0 + $0x48] sm:$0xff] }
   0x6   :  { %31 = vst.msk [vmem:[#allocation2 + $0x1a8] sm:$0x3] %vm23_vm1, %v8694_v0  ;;  %34 = vst.msk [vmem:[#allocation2 + $0x358] sm:$0x3] %vm23_vm1, %v8694_v0  ;;  %v118_v11 = vld [vmem:[%s14479_s0 + $0x50] sm:$0xff]  ;;  %v119_v12 = vld [vmem:[%s14479_s0 + $0x58] sm:$0xff] }
   0x7   :  { %37 = vst.msk [vmem:[#allocation2 + $0x18] sm:$0x1] %vm35_vm2, %v8694_v0  ;;  %38 = vst.msk [vmem:[#allocation2 + $0x30] sm:$0x1] %vm35_vm2, %v8694_v0  ;;  %v120_v13 = vld [vmem:[%s14479_s0 + $0x60] sm:$0xff]  ;;  %v121_v14 = vld [vmem:[%s14479_s0 + $0x68] sm:$0xff] }
   0x8   :  { %39 = vst.msk [vmem:[#allocation2 + $0x48] sm:$0x1] %vm35_vm2, %v8694_v0  ;;  %40 = vst.msk [vmem:[#allocation2 + $0x60] sm:$0x1] %vm35_vm2, %v8694_v0  ;;  %v122_v15 = vld [vmem:[%s14479_s0 + $0x70] sm:$0xff]  ;;  %v123_v16 = vld [vmem:[%s14479_s0 + $0x78] sm:$0xff] }
   0x9   :  { %41 = vst.msk [vmem:[#allocation2 + $0x78] sm:$0x1] %vm35_vm2, %v8694_v0  ;;  %42 = vst.msk [vmem:[#allocation2 + $0x90] sm:$0x1] %vm35_vm2, %v8694_v0  ;;  %v124_v17 = vld [vmem:[%s14479_s0 + $0x80] sm:$0xff]  ;;  %v125_v18 = vld [vmem:[%s14479_s0 + $0x88] sm:$0xff] }
   0xa   :  { %43 = vst.msk [vmem:[#allocation2 + $0xa8] sm:$0x1] %vm35_vm2, %v8694_v0  ;;  %44 = vst.msk [vmem:[#allocation2 + $0xc0] sm:$0x1] %vm35_vm2, %v8694_v0  ;;  %v126_v19 = vld [vmem:[%s14479_s0 + $0x90] sm:$0xff]  ;;  %v127_v20 = vld [vmem:[%s14479_s0 + $0x98] sm:$0xff] }
   0xb   :  { %45 = vst.msk [vmem:[#allocation2 + $0xd8] sm:$0x1] %vm35_vm2, %v8694_v0  ;;  %46 = vst.msk [vmem:[#allocation2 + $0xf0] sm:$0x1] %vm35_vm2, %v8694_v0  ;;  %v128_v21 = vld [vmem:[%s14479_s0 + $0xa0] sm:$0xff]  ;;  %v129_v23 = vld [vmem:[%s14479_s0 + $0xa8] sm:$0xff] }
   0xc   :  { %47 = vst.msk [vmem:[#allocation2 + $0x108] sm:$0x1] %vm35_vm2, %v8694_v0  ;;  %48 = vst.msk [vmem:[#allocation2 + $0x120] sm:$0x1] %vm35_vm2, %v8694_v0  ;;  %v301_v22 = vld [vmem:[#allocation2 + $0x1] sm:$0xff]  ;;  %v302_v25 = vld [vmem:[#allocation2 + $0x9] sm:$0xff] }
   0xd   :  { %49 = vst.msk [vmem:[#allocation2 + $0x138] sm:$0x1] %vm35_vm2, %v8694_v0  ;;  %50 = vst.msk [vmem:[#allocation2 + $0x150] sm:$0x1] %vm35_vm2, %v8694_v0  ;;  %878 = vrot.lane.b32.xlu0 %v301_v22, %s8695_s12  ;;  %v130_v30 = vld [vmem:[%s14479_s0 + $0xb0] sm:$0xff]  ;;  %v131_v31 = vld [vmem:[%s14479_s0 + $0xb8] sm:$0xff] }
   0xe   :  { %51 = vst.msk [vmem:[#allocation2 + $0x168] sm:$0x1] %vm35_vm2, %v8694_v0  ;;  %52 = vst.msk [vmem:[#allocation2 + $0x180] sm:$0x1] %vm35_vm2, %v8694_v0  ;;  %v132_v32 = vld [vmem:[%s14479_s0 + $0xc0] sm:$0xff]  ;;  %v133_v33 = vld [vmem:[%s14479_s0 + $0xc8] sm:$0xff] }
   0xf   :  { %55 = vst.msk [vmem:[#allocation2 + $0x1c8] sm:$0x1] %vm35_vm2, %v8694_v0  ;;  %56 = vst.msk [vmem:[#allocation2 + $0x1e0] sm:$0x1] %vm35_vm2, %v8694_v0  ;;  %v134_v34 = vld [vmem:[%s14479_s0 + $0xd0] sm:$0xff]  ;;  %v135_v35 = vld [vmem:[%s14479_s0 + $0xd8] sm:$0xff] }
  0x10   :  { %57 = vst.msk [vmem:[#allocation2 + $0x1f8] sm:$0x1] %vm35_vm2, %v8694_v0  ;;  %58 = vst.msk [vmem:[#allocation2 + $0x210] sm:$0x1] %vm35_vm2, %v8694_v0  ;;  %v136_v36 = vld [vmem:[%s14479_s0 + $0xe0] sm:$0xff]  ;;  %v137_v37 = vld [vmem:[%s14479_s0 + $0xe8] sm:$0xff] }
  0x11   :  { %59 = vst.msk [vmem:[#allocation2 + $0x228] sm:$0x1] %vm35_vm2, %v8694_v0  ;;  %60 = vst.msk [vmem:[#allocation2 + $0x240] sm:$0x1] %vm35_vm2, %v8694_v0  ;;  %880 = vrot.lane.b32.xlu0 %v302_v25, %s8695_s12  ;;  %v140_v39 = vld [vmem:[%s14479_s0 + $0x100] sm:$0xff]  ;;  %v141_v41 = vld [vmem:[%s14479_s0 + $0x108] sm:$0xff] }
  0x12   :  { %61 = vst.msk [vmem:[#allocation2 + $0x258] sm:$0x1] %vm35_vm2, %v8694_v0  ;;  %62 = vst.msk [vmem:[#allocation2 + $0x270] sm:$0x1] %vm35_vm2, %v8694_v0  ;;  %v142_v42 = vld [vmem:[%s14479_s0 + $0x110] sm:$0xff]  ;;  %v143_v43 = vld [vmem:[%s14479_s0 + $0x118] sm:$0xff] }
  0x13   :  { %63 = vst.msk [vmem:[#allocation2 + $0x288] sm:$0x1] %vm35_vm2, %v8694_v0  ;;  %64 = vst.msk [vmem:[#allocation2 + $0x2a0] sm:$0x1] %vm35_vm2, %v8694_v0  ;;  %v144_v45 = vld [vmem:[%s14479_s0 + $0x120] sm:$0xff]  ;;  %v145_v46 = vld [vmem:[%s14479_s0 + $0x128] sm:$0xff] }
  0x14   :  { %65 = vst.msk [vmem:[#allocation2 + $0x2b8] sm:$0x1] %vm35_vm2, %v8694_v0  ;;  %66 = vst.msk [vmem:[#allocation2 + $0x2d0] sm:$0x1] %vm35_vm2, %v8694_v0  ;;  %v146_v47 = vld [vmem:[%s14479_s0 + $0x130] sm:$0xff]  ;;  %v147_v48 = vld [vmem:[%s14479_s0 + $0x138] sm:$0xff] }
  0x15   :  { %67 = vst.msk [vmem:[#allocation2 + $0x2e8] sm:$0x1] %vm35_vm2, %v8694_v0  ;;  %68 = vst.msk [vmem:[#allocation2 + $0x300] sm:$0x1] %vm35_vm2, %v8694_v0  ;;  %v148_v49 = vld [vmem:[%s14479_s0 + $0x140] sm:$0xff]  ;;  %v149_v50 = vld [vmem:[%s14479_s0 + $0x148] sm:$0xff] }
  0x16   :  { %69 = vst.msk [vmem:[#allocation2 + $0x318] sm:$0x1] %vm35_vm2, %v8694_v0  ;;  %70 = vst.msk [vmem:[#allocation2 + $0x330] sm:$0x1] %vm35_vm2, %v8694_v0  ;;  %v150_v51 = vld [vmem:[%s14479_s0 + $0x150] sm:$0xff]  ;;  %v151_v52 = vld [vmem:[%s14479_s0 + $0x158] sm:$0xff] }
  0x17   :  { %73 = vst.msk [vmem:[#allocation2 + $0x29] sm:$0x1] %vm35_vm2, %v8694_v0  ;;  %74 = vst.msk [vmem:[#allocation2 + $0x41] sm:$0x1] %vm35_vm2, %v8694_v0  ;;  %v152_v53 = vld [vmem:[%s14479_s0 + $0x160] sm:$0xff]  ;;  %v153_v54 = vld [vmem:[%s14479_s0 + $0x168] sm:$0xff] }
  0x18   :  { %75 = vst.msk [vmem:[#allocation2 + $0x59] sm:$0x1] %vm35_vm2, %v8694_v0  ;;  %76 = vst.msk [vmem:[#allocation2 + $0x71] sm:$0x1] %vm35_vm2, %v8694_v0  ;;  %v154_v57 = vld [vmem:[%s14479_s0 + $0x170] sm:$0xff]  ;;  %v155_v58 = vld [vmem:[%s14479_s0 + $0x178] sm:$0xff] }
  0x19   :  { %77 = vst.msk [vmem:[#allocation2 + $0x89] sm:$0x1] %vm35_vm2, %v8694_v0  ;;  %78 = vst.msk [vmem:[#allocation2 + $0xa1] sm:$0x1] %vm35_vm2, %v8694_v0  ;;  %v156_v62 = vld [vmem:[%s14479_s0 + $0x180] sm:$0xff]  ;;  %v157_v63 = vld [vmem:[%s14479_s0 + $0x188] sm:$0xff] }
  0x1a   :  { %79 = vst.msk [vmem:[#allocation2 + $0xb9] sm:$0x1] %vm35_vm2, %v8694_v0  ;;  %80 = vst.msk [vmem:[#allocation2 + $0xd1] sm:$0x1] %vm35_vm2, %v8694_v0  ;;  %vm3121_vm6 = vcmask 326656   ;;  %vm3186_vm7 = vcmask 392192  }
  0x1b   :  { %81 = vst.msk [vmem:[#allocation2 + $0xe9] sm:$0x1] %vm35_vm2, %v8694_v0  ;;  %82 = vst.msk [vmem:[#allocation2 + $0x101] sm:$0x1] %vm35_vm2, %v8694_v0  ;;  %vm3251_vm8 = vcmask 457728   ;;  %vm3316_vm9 = vcmask 523264  }
  0x1c   :  { %83 = vst.msk [vmem:[#allocation2 + $0x119] sm:$0x1] %vm35_vm2, %v8694_v0  ;;  %84 = vst.msk [vmem:[#allocation2 + $0x131] sm:$0x1] %vm35_vm2, %v8694_v0  ;;  %vm3397_vm10 = vcmask 588800  }
  0x1d   :  { %85 = vst.msk [vmem:[#allocation2 + $0x149] sm:$0x1] %vm35_vm2, %v8694_v0  ;;  %86 = vst.msk [vmem:[#allocation2 + $0x161] sm:$0x1] %vm35_vm2, %v8694_v0 }
  0x1e   :  { %87 = vst.msk [vmem:[#allocation2 + $0x179] sm:$0x1] %vm35_vm2, %v8694_v0  ;;  %88 = vst.msk [vmem:[#allocation2 + $0x191] sm:$0x1] %vm35_vm2, %v8694_v0 }
  0x1f   :  { %91 = vst.msk [vmem:[#allocation2 + $0x1d9] sm:$0x1] %vm35_vm2, %v8694_v0  ;;  %92 = vst.msk [vmem:[#allocation2 + $0x1f1] sm:$0x1] %vm35_vm2, %v8694_v0 }
  0x20   :  { %93 = vst.msk [vmem:[#allocation2 + $0x209] sm:$0x1] %vm35_vm2, %v8694_v0  ;;  %94 = vst.msk [vmem:[#allocation2 + $0x221] sm:$0x1] %vm35_vm2, %v8694_v0 }
  0x21   :  { %95 = vst.msk [vmem:[#allocation2 + $0x239] sm:$0x1] %vm35_vm2, %v8694_v0  ;;  %96 = vst.msk [vmem:[#allocation2 + $0x251] sm:$0x1] %vm35_vm2, %v8694_v0 }
  0x22   :  { %97 = vst.msk [vmem:[#allocation2 + $0x269] sm:$0x1] %vm35_vm2, %v8694_v0  ;;  %98 = vst.msk [vmem:[#allocation2 + $0x281] sm:$0x1] %vm35_vm2, %v8694_v0 }
  0x23   :  { %99 = vst.msk [vmem:[#allocation2 + $0x299] sm:$0x1] %vm35_vm2, %v8694_v0  ;;  %100 = vst.msk [vmem:[#allocation2 + $0x2b1] sm:$0x1] %vm35_vm2, %v8694_v0 }
  0x24   :  { %101 = vst.msk [vmem:[#allocation2 + $0x2c9] sm:$0x1] %vm35_vm2, %v8694_v0  ;;  %102 = vst.msk [vmem:[#allocation2 + $0x2e1] sm:$0x1] %vm35_vm2, %v8694_v0 }
  0x25   :  { %103 = vst.msk [vmem:[#allocation2 + $0x2f9] sm:$0x1] %vm35_vm2, %v8694_v0  ;;  %104 = vst.msk [vmem:[#allocation2 + $0x311] sm:$0x1] %vm35_vm2, %v8694_v0 }
  0x26   :  { %105 = vst.msk [vmem:[#allocation2 + $0x329] sm:$0x1] %vm35_vm2, %v8694_v0  ;;  %106 = vst.msk [vmem:[#allocation2 + $0x341] sm:$0x1] %vm35_vm2, %v8694_v0 }
  0x27   :  { %173 = vst.msk [vmem:[#allocation2 + $0x19] sm:$0xff] %vm20_vm0, %v8752_v1  ;;  %174 = vst.msk [vmem:[#allocation2 + $0x21] sm:$0xff] %vm20_vm0, %v8761_v2  ;;  %v159_v1 = vld [vmem:[%s14479_s0 + $0x198] sm:$0xff]  ;;  %v160_v2 = vld [vmem:[%s14479_s0 + $0x1a0] sm:$0xff] }
  0x28   :  { %175 = vst.msk [vmem:[#allocation2 + $0x31] sm:$0xff] %vm20_vm0, %v8766_v3  ;;  %176 = vst.msk [vmem:[#allocation2 + $0x39] sm:$0xff] %vm20_vm0, %v111_v4  ;;  %v161_v3 = vld [vmem:[%s14479_s0 + $0x1a8] sm:$0xff]  ;;  %v162_v4 = vld [vmem:[%s14479_s0 + $0x1b0] sm:$0xff] }
  0x29   :  { %36 = vst.msk [vmem:[#allocation2] sm:$0x1] %vm35_vm2, %v8694_v0  ;;  %53 = vst.msk [vmem:[#allocation2 + $0x198] sm:$0x1] %vm35_vm2, %v8694_v0 }
  0x2a   :  { %54 = vst.msk [vmem:[#allocation2 + $0x1b0] sm:$0x1] %vm35_vm2, %v8694_v0  ;;  %71 = vst.msk [vmem:[#allocation2 + $0x348] sm:$0x1] %vm35_vm2, %v8694_v0 }
  0x2b   :  { %72 = vst.msk [vmem:[#allocation2 + $0x11] sm:$0x1] %vm35_vm2, %v8694_v0  ;;  %89 = vst.msk [vmem:[#allocation2 + $0x1a9] sm:$0x1] %vm35_vm2, %v8694_v0 }
  0x2c   :  { %90 = vst.msk [vmem:[#allocation2 + $0x1c1] sm:$0x1] %vm35_vm2, %v8694_v0  ;;  %107 = vst.msk [vmem:[#allocation2 + $0x359] sm:$0x1] %vm35_vm2, %v8694_v0  ;;  %v158_v0 = vld [vmem:[%s14479_s0 + $0x190] sm:$0xff] }
  0x2d   :  { %177 = vst.msk [vmem:[#allocation2 + $0x49] sm:$0xff] %vm20_vm0, %v112_v5  ;;  %178 = vst.msk [vmem:[#allocation2 + $0x51] sm:$0xff] %vm20_vm0, %v113_v6  ;;  %v163_v5 = vld [vmem:[%s14479_s0 + $0x1b8] sm:$0xff] }
  0x2e   :  { %179 = vst.msk [vmem:[#allocation2 + $0x61] sm:$0xff] %vm20_vm0, %v114_v7  ;;  %180 = vst.msk [vmem:[#allocation2 + $0x69] sm:$0xff] %vm20_vm0, %v115_v8  ;;  %v303_v24 = vld [vmem:[#allocation2 + $0x19] sm:$0xff]  ;;  %v304_v26 = vld [vmem:[#allocation2 + $0x21] sm:$0xff] }
  0x2f   :  { %181 = vst.msk [vmem:[#allocation2 + $0x79] sm:$0xff] %vm20_vm0, %v116_v9  ;;  %182 = vst.msk [vmem:[#allocation2 + $0x81] sm:$0xff] %vm20_vm0, %v117_v10  ;;  %882 = vrot.lane.b32.xlu1 %v303_v24, %s8695_s12  ;;  %v305_v27 = vld [vmem:[#allocation2 + $0x31] sm:$0xff]  ;;  %v306_v28 = vld [vmem:[#allocation2 + $0x39] sm:$0xff] }
  0x30   :  { %183 = vst.msk [vmem:[#allocation2 + $0x91] sm:$0xff] %vm20_vm0, %v118_v11  ;;  %184 = vst.msk [vmem:[#allocation2 + $0x99] sm:$0xff] %vm20_vm0, %v119_v12  ;;  %886 = vrot.lane.b32.xlu0 %v305_v27, %s8695_s12  ;;  %v164_v7 = vld [vmem:[%s14479_s0 + $0x1c0] sm:$0xff]  ;;  %v165_v8 = vld [vmem:[%s14479_s0 + $0x1c8] sm:$0xff] }
  0x31   :  { %185 = vst.msk [vmem:[#allocation2 + $0xa9] sm:$0xff] %vm20_vm0, %v120_v13  ;;  %186 = vst.msk [vmem:[#allocation2 + $0xb1] sm:$0xff] %vm20_vm0, %v121_v14  ;;  %v166_v9 = vld [vmem:[%s14479_s0 + $0x1d0] sm:$0xff]  ;;  %v167_v11 = vld [vmem:[%s14479_s0 + $0x1d8] sm:$0xff] }
  0x32   :  { %187 = vst.msk [vmem:[#allocation2 + $0xc1] sm:$0xff] %vm20_vm0, %v122_v15  ;;  %188 = vst.msk [vmem:[#allocation2 + $0xc9] sm:$0xff] %vm20_vm0, %v123_v16  ;;  %v168_v13 = vld [vmem:[%s14479_s0 + $0x1e0] sm:$0xff]  ;;  %v169_v14 = vld [vmem:[%s14479_s0 + $0x1e8] sm:$0xff] }
  0x33   :  { %189 = vst.msk [vmem:[#allocation2 + $0xd9] sm:$0xff] %vm20_vm0, %v124_v17  ;;  %190 = vst.msk [vmem:[#allocation2 + $0xe1] sm:$0xff] %vm20_vm0, %v125_v18  ;;  %884 = vrot.lane.b32.xlu1 %v304_v26, %s8695_s12 }
  0x34   :  { %191 = vst.msk [vmem:[#allocation2 + $0xf1] sm:$0xff] %vm20_vm0, %v126_v19  ;;  %192 = vst.msk [vmem:[#allocation2 + $0xf9] sm:$0xff] %vm20_vm0, %v127_v20  ;;  %v307_v29 = vld [vmem:[#allocation2 + $0x49] sm:$0xff]  ;;  %v308_v38 = vld [vmem:[#allocation2 + $0x51] sm:$0xff] }
  0x35   :  { %193 = vst.msk [vmem:[#allocation2 + $0x109] sm:$0xff] %vm20_vm0, %v128_v21  ;;  %194 = vst.msk [vmem:[#allocation2 + $0x111] sm:$0xff] %vm20_vm0, %v129_v23  ;;  %v309_v40 = vld [vmem:[#allocation2 + $0x61] sm:$0xff]  ;;  %890 = vrot.lane.b32.xlu0 %v307_v29, %s8695_s12  ;;  %v310_v44 = vld [vmem:[#allocation2 + $0x69] sm:$0xff] }
  0x36   :  { %195 = vst.msk [vmem:[#allocation2 + $0x121] sm:$0xff] %vm20_vm0, %v130_v30  ;;  %196 = vst.msk [vmem:[#allocation2 + $0x129] sm:$0xff] %vm20_vm0, %v131_v31  ;;  %v311_v55 = vld [vmem:[#allocation2 + $0x79] sm:$0xff]  ;;  %v312_v56 = vld [vmem:[#allocation2 + $0x81] sm:$0xff] }
  0x37   :  { %888 = vrot.lane.b32.xlu1 %v306_v28, %s8695_s12  ;;  %197 = vst.msk [vmem:[#allocation2 + $0x139] sm:$0xff] %vm20_vm0, %v132_v32  ;;  %198 = vst.msk [vmem:[#allocation2 + $0x141] sm:$0xff] %vm20_vm0, %v133_v33  ;;  %v313_v59 = vld [vmem:[#allocation2 + $0x91] sm:$0xff]  ;;  %v314_v60 = vld [vmem:[#allocation2 + $0x99] sm:$0xff] }
  0x38   :  { %199 = vst.msk [vmem:[#allocation2 + $0x151] sm:$0xff] %vm20_vm0, %v134_v34  ;;  %200 = vst.msk [vmem:[#allocation2 + $0x159] sm:$0xff] %vm20_vm0, %v135_v35  ;;  %v315_v61 = vld [vmem:[#allocation2 + $0xa9] sm:$0xff]  ;;  %v316_v6 = vld [vmem:[#allocation2 + $0xb1] sm:$0xff] }
  0x39   :  { %201 = vst.msk [vmem:[#allocation2 + $0x169] sm:$0xff] %vm20_vm0, %v136_v36  ;;  %202 = vst.msk [vmem:[#allocation2 + $0x171] sm:$0xff] %vm20_vm0, %v137_v37  ;;  %894 = vrot.lane.b32.xlu0 %v309_v40, %s8695_s12  ;;  %v317_v10 = vld [vmem:[#allocation2 + $0xc1] sm:$0xff]  ;;  %v318_v12 = vld [vmem:[#allocation2 + $0xc9] sm:$0xff] }
  0x3a   :  { %205 = vst.msk [vmem:[#allocation2 + $0x1c9] sm:$0xff] %vm20_vm0, %v140_v39  ;;  %206 = vst.msk [vmem:[#allocation2 + $0x1d1] sm:$0xff] %vm20_vm0, %v141_v41  ;;  %v319_v15 = vld [vmem:[#allocation2 + $0xd9] sm:$0xff]  ;;  %v320_v16 = vld [vmem:[#allocation2 + $0xe1] sm:$0xff] }
  0x3b   :  { %207 = vst.msk [vmem:[#allocation2 + $0x1e1] sm:$0xff] %vm20_vm0, %v142_v42  ;;  %208 = vst.msk [vmem:[#allocation2 + $0x1e9] sm:$0xff] %vm20_vm0, %v143_v43  ;;  %892 = vrot.lane.b32.xlu1 %v308_v38, %s8695_s12  ;;  %v321_v17 = vld [vmem:[#allocation2 + $0xf1] sm:$0xff]  ;;  %v322_v18 = vld [vmem:[#allocation2 + $0xf9] sm:$0xff] }
  0x3c   :  { %209 = vst.msk [vmem:[#allocation2 + $0x1f9] sm:$0xff] %vm20_vm0, %v144_v45  ;;  %210 = vst.msk [vmem:[#allocation2 + $0x201] sm:$0xff] %vm20_vm0, %v145_v46  ;;  %v323_v19 = vld [vmem:[#allocation2 + $0x109] sm:$0xff]  ;;  %v324_v20 = vld [vmem:[#allocation2 + $0x111] sm:$0xff] }
  0x3d   :  { %211 = vst.msk [vmem:[#allocation2 + $0x211] sm:$0xff] %vm20_vm0, %v146_v47  ;;  %212 = vst.msk [vmem:[#allocation2 + $0x219] sm:$0xff] %vm20_vm0, %v147_v48  ;;  %898 = vrot.lane.b32.xlu0 %v311_v55, %s8695_s12  ;;  %v325_v21 = vld [vmem:[#allocation2 + $0x121] sm:$0xff]  ;;  %v326_v22 = vld [vmem:[#allocation2 + $0x129] sm:$0xff] }
  0x3e   :  { %213 = vst.msk [vmem:[#allocation2 + $0x229] sm:$0xff] %vm20_vm0, %v148_v49  ;;  %214 = vst.msk [vmem:[#allocation2 + $0x231] sm:$0xff] %vm20_vm0, %v149_v50  ;;  %v327_v23 = vld [vmem:[#allocation2 + $0x139] sm:$0xff]  ;;  %v328_v24 = vld [vmem:[#allocation2 + $0x141] sm:$0xff] }
  0x3f   :  { %215 = vst.msk [vmem:[#allocation2 + $0x241] sm:$0xff] %vm20_vm0, %v150_v51  ;;  %216 = vst.msk [vmem:[#allocation2 + $0x249] sm:$0xff] %vm20_vm0, %v151_v52  ;;  %896 = vrot.lane.b32.xlu1 %v310_v44, %s8695_s12  ;;  %v329_v25 = vld [vmem:[#allocation2 + $0x151] sm:$0xff]  ;;  %v330_v26 = vld [vmem:[#allocation2 + $0x159] sm:$0xff] }
  0x40   :  { %217 = vst.msk [vmem:[#allocation2 + $0x259] sm:$0xff] %vm20_vm0, %v152_v53  ;;  %218 = vst.msk [vmem:[#allocation2 + $0x261] sm:$0xff] %vm20_vm0, %v153_v54  ;;  %v331_v27 = vld [vmem:[#allocation2 + $0x169] sm:$0xff]  ;;  %v332_v28 = vld [vmem:[#allocation2 + $0x171] sm:$0xff] }
  0x41   :  { %219 = vst.msk [vmem:[#allocation2 + $0x271] sm:$0xff] %vm20_vm0, %v154_v57  ;;  %220 = vst.msk [vmem:[#allocation2 + $0x279] sm:$0xff] %vm20_vm0, %v155_v58  ;;  %902 = vrot.lane.b32.xlu0 %v313_v59, %s8695_s12  ;;  %v333_v29 = vld [vmem:[#allocation2 + $0x1b1] sm:$0xff]  ;;  %v334_v30 = vld [vmem:[#allocation2 + $0x1b9] sm:$0xff] }
  0x42   :  { %221 = vst.msk [vmem:[#allocation2 + $0x289] sm:$0xff] %vm20_vm0, %v156_v62  ;;  %222 = vst.msk [vmem:[#allocation2 + $0x291] sm:$0xff] %vm20_vm0, %v157_v63  ;;  %v335_v31 = vld [vmem:[#allocation2 + $0x1c9] sm:$0xff]  ;;  %v336_v32 = vld [vmem:[#allocation2 + $0x1d1] sm:$0xff] }
  0x43   :  { %900 = vrot.lane.b32.xlu1 %v312_v56, %s8695_s12  ;;  %223 = vst.msk [vmem:[#allocation2 + $0x2a1] sm:$0xff] %vm20_vm0, %v158_v0  ;;  %224 = vst.msk [vmem:[#allocation2 + $0x2a9] sm:$0xff] %vm20_vm0, %v159_v1  ;;  %v337_v33 = vld [vmem:[#allocation2 + $0x1e1] sm:$0xff]  ;;  %v338_v34 = vld [vmem:[#allocation2 + $0x1e9] sm:$0xff] }
  0x44   :  { %225 = vst.msk [vmem:[#allocation2 + $0x2b9] sm:$0xff] %vm20_vm0, %v160_v2  ;;  %226 = vst.msk [vmem:[#allocation2 + $0x2c1] sm:$0xff] %vm20_vm0, %v161_v3  ;;  %v339_v35 = vld [vmem:[#allocation2 + $0x1f9] sm:$0xff]  ;;  %v340_v36 = vld [vmem:[#allocation2 + $0x201] sm:$0xff] }
  0x45   :  { %227 = vst.msk [vmem:[#allocation2 + $0x2d1] sm:$0xff] %vm20_vm0, %v162_v4  ;;  %228 = vst.msk [vmem:[#allocation2 + $0x2d9] sm:$0xff] %vm20_vm0, %v163_v5  ;;  %906 = vrot.lane.b32.xlu0 %v315_v61, %s8695_s12  ;;  %v341_v37 = vld [vmem:[#allocation2 + $0x211] sm:$0xff]  ;;  %v342_v38 = vld [vmem:[#allocation2 + $0x219] sm:$0xff] }
  0x46   :  { %229 = vst.msk [vmem:[#allocation2 + $0x2e9] sm:$0xff] %vm20_vm0, %v164_v7  ;;  %230 = vst.msk [vmem:[#allocation2 + $0x2f1] sm:$0xff] %vm20_vm0, %v165_v8  ;;  %v343_v39 = vld [vmem:[#allocation2 + $0x229] sm:$0xff]  ;;  %v344_v40 = vld [vmem:[#allocation2 + $0x231] sm:$0xff] }
  0x47   :  { %904 = vrot.lane.b32.xlu1 %v314_v60, %s8695_s12  ;;  %231 = vst.msk [vmem:[#allocation2 + $0x301] sm:$0xff] %vm20_vm0, %v166_v9  ;;  %232 = vst.msk [vmem:[#allocation2 + $0x309] sm:$0xff] %vm20_vm0, %v167_v11  ;;  %v345_v41 = vld [vmem:[#allocation2 + $0x241] sm:$0xff]  ;;  %v346_v42 = vld [vmem:[#allocation2 + $0x249] sm:$0xff] }
  0x48   :  { %233 = vst.msk [vmem:[#allocation2 + $0x319] sm:$0xff] %vm20_vm0, %v168_v13  ;;  %234 = vst.msk [vmem:[#allocation2 + $0x321] sm:$0xff] %vm20_vm0, %v169_v14  ;;  %v347_v43 = vld [vmem:[#allocation2 + $0x259] sm:$0xff]  ;;  %v348_v44 = vld [vmem:[#allocation2 + $0x261] sm:$0xff] }
  0x49   :  { %910 = vrot.lane.b32.xlu0 %v317_v10, %s8695_s12  ;;  %v349_v45 = vld [vmem:[#allocation2 + $0x271] sm:$0xff]  ;;  %v350_v46 = vld [vmem:[#allocation2 + $0x279] sm:$0xff]  ;;  %v351_v47 = vld [vmem:[#allocation2 + $0x289] sm:$0xff] }
  0x4a   :  { %v352_v48 = vld [vmem:[#allocation2 + $0x291] sm:$0xff]  ;;  %v353_v49 = vld [vmem:[#allocation2 + $0x2a1] sm:$0xff]  ;;  %v354_v50 = vld [vmem:[#allocation2 + $0x2a9] sm:$0xff] }
  0x4b   :  { %908 = vrot.lane.b32.xlu1 %v316_v6, %s8695_s12  ;;  %v355_v51 = vld [vmem:[#allocation2 + $0x2b9] sm:$0xff]  ;;  %v356_v52 = vld [vmem:[#allocation2 + $0x2c1] sm:$0xff]  ;;  %v366_v5 = vld [vmem:[#allocation2 + $0xa] sm:$0xff] }
  0x4c   :  { %v357_v53 = vld [vmem:[#allocation2 + $0x2d1] sm:$0xff]  ;;  %v358_v54 = vld [vmem:[#allocation2 + $0x2d9] sm:$0xff]  ;;  %v365_v3 = vld [vmem:[#allocation2 + $0x2] sm:$0xff] }
  0x4d   :  { %914 = vrot.lane.b32.xlu0 %v319_v15, %s8695_s12  ;;  %v359_v55 = vld [vmem:[#allocation2 + $0x2e9] sm:$0xff]  ;;  %v360_v57 = vld [vmem:[#allocation2 + $0x2f1] sm:$0xff]  ;;  %v367_v7 = vld [vmem:[#allocation2 + $0x1a] sm:$0xff] }
  0x4e   :  { %v361_v59 = vld [vmem:[#allocation2 + $0x301] sm:$0xff]  ;;  %v362_v61 = vld [vmem:[#allocation2 + $0x309] sm:$0xff]  ;;  %v369_v11 = vld [vmem:[#allocation2 + $0x32] sm:$0xff] }
  0x4f   :  { %912 = vrot.lane.b32.xlu1 %v318_v12, %s8695_s12  ;;  %v363_v63 = vld [vmem:[#allocation2 + $0x319] sm:$0xff]  ;;  %v364_v1 = vld [vmem:[#allocation2 + $0x321] sm:$0xff]  ;;  %v371_v15 = vld [vmem:[#allocation2 + $0x4a] sm:$0xff] }
  0x50   :  { %v368_v9 = vld [vmem:[#allocation2 + $0x22] sm:$0xff]  ;;  %v370_v13 = vld [vmem:[#allocation2 + $0x3a] sm:$0xff] }
  0x51   :  { %918 = vrot.lane.b32.xlu0 %v321_v17, %s8695_s12  ;;  %v372_v17 = vld [vmem:[#allocation2 + $0x52] sm:$0xff] }
  0x53   :  { %916 = vrot.lane.b32.xlu1 %v320_v16, %s8695_s12 }
  0x55   :  { %922 = vrot.lane.b32.xlu0 %v323_v19, %s8695_s12  ;;  %v373_v19 = vld [vmem:[#allocation2 + $0x62] sm:$0xff] }
  0x57   :  { %920 = vrot.lane.b32.xlu1 %v322_v18, %s8695_s12 }
  0x59   :  { %926 = vrot.lane.b32.xlu0 %v325_v21, %s8695_s12  ;;  %v374_v21 = vld [vmem:[#allocation2 + $0x6a] sm:$0xff] }
  0x5b   :  { %924 = vrot.lane.b32.xlu1 %v324_v20, %s8695_s12 }
  0x5d   :  { %930 = vrot.lane.b32.xlu0 %v327_v23, %s8695_s12  ;;  %v375_v23 = vld [vmem:[#allocation2 + $0x7a] sm:$0xff] }
  0x5f   :  { %928 = vrot.lane.b32.xlu1 %v326_v22, %s8695_s12 }
  0x61   :  { %934 = vrot.lane.b32.xlu0 %v329_v25, %s8695_s12  ;;  %v376_v25 = vld [vmem:[#allocation2 + $0x82] sm:$0xff] }
  0x63   :  { %932 = vrot.lane.b32.xlu1 %v328_v24, %s8695_s12 }
  0x65   :  { %938 = vrot.lane.b32.xlu0 %v331_v27, %s8695_s12  ;;  %v377_v27 = vld [vmem:[#allocation2 + $0x92] sm:$0xff] }
  0x67   :  { %936 = vrot.lane.b32.xlu1 %v330_v26, %s8695_s12 }
  0x69   :  { %942 = vrot.lane.b32.xlu0 %v333_v29, %s8695_s12  ;;  %v378_v29 = vld [vmem:[#allocation2 + $0x9a] sm:$0xff] }
  0x6b   :  { %940 = vrot.lane.b32.xlu1 %v332_v28, %s8695_s12 }
  0x6d   :  { %946 = vrot.lane.b32.xlu0 %v335_v31, %s8695_s12  ;;  %v379_v31 = vld [vmem:[#allocation2 + $0xaa] sm:$0xff] }
  0x6f   :  { %944 = vrot.lane.b32.xlu1 %v334_v30, %s8695_s12 }
  0x71   :  { %950 = vrot.lane.b32.xlu0 %v337_v33, %s8695_s12  ;;  %v380_v33 = vld [vmem:[#allocation2 + $0xb2] sm:$0xff] }
  0x73   :  { %948 = vrot.lane.b32.xlu1 %v336_v32, %s8695_s12 }
  0x75   :  { %954 = vrot.lane.b32.xlu0 %v339_v35, %s8695_s12  ;;  %v381_v35 = vld [vmem:[#allocation2 + $0xc2] sm:$0xff] }
  0x77   :  { %952 = vrot.lane.b32.xlu1 %v338_v34, %s8695_s12 }
  0x79   :  { %958 = vrot.lane.b32.xlu0 %v341_v37, %s8695_s12  ;;  %v382_v37 = vld [vmem:[#allocation2 + $0xca] sm:$0xff] }
  0x7b   :  { %956 = vrot.lane.b32.xlu1 %v340_v36, %s8695_s12 }
  0x7d   :  { %962 = vrot.lane.b32.xlu0 %v343_v39, %s8695_s12  ;;  %v383_v39 = vld [vmem:[#allocation2 + $0xda] sm:$0xff] }
  0x7f   :  { %960 = vrot.lane.b32.xlu1 %v342_v38, %s8695_s12  ;;  %v9204_v56 = vpop.permute.xlu0 %878 }
  0x81   :  { %966 = vrot.lane.b32.xlu0 %v345_v41, %s8695_s12  ;;  %v384_v41 = vld [vmem:[#allocation2 + $0xe2] sm:$0xff] }
  0x83   :  { %964 = vrot.lane.b32.xlu1 %v344_v40, %s8695_s12  ;;  %v9210_v60 = vpop.permute.xlu0 %880 }
  0x85   :  { %970 = vrot.lane.b32.xlu0 %v347_v43, %s8695_s12  ;;  %v385_v43 = vld [vmem:[#allocation2 + $0xf2] sm:$0xff] }
  0x87   :  { %968 = vrot.lane.b32.xlu1 %v346_v42, %s8695_s12 }
  0x89   :  { %974 = vrot.lane.b32.xlu0 %v349_v45, %s8695_s12  ;;  %v386_v45 = vld [vmem:[#allocation2 + $0xfa] sm:$0xff] }
  0x8b   :  { %972 = vrot.lane.b32.xlu1 %v348_v44, %s8695_s12 }
  0x8d   :  { %978 = vrot.lane.b32.xlu0 %v351_v47, %s8695_s12  ;;  %v387_v47 = vld [vmem:[#allocation2 + $0x10a] sm:$0xff] }
  0x8f   :  { %976 = vrot.lane.b32.xlu1 %v350_v46, %s8695_s12 }
  0x91   :  { %982 = vrot.lane.b32.xlu0 %v353_v49, %s8695_s12  ;;  %v388_v49 = vld [vmem:[#allocation2 + $0x112] sm:$0xff] }
  0x93   :  { %980 = vrot.lane.b32.xlu1 %v352_v48, %s8695_s12 }
  0x95   :  { %986 = vrot.lane.b32.xlu0 %v355_v51, %s8695_s12  ;;  %v389_v51 = vld [vmem:[#allocation2 + $0x122] sm:$0xff] }
  0x97   :  { %984 = vrot.lane.b32.xlu1 %v354_v50, %s8695_s12 }
  0x99   :  { %990 = vrot.lane.b32.xlu0 %v357_v53, %s8695_s12  ;;  %v390_v53 = vld [vmem:[#allocation2 + $0x12a] sm:$0xff] }
  0x9b   :  { %988 = vrot.lane.b32.xlu1 %v356_v52, %s8695_s12 }
  0x9d   :  { %994 = vrot.lane.b32.xlu0 %v359_v55, %s8695_s12  ;;  %v391_v55 = vld [vmem:[#allocation2 + $0x13a] sm:$0xff] }
  0x9f   :  { %992 = vrot.lane.b32.xlu1 %v358_v54, %s8695_s12 }
  0xa1   :  { %v9206_v58 = vpop.permute.xlu1 %882  ;;  %998 = vrot.lane.b32.xlu0 %v361_v59, %s8695_s12  ;;  %v392_v59 = vld [vmem:[#allocation2 + $0x142] sm:$0xff] }
  0xa2   :  { %v9216_v0 = vpop.permute.xlu0 %886 }
  0xa3   :  { %996 = vrot.lane.b32.xlu1 %v360_v57, %s8695_s12 }
  0xa5   :  { %v9212_v62 = vpop.permute.xlu1 %884  ;;  %1002 = vrot.lane.b32.xlu0 %v363_v63, %s8695_s12  ;;  %v138_v63 = vld [vmem:[%s14479_s0 + $0xf0] sm:$0xff] }
  0xa6   :  { %203 = vst.msk [vmem:[#allocation2 + $0x181] sm:$0xff] %vm20_vm0, %v138_v63  ;;  %v407_v63 = vld [vmem:[#allocation2 + $0x22a] sm:$0xff] }
  0xa7   :  { %1000 = vrot.lane.b32.xlu1 %v362_v61, %s8695_s12  ;;  %v9222_v4 = vpop.permute.xlu0 %890 }
  0xa9   :  { %v9218_v2 = vpop.permute.xlu1 %888  ;;  %1134 = vrot.lane.b32.xlu0 %v365_v3, %s8696_s17  ;;  %v393_v3 = vld [vmem:[#allocation2 + $0x152] sm:$0xff] }
  0xab   :  { %1004 = vrot.lane.b32.xlu1 %v364_v1, %s8695_s12  ;;  %v9228_v8 = vpop.permute.xlu0 %894  ;;  %v139_v1 = vld [vmem:[%s14479_s0 + $0xf8] sm:$0xff] }
  0xac   :  { %204 = vst.msk [vmem:[#allocation2 + $0x189] sm:$0xff] %vm20_vm0, %v139_v1 }
  0xad   :  { %v9224_v6 = vpop.permute.xlu1 %892  ;;  %1138 = vrot.lane.b32.xlu0 %v367_v7, %s8696_s17  ;;  %v394_v7 = vld [vmem:[#allocation2 + $0x15a] sm:$0xff] }
  0xaf   :  { %1136 = vrot.lane.b32.xlu1 %v366_v5, %s8696_s17  ;;  %v9234_v12 = vpop.permute.xlu0 %898 }
  0xb1   :  { %v9230_v10 = vpop.permute.xlu1 %896  ;;  %1142 = vrot.lane.b32.xlu0 %v369_v11, %s8696_s17  ;;  %v395_v11 = vld [vmem:[#allocation2 + $0x16a] sm:$0xff] }
  0xb3   :  { %1140 = vrot.lane.b32.xlu1 %v368_v9, %s8696_s17  ;;  %v9240_v16 = vpop.permute.xlu0 %902 }
  0xb4   :  { %14492 = vst [vmem:[#allocation4_spill] sm:$0xff] %v9240_v16  ;;  %v687_v16 = vld [vmem:[#allocation2 + $0x39] sm:$0xff] }
  0xb5   :  { %v9236_v14 = vpop.permute.xlu1 %900  ;;  %1146 = vrot.lane.b32.xlu0 %v371_v15, %s8696_s17  ;;  %v396_v15 = vld [vmem:[#allocation2 + $0x172] sm:$0xff] }
  0xb6   :  { %14491 = vst [vmem:[#allocation3_spill] sm:$0xff] %v9236_v14 }
  0xb7   :  { %1144 = vrot.lane.b32.xlu1 %v370_v13, %s8696_s17  ;;  %v9246_v20 = vpop.permute.xlu0 %906 }
  0xb8   :  { %14494 = vst [vmem:[#allocation6_spill] sm:$0xff] %v9246_v20 }
  0xb9   :  { %v9242_v18 = vpop.permute.xlu1 %904  ;;  %1150 = vrot.lane.b32.xlu0 %v373_v19, %s8696_s17  ;;  %v397_v19 = vld [vmem:[#allocation2 + $0x1b2] sm:$0xff] }
  0xba   :  { %14493 = vst [vmem:[#allocation5_spill] sm:$0xff] %v9242_v18 }
  0xbb   :  { %1148 = vrot.lane.b32.xlu1 %v372_v17, %s8696_s17  ;;  %v9252_v24 = vpop.permute.xlu0 %910 }
  0xbc   :  { %14496 = vst [vmem:[#allocation8_spill] sm:$0xff] %v9252_v24 }
  0xbd   :  { %v9248_v22 = vpop.permute.xlu1 %908  ;;  %1154 = vrot.lane.b32.xlu0 %v375_v23, %s8696_s17  ;;  %v398_v23 = vld [vmem:[#allocation2 + $0x1ba] sm:$0xff] }
  0xbe   :  { %14495 = vst [vmem:[#allocation7_spill] sm:$0xff] %v9248_v22  ;;  %v566_v22 = vld [vmem:[#allocation2 + $0x82] sm:$0xff] }
  0xbf   :  { %1152 = vrot.lane.b32.xlu1 %v374_v21, %s8696_s17  ;;  %v9258_v28 = vpop.permute.xlu0 %914 }
  0xc0   :  { %14498 = vst [vmem:[#allocation10_spill] sm:$0xff] %v9258_v28 }
  0xc1   :  { %v9254_v26 = vpop.permute.xlu1 %912  ;;  %1158 = vrot.lane.b32.xlu0 %v377_v27, %s8696_s17  ;;  %v399_v27 = vld [vmem:[#allocation2 + $0x1ca] sm:$0xff] }
  0xc2   :  { %14497 = vst [vmem:[#allocation9_spill] sm:$0xff] %v9254_v26  ;;  %v560_v26 = vld [vmem:[#allocation2 + $0x3a] sm:$0xff] }
  0xc3   :  { %1156 = vrot.lane.b32.xlu1 %v376_v25, %s8696_s17  ;;  %v9264_v32 = vpop.permute.xlu0 %918 }
  0xc4   :  { %14500 = vst [vmem:[#allocation12_spill] sm:$0xff] %v9264_v32 }
  0xc5   :  { %v9260_v30 = vpop.permute.xlu1 %916  ;;  %1162 = vrot.lane.b32.xlu0 %v379_v31, %s8696_s17  ;;  %v400_v31 = vld [vmem:[#allocation2 + $0x1d2] sm:$0xff] }
  0xc6   :  { %14499 = vst [vmem:[#allocation11_spill] sm:$0xff] %v9260_v30  ;;  %v508_v30 = vld [vmem:[#allocation2 + $0xc9] sm:$0xff] }
  0xc7   :  { %1160 = vrot.lane.b32.xlu1 %v378_v29, %s8696_s17  ;;  %v9270_v36 = vpop.permute.xlu0 %922 }
  0xc8   :  { %14502 = vst [vmem:[#allocation14_spill] sm:$0xff] %v9270_v36 }
  0xc9   :  { %v9266_v34 = vpop.permute.xlu1 %920  ;;  %1166 = vrot.lane.b32.xlu0 %v381_v35, %s8696_s17  ;;  %v401_v35 = vld [vmem:[#allocation2 + $0x1e2] sm:$0xff] }
  0xca   :  { %14501 = vst [vmem:[#allocation13_spill] sm:$0xff] %v9266_v34  ;;  %v504_v34 = vld [vmem:[#allocation2 + $0x99] sm:$0xff] }
  0xcb   :  { %1164 = vrot.lane.b32.xlu1 %v380_v33, %s8696_s17  ;;  %v9276_v40 = vpop.permute.xlu0 %926 }
  0xcc   :  { %14504 = vst [vmem:[#allocation16_spill] sm:$0xff] %v9276_v40 }
  0xcd   :  { %v9272_v38 = vpop.permute.xlu1 %924  ;;  %1170 = vrot.lane.b32.xlu0 %v383_v39, %s8696_s17  ;;  %v402_v39 = vld [vmem:[#allocation2 + $0x1ea] sm:$0xff] }
  0xce   :  { %14503 = vst [vmem:[#allocation15_spill] sm:$0xff] %v9272_v38  ;;  %v500_v38 = vld [vmem:[#allocation2 + $0x69] sm:$0xff] }
  0xcf   :  { %1168 = vrot.lane.b32.xlu1 %v382_v37, %s8696_s17  ;;  %v9282_v44 = vpop.permute.xlu0 %930 }
  0xd0   :  { %14506 = vst [vmem:[#allocation18_spill] sm:$0xff] %v9282_v44 }
  0xd1   :  { %v9278_v42 = vpop.permute.xlu1 %928  ;;  %1174 = vrot.lane.b32.xlu0 %v385_v43, %s8696_s17  ;;  %v403_v43 = vld [vmem:[#allocation2 + $0x1fa] sm:$0xff] }
  0xd2   :  { %14505 = vst [vmem:[#allocation17_spill] sm:$0xff] %v9278_v42  ;;  %v496_v42 = vld [vmem:[#allocation2 + $0x39] sm:$0xff] }
  0xd3   :  { %1172 = vrot.lane.b32.xlu1 %v384_v41, %s8696_s17  ;;  %v9288_v48 = vpop.permute.xlu0 %934 }
  0xd4   :  { %14508 = vst [vmem:[#allocation20_spill] sm:$0xff] %v9288_v48  ;;  %v262_v48 = vld [vmem:[#allocation2 + $0x128] sm:$0xff] }
  0xd5   :  { %v9284_v46 = vpop.permute.xlu1 %932  ;;  %1178 = vrot.lane.b32.xlu0 %v387_v47, %s8696_s17  ;;  %v404_v47 = vld [vmem:[#allocation2 + $0x202] sm:$0xff] }
  0xd6   :  { %14507 = vst [vmem:[#allocation19_spill] sm:$0xff] %v9284_v46 }
  0xd7   :  { %1176 = vrot.lane.b32.xlu1 %v386_v45, %s8696_s17  ;;  %v9294_v52 = vpop.permute.xlu0 %938 }
  0xd8   :  { %14510 = vst [vmem:[#allocation22_spill] sm:$0xff] %v9294_v52  ;;  %v260_v52 = vld [vmem:[#allocation2 + $0x110] sm:$0xff] }
  0xd9   :  { %v9290_v50 = vpop.permute.xlu1 %936  ;;  %1182 = vrot.lane.b32.xlu0 %v389_v51, %s8696_s17  ;;  %v405_v51 = vld [vmem:[#allocation2 + $0x212] sm:$0xff] }
  0xda   :  { %14509 = vst [vmem:[#allocation21_spill] sm:$0xff] %v9290_v50 }
  0xdb   :  { %1180 = vrot.lane.b32.xlu1 %v388_v49, %s8696_s17  ;;  %v9300_v57 = vpop.permute.xlu0 %942 }
  0xdc   :  { %14512 = vst [vmem:[#allocation24_spill] sm:$0xff] %v9300_v57  ;;  %v258_v57 = vld [vmem:[#allocation2 + $0xf8] sm:$0xff] }
  0xdd   :  { %v9296_v54 = vpop.permute.xlu1 %940  ;;  %1186 = vrot.lane.b32.xlu0 %v391_v55, %s8696_s17  ;;  %v406_v55 = vld [vmem:[#allocation2 + $0x21a] sm:$0xff] }
  0xde   :  { %14511 = vst [vmem:[#allocation23_spill] sm:$0xff] %v9296_v54 }
  0xdf   :  { %1184 = vrot.lane.b32.xlu1 %v390_v53, %s8696_s17  ;;  %v9314_v5 = vpop.permute.xlu0 %946 }
  0xe0   :  { %14514 = vst [vmem:[#allocation26_spill] sm:$0xff] %v9314_v5  ;;  %v256_v5 = vld [vmem:[#allocation2 + $0xe0] sm:$0xff] }
  0xe1   :  { %v9302_v61 = vpop.permute.xlu1 %944  ;;  %1190 = vrot.lane.b32.xlu0 %v393_v3, %s8696_s17  ;;  %v408_v3 = vld [vmem:[#allocation2 + $0x232] sm:$0xff] }
  0xe2   :  { %14513 = vst [vmem:[#allocation25_spill] sm:$0xff] %v9302_v61 }
  0xe3   :  { %1188 = vrot.lane.b32.xlu1 %v392_v59, %s8696_s17  ;;  %v9320_v13 = vpop.permute.xlu0 %950 }
  0xe4   :  { %14516 = vst [vmem:[#allocation28_spill] sm:$0xff] %v9320_v13  ;;  %v254_v13 = vld [vmem:[#allocation2 + $0xc8] sm:$0xff] }
  0xe5   :  { %v9316_v9 = vpop.permute.xlu1 %948  ;;  %1194 = vrot.lane.b32.xlu0 %v395_v11, %s8696_s17  ;;  %v409_v11 = vld [vmem:[#allocation2 + $0x242] sm:$0xff] }
  0xe6   :  { %14515 = vst [vmem:[#allocation27_spill] sm:$0xff] %v9316_v9 }
  0xe7   :  { %1192 = vrot.lane.b32.xlu1 %v394_v7, %s8696_s17  ;;  %v9326_v21 = vpop.permute.xlu0 %954 }
  0xe8   :  { %14518 = vst [vmem:[#allocation30_spill] sm:$0xff] %v9326_v21  ;;  %v252_v21 = vld [vmem:[#allocation2 + $0xb0] sm:$0xff] }
  0xe9   :  { %v9322_v17 = vpop.permute.xlu1 %952  ;;  %1198 = vrot.lane.b32.xlu0 %v397_v19, %s8696_s17  ;;  %v410_v19 = vld [vmem:[#allocation2 + $0x24a] sm:$0xff] }
  0xea   :  { %14517 = vst [vmem:[#allocation29_spill] sm:$0xff] %v9322_v17 }
  0xeb   :  { %1196 = vrot.lane.b32.xlu1 %v396_v15, %s8696_s17  ;;  %v9332_v29 = vpop.permute.xlu0 %958 }
  0xec   :  { %14520 = vst [vmem:[#allocation32_spill] sm:$0xff] %v9332_v29  ;;  %v250_v29 = vld [vmem:[#allocation2 + $0x98] sm:$0xff] }
  0xed   :  { %v9328_v25 = vpop.permute.xlu1 %956  ;;  %1202 = vrot.lane.b32.xlu0 %v399_v27, %s8696_s17  ;;  %v411_v27 = vld [vmem:[#allocation2 + $0x25a] sm:$0xff] }
  0xee   :  { %14519 = vst [vmem:[#allocation31_spill] sm:$0xff] %v9328_v25 }
  0xef   :  { %1200 = vrot.lane.b32.xlu1 %v398_v23, %s8696_s17  ;;  %v9338_v37 = vpop.permute.xlu0 %962 }
  0xf0   :  { %14522 = vst [vmem:[#allocation34_spill] sm:$0xff] %v9338_v37  ;;  %v248_v37 = vld [vmem:[#allocation2 + $0x80] sm:$0xff] }
  0xf1   :  { %v9334_v33 = vpop.permute.xlu1 %960  ;;  %1206 = vrot.lane.b32.xlu0 %v401_v35, %s8696_s17  ;;  %v412_v35 = vld [vmem:[#allocation2 + $0x262] sm:$0xff] }
  0xf2   :  { %14521 = vst [vmem:[#allocation33_spill] sm:$0xff] %v9334_v33 }
  0xf3   :  { %1204 = vrot.lane.b32.xlu1 %v400_v31, %s8696_s17  ;;  %v9344_v45 = vpop.permute.xlu0 %966 }
  0xf4   :  { %14524 = vst [vmem:[#allocation36_spill] sm:$0xff] %v9344_v45  ;;  %v246_v45 = vld [vmem:[#allocation2 + $0x68] sm:$0xff] }
  0xf5   :  { %v9340_v41 = vpop.permute.xlu1 %964  ;;  %1210 = vrot.lane.b32.xlu0 %v403_v43, %s8696_s17  ;;  %v413_v43 = vld [vmem:[#allocation2 + $0x272] sm:$0xff] }
  0xf6   :  { %14523 = vst [vmem:[#allocation35_spill] sm:$0xff] %v9340_v41 }
  0xf7   :  { %1208 = vrot.lane.b32.xlu1 %v402_v39, %s8696_s17  ;;  %v9350_v53 = vpop.permute.xlu0 %970 }
  0xf8   :  { %14526 = vst [vmem:[#allocation38_spill] sm:$0xff] %v9350_v53  ;;  %v244_v53 = vld [vmem:[#allocation2 + $0x50] sm:$0xff] }
  0xf9   :  { %v9346_v49 = vpop.permute.xlu1 %968  ;;  %1214 = vrot.lane.b32.xlu0 %v405_v51, %s8696_s17  ;;  %v414_v51 = vld [vmem:[#allocation2 + $0x27a] sm:$0xff] }
  0xfa   :  { %14525 = vst [vmem:[#allocation37_spill] sm:$0xff] %v9346_v49 }
  0xfb   :  { %1212 = vrot.lane.b32.xlu1 %v404_v47, %s8696_s17  ;;  %v9356_v1 = vpop.permute.xlu0 %974 }
  0xfc   :  { %14528 = vst [vmem:[#allocation40_spill] sm:$0xff] %v9356_v1  ;;  %v242_v1 = vld [vmem:[#allocation2 + $0x38] sm:$0xff] }
  0xfd   :  { %v9352_v59 = vpop.permute.xlu1 %972  ;;  %1218 = vrot.lane.b32.xlu0 %v407_v63, %s8696_s17  ;;  %v415_v63 = vld [vmem:[#allocation2 + $0x28a] sm:$0xff] }
  0xfe   :  { %14527 = vst [vmem:[#allocation39_spill] sm:$0xff] %v9352_v59 }
  0xff   :  { %1216 = vrot.lane.b32.xlu1 %v406_v55, %s8696_s17  ;;  %v9362_v15 = vpop.permute.xlu0 %978 }
 0x100   :  { %14530 = vst [vmem:[#allocation42_spill] sm:$0xff] %v9362_v15  ;;  %v240_v15 = vld [vmem:[#allocation2 + $0x20] sm:$0xff] }
 0x101   :  { %v9358_v7 = vpop.permute.xlu1 %976  ;;  %1222 = vrot.lane.b32.xlu0 %v409_v11, %s8696_s17  ;;  %v416_v11 = vld [vmem:[#allocation2 + $0x292] sm:$0xff] }
 0x102   :  { %14529 = vst [vmem:[#allocation41_spill] sm:$0xff] %v9358_v7 }
 0x103   :  { %1220 = vrot.lane.b32.xlu1 %v408_v3, %s8696_s17  ;;  %v9368_v31 = vpop.permute.xlu0 %982 }
 0x104   :  { %14532 = vst [vmem:[#allocation44_spill] sm:$0xff] %v9368_v31 }
 0x105   :  { %v9364_v23 = vpop.permute.xlu1 %980  ;;  %1226 = vrot.lane.b32.xlu0 %v411_v27, %s8696_s17  ;;  %v417_v27 = vld [vmem:[#allocation2 + $0x2a2] sm:$0xff] }
 0x106   :  { %14531 = vst [vmem:[#allocation43_spill] sm:$0xff] %v9364_v23 }
 0x107   :  { %1224 = vrot.lane.b32.xlu1 %v410_v19, %s8696_s17  ;;  %v9374_v47 = vpop.permute.xlu0 %986 }
 0x108   :  { %14534 = vst [vmem:[#allocation46_spill] sm:$0xff] %v9374_v47  ;;  %v418_v47 = vld [vmem:[#allocation2 + $0x2aa] sm:$0xff] }
 0x109   :  { %v9370_v39 = vpop.permute.xlu1 %984  ;;  %1230 = vrot.lane.b32.xlu0 %v413_v43, %s8696_s17  ;;  %v419_v43 = vld [vmem:[#allocation2 + $0x2ba] sm:$0xff] }
 0x10a   :  { %14533 = vst [vmem:[#allocation45_spill] sm:$0xff] %v9370_v39 }
 0x10b   :  { %1228 = vrot.lane.b32.xlu1 %v412_v35, %s8696_s17  ;;  %v9380_v3 = vpop.permute.xlu0 %990 }
 0x10c   :  { %14536 = vst [vmem:[#allocation48_spill] sm:$0xff] %v9380_v3  ;;  %v420_v3 = vld [vmem:[#allocation2 + $0x2c2] sm:$0xff] }
 0x10d   :  { %v9376_v55 = vpop.permute.xlu1 %988  ;;  %1234 = vrot.lane.b32.xlu0 %v415_v63, %s8696_s17  ;;  %v421_v63 = vld [vmem:[#allocation2 + $0x2d2] sm:$0xff] }
 0x10e   :  { %14535 = vst [vmem:[#allocation47_spill] sm:$0xff] %v9376_v55 }
 0x10f   :  { %1232 = vrot.lane.b32.xlu1 %v414_v51, %s8696_s17  ;;  %v9386_v35 = vpop.permute.xlu0 %994 }
 0x110   :  { %14538 = vst [vmem:[#allocation50_spill] sm:$0xff] %v9386_v35  ;;  %v422_v35 = vld [vmem:[#allocation2 + $0x2da] sm:$0xff] }
 0x111   :  { %v9382_v19 = vpop.permute.xlu1 %992  ;;  %1238 = vrot.lane.b32.xlu0 %v417_v27, %s8696_s17 }
 0x112   :  { %14537 = vst [vmem:[#allocation49_spill] sm:$0xff] %v9382_v19 }
 0x113   :  { %1236 = vrot.lane.b32.xlu1 %v416_v11, %s8696_s17  ;;  %v9392_v51 = vpop.permute.xlu0 %998 }
 0x114   :  { %14540 = vst [vmem:[#allocation52_spill] sm:$0xff] %v9392_v51  ;;  %v424_v51 = vld [vmem:[#allocation2 + $0x2f2] sm:$0xff] }
 0x115   :  { %v9388_v39 = vpop.permute.xlu1 %996  ;;  %1242 = vrot.lane.b32.xlu0 %v419_v43, %s8696_s17  ;;  %v171_v43 = vld [vmem:[%s14479_s0 + $0x1f8] sm:$0xff] }
 0x116   :  { %14539 = vst [vmem:[#allocation51_spill] sm:$0xff] %v9388_v39  ;;  %236 = vst.msk [vmem:[#allocation2 + $0x339] sm:$0xff] %vm20_vm0, %v171_v43  ;;  %v239_v43 = vld [vmem:[#allocation2 + $0x18] sm:$0xff] }
 0x117   :  { %1240 = vrot.lane.b32.xlu1 %v418_v47, %s8696_s17  ;;  %v9398_v11 = vpop.permute.xlu0 %1002  ;;  %v423_v47 = vld [vmem:[#allocation2 + $0x2ea] sm:$0xff] }
 0x118   :  { %14542 = vst [vmem:[#allocation54_spill] sm:$0xff] %v9398_v11 }
 0x119   :  { %v9394_v55 = vpop.permute.xlu1 %1000  ;;  %1246 = vrot.lane.b32.xlu0 %v421_v63, %s8696_s17 }
 0x11a   :  { %14541 = vst [vmem:[#allocation53_spill] sm:$0xff] %v9394_v55  ;;  %v428_v55 = vld [vmem:[#allocation2 + $0x322] sm:$0xff] }
 0x11b   :  { %1244 = vrot.lane.b32.xlu1 %v420_v3, %s8696_s17  ;;  %v9404_v27 = vpop.permute.xlu0 %1134  ;;  %v170_v3 = vld [vmem:[%s14479_s0 + $0x1f0] sm:$0xff] }
 0x11c   :  { %235 = vst.msk [vmem:[#allocation2 + $0x331] sm:$0xff] %vm20_vm0, %v170_v3 }
 0x11d   :  { %v9400_v19 = vpop.permute.xlu1 %1004  ;;  %1250 = vrot.lane.b32.xlu0 %v423_v47, %s8696_s17  ;;  %v427_v47 = vld [vmem:[#allocation2 + $0x31a] sm:$0xff] }
 0x11e   :  { %14543 = vst [vmem:[#allocation55_spill] sm:$0xff] %v9400_v19  ;;  %v426_v19 = vld [vmem:[#allocation2 + $0x30a] sm:$0xff] }
 0x11f   :  { %1248 = vrot.lane.b32.xlu1 %v422_v35, %s8696_s17  ;;  %v425_v35 = vld [vmem:[#allocation2 + $0x302] sm:$0xff]  ;;  %v9418_v63 = vpop.permute.xlu0 %1138 }
 0x121   :  { %v9406_v39 = vpop.permute.xlu1 %1136  ;;  %1254 = vrot.lane.b32.xlu0 %v425_v35, %s8696_s17  ;;  %v241_v35 = vld [vmem:[#allocation2 + $0x30] sm:$0xff] }
 0x123   :  { %1252 = vrot.lane.b32.xlu1 %v424_v51, %s8696_s17  ;;  %v9424_v3 = vpop.permute.xlu0 %1142  ;;  %v492_v46 = vld [vmem:[#allocation2 + $0x338] sm:$0xff] }
 0x125   :  { %v9420_v11 = vpop.permute.xlu1 %1140  ;;  %1258 = vrot.lane.b32.xlu0 %v427_v47, %s8696_s17  ;;  %v243_v47 = vld [vmem:[#allocation2 + $0x48] sm:$0xff] }
 0x127   :  { %1256 = vrot.lane.b32.xlu1 %v426_v19, %s8696_s17  ;;  %v9430_v51 = vpop.permute.xlu0 %1146 }
 0x129   :  { %v9426_v31 = vpop.permute.xlu1 %1144  ;;  %1390 = vrot.lane.b32.xlu0 %v239_v43, %s8697_s26  ;;  %v245_v43 = vld [vmem:[#allocation2 + $0x60] sm:$0xff] }
 0x12b   :  { %1260 = vrot.lane.b32.xlu1 %v428_v55, %s8696_s17  ;;  %v9436_v19 = vpop.permute.xlu0 %1150 }
 0x12c   :  { %14544 = vst [vmem:[#allocation56_spill] sm:$0xff] %v9436_v19 }
 0x12d   :  { %v9432_v23 = vpop.permute.xlu1 %1148  ;;  %1394 = vrot.lane.b32.xlu0 %v241_v35, %s8697_s26  ;;  %v247_v35 = vld [vmem:[#allocation2 + $0x78] sm:$0xff] }
 0x12f   :  { %1392 = vrot.lane.b32.xlu1 %v240_v15, %s8697_s26  ;;  %v9442_v55 = vpop.permute.xlu0 %1154 }
 0x130   :  { %14546 = vst [vmem:[#allocation58_spill] sm:$0xff] %v9442_v55 }
 0x131   :  { %v9438_v7 = vpop.permute.xlu1 %1152  ;;  %1398 = vrot.lane.b32.xlu0 %v243_v47, %s8697_s26  ;;  %v249_v47 = vld [vmem:[#allocation2 + $0x90] sm:$0xff] }
 0x132   :  { %14545 = vst [vmem:[#allocation57_spill] sm:$0xff] %v9438_v7 }
 0x133   :  { %1396 = vrot.lane.b32.xlu1 %v242_v1, %s8697_s26  ;;  %v9448_v15 = vpop.permute.xlu0 %1158 }
 0x134   :  { %14548 = vst [vmem:[#allocation60_spill] sm:$0xff] %v9448_v15  ;;  %v623_v15 = vld [vmem:[#allocation2 + $0x38] sm:$0xff] }
 0x135   :  { %v9444_v59 = vpop.permute.xlu1 %1156  ;;  %1402 = vrot.lane.b32.xlu0 %v245_v43, %s8697_s26  ;;  %v251_v43 = vld [vmem:[#allocation2 + $0xa8] sm:$0xff] }
 0x136   :  { %14547 = vst [vmem:[#allocation59_spill] sm:$0xff] %v9444_v59 }
 0x137   :  { %1400 = vrot.lane.b32.xlu1 %v244_v53, %s8697_s26  ;;  %v9454_v1 = vpop.permute.xlu0 %1162 }
 0x138   :  { %14550 = vst [vmem:[#allocation62_spill] sm:$0xff] %v9454_v1  ;;  %v564_v1 = vld [vmem:[#allocation2 + $0x6a] sm:$0xff] }
 0x139   :  { %v9450_v49 = vpop.permute.xlu1 %1160  ;;  %1406 = vrot.lane.b32.xlu0 %v247_v35, %s8697_s26  ;;  %v253_v35 = vld [vmem:[#allocation2 + $0xc0] sm:$0xff] }
 0x13a   :  { %14549 = vst [vmem:[#allocation61_spill] sm:$0xff] %v9450_v49 }
 0x13b   :  { %1404 = vrot.lane.b32.xlu1 %v246_v45, %s8697_s26  ;;  %v9460_v53 = vpop.permute.xlu0 %1166 }
 0x13c   :  { %14552 = vst [vmem:[#allocation64_spill] sm:$0xff] %v9460_v53  ;;  %v558_v53 = vld [vmem:[#allocation2 + $0x22] sm:$0xff] }
 0x13d   :  { %v9456_v41 = vpop.permute.xlu1 %1164  ;;  %1410 = vrot.lane.b32.xlu0 %v249_v47, %s8697_s26  ;;  %v255_v47 = vld [vmem:[#allocation2 + $0xd8] sm:$0xff] }
 0x13e   :  { %14551 = vst [vmem:[#allocation63_spill] sm:$0xff] %v9456_v41 }
 0x13f   :  { %1408 = vrot.lane.b32.xlu1 %v248_v37, %s8697_s26  ;;  %v9466_v45 = vpop.permute.xlu0 %1170 }
 0x140   :  { %14554 = vst [vmem:[#allocation66_spill] sm:$0xff] %v9466_v45  ;;  %v506_v45 = vld [vmem:[#allocation2 + $0xb1] sm:$0xff] }
 0x141   :  { %v9462_v33 = vpop.permute.xlu1 %1168  ;;  %1414 = vrot.lane.b32.xlu0 %v251_v43, %s8697_s26  ;;  %v257_v43 = vld [vmem:[#allocation2 + $0xf0] sm:$0xff] }
 0x142   :  { %14553 = vst [vmem:[#allocation65_spill] sm:$0xff] %v9462_v33 }
 0x143   :  { %1412 = vrot.lane.b32.xlu1 %v250_v29, %s8697_s26  ;;  %v9472_v37 = vpop.permute.xlu0 %1174 }
 0x144   :  { %14556 = vst [vmem:[#allocation68_spill] sm:$0xff] %v9472_v37  ;;  %v502_v37 = vld [vmem:[#allocation2 + $0x81] sm:$0xff] }
 0x145   :  { %v9468_v25 = vpop.permute.xlu1 %1172  ;;  %1418 = vrot.lane.b32.xlu0 %v253_v35, %s8697_s26  ;;  %v259_v35 = vld [vmem:[#allocation2 + $0x108] sm:$0xff] }
 0x146   :  { %14555 = vst [vmem:[#allocation67_spill] sm:$0xff] %v9468_v25 }
 0x147   :  { %1416 = vrot.lane.b32.xlu1 %v252_v21, %s8697_s26  ;;  %v9478_v29 = vpop.permute.xlu0 %1178 }
 0x148   :  { %14558 = vst [vmem:[#allocation70_spill] sm:$0xff] %v9478_v29  ;;  %v498_v29 = vld [vmem:[#allocation2 + $0x51] sm:$0xff] }
 0x149   :  { %v9474_v17 = vpop.permute.xlu1 %1176  ;;  %1422 = vrot.lane.b32.xlu0 %v255_v47, %s8697_s26  ;;  %v261_v47 = vld [vmem:[#allocation2 + $0x120] sm:$0xff] }
 0x14a   :  { %14557 = vst [vmem:[#allocation69_spill] sm:$0xff] %v9474_v17 }
 0x14b   :  { %1420 = vrot.lane.b32.xlu1 %v254_v13, %s8697_s26  ;;  %v9484_v21 = vpop.permute.xlu0 %1182 }
 0x14c   :  { %14560 = vst [vmem:[#allocation72_spill] sm:$0xff] %v9484_v21  ;;  %v494_v21 = vld [vmem:[#allocation2 + $0x21] sm:$0xff] }
 0x14d   :  { %v9480_v9 = vpop.permute.xlu1 %1180  ;;  %1426 = vrot.lane.b32.xlu0 %v257_v43, %s8697_s26  ;;  %v263_v43 = vld [vmem:[#allocation2 + $0x138] sm:$0xff] }
 0x14e   :  { %14559 = vst [vmem:[#allocation71_spill] sm:$0xff] %v9480_v9 }
 0x14f   :  { %1424 = vrot.lane.b32.xlu1 %v256_v5, %s8697_s26  ;;  %v9490_v13 = vpop.permute.xlu0 %1186 }
 0x150   :  { %14562 = vst [vmem:[#allocation74_spill] sm:$0xff] %v9490_v13 }
 0x151   :  { %v9486_v61 = vpop.permute.xlu1 %1184  ;;  %1430 = vrot.lane.b32.xlu0 %v259_v35, %s8697_s26  ;;  %v265_v35 = vld [vmem:[#allocation2 + $0x150] sm:$0xff] }
 0x152   :  { %14561 = vst [vmem:[#allocation73_spill] sm:$0xff] %v9486_v61 }
 0x153   :  { %1428 = vrot.lane.b32.xlu1 %v258_v57, %s8697_s26  ;;  %v9496_v5 = vpop.permute.xlu0 %1190 }
 0x154   :  { %14564 = vst [vmem:[#allocation76_spill] sm:$0xff] %v9496_v5 }
 0x155   :  { %v9492_v54 = vpop.permute.xlu1 %1188  ;;  %1434 = vrot.lane.b32.xlu0 %v261_v47, %s8697_s26  ;;  %v267_v47 = vld [vmem:[#allocation2 + $0x168] sm:$0xff] }
 0x156   :  { %14563 = vst [vmem:[#allocation75_spill] sm:$0xff] %v9492_v54  ;;  %v264_v54 = vld [vmem:[#allocation2 + $0x140] sm:$0xff] }
 0x157   :  { %1432 = vrot.lane.b32.xlu1 %v260_v52, %s8697_s26  ;;  %v9502_v57 = vpop.permute.xlu0 %1194 }
 0x158   :  { %14566 = vst [vmem:[#allocation78_spill] sm:$0xff] %v9502_v57 }
 0x159   :  { %v9498_v50 = vpop.permute.xlu1 %1192  ;;  %1438 = vrot.lane.b32.xlu0 %v263_v43, %s8697_s26 }
 0x15a   :  { %14565 = vst [vmem:[#allocation77_spill] sm:$0xff] %v9498_v50  ;;  %v266_v50 = vld [vmem:[#allocation2 + $0x158] sm:$0xff] }
 0x15b   :  { %1436 = vrot.lane.b32.xlu1 %v262_v48, %s8697_s26  ;;  %v9508_v52 = vpop.permute.xlu0 %1198 }
 0x15c   :  { %14568 = vst [vmem:[#allocation80_spill] sm:$0xff] %v9508_v52  ;;  %v460_v52 = vld [vmem:[#allocation2 + $0x188] sm:$0xff] }
 0x15d   :  { %v9504_v13 = vpop.permute.xlu1 %1196  ;;  %1442 = vrot.lane.b32.xlu0 %v265_v35, %s8697_s26  ;;  %v271_v35 = vld [vmem:[#allocation2 + $0x1c8] sm:$0xff] }
 0x15e   :  { %14567 = vst [vmem:[#allocation79_spill] sm:$0xff] %v9504_v13  ;;  %v268_v13 = vld [vmem:[#allocation2 + $0x170] sm:$0xff] }
 0x15f   :  { %1440 = vrot.lane.b32.xlu1 %v264_v54, %s8697_s26  ;;  %v9514_v48 = vpop.permute.xlu0 %1202  ;;  %v459_v54 = vld [vmem:[#allocation2 + $0x180] sm:$0xff] }
 0x160   :  { %14570 = vst [vmem:[#allocation82_spill] sm:$0xff] %v9514_v48 }
 0x161   :  { %v9510_v5 = vpop.permute.xlu1 %1200  ;;  %1446 = vrot.lane.b32.xlu0 %v267_v47, %s8697_s26  ;;  %v273_v47 = vld [vmem:[#allocation2 + $0x1e0] sm:$0xff] }
 0x162   :  { %14569 = vst [vmem:[#allocation81_spill] sm:$0xff] %v9510_v5 }
 0x163   :  { %1444 = vrot.lane.b32.xlu1 %v266_v50, %s8697_s26  ;;  %v9520_v43 = vpop.permute.xlu0 %1206 }
 0x164   :  { %14572 = vst [vmem:[#allocation84_spill] sm:$0xff] %v9520_v43 }
 0x165   :  { %v9516_v57 = vpop.permute.xlu1 %1204  ;;  %1450 = vrot.lane.b32.xlu0 %v459_v54, %s8697_s26  ;;  %v275_v54 = vld [vmem:[#allocation2 + $0x1f8] sm:$0xff] }
 0x166   :  { %14571 = vst [vmem:[#allocation83_spill] sm:$0xff] %v9516_v57  ;;  %v272_v57 = vld [vmem:[#allocation2 + $0x1d0] sm:$0xff] }
 0x167   :  { %1448 = vrot.lane.b32.xlu1 %v268_v13, %s8697_s26  ;;  %v9526_v50 = vpop.permute.xlu0 %1210 }
 0x168   :  { %14574 = vst [vmem:[#allocation86_spill] sm:$0xff] %v9526_v50 }
 0x169   :  { %v9522_v5 = vpop.permute.xlu1 %1208  ;;  %1454 = vrot.lane.b32.xlu0 %v271_v35, %s8697_s26  ;;  %v277_v35 = vld [vmem:[#allocation2 + $0x210] sm:$0xff] }
 0x16a   :  { %14573 = vst [vmem:[#allocation85_spill] sm:$0xff] %v9522_v5  ;;  %v274_v5 = vld [vmem:[#allocation2 + $0x1e8] sm:$0xff] }
 0x16b   :  { %1452 = vrot.lane.b32.xlu1 %v460_v52, %s8697_s26  ;;  %v9532_v13 = vpop.permute.xlu0 %1214 }
 0x16c   :  { %14576 = vst [vmem:[#allocation88_spill] sm:$0xff] %v9532_v13 }
 0x16d   :  { %v9528_v48 = vpop.permute.xlu1 %1212  ;;  %1458 = vrot.lane.b32.xlu0 %v273_v47, %s8697_s26  ;;  %v279_v47 = vld [vmem:[#allocation2 + $0x228] sm:$0xff] }
 0x16e   :  { %14575 = vst [vmem:[#allocation87_spill] sm:$0xff] %v9528_v48  ;;  %v276_v48 = vld [vmem:[#allocation2 + $0x200] sm:$0xff] }
 0x16f   :  { %1456 = vrot.lane.b32.xlu1 %v272_v57, %s8697_s26  ;;  %v9538_v52 = vpop.permute.xlu0 %1218 }
 0x170   :  { %14578 = vst [vmem:[#allocation90_spill] sm:$0xff] %v9538_v52 }
 0x171   :  { %v9534_v43 = vpop.permute.xlu1 %1216  ;;  %1462 = vrot.lane.b32.xlu0 %v275_v54, %s8697_s26  ;;  %v281_v54 = vld [vmem:[#allocation2 + $0x240] sm:$0xff] }
 0x172   :  { %14577 = vst [vmem:[#allocation89_spill] sm:$0xff] %v9534_v43  ;;  %v278_v43 = vld [vmem:[#allocation2 + $0x218] sm:$0xff] }
 0x173   :  { %1460 = vrot.lane.b32.xlu1 %v274_v5, %s8697_s26  ;;  %v9544_v57 = vpop.permute.xlu0 %1222 }
 0x174   :  { %14580 = vst [vmem:[#allocation92_spill] sm:$0xff] %v9544_v57 }
 0x175   :  { %v9540_v50 = vpop.permute.xlu1 %1220  ;;  %1466 = vrot.lane.b32.xlu0 %v277_v35, %s8697_s26  ;;  %v283_v35 = vld [vmem:[#allocation2 + $0x258] sm:$0xff] }
 0x176   :  { %14579 = vst [vmem:[#allocation91_spill] sm:$0xff] %v9540_v50  ;;  %v280_v50 = vld [vmem:[#allocation2 + $0x230] sm:$0xff] }
 0x177   :  { %1464 = vrot.lane.b32.xlu1 %v276_v48, %s8697_s26  ;;  %v9550_v5 = vpop.permute.xlu0 %1226 }
 0x178   :  { %14582 = vst [vmem:[#allocation94_spill] sm:$0xff] %v9550_v5 }
 0x179   :  { %v9546_v13 = vpop.permute.xlu1 %1224  ;;  %1470 = vrot.lane.b32.xlu0 %v279_v47, %s8697_s26  ;;  %v285_v47 = vld [vmem:[#allocation2 + $0x270] sm:$0xff] }
 0x17a   :  { %14581 = vst [vmem:[#allocation93_spill] sm:$0xff] %v9546_v13  ;;  %v282_v13 = vld [vmem:[#allocation2 + $0x248] sm:$0xff] }
 0x17b   :  { %1468 = vrot.lane.b32.xlu1 %v278_v43, %s8697_s26  ;;  %v9556_v48 = vpop.permute.xlu0 %1230 }
 0x17c   :  { %14584 = vst [vmem:[#allocation96_spill] sm:$0xff] %v9556_v48 }
 0x17d   :  { %v9552_v52 = vpop.permute.xlu1 %1228  ;;  %1474 = vrot.lane.b32.xlu0 %v281_v54, %s8697_s26  ;;  %v287_v54 = vld [vmem:[#allocation2 + $0x288] sm:$0xff] }
 0x17e   :  { %14583 = vst [vmem:[#allocation95_spill] sm:$0xff] %v9552_v52  ;;  %v284_v52 = vld [vmem:[#allocation2 + $0x260] sm:$0xff] }
 0x17f   :  { %1472 = vrot.lane.b32.xlu1 %v280_v50, %s8697_s26  ;;  %v9562_v43 = vpop.permute.xlu0 %1234 }
 0x180   :  { %14586 = vst [vmem:[#allocation98_spill] sm:$0xff] %v9562_v43 }
 0x181   :  { %v9558_v57 = vpop.permute.xlu1 %1232  ;;  %1478 = vrot.lane.b32.xlu0 %v283_v35, %s8697_s26  ;;  %v289_v35 = vld [vmem:[#allocation2 + $0x2a0] sm:$0xff] }
 0x182   :  { %14585 = vst [vmem:[#allocation97_spill] sm:$0xff] %v9558_v57  ;;  %v286_v57 = vld [vmem:[#allocation2 + $0x278] sm:$0xff] }
 0x183   :  { %1476 = vrot.lane.b32.xlu1 %v282_v13, %s8697_s26  ;;  %v9568_v50 = vpop.permute.xlu0 %1238 }
 0x184   :  { %14588 = vst [vmem:[#allocation100_spill] sm:$0xff] %v9568_v50 }
 0x185   :  { %v9564_v5 = vpop.permute.xlu1 %1236  ;;  %1482 = vrot.lane.b32.xlu0 %v285_v47, %s8697_s26  ;;  %v291_v47 = vld [vmem:[#allocation2 + $0x2b8] sm:$0xff] }
 0x186   :  { %14587 = vst [vmem:[#allocation99_spill] sm:$0xff] %v9564_v5  ;;  %v288_v5 = vld [vmem:[#allocation2 + $0x290] sm:$0xff] }
 0x187   :  { %1480 = vrot.lane.b32.xlu1 %v284_v52, %s8697_s26  ;;  %v9574_v13 = vpop.permute.xlu0 %1242 }
 0x188   :  { %14590 = vst [vmem:[#allocation102_spill] sm:$0xff] %v9574_v13 }
 0x189   :  { %v9570_v48 = vpop.permute.xlu1 %1240  ;;  %1486 = vrot.lane.b32.xlu0 %v287_v54, %s8697_s26  ;;  %v293_v54 = vld [vmem:[#allocation2 + $0x2d0] sm:$0xff] }
 0x18a   :  { %14589 = vst [vmem:[#allocation101_spill] sm:$0xff] %v9570_v48  ;;  %v290_v48 = vld [vmem:[#allocation2 + $0x2a8] sm:$0xff] }
 0x18b   :  { %1484 = vrot.lane.b32.xlu1 %v286_v57, %s8697_s26  ;;  %v9580_v52 = vpop.permute.xlu0 %1246 }
 0x18c   :  { %14592 = vst [vmem:[#allocation104_spill] sm:$0xff] %v9580_v52 }
 0x18d   :  { %v9576_v43 = vpop.permute.xlu1 %1244  ;;  %1490 = vrot.lane.b32.xlu0 %v289_v35, %s8697_s26  ;;  %v295_v35 = vld [vmem:[#allocation2 + $0x2e8] sm:$0xff] }
 0x18e   :  { %14591 = vst [vmem:[#allocation103_spill] sm:$0xff] %v9576_v43  ;;  %v292_v43 = vld [vmem:[#allocation2 + $0x2c0] sm:$0xff] }
 0x18f   :  { %1488 = vrot.lane.b32.xlu1 %v288_v5, %s8697_s26  ;;  %v9586_v57 = vpop.permute.xlu0 %1250 }
 0x190   :  { %14594 = vst [vmem:[#allocation106_spill] sm:$0xff] %v9586_v57 }
 0x191   :  { %v9582_v50 = vpop.permute.xlu1 %1248  ;;  %1494 = vrot.lane.b32.xlu0 %v291_v47, %s8697_s26  ;;  %v297_v47 = vld [vmem:[#allocation2 + $0x300] sm:$0xff] }
 0x192   :  { %14593 = vst [vmem:[#allocation105_spill] sm:$0xff] %v9582_v50  ;;  %v294_v50 = vld [vmem:[#allocation2 + $0x2d8] sm:$0xff] }
 0x193   :  { %1492 = vrot.lane.b32.xlu1 %v290_v48, %s8697_s26  ;;  %v9592_v5 = vpop.permute.xlu0 %1254 }
 0x194   :  { %14596 = vst [vmem:[#allocation108_spill] sm:$0xff] %v9592_v5 }
 0x195   :  { %v9588_v13 = vpop.permute.xlu1 %1252  ;;  %1498 = vrot.lane.b32.xlu0 %v293_v54, %s8697_s26  ;;  %v299_v54 = vld [vmem:[#allocation2 + $0x318] sm:$0xff] }
 0x196   :  { %14595 = vst [vmem:[#allocation107_spill] sm:$0xff] %v9588_v13  ;;  %v296_v13 = vld [vmem:[#allocation2 + $0x2f0] sm:$0xff] }
 0x197   :  { %1496 = vrot.lane.b32.xlu1 %v292_v43, %s8697_s26  ;;  %v9598_v48 = vpop.permute.xlu0 %1258 }
 0x198   :  { %14598 = vst [vmem:[#allocation110_spill] sm:$0xff] %v9598_v48 }
 0x199   :  { %v9594_v52 = vpop.permute.xlu1 %1256  ;;  %1502 = vrot.lane.b32.xlu0 %v295_v35, %s8697_s26 }
 0x19a   :  { %14597 = vst [vmem:[#allocation109_spill] sm:$0xff] %v9594_v52  ;;  %v298_v52 = vld [vmem:[#allocation2 + $0x308] sm:$0xff] }
 0x19b   :  { %1500 = vrot.lane.b32.xlu1 %v294_v50, %s8697_s26  ;;  %v9604_v43 = vpop.permute.xlu0 %1390 }
 0x19d   :  { %v9600_v57 = vpop.permute.xlu1 %1260  ;;  %1506 = vrot.lane.b32.xlu0 %v297_v47, %s8697_s26 }
 0x19e   :  { %14599 = vst [vmem:[#allocation111_spill] sm:$0xff] %v9600_v57  ;;  %v300_v57 = vld [vmem:[#allocation2 + $0x320] sm:$0xff] }
 0x19f   :  { %1504 = vrot.lane.b32.xlu1 %v296_v13, %s8697_s26  ;;  %v9610_v50 = vpop.permute.xlu0 %1394  ;;  %v491_v13 = vld [vmem:[#allocation2 + $0x330] sm:$0xff] }
 0x1a1   :  { %v9606_v5 = vpop.permute.xlu1 %1392  ;;  %1510 = vrot.lane.b32.xlu0 %v299_v54, %s8697_s26 }
 0x1a3   :  { %1508 = vrot.lane.b32.xlu1 %v298_v52, %s8697_s26  ;;  %v9616_v35 = vpop.permute.xlu0 %1398  ;;  %v493_v52 = vld [vmem:[#allocation2 + $0x19] sm:$0xff] }
 0x1a5   :  { %v9612_v48 = vpop.permute.xlu1 %1396  ;;  %1514 = vrot.lane.b32.xlu0 %v491_v13, %s8697_s26 }
 0x1a7   :  { %1512 = vrot.lane.b32.xlu1 %v300_v57, %s8697_s26  ;;  %v9622_v47 = vpop.permute.xlu0 %1402  ;;  %v495_v57 = vld [vmem:[#allocation2 + $0x31] sm:$0xff] }
 0x1a9   :  { %v9618_v61 = vpop.permute.xlu1 %1400  ;;  %1646 = vrot.lane.b32.xlu0 %v493_v52, %s8698_s27 }
 0x1ab   :  { %1516 = vrot.lane.b32.xlu1 %v492_v46, %s8697_s26  ;;  %v9628_v54 = vpop.permute.xlu0 %1406  ;;  %v497_v46 = vld [vmem:[#allocation2 + $0x49] sm:$0xff] }
 0x1ac   :  { %14600 = vst [vmem:[#allocation112_spill] sm:$0xff] %v9628_v54  ;;  %v749_v54 = vld [vmem:[#allocation2 + $0x351] sm:$0xff] }
 0x1ad   :  { %v9624_v44 = vpop.permute.xlu1 %1404  ;;  %1650 = vrot.lane.b32.xlu0 %v495_v57, %s8698_s27 }
 0x1af   :  { %1648 = vrot.lane.b32.xlu1 %v494_v21, %s8698_s27  ;;  %v9634_v13 = vpop.permute.xlu0 %1410  ;;  %v499_v21 = vld [vmem:[#allocation2 + $0x61] sm:$0xff] }
 0x1b0   :  { %14602 = vst [vmem:[#allocation114_spill] sm:$0xff] %v9634_v13  ;;  %v629_v13 = vld [vmem:[#allocation2 + $0x80] sm:$0xff] }
 0x1b1   :  { %v9630_v9 = vpop.permute.xlu1 %1408  ;;  %1654 = vrot.lane.b32.xlu0 %v497_v46, %s8698_s27 }
 0x1b2   :  { %14601 = vst [vmem:[#allocation113_spill] sm:$0xff] %v9630_v9 }
 0x1b3   :  { %1652 = vrot.lane.b32.xlu1 %v496_v42, %s8698_s27  ;;  %v9640_v52 = vpop.permute.xlu0 %1414  ;;  %v501_v42 = vld [vmem:[#allocation2 + $0x79] sm:$0xff] }
 0x1b4   :  { %14604 = vst [vmem:[#allocation116_spill] sm:$0xff] %v9640_v52 }
 0x1b5   :  { %v9636_v40 = vpop.permute.xlu1 %1412  ;;  %1658 = vrot.lane.b32.xlu0 %v499_v21, %s8698_s27 }
 0x1b6   :  { %14603 = vst [vmem:[#allocation115_spill] sm:$0xff] %v9636_v40 }
 0x1b7   :  { %1656 = vrot.lane.b32.xlu1 %v498_v29, %s8698_s27  ;;  %v9646_v57 = vpop.permute.xlu0 %1418  ;;  %v503_v29 = vld [vmem:[#allocation2 + $0x91] sm:$0xff] }
 0x1b8   :  { %14606 = vst [vmem:[#allocation118_spill] sm:$0xff] %v9646_v57  ;;  %v562_v57 = vld [vmem:[#allocation2 + $0x52] sm:$0xff] }
 0x1b9   :  { %v9642_v17 = vpop.permute.xlu1 %1416  ;;  %1662 = vrot.lane.b32.xlu0 %v501_v42, %s8698_s27 }
 0x1ba   :  { %14605 = vst [vmem:[#allocation117_spill] sm:$0xff] %v9642_v17 }
 0x1bb   :  { %1660 = vrot.lane.b32.xlu1 %v500_v38, %s8698_s27  ;;  %v9652_v46 = vpop.permute.xlu0 %1422  ;;  %v505_v38 = vld [vmem:[#allocation2 + $0xa9] sm:$0xff] }
 0x1bc   :  { %14608 = vst [vmem:[#allocation120_spill] sm:$0xff] %v9652_v46 }
 0x1bd   :  { %v9648_v36 = vpop.permute.xlu1 %1420  ;;  %1666 = vrot.lane.b32.xlu0 %v503_v29, %s8698_s27 }
 0x1be   :  { %14607 = vst [vmem:[#allocation119_spill] sm:$0xff] %v9648_v36 }
 0x1bf   :  { %1664 = vrot.lane.b32.xlu1 %v502_v37, %s8698_s27  ;;  %v9658_v21 = vpop.permute.xlu0 %1426  ;;  %v507_v37 = vld [vmem:[#allocation2 + $0xc1] sm:$0xff] }
 0x1c0   :  { %14610 = vst [vmem:[#allocation122_spill] sm:$0xff] %v9658_v21  ;;  %v510_v21 = vld [vmem:[#allocation2 + $0xe1] sm:$0xff] }
 0x1c1   :  { %v9654_v25 = vpop.permute.xlu1 %1424  ;;  %1670 = vrot.lane.b32.xlu0 %v505_v38, %s8698_s27 }
 0x1c2   :  { %14609 = vst [vmem:[#allocation121_spill] sm:$0xff] %v9654_v25 }
 0x1c3   :  { %1668 = vrot.lane.b32.xlu1 %v504_v34, %s8698_s27  ;;  %v9664_v42 = vpop.permute.xlu0 %1430  ;;  %v509_v34 = vld [vmem:[#allocation2 + $0xd9] sm:$0xff] }
 0x1c4   :  { %14612 = vst [vmem:[#allocation124_spill] sm:$0xff] %v9664_v42  ;;  %v512_v42 = vld [vmem:[#allocation2 + $0xf9] sm:$0xff] }
 0x1c5   :  { %v9660_v32 = vpop.permute.xlu1 %1428  ;;  %1674 = vrot.lane.b32.xlu0 %v507_v37, %s8698_s27 }
 0x1c6   :  { %14611 = vst [vmem:[#allocation123_spill] sm:$0xff] %v9660_v32 }
 0x1c7   :  { %1672 = vrot.lane.b32.xlu1 %v506_v45, %s8698_s27  ;;  %v9670_v29 = vpop.permute.xlu0 %1434  ;;  %v511_v45 = vld [vmem:[#allocation2 + $0xf1] sm:$0xff] }
 0x1c8   :  { %14614 = vst [vmem:[#allocation126_spill] sm:$0xff] %v9670_v29  ;;  %v514_v29 = vld [vmem:[#allocation2 + $0x111] sm:$0xff] }
 0x1c9   :  { %v9666_v46 = vpop.permute.xlu1 %1432  ;;  %1678 = vrot.lane.b32.xlu0 %v509_v34, %s8698_s27 }
 0x1ca   :  { %14613 = vst [vmem:[#allocation125_spill] sm:$0xff] %v9666_v46 }
 0x1cb   :  { %1676 = vrot.lane.b32.xlu1 %v508_v30, %s8698_s27  ;;  %v9676_v38 = vpop.permute.xlu0 %1438  ;;  %v513_v30 = vld [vmem:[#allocation2 + $0x109] sm:$0xff] }
 0x1cc   :  { %14616 = vst [vmem:[#allocation128_spill] sm:$0xff] %v9676_v38  ;;  %v516_v38 = vld [vmem:[#allocation2 + $0x129] sm:$0xff] }
 0x1cd   :  { %v9672_v25 = vpop.permute.xlu1 %1436  ;;  %1682 = vrot.lane.b32.xlu0 %v511_v45, %s8698_s27 }
 0x1ce   :  { %14615 = vst [vmem:[#allocation127_spill] sm:$0xff] %v9672_v25 }
 0x1cf   :  { %1680 = vrot.lane.b32.xlu1 %v510_v21, %s8698_s27  ;;  %v9682_v37 = vpop.permute.xlu0 %1442  ;;  %v515_v21 = vld [vmem:[#allocation2 + $0x121] sm:$0xff] }
 0x1d0   :  { %14618 = vst [vmem:[#allocation130_spill] sm:$0xff] %v9682_v37  ;;  %v518_v37 = vld [vmem:[#allocation2 + $0x141] sm:$0xff] }
 0x1d1   :  { %v9678_v32 = vpop.permute.xlu1 %1440  ;;  %1686 = vrot.lane.b32.xlu0 %v513_v30, %s8698_s27 }
 0x1d2   :  { %14617 = vst [vmem:[#allocation129_spill] sm:$0xff] %v9678_v32 }
 0x1d3   :  { %1684 = vrot.lane.b32.xlu1 %v512_v42, %s8698_s27  ;;  %v9688_v34 = vpop.permute.xlu0 %1446  ;;  %v517_v42 = vld [vmem:[#allocation2 + $0x139] sm:$0xff] }
 0x1d4   :  { %14620 = vst [vmem:[#allocation132_spill] sm:$0xff] %v9688_v34  ;;  %v520_v34 = vld [vmem:[#allocation2 + $0x159] sm:$0xff] }
 0x1d5   :  { %v9684_v46 = vpop.permute.xlu1 %1444  ;;  %1690 = vrot.lane.b32.xlu0 %v515_v21, %s8698_s27 }
 0x1d6   :  { %14619 = vst [vmem:[#allocation131_spill] sm:$0xff] %v9684_v46 }
 0x1d7   :  { %1688 = vrot.lane.b32.xlu1 %v514_v29, %s8698_s27  ;;  %v9694_v45 = vpop.permute.xlu0 %1450  ;;  %v519_v29 = vld [vmem:[#allocation2 + $0x151] sm:$0xff] }
 0x1d8   :  { %14622 = vst [vmem:[#allocation134_spill] sm:$0xff] %v9694_v45  ;;  %v522_v45 = vld [vmem:[#allocation2 + $0x171] sm:$0xff] }
 0x1d9   :  { %v9690_v25 = vpop.permute.xlu1 %1448  ;;  %1694 = vrot.lane.b32.xlu0 %v517_v42, %s8698_s27 }
 0x1da   :  { %14621 = vst [vmem:[#allocation133_spill] sm:$0xff] %v9690_v25 }
 0x1db   :  { %1692 = vrot.lane.b32.xlu1 %v516_v38, %s8698_s27  ;;  %v9700_v30 = vpop.permute.xlu0 %1454  ;;  %v521_v38 = vld [vmem:[#allocation2 + $0x169] sm:$0xff] }
 0x1dc   :  { %14624 = vst [vmem:[#allocation136_spill] sm:$0xff] %v9700_v30  ;;  %v524_v30 = vld [vmem:[#allocation2 + $0x189] sm:$0xff] }
 0x1dd   :  { %v9696_v32 = vpop.permute.xlu1 %1452  ;;  %1698 = vrot.lane.b32.xlu0 %v519_v29, %s8698_s27 }
 0x1de   :  { %14623 = vst [vmem:[#allocation135_spill] sm:$0xff] %v9696_v32 }
 0x1df   :  { %1696 = vrot.lane.b32.xlu1 %v518_v37, %s8698_s27  ;;  %v9706_v21 = vpop.permute.xlu0 %1458  ;;  %v523_v37 = vld [vmem:[#allocation2 + $0x181] sm:$0xff] }
 0x1e0   :  { %14626 = vst [vmem:[#allocation138_spill] sm:$0xff] %v9706_v21  ;;  %v526_v21 = vld [vmem:[#allocation2 + $0x1d1] sm:$0xff] }
 0x1e1   :  { %v9702_v46 = vpop.permute.xlu1 %1456  ;;  %1702 = vrot.lane.b32.xlu0 %v521_v38, %s8698_s27 }
 0x1e2   :  { %14625 = vst [vmem:[#allocation137_spill] sm:$0xff] %v9702_v46 }
 0x1e3   :  { %1700 = vrot.lane.b32.xlu1 %v520_v34, %s8698_s27  ;;  %v9712_v42 = vpop.permute.xlu0 %1462  ;;  %v525_v34 = vld [vmem:[#allocation2 + $0x1c9] sm:$0xff] }
 0x1e4   :  { %14628 = vst [vmem:[#allocation140_spill] sm:$0xff] %v9712_v42  ;;  %v528_v42 = vld [vmem:[#allocation2 + $0x1e9] sm:$0xff] }
 0x1e5   :  { %v9708_v25 = vpop.permute.xlu1 %1460  ;;  %1706 = vrot.lane.b32.xlu0 %v523_v37, %s8698_s27 }
 0x1e6   :  { %14627 = vst [vmem:[#allocation139_spill] sm:$0xff] %v9708_v25 }
 0x1e7   :  { %1704 = vrot.lane.b32.xlu1 %v522_v45, %s8698_s27  ;;  %v9718_v29 = vpop.permute.xlu0 %1466  ;;  %v527_v45 = vld [vmem:[#allocation2 + $0x1e1] sm:$0xff] }
 0x1e8   :  { %14630 = vst [vmem:[#allocation142_spill] sm:$0xff] %v9718_v29  ;;  %v530_v29 = vld [vmem:[#allocation2 + $0x201] sm:$0xff] }
 0x1e9   :  { %v9714_v32 = vpop.permute.xlu1 %1464  ;;  %1710 = vrot.lane.b32.xlu0 %v525_v34, %s8698_s27 }
 0x1ea   :  { %14629 = vst [vmem:[#allocation141_spill] sm:$0xff] %v9714_v32 }
 0x1eb   :  { %1708 = vrot.lane.b32.xlu1 %v524_v30, %s8698_s27  ;;  %v9724_v38 = vpop.permute.xlu0 %1470  ;;  %v529_v30 = vld [vmem:[#allocation2 + $0x1f9] sm:$0xff] }
 0x1ec   :  { %14632 = vst [vmem:[#allocation144_spill] sm:$0xff] %v9724_v38  ;;  %v532_v38 = vld [vmem:[#allocation2 + $0x219] sm:$0xff] }
 0x1ed   :  { %v9720_v46 = vpop.permute.xlu1 %1468  ;;  %1714 = vrot.lane.b32.xlu0 %v527_v45, %s8698_s27 }
 0x1ee   :  { %14631 = vst [vmem:[#allocation143_spill] sm:$0xff] %v9720_v46 }
 0x1ef   :  { %1712 = vrot.lane.b32.xlu1 %v526_v21, %s8698_s27  ;;  %v9730_v37 = vpop.permute.xlu0 %1474  ;;  %v531_v21 = vld [vmem:[#allocation2 + $0x211] sm:$0xff] }
 0x1f0   :  { %14634 = vst [vmem:[#allocation146_spill] sm:$0xff] %v9730_v37  ;;  %v534_v37 = vld [vmem:[#allocation2 + $0x231] sm:$0xff] }
 0x1f1   :  { %v9726_v25 = vpop.permute.xlu1 %1472  ;;  %1718 = vrot.lane.b32.xlu0 %v529_v30, %s8698_s27 }
 0x1f2   :  { %14633 = vst [vmem:[#allocation145_spill] sm:$0xff] %v9726_v25 }
 0x1f3   :  { %1716 = vrot.lane.b32.xlu1 %v528_v42, %s8698_s27  ;;  %v9736_v34 = vpop.permute.xlu0 %1478  ;;  %v533_v42 = vld [vmem:[#allocation2 + $0x229] sm:$0xff] }
 0x1f4   :  { %14636 = vst [vmem:[#allocation148_spill] sm:$0xff] %v9736_v34  ;;  %v536_v34 = vld [vmem:[#allocation2 + $0x249] sm:$0xff] }
 0x1f5   :  { %v9732_v32 = vpop.permute.xlu1 %1476  ;;  %1722 = vrot.lane.b32.xlu0 %v531_v21, %s8698_s27 }
 0x1f6   :  { %14635 = vst [vmem:[#allocation147_spill] sm:$0xff] %v9732_v32 }
 0x1f7   :  { %1720 = vrot.lane.b32.xlu1 %v530_v29, %s8698_s27  ;;  %v9742_v45 = vpop.permute.xlu0 %1482  ;;  %v535_v29 = vld [vmem:[#allocation2 + $0x241] sm:$0xff] }
 0x1f8   :  { %14638 = vst [vmem:[#allocation150_spill] sm:$0xff] %v9742_v45  ;;  %v538_v45 = vld [vmem:[#allocation2 + $0x261] sm:$0xff] }
 0x1f9   :  { %v9738_v46 = vpop.permute.xlu1 %1480  ;;  %1726 = vrot.lane.b32.xlu0 %v533_v42, %s8698_s27 }
 0x1fa   :  { %14637 = vst [vmem:[#allocation149_spill] sm:$0xff] %v9738_v46 }
 0x1fb   :  { %1724 = vrot.lane.b32.xlu1 %v532_v38, %s8698_s27  ;;  %v9748_v30 = vpop.permute.xlu0 %1486  ;;  %v537_v38 = vld [vmem:[#allocation2 + $0x259] sm:$0xff] }
 0x1fc   :  { %14640 = vst [vmem:[#allocation152_spill] sm:$0xff] %v9748_v30  ;;  %v540_v30 = vld [vmem:[#allocation2 + $0x279] sm:$0xff] }
 0x1fd   :  { %v9744_v25 = vpop.permute.xlu1 %1484  ;;  %1730 = vrot.lane.b32.xlu0 %v535_v29, %s8698_s27 }
 0x1fe   :  { %14639 = vst [vmem:[#allocation151_spill] sm:$0xff] %v9744_v25 }
 0x1ff   :  { %1728 = vrot.lane.b32.xlu1 %v534_v37, %s8698_s27  ;;  %v9754_v21 = vpop.permute.xlu0 %1490  ;;  %v539_v37 = vld [vmem:[#allocation2 + $0x271] sm:$0xff] }
 0x200   :  { %14642 = vst [vmem:[#allocation154_spill] sm:$0xff] %v9754_v21  ;;  %v542_v21 = vld [vmem:[#allocation2 + $0x291] sm:$0xff] }
 0x201   :  { %v9750_v32 = vpop.permute.xlu1 %1488  ;;  %1734 = vrot.lane.b32.xlu0 %v537_v38, %s8698_s27 }
 0x202   :  { %14641 = vst [vmem:[#allocation153_spill] sm:$0xff] %v9750_v32 }
 0x203   :  { %1732 = vrot.lane.b32.xlu1 %v536_v34, %s8698_s27  ;;  %v9760_v42 = vpop.permute.xlu0 %1494  ;;  %v541_v34 = vld [vmem:[#allocation2 + $0x289] sm:$0xff] }
 0x204   :  { %14644 = vst [vmem:[#allocation156_spill] sm:$0xff] %v9760_v42  ;;  %v544_v42 = vld [vmem:[#allocation2 + $0x2a9] sm:$0xff] }
 0x205   :  { %v9756_v46 = vpop.permute.xlu1 %1492  ;;  %1738 = vrot.lane.b32.xlu0 %v539_v37, %s8698_s27 }
 0x206   :  { %14643 = vst [vmem:[#allocation155_spill] sm:$0xff] %v9756_v46 }
 0x207   :  { %1736 = vrot.lane.b32.xlu1 %v538_v45, %s8698_s27  ;;  %v9766_v29 = vpop.permute.xlu0 %1498  ;;  %v543_v45 = vld [vmem:[#allocation2 + $0x2a1] sm:$0xff] }
 0x208   :  { %14646 = vst [vmem:[#allocation158_spill] sm:$0xff] %v9766_v29  ;;  %v546_v29 = vld [vmem:[#allocation2 + $0x2c1] sm:$0xff] }
 0x209   :  { %v9762_v25 = vpop.permute.xlu1 %1496  ;;  %1742 = vrot.lane.b32.xlu0 %v541_v34, %s8698_s27 }
 0x20a   :  { %14645 = vst [vmem:[#allocation157_spill] sm:$0xff] %v9762_v25 }
 0x20b   :  { %1740 = vrot.lane.b32.xlu1 %v540_v30, %s8698_s27  ;;  %v9772_v38 = vpop.permute.xlu0 %1502  ;;  %v545_v30 = vld [vmem:[#allocation2 + $0x2b9] sm:$0xff] }
 0x20c   :  { %14648 = vst [vmem:[#allocation160_spill] sm:$0xff] %v9772_v38  ;;  %v548_v38 = vld [vmem:[#allocation2 + $0x2d9] sm:$0xff] }
 0x20d   :  { %v9768_v32 = vpop.permute.xlu1 %1500  ;;  %1746 = vrot.lane.b32.xlu0 %v543_v45, %s8698_s27 }
 0x20e   :  { %14647 = vst [vmem:[#allocation159_spill] sm:$0xff] %v9768_v32 }
 0x20f   :  { %1744 = vrot.lane.b32.xlu1 %v542_v21, %s8698_s27  ;;  %v9778_v37 = vpop.permute.xlu0 %1506  ;;  %v547_v21 = vld [vmem:[#allocation2 + $0x2d1] sm:$0xff] }
 0x210   :  { %14650 = vst [vmem:[#allocation162_spill] sm:$0xff] %v9778_v37  ;;  %v550_v37 = vld [vmem:[#allocation2 + $0x2f1] sm:$0xff] }
 0x211   :  { %v9774_v46 = vpop.permute.xlu1 %1504  ;;  %1750 = vrot.lane.b32.xlu0 %v545_v30, %s8698_s27 }
 0x212   :  { %14649 = vst [vmem:[#allocation161_spill] sm:$0xff] %v9774_v46 }
 0x213   :  { %1748 = vrot.lane.b32.xlu1 %v544_v42, %s8698_s27  ;;  %v9784_v34 = vpop.permute.xlu0 %1510  ;;  %v549_v42 = vld [vmem:[#allocation2 + $0x2e9] sm:$0xff] }
 0x214   :  { %14652 = vst [vmem:[#allocation164_spill] sm:$0xff] %v9784_v34  ;;  %v552_v34 = vld [vmem:[#allocation2 + $0x309] sm:$0xff] }
 0x215   :  { %v9780_v25 = vpop.permute.xlu1 %1508  ;;  %1754 = vrot.lane.b32.xlu0 %v547_v21, %s8698_s27 }
 0x216   :  { %14651 = vst [vmem:[#allocation163_spill] sm:$0xff] %v9780_v25 }
 0x217   :  { %1752 = vrot.lane.b32.xlu1 %v546_v29, %s8698_s27  ;;  %v9790_v45 = vpop.permute.xlu0 %1514  ;;  %v551_v29 = vld [vmem:[#allocation2 + $0x301] sm:$0xff] }
 0x218   :  { %14654 = vst [vmem:[#allocation166_spill] sm:$0xff] %v9790_v45  ;;  %v554_v45 = vld [vmem:[#allocation2 + $0x321] sm:$0xff] }
 0x219   :  { %v9786_v32 = vpop.permute.xlu1 %1512  ;;  %1758 = vrot.lane.b32.xlu0 %v549_v42, %s8698_s27 }
 0x21a   :  { %14653 = vst [vmem:[#allocation165_spill] sm:$0xff] %v9786_v32 }
 0x21b   :  { %1756 = vrot.lane.b32.xlu1 %v548_v38, %s8698_s27  ;;  %v9796_v30 = vpop.permute.xlu0 %1646  ;;  %v553_v38 = vld [vmem:[#allocation2 + $0x319] sm:$0xff] }
 0x21d   :  { %v9792_v46 = vpop.permute.xlu1 %1516  ;;  %1762 = vrot.lane.b32.xlu0 %v551_v29, %s8698_s27 }
 0x21e   :  { %14655 = vst [vmem:[#allocation167_spill] sm:$0xff] %v9792_v46  ;;  %v556_v46 = vld [vmem:[#allocation2 + $0x339] sm:$0xff] }
 0x21f   :  { %1760 = vrot.lane.b32.xlu1 %v550_v37, %s8698_s27  ;;  %v9802_v21 = vpop.permute.xlu0 %1650  ;;  %v555_v37 = vld [vmem:[#allocation2 + $0x331] sm:$0xff] }
 0x221   :  { %v9798_v25 = vpop.permute.xlu1 %1648  ;;  %1766 = vrot.lane.b32.xlu0 %v553_v38, %s8698_s27 }
 0x223   :  { %1764 = vrot.lane.b32.xlu1 %v552_v34, %s8698_s27  ;;  %v9808_v42 = vpop.permute.xlu0 %1654  ;;  %v557_v34 = vld [vmem:[#allocation2 + $0x1a] sm:$0xff] }
 0x225   :  { %v9804_v32 = vpop.permute.xlu1 %1652  ;;  %1770 = vrot.lane.b32.xlu0 %v555_v37, %s8698_s27 }
 0x227   :  { %1768 = vrot.lane.b32.xlu1 %v554_v45, %s8698_s27  ;;  %v9814_v29 = vpop.permute.xlu0 %1658  ;;  %v559_v45 = vld [vmem:[#allocation2 + $0x32] sm:$0xff] }
 0x228   :  { %14656 = vst [vmem:[#allocation168_spill] sm:$0xff] %v9814_v29  ;;  %v8576_v29 = vld [vmem:[#allocation2 + $0x38] sm:$0xff] }
 0x229   :  { %v9810_v33 = vpop.permute.xlu1 %1656  ;;  %1902 = vrot.lane.b32.xlu0 %v557_v34, %s8699_s28 }
 0x22b   :  { %1772 = vrot.lane.b32.xlu1 %v556_v46, %s8698_s27  ;;  %v9820_v38 = vpop.permute.xlu0 %1662  ;;  %v561_v46 = vld [vmem:[#allocation2 + $0x4a] sm:$0xff] }
 0x22c   :  { %14658 = vst [vmem:[#allocation170_spill] sm:$0xff] %v9820_v38  ;;  %v691_v38 = vld [vmem:[#allocation2 + $0x69] sm:$0xff] }
 0x22d   :  { %v9816_v28 = vpop.permute.xlu1 %1660  ;;  %1906 = vrot.lane.b32.xlu0 %v559_v45, %s8699_s28 }
 0x22e   :  { %14657 = vst [vmem:[#allocation169_spill] sm:$0xff] %v9816_v28 }
 0x22f   :  { %1904 = vrot.lane.b32.xlu1 %v558_v53, %s8699_s28  ;;  %v9826_v37 = vpop.permute.xlu0 %1666  ;;  %v563_v53 = vld [vmem:[#allocation2 + $0x62] sm:$0xff] }
 0x230   :  { %14660 = vst [vmem:[#allocation172_spill] sm:$0xff] %v9826_v37  ;;  %v627_v37 = vld [vmem:[#allocation2 + $0x68] sm:$0xff] }
 0x231   :  { %v9822_v36 = vpop.permute.xlu1 %1664  ;;  %1910 = vrot.lane.b32.xlu0 %v561_v46, %s8699_s28 }
 0x232   :  { %14659 = vst [vmem:[#allocation171_spill] sm:$0xff] %v9822_v36  ;;  %v689_v36 = vld [vmem:[#allocation2 + $0x51] sm:$0xff] }
 0x233   :  { %1908 = vrot.lane.b32.xlu1 %v560_v26, %s8699_s28  ;;  %v9832_v34 = vpop.permute.xlu0 %1670  ;;  %v565_v26 = vld [vmem:[#allocation2 + $0x7a] sm:$0xff] }
 0x234   :  { %14662 = vst [vmem:[#allocation174_spill] sm:$0xff] %v9832_v34  ;;  %v568_v34 = vld [vmem:[#allocation2 + $0x9a] sm:$0xff] }
 0x235   :  { %v9828_v41 = vpop.permute.xlu1 %1668  ;;  %1914 = vrot.lane.b32.xlu0 %v563_v53, %s8699_s28 }
 0x236   :  { %14661 = vst [vmem:[#allocation173_spill] sm:$0xff] %v9828_v41  ;;  %v625_v41 = vld [vmem:[#allocation2 + $0x50] sm:$0xff] }
 0x237   :  { %1912 = vrot.lane.b32.xlu1 %v562_v57, %s8699_s28  ;;  %v9838_v45 = vpop.permute.xlu0 %1674  ;;  %v567_v57 = vld [vmem:[#allocation2 + $0x92] sm:$0xff] }
 0x238   :  { %14664 = vst [vmem:[#allocation176_spill] sm:$0xff] %v9838_v45  ;;  %v570_v45 = vld [vmem:[#allocation2 + $0xb2] sm:$0xff] }
 0x239   :  { %v9834_v24 = vpop.permute.xlu1 %1672  ;;  %1918 = vrot.lane.b32.xlu0 %v565_v26, %s8699_s28 }
 0x23a   :  { %14663 = vst [vmem:[#allocation175_spill] sm:$0xff] %v9834_v24 }
 0x23b   :  { %1916 = vrot.lane.b32.xlu1 %v564_v1, %s8699_s28  ;;  %v9844_v46 = vpop.permute.xlu0 %1678  ;;  %v569_v1 = vld [vmem:[#allocation2 + $0xaa] sm:$0xff] }
 0x23c   :  { %14666 = vst [vmem:[#allocation178_spill] sm:$0xff] %v9844_v46  ;;  %v572_v46 = vld [vmem:[#allocation2 + $0xca] sm:$0xff] }
 0x23d   :  { %v9840_v17 = vpop.permute.xlu1 %1676  ;;  %1922 = vrot.lane.b32.xlu0 %v567_v57, %s8699_s28 }
 0x23e   :  { %14665 = vst [vmem:[#allocation177_spill] sm:$0xff] %v9840_v17 }
 0x23f   :  { %1920 = vrot.lane.b32.xlu1 %v566_v22, %s8699_s28  ;;  %v9850_v53 = vpop.permute.xlu0 %1682  ;;  %v571_v22 = vld [vmem:[#allocation2 + $0xc2] sm:$0xff] }
 0x240   :  { %14668 = vst [vmem:[#allocation180_spill] sm:$0xff] %v9850_v53  ;;  %v574_v53 = vld [vmem:[#allocation2 + $0xe2] sm:$0xff] }
 0x241   :  { %v9846_v52 = vpop.permute.xlu1 %1680  ;;  %1926 = vrot.lane.b32.xlu0 %v569_v1, %s8699_s28 }
 0x242   :  { %14667 = vst [vmem:[#allocation179_spill] sm:$0xff] %v9846_v52 }
 0x243   :  { %1924 = vrot.lane.b32.xlu1 %v568_v34, %s8699_s28  ;;  %v9856_v26 = vpop.permute.xlu0 %1686  ;;  %v573_v34 = vld [vmem:[#allocation2 + $0xda] sm:$0xff] }
 0x244   :  { %14670 = vst [vmem:[#allocation182_spill] sm:$0xff] %v9856_v26  ;;  %v576_v26 = vld [vmem:[#allocation2 + $0xfa] sm:$0xff] }
 0x245   :  { %v9852_v24 = vpop.permute.xlu1 %1684  ;;  %1930 = vrot.lane.b32.xlu0 %v571_v22, %s8699_s28 }
 0x246   :  { %14669 = vst [vmem:[#allocation181_spill] sm:$0xff] %v9852_v24 }
 0x247   :  { %1928 = vrot.lane.b32.xlu1 %v570_v45, %s8699_s28  ;;  %v9862_v57 = vpop.permute.xlu0 %1690  ;;  %v575_v45 = vld [vmem:[#allocation2 + $0xf2] sm:$0xff] }
 0x248   :  { %14672 = vst [vmem:[#allocation184_spill] sm:$0xff] %v9862_v57  ;;  %v578_v57 = vld [vmem:[#allocation2 + $0x112] sm:$0xff] }
 0x249   :  { %v9858_v17 = vpop.permute.xlu1 %1688  ;;  %1934 = vrot.lane.b32.xlu0 %v573_v34, %s8699_s28 }
 0x24a   :  { %14671 = vst [vmem:[#allocation183_spill] sm:$0xff] %v9858_v17 }
 0x24b   :  { %1932 = vrot.lane.b32.xlu1 %v572_v46, %s8699_s28  ;;  %v9868_v1 = vpop.permute.xlu0 %1694  ;;  %v577_v46 = vld [vmem:[#allocation2 + $0x10a] sm:$0xff] }
 0x24c   :  { %14674 = vst [vmem:[#allocation186_spill] sm:$0xff] %v9868_v1  ;;  %v580_v1 = vld [vmem:[#allocation2 + $0x12a] sm:$0xff] }
 0x24d   :  { %v9864_v52 = vpop.permute.xlu1 %1692  ;;  %1938 = vrot.lane.b32.xlu0 %v575_v45, %s8699_s28 }
 0x24e   :  { %14673 = vst [vmem:[#allocation185_spill] sm:$0xff] %v9864_v52 }
 0x24f   :  { %1936 = vrot.lane.b32.xlu1 %v574_v53, %s8699_s28  ;;  %v9874_v22 = vpop.permute.xlu0 %1698  ;;  %v579_v53 = vld [vmem:[#allocation2 + $0x122] sm:$0xff] }
 0x250   :  { %14676 = vst [vmem:[#allocation188_spill] sm:$0xff] %v9874_v22  ;;  %v582_v22 = vld [vmem:[#allocation2 + $0x142] sm:$0xff] }
 0x251   :  { %v9870_v24 = vpop.permute.xlu1 %1696  ;;  %1942 = vrot.lane.b32.xlu0 %v577_v46, %s8699_s28 }
 0x252   :  { %14675 = vst [vmem:[#allocation187_spill] sm:$0xff] %v9870_v24 }
 0x253   :  { %1940 = vrot.lane.b32.xlu1 %v576_v26, %s8699_s28  ;;  %v9880_v34 = vpop.permute.xlu0 %1702  ;;  %v581_v26 = vld [vmem:[#allocation2 + $0x13a] sm:$0xff] }
 0x254   :  { %14678 = vst [vmem:[#allocation190_spill] sm:$0xff] %v9880_v34  ;;  %v584_v34 = vld [vmem:[#allocation2 + $0x15a] sm:$0xff] }
 0x255   :  { %v9876_v17 = vpop.permute.xlu1 %1700  ;;  %1946 = vrot.lane.b32.xlu0 %v579_v53, %s8699_s28 }
 0x256   :  { %14677 = vst [vmem:[#allocation189_spill] sm:$0xff] %v9876_v17 }
 0x257   :  { %1944 = vrot.lane.b32.xlu1 %v578_v57, %s8699_s28  ;;  %v9886_v45 = vpop.permute.xlu0 %1706  ;;  %v583_v57 = vld [vmem:[#allocation2 + $0x152] sm:$0xff] }
 0x258   :  { %14680 = vst [vmem:[#allocation192_spill] sm:$0xff] %v9886_v45  ;;  %v586_v45 = vld [vmem:[#allocation2 + $0x172] sm:$0xff] }
 0x259   :  { %v9882_v52 = vpop.permute.xlu1 %1704  ;;  %1950 = vrot.lane.b32.xlu0 %v581_v26, %s8699_s28 }
 0x25a   :  { %14679 = vst [vmem:[#allocation191_spill] sm:$0xff] %v9882_v52 }
 0x25b   :  { %1948 = vrot.lane.b32.xlu1 %v580_v1, %s8699_s28  ;;  %v9892_v46 = vpop.permute.xlu0 %1710  ;;  %v585_v1 = vld [vmem:[#allocation2 + $0x16a] sm:$0xff] }
 0x25c   :  { %14682 = vst [vmem:[#allocation194_spill] sm:$0xff] %v9892_v46  ;;  %v588_v46 = vld [vmem:[#allocation2 + $0x18a] sm:$0xff] }
 0x25d   :  { %v9888_v24 = vpop.permute.xlu1 %1708  ;;  %1954 = vrot.lane.b32.xlu0 %v583_v57, %s8699_s28 }
 0x25e   :  { %14681 = vst [vmem:[#allocation193_spill] sm:$0xff] %v9888_v24 }
 0x25f   :  { %1952 = vrot.lane.b32.xlu1 %v582_v22, %s8699_s28  ;;  %v9898_v53 = vpop.permute.xlu0 %1714  ;;  %v587_v22 = vld [vmem:[#allocation2 + $0x182] sm:$0xff] }
 0x260   :  { %14684 = vst [vmem:[#allocation196_spill] sm:$0xff] %v9898_v53  ;;  %v590_v53 = vld [vmem:[#allocation2 + $0x1d2] sm:$0xff] }
 0x261   :  { %v9894_v17 = vpop.permute.xlu1 %1712  ;;  %1958 = vrot.lane.b32.xlu0 %v585_v1, %s8699_s28 }
 0x262   :  { %14683 = vst [vmem:[#allocation195_spill] sm:$0xff] %v9894_v17 }
 0x263   :  { %1956 = vrot.lane.b32.xlu1 %v584_v34, %s8699_s28  ;;  %v9904_v26 = vpop.permute.xlu0 %1718  ;;  %v589_v34 = vld [vmem:[#allocation2 + $0x1ca] sm:$0xff] }
 0x264   :  { %14686 = vst [vmem:[#allocation198_spill] sm:$0xff] %v9904_v26  ;;  %v592_v26 = vld [vmem:[#allocation2 + $0x1ea] sm:$0xff] }
 0x265   :  { %v9900_v52 = vpop.permute.xlu1 %1716  ;;  %1962 = vrot.lane.b32.xlu0 %v587_v22, %s8699_s28 }
 0x266   :  { %14685 = vst [vmem:[#allocation197_spill] sm:$0xff] %v9900_v52 }
 0x267   :  { %1960 = vrot.lane.b32.xlu1 %v586_v45, %s8699_s28  ;;  %v9910_v57 = vpop.permute.xlu0 %1722  ;;  %v591_v45 = vld [vmem:[#allocation2 + $0x1e2] sm:$0xff] }
 0x268   :  { %14688 = vst [vmem:[#allocation200_spill] sm:$0xff] %v9910_v57  ;;  %v594_v57 = vld [vmem:[#allocation2 + $0x202] sm:$0xff] }
 0x269   :  { %v9906_v24 = vpop.permute.xlu1 %1720  ;;  %1966 = vrot.lane.b32.xlu0 %v589_v34, %s8699_s28 }
 0x26a   :  { %14687 = vst [vmem:[#allocation199_spill] sm:$0xff] %v9906_v24 }
 0x26b   :  { %1964 = vrot.lane.b32.xlu1 %v588_v46, %s8699_s28  ;;  %v9916_v1 = vpop.permute.xlu0 %1726  ;;  %v593_v46 = vld [vmem:[#allocation2 + $0x1fa] sm:$0xff] }
 0x26c   :  { %14690 = vst [vmem:[#allocation202_spill] sm:$0xff] %v9916_v1  ;;  %v596_v1 = vld [vmem:[#allocation2 + $0x21a] sm:$0xff] }
 0x26d   :  { %v9912_v17 = vpop.permute.xlu1 %1724  ;;  %1970 = vrot.lane.b32.xlu0 %v591_v45, %s8699_s28 }
 0x26e   :  { %14689 = vst [vmem:[#allocation201_spill] sm:$0xff] %v9912_v17 }
 0x26f   :  { %1968 = vrot.lane.b32.xlu1 %v590_v53, %s8699_s28  ;;  %v9922_v22 = vpop.permute.xlu0 %1730  ;;  %v595_v53 = vld [vmem:[#allocation2 + $0x212] sm:$0xff] }
 0x270   :  { %14692 = vst [vmem:[#allocation204_spill] sm:$0xff] %v9922_v22  ;;  %v598_v22 = vld [vmem:[#allocation2 + $0x232] sm:$0xff] }
 0x271   :  { %v9918_v52 = vpop.permute.xlu1 %1728  ;;  %1974 = vrot.lane.b32.xlu0 %v593_v46, %s8699_s28 }
 0x272   :  { %14691 = vst [vmem:[#allocation203_spill] sm:$0xff] %v9918_v52 }
 0x273   :  { %1972 = vrot.lane.b32.xlu1 %v592_v26, %s8699_s28  ;;  %v9928_v34 = vpop.permute.xlu0 %1734  ;;  %v597_v26 = vld [vmem:[#allocation2 + $0x22a] sm:$0xff] }
 0x274   :  { %14694 = vst [vmem:[#allocation206_spill] sm:$0xff] %v9928_v34  ;;  %v600_v34 = vld [vmem:[#allocation2 + $0x24a] sm:$0xff] }
 0x275   :  { %v9924_v24 = vpop.permute.xlu1 %1732  ;;  %1978 = vrot.lane.b32.xlu0 %v595_v53, %s8699_s28 }
 0x276   :  { %14693 = vst [vmem:[#allocation205_spill] sm:$0xff] %v9924_v24 }
 0x277   :  { %1976 = vrot.lane.b32.xlu1 %v594_v57, %s8699_s28  ;;  %v9934_v45 = vpop.permute.xlu0 %1738  ;;  %v599_v57 = vld [vmem:[#allocation2 + $0x242] sm:$0xff] }
 0x278   :  { %14696 = vst [vmem:[#allocation208_spill] sm:$0xff] %v9934_v45  ;;  %v602_v45 = vld [vmem:[#allocation2 + $0x262] sm:$0xff] }
 0x279   :  { %v9930_v17 = vpop.permute.xlu1 %1736  ;;  %1982 = vrot.lane.b32.xlu0 %v597_v26, %s8699_s28 }
 0x27a   :  { %14695 = vst [vmem:[#allocation207_spill] sm:$0xff] %v9930_v17 }
 0x27b   :  { %1980 = vrot.lane.b32.xlu1 %v596_v1, %s8699_s28  ;;  %v9940_v46 = vpop.permute.xlu0 %1742  ;;  %v601_v1 = vld [vmem:[#allocation2 + $0x25a] sm:$0xff] }
 0x27c   :  { %14698 = vst [vmem:[#allocation210_spill] sm:$0xff] %v9940_v46  ;;  %v604_v46 = vld [vmem:[#allocation2 + $0x27a] sm:$0xff] }
 0x27d   :  { %v9936_v52 = vpop.permute.xlu1 %1740  ;;  %1986 = vrot.lane.b32.xlu0 %v599_v57, %s8699_s28 }
 0x27e   :  { %14697 = vst [vmem:[#allocation209_spill] sm:$0xff] %v9936_v52 }
 0x27f   :  { %1984 = vrot.lane.b32.xlu1 %v598_v22, %s8699_s28  ;;  %v9946_v53 = vpop.permute.xlu0 %1746  ;;  %v603_v22 = vld [vmem:[#allocation2 + $0x272] sm:$0xff] }
 0x280   :  { %14700 = vst [vmem:[#allocation212_spill] sm:$0xff] %v9946_v53  ;;  %v606_v53 = vld [vmem:[#allocation2 + $0x292] sm:$0xff] }
 0x281   :  { %v9942_v24 = vpop.permute.xlu1 %1744  ;;  %1990 = vrot.lane.b32.xlu0 %v601_v1, %s8699_s28 }
 0x282   :  { %14699 = vst [vmem:[#allocation211_spill] sm:$0xff] %v9942_v24 }
 0x283   :  { %1988 = vrot.lane.b32.xlu1 %v600_v34, %s8699_s28  ;;  %v9952_v26 = vpop.permute.xlu0 %1750  ;;  %v605_v34 = vld [vmem:[#allocation2 + $0x28a] sm:$0xff] }
 0x284   :  { %14702 = vst [vmem:[#allocation214_spill] sm:$0xff] %v9952_v26  ;;  %v608_v26 = vld [vmem:[#allocation2 + $0x2aa] sm:$0xff] }
 0x285   :  { %v9948_v17 = vpop.permute.xlu1 %1748  ;;  %1994 = vrot.lane.b32.xlu0 %v603_v22, %s8699_s28 }
 0x286   :  { %14701 = vst [vmem:[#allocation213_spill] sm:$0xff] %v9948_v17 }
 0x287   :  { %1992 = vrot.lane.b32.xlu1 %v602_v45, %s8699_s28  ;;  %v9958_v57 = vpop.permute.xlu0 %1754  ;;  %v607_v45 = vld [vmem:[#allocation2 + $0x2a2] sm:$0xff] }
 0x288   :  { %14704 = vst [vmem:[#allocation216_spill] sm:$0xff] %v9958_v57  ;;  %v610_v57 = vld [vmem:[#allocation2 + $0x2c2] sm:$0xff] }
 0x289   :  { %v9954_v52 = vpop.permute.xlu1 %1752  ;;  %1998 = vrot.lane.b32.xlu0 %v605_v34, %s8699_s28 }
 0x28a   :  { %14703 = vst [vmem:[#allocation215_spill] sm:$0xff] %v9954_v52 }
 0x28b   :  { %1996 = vrot.lane.b32.xlu1 %v604_v46, %s8699_s28  ;;  %v9964_v1 = vpop.permute.xlu0 %1758  ;;  %v609_v46 = vld [vmem:[#allocation2 + $0x2ba] sm:$0xff] }
 0x28c   :  { %14706 = vst [vmem:[#allocation218_spill] sm:$0xff] %v9964_v1  ;;  %v612_v1 = vld [vmem:[#allocation2 + $0x2da] sm:$0xff] }
 0x28d   :  { %v9960_v24 = vpop.permute.xlu1 %1756  ;;  %2002 = vrot.lane.b32.xlu0 %v607_v45, %s8699_s28 }
 0x28e   :  { %14705 = vst [vmem:[#allocation217_spill] sm:$0xff] %v9960_v24 }
 0x28f   :  { %2000 = vrot.lane.b32.xlu1 %v606_v53, %s8699_s28  ;;  %v9970_v22 = vpop.permute.xlu0 %1762  ;;  %v611_v53 = vld [vmem:[#allocation2 + $0x2d2] sm:$0xff] }
 0x290   :  { %14708 = vst [vmem:[#allocation220_spill] sm:$0xff] %v9970_v22  ;;  %v614_v22 = vld [vmem:[#allocation2 + $0x2f2] sm:$0xff] }
 0x291   :  { %v9966_v17 = vpop.permute.xlu1 %1760  ;;  %2006 = vrot.lane.b32.xlu0 %v609_v46, %s8699_s28 }
 0x292   :  { %14707 = vst [vmem:[#allocation219_spill] sm:$0xff] %v9966_v17 }
 0x293   :  { %2004 = vrot.lane.b32.xlu1 %v608_v26, %s8699_s28  ;;  %v9976_v34 = vpop.permute.xlu0 %1766  ;;  %v613_v26 = vld [vmem:[#allocation2 + $0x2ea] sm:$0xff] }
 0x294   :  { %14710 = vst [vmem:[#allocation222_spill] sm:$0xff] %v9976_v34  ;;  %v616_v34 = vld [vmem:[#allocation2 + $0x30a] sm:$0xff] }
 0x295   :  { %v9972_v52 = vpop.permute.xlu1 %1764  ;;  %2010 = vrot.lane.b32.xlu0 %v611_v53, %s8699_s28 }
 0x296   :  { %14709 = vst [vmem:[#allocation221_spill] sm:$0xff] %v9972_v52 }
 0x297   :  { %2008 = vrot.lane.b32.xlu1 %v610_v57, %s8699_s28  ;;  %v9982_v45 = vpop.permute.xlu0 %1770  ;;  %v615_v57 = vld [vmem:[#allocation2 + $0x302] sm:$0xff] }
 0x298   :  { %14712 = vst [vmem:[#allocation224_spill] sm:$0xff] %v9982_v45  ;;  %v618_v45 = vld [vmem:[#allocation2 + $0x322] sm:$0xff] }
 0x299   :  { %v9978_v24 = vpop.permute.xlu1 %1768  ;;  %2014 = vrot.lane.b32.xlu0 %v613_v26, %s8699_s28 }
 0x29a   :  { %14711 = vst [vmem:[#allocation223_spill] sm:$0xff] %v9978_v24 }
 0x29b   :  { %2012 = vrot.lane.b32.xlu1 %v612_v1, %s8699_s28  ;;  %v9988_v46 = vpop.permute.xlu0 %1902  ;;  %v617_v1 = vld [vmem:[#allocation2 + $0x31a] sm:$0xff] }
 0x29d   :  { %v9984_v17 = vpop.permute.xlu1 %1772  ;;  %2018 = vrot.lane.b32.xlu0 %v615_v57, %s8699_s28 }
 0x29e   :  { %14713 = vst [vmem:[#allocation225_spill] sm:$0xff] %v9984_v17  ;;  %v620_v17 = vld [vmem:[#allocation2 + $0x33a] sm:$0xff] }
 0x29f   :  { %2016 = vrot.lane.b32.xlu1 %v614_v22, %s8699_s28  ;;  %v9994_v53 = vpop.permute.xlu0 %1906  ;;  %v619_v22 = vld [vmem:[#allocation2 + $0x332] sm:$0xff] }
 0x2a1   :  { %v9990_v52 = vpop.permute.xlu1 %1904  ;;  %2022 = vrot.lane.b32.xlu0 %v617_v1, %s8699_s28 }
 0x2a3   :  { %2020 = vrot.lane.b32.xlu1 %v616_v34, %s8699_s28  ;;  %v10000_v26 = vpop.permute.xlu0 %1910  ;;  %v622_v34 = vld [vmem:[#allocation2 + $0x30] sm:$0xff] }
 0x2a5   :  { %v9996_v24 = vpop.permute.xlu1 %1908  ;;  %2026 = vrot.lane.b32.xlu0 %v619_v22, %s8699_s28 }
 0x2a7   :  { %2024 = vrot.lane.b32.xlu1 %v618_v45, %s8699_s28  ;;  %v10006_v57 = vpop.permute.xlu0 %1914  ;;  %v624_v45 = vld [vmem:[#allocation2 + $0x48] sm:$0xff] }
 0x2a8   :  { %14714 = vst [vmem:[#allocation226_spill] sm:$0xff] %v10006_v57 }
 0x2a9   :  { %v10002_v49 = vpop.permute.xlu1 %1912  ;;  %2158 = vrot.lane.b32.xlu0 %v622_v34, %s8700_s29 }
 0x2ab   :  { %2028 = vrot.lane.b32.xlu1 %v620_v17, %s8699_s28  ;;  %v10012_v1 = vpop.permute.xlu0 %1918  ;;  %v626_v17 = vld [vmem:[#allocation2 + $0x60] sm:$0xff] }
 0x2ac   :  { %14716 = vst [vmem:[#allocation228_spill] sm:$0xff] %v10012_v1 }
 0x2ad   :  { %v10008_v20 = vpop.permute.xlu1 %1916  ;;  %2162 = vrot.lane.b32.xlu0 %v624_v45, %s8700_s29 }
 0x2ae   :  { %14715 = vst [vmem:[#allocation227_spill] sm:$0xff] %v10008_v20  ;;  %v753_v20 = vld [vmem:[#allocation2 + $0x52] sm:$0xff] }
 0x2af   :  { %2160 = vrot.lane.b32.xlu1 %v623_v15, %s8700_s29  ;;  %v10018_v22 = vpop.permute.xlu0 %1922  ;;  %v628_v15 = vld [vmem:[#allocation2 + $0x78] sm:$0xff] }
 0x2b0   :  { %14718 = vst [vmem:[#allocation230_spill] sm:$0xff] %v10018_v22  ;;  %v631_v22 = vld [vmem:[#allocation2 + $0x98] sm:$0xff] }
 0x2b1   :  { %v10014_v18 = vpop.permute.xlu1 %1920  ;;  %2166 = vrot.lane.b32.xlu0 %v626_v17, %s8700_s29 }
 0x2b2   :  { %14717 = vst [vmem:[#allocation229_spill] sm:$0xff] %v10014_v18 }
 0x2b3   :  { %2164 = vrot.lane.b32.xlu1 %v625_v41, %s8700_s29  ;;  %v10024_v34 = vpop.permute.xlu0 %1926  ;;  %v630_v41 = vld [vmem:[#allocation2 + $0x90] sm:$0xff] }
 0x2b4   :  { %14720 = vst [vmem:[#allocation232_spill] sm:$0xff] %v10024_v34  ;;  %v633_v34 = vld [vmem:[#allocation2 + $0xb0] sm:$0xff] }
 0x2b5   :  { %v10020_v40 = vpop.permute.xlu1 %1924  ;;  %2170 = vrot.lane.b32.xlu0 %v628_v15, %s8700_s29 }
 0x2b6   :  { %14719 = vst [vmem:[#allocation231_spill] sm:$0xff] %v10020_v40 }
 0x2b7   :  { %2168 = vrot.lane.b32.xlu1 %v627_v37, %s8700_s29  ;;  %v10030_v45 = vpop.permute.xlu0 %1930  ;;  %v632_v37 = vld [vmem:[#allocation2 + $0xa8] sm:$0xff] }
 0x2b8   :  { %14722 = vst [vmem:[#allocation234_spill] sm:$0xff] %v10030_v45  ;;  %v635_v45 = vld [vmem:[#allocation2 + $0xc8] sm:$0xff] }
 0x2b9   :  { %v10026_v59 = vpop.permute.xlu1 %1928  ;;  %2174 = vrot.lane.b32.xlu0 %v630_v41, %s8700_s29 }
 0x2ba   :  { %14721 = vst [vmem:[#allocation233_spill] sm:$0xff] %v10026_v59 }
 0x2bb   :  { %2172 = vrot.lane.b32.xlu1 %v629_v13, %s8700_s29  ;;  %v10036_v17 = vpop.permute.xlu0 %1934  ;;  %v634_v13 = vld [vmem:[#allocation2 + $0xc0] sm:$0xff] }
 0x2bc   :  { %14724 = vst [vmem:[#allocation236_spill] sm:$0xff] %v10036_v17  ;;  %v637_v17 = vld [vmem:[#allocation2 + $0xe0] sm:$0xff] }
 0x2bd   :  { %v10032_v18 = vpop.permute.xlu1 %1932  ;;  %2178 = vrot.lane.b32.xlu0 %v632_v37, %s8700_s29 }
 0x2be   :  { %14723 = vst [vmem:[#allocation235_spill] sm:$0xff] %v10032_v18 }
 0x2bf   :  { %2176 = vrot.lane.b32.xlu1 %v631_v22, %s8700_s29  ;;  %v10042_v15 = vpop.permute.xlu0 %1938  ;;  %v636_v22 = vld [vmem:[#allocation2 + $0xd8] sm:$0xff] }
 0x2c0   :  { %14726 = vst [vmem:[#allocation238_spill] sm:$0xff] %v10042_v15  ;;  %v639_v15 = vld [vmem:[#allocation2 + $0xf8] sm:$0xff] }
 0x2c1   :  { %v10038_v40 = vpop.permute.xlu1 %1936  ;;  %2182 = vrot.lane.b32.xlu0 %v634_v13, %s8700_s29 }
 0x2c2   :  { %14725 = vst [vmem:[#allocation237_spill] sm:$0xff] %v10038_v40 }
 0x2c3   :  { %2180 = vrot.lane.b32.xlu1 %v633_v34, %s8700_s29  ;;  %v10048_v41 = vpop.permute.xlu0 %1942  ;;  %v638_v34 = vld [vmem:[#allocation2 + $0xf0] sm:$0xff] }
 0x2c4   :  { %14728 = vst [vmem:[#allocation240_spill] sm:$0xff] %v10048_v41  ;;  %v641_v41 = vld [vmem:[#allocation2 + $0x110] sm:$0xff] }
 0x2c5   :  { %v10044_v59 = vpop.permute.xlu1 %1940  ;;  %2186 = vrot.lane.b32.xlu0 %v636_v22, %s8700_s29 }
 0x2c6   :  { %14727 = vst [vmem:[#allocation239_spill] sm:$0xff] %v10044_v59 }
 0x2c7   :  { %2184 = vrot.lane.b32.xlu1 %v635_v45, %s8700_s29  ;;  %v10054_v37 = vpop.permute.xlu0 %1946  ;;  %v640_v45 = vld [vmem:[#allocation2 + $0x108] sm:$0xff] }
 0x2c8   :  { %14730 = vst [vmem:[#allocation242_spill] sm:$0xff] %v10054_v37  ;;  %v643_v37 = vld [vmem:[#allocation2 + $0x128] sm:$0xff] }
 0x2c9   :  { %v10050_v18 = vpop.permute.xlu1 %1944  ;;  %2190 = vrot.lane.b32.xlu0 %v638_v34, %s8700_s29 }
 0x2ca   :  { %14729 = vst [vmem:[#allocation241_spill] sm:$0xff] %v10050_v18 }
 0x2cb   :  { %2188 = vrot.lane.b32.xlu1 %v637_v17, %s8700_s29  ;;  %v10060_v13 = vpop.permute.xlu0 %1950  ;;  %v642_v17 = vld [vmem:[#allocation2 + $0x120] sm:$0xff] }
 0x2cc   :  { %14732 = vst [vmem:[#allocation244_spill] sm:$0xff] %v10060_v13  ;;  %v645_v13 = vld [vmem:[#allocation2 + $0x140] sm:$0xff] }
 0x2cd   :  { %v10056_v40 = vpop.permute.xlu1 %1948  ;;  %2194 = vrot.lane.b32.xlu0 %v640_v45, %s8700_s29 }
 0x2ce   :  { %14731 = vst [vmem:[#allocation243_spill] sm:$0xff] %v10056_v40 }
 0x2cf   :  { %2192 = vrot.lane.b32.xlu1 %v639_v15, %s8700_s29  ;;  %v10066_v22 = vpop.permute.xlu0 %1954  ;;  %v644_v15 = vld [vmem:[#allocation2 + $0x138] sm:$0xff] }
 0x2d0   :  { %14734 = vst [vmem:[#allocation246_spill] sm:$0xff] %v10066_v22  ;;  %v647_v22 = vld [vmem:[#allocation2 + $0x158] sm:$0xff] }
 0x2d1   :  { %v10062_v59 = vpop.permute.xlu1 %1952  ;;  %2198 = vrot.lane.b32.xlu0 %v642_v17, %s8700_s29 }
 0x2d2   :  { %14733 = vst [vmem:[#allocation245_spill] sm:$0xff] %v10062_v59 }
 0x2d3   :  { %2196 = vrot.lane.b32.xlu1 %v641_v41, %s8700_s29  ;;  %v10072_v34 = vpop.permute.xlu0 %1958  ;;  %v646_v41 = vld [vmem:[#allocation2 + $0x150] sm:$0xff] }
 0x2d4   :  { %14736 = vst [vmem:[#allocation248_spill] sm:$0xff] %v10072_v34  ;;  %v649_v34 = vld [vmem:[#allocation2 + $0x170] sm:$0xff] }
 0x2d5   :  { %v10068_v18 = vpop.permute.xlu1 %1956  ;;  %2202 = vrot.lane.b32.xlu0 %v644_v15, %s8700_s29 }
 0x2d6   :  { %14735 = vst [vmem:[#allocation247_spill] sm:$0xff] %v10068_v18 }
 0x2d7   :  { %2200 = vrot.lane.b32.xlu1 %v643_v37, %s8700_s29  ;;  %v10078_v45 = vpop.permute.xlu0 %1962  ;;  %v648_v37 = vld [vmem:[#allocation2 + $0x168] sm:$0xff] }
 0x2d8   :  { %14738 = vst [vmem:[#allocation250_spill] sm:$0xff] %v10078_v45  ;;  %v651_v45 = vld [vmem:[#allocation2 + $0x188] sm:$0xff] }
 0x2d9   :  { %v10074_v40 = vpop.permute.xlu1 %1960  ;;  %2206 = vrot.lane.b32.xlu0 %v646_v41, %s8700_s29 }
 0x2da   :  { %14737 = vst [vmem:[#allocation249_spill] sm:$0xff] %v10074_v40 }
 0x2db   :  { %2204 = vrot.lane.b32.xlu1 %v645_v13, %s8700_s29  ;;  %v10084_v17 = vpop.permute.xlu0 %1966  ;;  %v650_v13 = vld [vmem:[#allocation2 + $0x180] sm:$0xff] }
 0x2dc   :  { %14740 = vst [vmem:[#allocation252_spill] sm:$0xff] %v10084_v17  ;;  %v653_v17 = vld [vmem:[#allocation2 + $0x1a0] sm:$0xff] }
 0x2dd   :  { %v10080_v59 = vpop.permute.xlu1 %1964  ;;  %2210 = vrot.lane.b32.xlu0 %v648_v37, %s8700_s29 }
 0x2de   :  { %14739 = vst [vmem:[#allocation251_spill] sm:$0xff] %v10080_v59 }
 0x2df   :  { %2208 = vrot.lane.b32.xlu1 %v647_v22, %s8700_s29  ;;  %v10090_v15 = vpop.permute.xlu0 %1970  ;;  %v652_v22 = vld [vmem:[#allocation2 + $0x198] sm:$0xff] }
 0x2e0   :  { %14742 = vst [vmem:[#allocation254_spill] sm:$0xff] %v10090_v15  ;;  %v655_v15 = vld [vmem:[#allocation2 + $0x1e8] sm:$0xff] }
 0x2e1   :  { %v10086_v18 = vpop.permute.xlu1 %1968  ;;  %2214 = vrot.lane.b32.xlu0 %v650_v13, %s8700_s29 }
 0x2e2   :  { %14741 = vst [vmem:[#allocation253_spill] sm:$0xff] %v10086_v18 }
 0x2e3   :  { %2212 = vrot.lane.b32.xlu1 %v649_v34, %s8700_s29  ;;  %v10096_v41 = vpop.permute.xlu0 %1974  ;;  %v654_v34 = vld [vmem:[#allocation2 + $0x1e0] sm:$0xff] }
 0x2e4   :  { %14744 = vst [vmem:[#allocation256_spill] sm:$0xff] %v10096_v41  ;;  %v657_v41 = vld [vmem:[#allocation2 + $0x200] sm:$0xff] }
 0x2e5   :  { %v10092_v40 = vpop.permute.xlu1 %1972  ;;  %2218 = vrot.lane.b32.xlu0 %v652_v22, %s8700_s29 }
 0x2e6   :  { %14743 = vst [vmem:[#allocation255_spill] sm:$0xff] %v10092_v40 }
 0x2e7   :  { %2216 = vrot.lane.b32.xlu1 %v651_v45, %s8700_s29  ;;  %v10102_v37 = vpop.permute.xlu0 %1978  ;;  %v656_v45 = vld [vmem:[#allocation2 + $0x1f8] sm:$0xff] }
 0x2e8   :  { %14746 = vst [vmem:[#allocation258_spill] sm:$0xff] %v10102_v37  ;;  %v659_v37 = vld [vmem:[#allocation2 + $0x218] sm:$0xff] }
 0x2e9   :  { %v10098_v59 = vpop.permute.xlu1 %1976  ;;  %2222 = vrot.lane.b32.xlu0 %v654_v34, %s8700_s29 }
 0x2ea   :  { %14745 = vst [vmem:[#allocation257_spill] sm:$0xff] %v10098_v59 }
 0x2eb   :  { %2220 = vrot.lane.b32.xlu1 %v653_v17, %s8700_s29  ;;  %v10108_v13 = vpop.permute.xlu0 %1982  ;;  %v658_v17 = vld [vmem:[#allocation2 + $0x210] sm:$0xff] }
 0x2ec   :  { %14748 = vst [vmem:[#allocation260_spill] sm:$0xff] %v10108_v13  ;;  %v661_v13 = vld [vmem:[#allocation2 + $0x230] sm:$0xff] }
 0x2ed   :  { %v10104_v18 = vpop.permute.xlu1 %1980  ;;  %2226 = vrot.lane.b32.xlu0 %v656_v45, %s8700_s29 }
 0x2ee   :  { %14747 = vst [vmem:[#allocation259_spill] sm:$0xff] %v10104_v18 }
 0x2ef   :  { %2224 = vrot.lane.b32.xlu1 %v655_v15, %s8700_s29  ;;  %v10114_v22 = vpop.permute.xlu0 %1986  ;;  %v660_v15 = vld [vmem:[#allocation2 + $0x228] sm:$0xff] }
 0x2f0   :  { %14750 = vst [vmem:[#allocation262_spill] sm:$0xff] %v10114_v22  ;;  %v663_v22 = vld [vmem:[#allocation2 + $0x248] sm:$0xff] }
 0x2f1   :  { %v10110_v40 = vpop.permute.xlu1 %1984  ;;  %2230 = vrot.lane.b32.xlu0 %v658_v17, %s8700_s29 }
 0x2f2   :  { %14749 = vst [vmem:[#allocation261_spill] sm:$0xff] %v10110_v40 }
 0x2f3   :  { %2228 = vrot.lane.b32.xlu1 %v657_v41, %s8700_s29  ;;  %v10120_v34 = vpop.permute.xlu0 %1990  ;;  %v662_v41 = vld [vmem:[#allocation2 + $0x240] sm:$0xff] }
 0x2f4   :  { %14752 = vst [vmem:[#allocation264_spill] sm:$0xff] %v10120_v34  ;;  %v665_v34 = vld [vmem:[#allocation2 + $0x260] sm:$0xff] }
 0x2f5   :  { %v10116_v59 = vpop.permute.xlu1 %1988  ;;  %2234 = vrot.lane.b32.xlu0 %v660_v15, %s8700_s29 }
 0x2f6   :  { %14751 = vst [vmem:[#allocation263_spill] sm:$0xff] %v10116_v59 }
 0x2f7   :  { %2232 = vrot.lane.b32.xlu1 %v659_v37, %s8700_s29  ;;  %v10126_v45 = vpop.permute.xlu0 %1994  ;;  %v664_v37 = vld [vmem:[#allocation2 + $0x258] sm:$0xff] }
 0x2f8   :  { %14754 = vst [vmem:[#allocation266_spill] sm:$0xff] %v10126_v45  ;;  %v667_v45 = vld [vmem:[#allocation2 + $0x278] sm:$0xff] }
 0x2f9   :  { %v10122_v18 = vpop.permute.xlu1 %1992  ;;  %2238 = vrot.lane.b32.xlu0 %v662_v41, %s8700_s29 }
 0x2fa   :  { %14753 = vst [vmem:[#allocation265_spill] sm:$0xff] %v10122_v18 }
 0x2fb   :  { %2236 = vrot.lane.b32.xlu1 %v661_v13, %s8700_s29  ;;  %v10132_v17 = vpop.permute.xlu0 %1998  ;;  %v666_v13 = vld [vmem:[#allocation2 + $0x270] sm:$0xff] }
 0x2fc   :  { %14756 = vst [vmem:[#allocation268_spill] sm:$0xff] %v10132_v17  ;;  %v669_v17 = vld [vmem:[#allocation2 + $0x290] sm:$0xff] }
 0x2fd   :  { %v10128_v40 = vpop.permute.xlu1 %1996  ;;  %2242 = vrot.lane.b32.xlu0 %v664_v37, %s8700_s29 }
 0x2fe   :  { %14755 = vst [vmem:[#allocation267_spill] sm:$0xff] %v10128_v40 }
 0x2ff   :  { %2240 = vrot.lane.b32.xlu1 %v663_v22, %s8700_s29  ;;  %v10138_v15 = vpop.permute.xlu0 %2002  ;;  %v668_v22 = vld [vmem:[#allocation2 + $0x288] sm:$0xff] }
 0x300   :  { %14758 = vst [vmem:[#allocation270_spill] sm:$0xff] %v10138_v15  ;;  %v671_v15 = vld [vmem:[#allocation2 + $0x2a8] sm:$0xff] }
 0x301   :  { %v10134_v59 = vpop.permute.xlu1 %2000  ;;  %2246 = vrot.lane.b32.xlu0 %v666_v13, %s8700_s29 }
 0x302   :  { %14757 = vst [vmem:[#allocation269_spill] sm:$0xff] %v10134_v59 }
 0x303   :  { %2244 = vrot.lane.b32.xlu1 %v665_v34, %s8700_s29  ;;  %v10144_v41 = vpop.permute.xlu0 %2006  ;;  %v670_v34 = vld [vmem:[#allocation2 + $0x2a0] sm:$0xff] }
 0x304   :  { %14760 = vst [vmem:[#allocation272_spill] sm:$0xff] %v10144_v41  ;;  %v673_v41 = vld [vmem:[#allocation2 + $0x2c0] sm:$0xff] }
 0x305   :  { %v10140_v18 = vpop.permute.xlu1 %2004  ;;  %2250 = vrot.lane.b32.xlu0 %v668_v22, %s8700_s29 }
 0x306   :  { %14759 = vst [vmem:[#allocation271_spill] sm:$0xff] %v10140_v18 }
 0x307   :  { %2248 = vrot.lane.b32.xlu1 %v667_v45, %s8700_s29  ;;  %v10150_v37 = vpop.permute.xlu0 %2010  ;;  %v672_v45 = vld [vmem:[#allocation2 + $0x2b8] sm:$0xff] }
 0x308   :  { %14762 = vst [vmem:[#allocation274_spill] sm:$0xff] %v10150_v37  ;;  %v675_v37 = vld [vmem:[#allocation2 + $0x2d8] sm:$0xff] }
 0x309   :  { %v10146_v40 = vpop.permute.xlu1 %2008  ;;  %2254 = vrot.lane.b32.xlu0 %v670_v34, %s8700_s29 }
 0x30a   :  { %14761 = vst [vmem:[#allocation273_spill] sm:$0xff] %v10146_v40 }
 0x30b   :  { %2252 = vrot.lane.b32.xlu1 %v669_v17, %s8700_s29  ;;  %v10156_v13 = vpop.permute.xlu0 %2014  ;;  %v674_v17 = vld [vmem:[#allocation2 + $0x2d0] sm:$0xff] }
 0x30c   :  { %14764 = vst [vmem:[#allocation276_spill] sm:$0xff] %v10156_v13  ;;  %v677_v13 = vld [vmem:[#allocation2 + $0x2f0] sm:$0xff] }
 0x30d   :  { %v10152_v59 = vpop.permute.xlu1 %2012  ;;  %2258 = vrot.lane.b32.xlu0 %v672_v45, %s8700_s29 }
 0x30e   :  { %14763 = vst [vmem:[#allocation275_spill] sm:$0xff] %v10152_v59 }
 0x30f   :  { %2256 = vrot.lane.b32.xlu1 %v671_v15, %s8700_s29  ;;  %v10162_v22 = vpop.permute.xlu0 %2018  ;;  %v676_v15 = vld [vmem:[#allocation2 + $0x2e8] sm:$0xff] }
 0x310   :  { %14766 = vst [vmem:[#allocation278_spill] sm:$0xff] %v10162_v22  ;;  %v679_v22 = vld [vmem:[#allocation2 + $0x308] sm:$0xff] }
 0x311   :  { %v10158_v18 = vpop.permute.xlu1 %2016  ;;  %2262 = vrot.lane.b32.xlu0 %v674_v17, %s8700_s29 }
 0x312   :  { %14765 = vst [vmem:[#allocation277_spill] sm:$0xff] %v10158_v18 }
 0x313   :  { %2260 = vrot.lane.b32.xlu1 %v673_v41, %s8700_s29  ;;  %v10168_v34 = vpop.permute.xlu0 %2022  ;;  %v678_v41 = vld [vmem:[#allocation2 + $0x300] sm:$0xff] }
 0x314   :  { %14768 = vst [vmem:[#allocation280_spill] sm:$0xff] %v10168_v34  ;;  %v681_v34 = vld [vmem:[#allocation2 + $0x320] sm:$0xff] }
 0x315   :  { %v10164_v40 = vpop.permute.xlu1 %2020  ;;  %2266 = vrot.lane.b32.xlu0 %v676_v15, %s8700_s29 }
 0x316   :  { %14767 = vst [vmem:[#allocation279_spill] sm:$0xff] %v10164_v40 }
 0x317   :  { %2264 = vrot.lane.b32.xlu1 %v675_v37, %s8700_s29  ;;  %v10174_v45 = vpop.permute.xlu0 %2026  ;;  %v680_v37 = vld [vmem:[#allocation2 + $0x318] sm:$0xff] }
 0x318   :  { %14770 = vst [vmem:[#allocation282_spill] sm:$0xff] %v10174_v45  ;;  %v683_v45 = vld [vmem:[#allocation2 + $0x338] sm:$0xff] }
 0x319   :  { %v10170_v59 = vpop.permute.xlu1 %2024  ;;  %2270 = vrot.lane.b32.xlu0 %v678_v41, %s8700_s29 }
 0x31a   :  { %14769 = vst [vmem:[#allocation281_spill] sm:$0xff] %v10170_v59 }
 0x31b   :  { %2268 = vrot.lane.b32.xlu1 %v677_v13, %s8700_s29  ;;  %v10180_v17 = vpop.permute.xlu0 %2158  ;;  %v682_v13 = vld [vmem:[#allocation2 + $0x330] sm:$0xff] }
 0x31d   :  { %v10176_v18 = vpop.permute.xlu1 %2028  ;;  %2274 = vrot.lane.b32.xlu0 %v680_v37, %s8700_s29 }
 0x31e   :  { %14771 = vst [vmem:[#allocation283_spill] sm:$0xff] %v10176_v18  ;;  %v685_v18 = vld [vmem:[#allocation2 + $0x350] sm:$0xff] }
 0x31f   :  { %2272 = vrot.lane.b32.xlu1 %v679_v22, %s8700_s29  ;;  %v10186_v15 = vpop.permute.xlu0 %2162  ;;  %v684_v22 = vld [vmem:[#allocation2 + $0x348] sm:$0xff] }
 0x321   :  { %v10182_v40 = vpop.permute.xlu1 %2160  ;;  %2278 = vrot.lane.b32.xlu0 %v682_v13, %s8700_s29 }
 0x323   :  { %2276 = vrot.lane.b32.xlu1 %v681_v34, %s8700_s29  ;;  %v10192_v41 = vpop.permute.xlu0 %2166  ;;  %v686_v34 = vld [vmem:[#allocation2 + $0x31] sm:$0xff] }
 0x325   :  { %v10188_v59 = vpop.permute.xlu1 %2164  ;;  %2282 = vrot.lane.b32.xlu0 %v684_v22, %s8700_s29 }
 0x327   :  { %2280 = vrot.lane.b32.xlu1 %v683_v45, %s8700_s29  ;;  %v10198_v37 = vpop.permute.xlu0 %2170  ;;  %v688_v45 = vld [vmem:[#allocation2 + $0x49] sm:$0xff] }
 0x328   :  { %14772 = vst [vmem:[#allocation284_spill] sm:$0xff] %v10198_v37 }
 0x329   :  { %v10194_v55 = vpop.permute.xlu1 %2168  ;;  %2414 = vrot.lane.b32.xlu0 %v686_v34, %s8701_s30 }
 0x32b   :  { %2284 = vrot.lane.b32.xlu1 %v685_v18, %s8700_s29  ;;  %v10204_v13 = vpop.permute.xlu0 %2174  ;;  %v690_v18 = vld [vmem:[#allocation2 + $0x61] sm:$0xff] }
 0x32c   :  { %14774 = vst [vmem:[#allocation286_spill] sm:$0xff] %v10204_v13  ;;  %v693_v13 = vld [vmem:[#allocation2 + $0x81] sm:$0xff] }
 0x32d   :  { %v10200_v1 = vpop.permute.xlu1 %2172  ;;  %2418 = vrot.lane.b32.xlu0 %v688_v45, %s8701_s30 }
 0x32e   :  { %14773 = vst [vmem:[#allocation285_spill] sm:$0xff] %v10200_v1 }
 0x32f   :  { %2416 = vrot.lane.b32.xlu1 %v687_v16, %s8701_s30  ;;  %v10210_v22 = vpop.permute.xlu0 %2178  ;;  %v692_v16 = vld [vmem:[#allocation2 + $0x79] sm:$0xff] }
 0x330   :  { %14776 = vst [vmem:[#allocation288_spill] sm:$0xff] %v10210_v22  ;;  %v695_v22 = vld [vmem:[#allocation2 + $0x99] sm:$0xff] }
 0x331   :  { %v10206_v14 = vpop.permute.xlu1 %2176  ;;  %2422 = vrot.lane.b32.xlu0 %v690_v18, %s8701_s30 }
 0x332   :  { %14775 = vst [vmem:[#allocation287_spill] sm:$0xff] %v10206_v14 }
 0x333   :  { %2420 = vrot.lane.b32.xlu1 %v689_v36, %s8701_s30  ;;  %v10216_v34 = vpop.permute.xlu0 %2182  ;;  %v694_v36 = vld [vmem:[#allocation2 + $0x91] sm:$0xff] }
 0x334   :  { %14778 = vst [vmem:[#allocation290_spill] sm:$0xff] %v10216_v34  ;;  %v697_v34 = vld [vmem:[#allocation2 + $0xb1] sm:$0xff] }
 0x335   :  { %v10212_v9 = vpop.permute.xlu1 %2180  ;;  %2426 = vrot.lane.b32.xlu0 %v692_v16, %s8701_s30 }
 0x336   :  { %14777 = vst [vmem:[#allocation289_spill] sm:$0xff] %v10212_v9 }
 0x337   :  { %2424 = vrot.lane.b32.xlu1 %v691_v38, %s8701_s30  ;;  %v10222_v45 = vpop.permute.xlu0 %2186  ;;  %v696_v38 = vld [vmem:[#allocation2 + $0xa9] sm:$0xff] }
 0x338   :  { %14780 = vst [vmem:[#allocation292_spill] sm:$0xff] %v10222_v45  ;;  %v699_v45 = vld [vmem:[#allocation2 + $0xc9] sm:$0xff] }
 0x339   :  { %v10218_v1 = vpop.permute.xlu1 %2184  ;;  %2430 = vrot.lane.b32.xlu0 %v694_v36, %s8701_s30 }
 0x33a   :  { %14779 = vst [vmem:[#allocation291_spill] sm:$0xff] %v10218_v1 }
 0x33b   :  { %2428 = vrot.lane.b32.xlu1 %v693_v13, %s8701_s30  ;;  %v10228_v18 = vpop.permute.xlu0 %2190  ;;  %v698_v13 = vld [vmem:[#allocation2 + $0xc1] sm:$0xff] }
 0x33c   :  { %14782 = vst [vmem:[#allocation294_spill] sm:$0xff] %v10228_v18  ;;  %v701_v18 = vld [vmem:[#allocation2 + $0xe1] sm:$0xff] }
 0x33d   :  { %v10224_v14 = vpop.permute.xlu1 %2188  ;;  %2434 = vrot.lane.b32.xlu0 %v696_v38, %s8701_s30 }
 0x33e   :  { %14781 = vst [vmem:[#allocation293_spill] sm:$0xff] %v10224_v14 }
 0x33f   :  { %2432 = vrot.lane.b32.xlu1 %v695_v22, %s8701_s30  ;;  %v10234_v16 = vpop.permute.xlu0 %2194  ;;  %v700_v22 = vld [vmem:[#allocation2 + $0xd9] sm:$0xff] }
 0x340   :  { %14784 = vst [vmem:[#allocation296_spill] sm:$0xff] %v10234_v16  ;;  %v703_v16 = vld [vmem:[#allocation2 + $0xf9] sm:$0xff] }
 0x341   :  { %v10230_v9 = vpop.permute.xlu1 %2192  ;;  %2438 = vrot.lane.b32.xlu0 %v698_v13, %s8701_s30 }
 0x342   :  { %14783 = vst [vmem:[#allocation295_spill] sm:$0xff] %v10230_v9 }
 0x343   :  { %2436 = vrot.lane.b32.xlu1 %v697_v34, %s8701_s30  ;;  %v10240_v36 = vpop.permute.xlu0 %2198  ;;  %v702_v34 = vld [vmem:[#allocation2 + $0xf1] sm:$0xff] }
 0x344   :  { %14786 = vst [vmem:[#allocation298_spill] sm:$0xff] %v10240_v36  ;;  %v705_v36 = vld [vmem:[#allocation2 + $0x111] sm:$0xff] }
 0x345   :  { %v10236_v1 = vpop.permute.xlu1 %2196  ;;  %2442 = vrot.lane.b32.xlu0 %v700_v22, %s8701_s30 }
 0x346   :  { %14785 = vst [vmem:[#allocation297_spill] sm:$0xff] %v10236_v1 }
 0x347   :  { %2440 = vrot.lane.b32.xlu1 %v699_v45, %s8701_s30  ;;  %v10246_v38 = vpop.permute.xlu0 %2202  ;;  %v704_v45 = vld [vmem:[#allocation2 + $0x109] sm:$0xff] }
 0x348   :  { %14788 = vst [vmem:[#allocation300_spill] sm:$0xff] %v10246_v38  ;;  %v707_v38 = vld [vmem:[#allocation2 + $0x129] sm:$0xff] }
 0x349   :  { %v10242_v14 = vpop.permute.xlu1 %2200  ;;  %2446 = vrot.lane.b32.xlu0 %v702_v34, %s8701_s30 }
 0x34a   :  { %14787 = vst [vmem:[#allocation299_spill] sm:$0xff] %v10242_v14 }
 0x34b   :  { %2444 = vrot.lane.b32.xlu1 %v701_v18, %s8701_s30  ;;  %v10252_v13 = vpop.permute.xlu0 %2206  ;;  %v706_v18 = vld [vmem:[#allocation2 + $0x121] sm:$0xff] }
 0x34c   :  { %14790 = vst [vmem:[#allocation302_spill] sm:$0xff] %v10252_v13  ;;  %v709_v13 = vld [vmem:[#allocation2 + $0x141] sm:$0xff] }
 0x34d   :  { %v10248_v9 = vpop.permute.xlu1 %2204  ;;  %2450 = vrot.lane.b32.xlu0 %v704_v45, %s8701_s30 }
 0x34e   :  { %14789 = vst [vmem:[#allocation301_spill] sm:$0xff] %v10248_v9 }
 0x34f   :  { %2448 = vrot.lane.b32.xlu1 %v703_v16, %s8701_s30  ;;  %v10258_v22 = vpop.permute.xlu0 %2210  ;;  %v708_v16 = vld [vmem:[#allocation2 + $0x139] sm:$0xff] }
 0x350   :  { %14792 = vst [vmem:[#allocation304_spill] sm:$0xff] %v10258_v22  ;;  %v711_v22 = vld [vmem:[#allocation2 + $0x159] sm:$0xff] }
 0x351   :  { %v10254_v1 = vpop.permute.xlu1 %2208  ;;  %2454 = vrot.lane.b32.xlu0 %v706_v18, %s8701_s30 }
 0x352   :  { %14791 = vst [vmem:[#allocation303_spill] sm:$0xff] %v10254_v1 }
 0x353   :  { %2452 = vrot.lane.b32.xlu1 %v705_v36, %s8701_s30  ;;  %v10264_v34 = vpop.permute.xlu0 %2214  ;;  %v710_v36 = vld [vmem:[#allocation2 + $0x151] sm:$0xff] }
 0x354   :  { %14794 = vst [vmem:[#allocation306_spill] sm:$0xff] %v10264_v34  ;;  %v713_v34 = vld [vmem:[#allocation2 + $0x171] sm:$0xff] }
 0x355   :  { %v10260_v14 = vpop.permute.xlu1 %2212  ;;  %2458 = vrot.lane.b32.xlu0 %v708_v16, %s8701_s30 }
 0x356   :  { %14793 = vst [vmem:[#allocation305_spill] sm:$0xff] %v10260_v14 }
 0x357   :  { %2456 = vrot.lane.b32.xlu1 %v707_v38, %s8701_s30  ;;  %v10270_v45 = vpop.permute.xlu0 %2218  ;;  %v712_v38 = vld [vmem:[#allocation2 + $0x169] sm:$0xff] }
 0x358   :  { %14796 = vst [vmem:[#allocation308_spill] sm:$0xff] %v10270_v45  ;;  %v715_v45 = vld [vmem:[#allocation2 + $0x189] sm:$0xff] }
 0x359   :  { %v10266_v9 = vpop.permute.xlu1 %2216  ;;  %2462 = vrot.lane.b32.xlu0 %v710_v36, %s8701_s30 }
 0x35a   :  { %14795 = vst [vmem:[#allocation307_spill] sm:$0xff] %v10266_v9 }
 0x35b   :  { %2460 = vrot.lane.b32.xlu1 %v709_v13, %s8701_s30  ;;  %v10276_v18 = vpop.permute.xlu0 %2222  ;;  %v714_v13 = vld [vmem:[#allocation2 + $0x181] sm:$0xff] }
 0x35c   :  { %14798 = vst [vmem:[#allocation310_spill] sm:$0xff] %v10276_v18  ;;  %v717_v18 = vld [vmem:[#allocation2 + $0x1a1] sm:$0xff] }
 0x35d   :  { %v10272_v1 = vpop.permute.xlu1 %2220  ;;  %2466 = vrot.lane.b32.xlu0 %v712_v38, %s8701_s30 }
 0x35e   :  { %14797 = vst [vmem:[#allocation309_spill] sm:$0xff] %v10272_v1 }
 0x35f   :  { %2464 = vrot.lane.b32.xlu1 %v711_v22, %s8701_s30  ;;  %v10282_v16 = vpop.permute.xlu0 %2226  ;;  %v716_v22 = vld [vmem:[#allocation2 + $0x199] sm:$0xff] }
 0x360   :  { %14800 = vst [vmem:[#allocation312_spill] sm:$0xff] %v10282_v16  ;;  %v719_v16 = vld [vmem:[#allocation2 + $0x1e9] sm:$0xff] }
 0x361   :  { %v10278_v14 = vpop.permute.xlu1 %2224  ;;  %2470 = vrot.lane.b32.xlu0 %v714_v13, %s8701_s30 }
 0x362   :  { %14799 = vst [vmem:[#allocation311_spill] sm:$0xff] %v10278_v14 }
 0x363   :  { %2468 = vrot.lane.b32.xlu1 %v713_v34, %s8701_s30  ;;  %v10288_v36 = vpop.permute.xlu0 %2230  ;;  %v718_v34 = vld [vmem:[#allocation2 + $0x1e1] sm:$0xff] }
 0x364   :  { %14802 = vst [vmem:[#allocation314_spill] sm:$0xff] %v10288_v36  ;;  %v721_v36 = vld [vmem:[#allocation2 + $0x201] sm:$0xff] }
 0x365   :  { %v10284_v9 = vpop.permute.xlu1 %2228  ;;  %2474 = vrot.lane.b32.xlu0 %v716_v22, %s8701_s30 }
 0x366   :  { %14801 = vst [vmem:[#allocation313_spill] sm:$0xff] %v10284_v9 }
 0x367   :  { %2472 = vrot.lane.b32.xlu1 %v715_v45, %s8701_s30  ;;  %v10294_v38 = vpop.permute.xlu0 %2234  ;;  %v720_v45 = vld [vmem:[#allocation2 + $0x1f9] sm:$0xff] }
 0x368   :  { %14804 = vst [vmem:[#allocation316_spill] sm:$0xff] %v10294_v38  ;;  %v723_v38 = vld [vmem:[#allocation2 + $0x219] sm:$0xff] }
 0x369   :  { %v10290_v1 = vpop.permute.xlu1 %2232  ;;  %2478 = vrot.lane.b32.xlu0 %v718_v34, %s8701_s30 }
 0x36a   :  { %14803 = vst [vmem:[#allocation315_spill] sm:$0xff] %v10290_v1 }
 0x36b   :  { %2476 = vrot.lane.b32.xlu1 %v717_v18, %s8701_s30  ;;  %v10300_v13 = vpop.permute.xlu0 %2238  ;;  %v722_v18 = vld [vmem:[#allocation2 + $0x211] sm:$0xff] }
 0x36c   :  { %14806 = vst [vmem:[#allocation318_spill] sm:$0xff] %v10300_v13  ;;  %v725_v13 = vld [vmem:[#allocation2 + $0x231] sm:$0xff] }
 0x36d   :  { %v10296_v14 = vpop.permute.xlu1 %2236  ;;  %2482 = vrot.lane.b32.xlu0 %v720_v45, %s8701_s30 }
 0x36e   :  { %14805 = vst [vmem:[#allocation317_spill] sm:$0xff] %v10296_v14 }
 0x36f   :  { %2480 = vrot.lane.b32.xlu1 %v719_v16, %s8701_s30  ;;  %v10306_v22 = vpop.permute.xlu0 %2242  ;;  %v724_v16 = vld [vmem:[#allocation2 + $0x229] sm:$0xff] }
 0x370   :  { %14808 = vst [vmem:[#allocation320_spill] sm:$0xff] %v10306_v22  ;;  %v727_v22 = vld [vmem:[#allocation2 + $0x249] sm:$0xff] }
 0x371   :  { %v10302_v9 = vpop.permute.xlu1 %2240  ;;  %2486 = vrot.lane.b32.xlu0 %v722_v18, %s8701_s30 }
 0x372   :  { %14807 = vst [vmem:[#allocation319_spill] sm:$0xff] %v10302_v9 }
 0x373   :  { %2484 = vrot.lane.b32.xlu1 %v721_v36, %s8701_s30  ;;  %v10312_v34 = vpop.permute.xlu0 %2246  ;;  %v726_v36 = vld [vmem:[#allocation2 + $0x241] sm:$0xff] }
 0x374   :  { %14810 = vst [vmem:[#allocation322_spill] sm:$0xff] %v10312_v34  ;;  %v729_v34 = vld [vmem:[#allocation2 + $0x261] sm:$0xff] }
 0x375   :  { %v10308_v1 = vpop.permute.xlu1 %2244  ;;  %2490 = vrot.lane.b32.xlu0 %v724_v16, %s8701_s30 }
 0x376   :  { %14809 = vst [vmem:[#allocation321_spill] sm:$0xff] %v10308_v1 }
 0x377   :  { %2488 = vrot.lane.b32.xlu1 %v723_v38, %s8701_s30  ;;  %v10318_v45 = vpop.permute.xlu0 %2250  ;;  %v728_v38 = vld [vmem:[#allocation2 + $0x259] sm:$0xff] }
 0x378   :  { %14812 = vst [vmem:[#allocation324_spill] sm:$0xff] %v10318_v45  ;;  %v731_v45 = vld [vmem:[#allocation2 + $0x279] sm:$0xff] }
 0x379   :  { %v10314_v14 = vpop.permute.xlu1 %2248  ;;  %2494 = vrot.lane.b32.xlu0 %v726_v36, %s8701_s30 }
 0x37a   :  { %14811 = vst [vmem:[#allocation323_spill] sm:$0xff] %v10314_v14 }
 0x37b   :  { %2492 = vrot.lane.b32.xlu1 %v725_v13, %s8701_s30  ;;  %v10324_v18 = vpop.permute.xlu0 %2254  ;;  %v730_v13 = vld [vmem:[#allocation2 + $0x271] sm:$0xff] }
 0x37c   :  { %14814 = vst [vmem:[#allocation326_spill] sm:$0xff] %v10324_v18  ;;  %v733_v18 = vld [vmem:[#allocation2 + $0x291] sm:$0xff] }
 0x37d   :  { %v10320_v9 = vpop.permute.xlu1 %2252  ;;  %2498 = vrot.lane.b32.xlu0 %v728_v38, %s8701_s30 }
 0x37e   :  { %14813 = vst [vmem:[#allocation325_spill] sm:$0xff] %v10320_v9 }
 0x37f   :  { %2496 = vrot.lane.b32.xlu1 %v727_v22, %s8701_s30  ;;  %v10330_v16 = vpop.permute.xlu0 %2258  ;;  %v732_v22 = vld [vmem:[#allocation2 + $0x289] sm:$0xff] }
 0x380   :  { %14816 = vst [vmem:[#allocation328_spill] sm:$0xff] %v10330_v16  ;;  %v735_v16 = vld [vmem:[#allocation2 + $0x2a9] sm:$0xff] }
 0x381   :  { %v10326_v1 = vpop.permute.xlu1 %2256  ;;  %2502 = vrot.lane.b32.xlu0 %v730_v13, %s8701_s30  ;;  %v3382_v13 = vld [vmem:[%s14480_s1 + $0x8] sm:$0xff] }
 0x382   :  { %14815 = vst [vmem:[#allocation327_spill] sm:$0xff] %v10326_v1 }
 0x383   :  { %2500 = vrot.lane.b32.xlu1 %v729_v34, %s8701_s30  ;;  %v10336_v36 = vpop.permute.xlu0 %2262  ;;  %v734_v34 = vld [vmem:[#allocation2 + $0x2a1] sm:$0xff] }
 0x384   :  { %14818 = vst [vmem:[#allocation330_spill] sm:$0xff] %v10336_v36 }
 0x385   :  { %v10332_v14 = vpop.permute.xlu1 %2260  ;;  %2506 = vrot.lane.b32.xlu0 %v732_v22, %s8701_s30  ;;  %v736_v22 = vld [vmem:[#allocation2 + $0x2b9] sm:$0xff] }
 0x386   :  { %14817 = vst [vmem:[#allocation329_spill] sm:$0xff] %v10332_v14  ;;  %v745_v14 = vld [vmem:[#allocation2 + $0x321] sm:$0xff] }
 0x387   :  { %2504 = vrot.lane.b32.xlu1 %v731_v45, %s8701_s30  ;;  %v10342_v38 = vpop.permute.xlu0 %2266  ;;  %v3381_v45 = vld [vmem:[%s14480_s1] sm:$0xff] }
 0x388   :  { %14820 = vst [vmem:[#allocation332_spill] sm:$0xff] %v10342_v38  ;;  %v737_v38 = vld [vmem:[#allocation2 + $0x2c1] sm:$0xff] }
 0x389   :  { %v10338_v9 = vpop.permute.xlu1 %2264  ;;  %2510 = vrot.lane.b32.xlu0 %v734_v34, %s8701_s30  ;;  %v3383_v34 = vld [vmem:[%s14480_s1 + $0x10] sm:$0xff] }
 0x38a   :  { %14819 = vst [vmem:[#allocation331_spill] sm:$0xff] %v10338_v9 }
 0x38b   :  { %2508 = vrot.lane.b32.xlu1 %v733_v18, %s8701_s30  ;;  %v8532_v18 = vpack.c.bf16 %v3382_v13, %v3381_v45  ;;  %v10354_v9 = vpop.permute.xlu0 %2270 }
 0x38c   :  { %14822 = vst [vmem:[#allocation334_spill] sm:$0xff] %v10354_v9  ;;  %v739_v9 = vld [vmem:[#allocation2 + $0x2d9] sm:$0xff] }
 0x38d   :  { %v10344_v1 = vpop.permute.xlu1 %2268  ;;  %8533 = vmatprep.subr.bf16.mxu0 %v8532_v18  ;;  %2514 = vrot.lane.b32.xlu0 %v736_v22, %s8701_s30  ;;  %v3385_v22 = vld [vmem:[%s14480_s1 + $0x20] sm:$0xff] }
 0x38e   :  { %14821 = vst [vmem:[#allocation333_spill] sm:$0xff] %v10344_v1  ;;  %8535 = vmatpush3.bf16.msra.mxu0 %v8532_v18  ;;  %v3384_v1 = vld [vmem:[%s14480_s1 + $0x18] sm:$0xff]  ;;  %v3386_v18 = vld [vmem:[%s14480_s1 + $0x28] sm:$0xff] }
 0x38f   :  { %2512 = vrot.lane.b32.xlu1 %v735_v16, %s8701_s30  ;;  %v738_v16 = vld [vmem:[#allocation2 + $0x2d1] sm:$0xff]  ;;  %v8536_v45 = vpack.c.bf16 %v3384_v1, %v3383_v34  ;;  %v10366_v13 = vpop.permute.xlu0 %2274  ;;  %v740_v1 = vld [vmem:[#allocation2 + $0x2e9] sm:$0xff] }
 0x390   :  { %14824 = vst [vmem:[#allocation336_spill] sm:$0xff] %v10366_v13  ;;  %v741_v13 = vld [vmem:[#allocation2 + $0x2f1] sm:$0xff] }
 0x391   :  { %v10356_v36 = vpop.permute.xlu1 %2272  ;;  %8537 = vmatprep.subr.bf16.mxu0 %v8536_v45  ;;  %2518 = vrot.lane.b32.xlu0 %v738_v16, %s8701_s30  ;;  %v3387_v16 = vld [vmem:[%s14480_s1 + $0x30] sm:$0xff] }
 0x392   :  { %14823 = vst [vmem:[#allocation335_spill] sm:$0xff] %v10356_v36  ;;  %8539 = vmatpush3.bf16.msra.mxu0 %v8536_v45  ;;  %v3388_v45 = vld [vmem:[%s14480_s1 + $0x38] sm:$0xff] }
 0x393   :  { %2516 = vrot.lane.b32.xlu1 %v737_v38, %s8701_s30  ;;  %v8540_v38 = vpack.c.bf16 %v3386_v18, %v3385_v22  ;;  %v10378_v34 = vpop.permute.xlu0 %2278  ;;  %v8544_v22 = vpack.c.bf16 %v3388_v45, %v3387_v16  ;;  %v746_v45 = vld [vmem:[#allocation2 + $0x331] sm:$0xff] }
 0x394   :  { %14826 = vst [vmem:[#allocation338_spill] sm:$0xff] %v10378_v34  ;;  %v743_v34 = vld [vmem:[#allocation2 + $0x309] sm:$0xff] }
 0x395   :  { %v10368_v36 = vpop.permute.xlu1 %2276  ;;  %8541 = vmatprep.subr.bf16.mxu0 %v8540_v38  ;;  %2522 = vrot.lane.b32.xlu0 %v740_v1, %s8701_s30  ;;  %v744_v1 = vld [vmem:[#allocation2 + $0x319] sm:$0xff] }
 0x396   :  { %14825 = vst [vmem:[#allocation337_spill] sm:$0xff] %v10368_v36  ;;  %8543 = vmatpush3.bf16.msra.mxu0 %v8540_v38 }
 0x397   :  { %2520 = vrot.lane.b32.xlu1 %v739_v9, %s8701_s30  ;;  %v742_v9 = vld [vmem:[#allocation2 + $0x301] sm:$0xff]  ;;  %v10390_v18 = vpop.permute.xlu0 %2282  ;;  %8545 = vmatprep.subr.bf16.mxu0 %v8544_v22 }
 0x398   :  { %14828 = vst [vmem:[#allocation340_spill] sm:$0xff] %v10390_v18 }
 0x399   :  { %v10380_v36 = vpop.permute.xlu1 %2280  ;;  %2526 = vrot.lane.b32.xlu0 %v742_v9, %s8701_s30 }
 0x39a   :  { %14827 = vst [vmem:[#allocation339_spill] sm:$0xff] %v10380_v36  ;;  %8547 = vmatpush3.bf16.msra.mxu0 %v8544_v22 }
 0x39b   :  { %2524 = vrot.lane.b32.xlu1 %v741_v13, %s8701_s30  ;;  %v10396_v38 = vpop.permute.xlu0 %2414  ;;  %v3389_v13 = vld [vmem:[%s14480_s1 + $0x40] sm:$0xff]  ;;  %s8702_s1 = smov 64  }
 0x39c   :  { %8320 = vmatprep.subr.mxu0 %v3389_v13 }
 0x39d   :  { %v10392_v36 = vpop.permute.xlu1 %2284  ;;  %2530 = vrot.lane.b32.xlu0 %v744_v1, %s8701_s30 }
 0x39e   :  { %14829 = vst [vmem:[#allocation341_spill] sm:$0xff] %v10392_v36  ;;  %8321 = vmatpush3.msra.mxu0 %v3389_v13  ;;  %v748_v36 = vld [vmem:[#allocation2 + $0x349] sm:$0xff]  ;;  %v751_v13 = vld [vmem:[#allocation2 + $0x3a] sm:$0xff] }
 0x39f   :  { %2528 = vrot.lane.b32.xlu1 %v743_v34, %s8701_s30  ;;  %v10405_v9 = vpop.permute.xlu0 %2418  ;;  %v747_v34 = vld [vmem:[#allocation2 + $0x339] sm:$0xff] }
 0x3a1   :  { %v10401_v16 = vpop.permute.xlu1 %2416  ;;  %2534 = vrot.lane.b32.xlu0 %v746_v45, %s8701_s30  ;;  %v752_v45 = vld [vmem:[#allocation2 + $0x4a] sm:$0xff] }
 0x3a3   :  { %2532 = vrot.lane.b32.xlu1 %v745_v14, %s8701_s30  ;;  %v10411_v18 = vpop.permute.xlu0 %2422  ;;  %v750_v14 = vld [vmem:[#allocation2 + $0x32] sm:$0xff] }
 0x3a5   :  { %v10407_v22 = vpop.permute.xlu1 %2420  ;;  %2538 = vrot.lane.b32.xlu0 %v748_v36, %s8701_s30 }
 0x3a7   :  { %2536 = vrot.lane.b32.xlu1 %v747_v34, %s8701_s30  ;;  %v10417_v1 = vpop.permute.xlu0 %2426 }
 0x3a8   :  { %14831 = vst [vmem:[#allocation343_spill] sm:$0xff] %v10417_v1  ;;  %v755_v1 = vld [vmem:[#allocation2 + $0x6a] sm:$0xff] }
 0x3a9   :  { %v10413_v7 = vpop.permute.xlu1 %2424  ;;  %2670 = vrot.lane.b32.xlu0 %v750_v14, %s8702_s1  ;;  %v756_v14 = vld [vmem:[#allocation2 + $0x7a] sm:$0xff] }
 0x3aa   :  { %14830 = vst [vmem:[#allocation342_spill] sm:$0xff] %v10413_v7  ;;  %v8575_v7 = vld [vmem:[#allocation2 + $0x30] sm:$0xff] }
 0x3ab   :  { %2540 = vrot.lane.b32.xlu1 %v749_v54, %s8701_s30  ;;  %v10423_v34 = vpop.permute.xlu0 %2430  ;;  %v754_v54 = vld [vmem:[#allocation2 + $0x62] sm:$0xff] }
 0x3ac   :  { %14833 = vst [vmem:[#allocation345_spill] sm:$0xff] %v10423_v34  ;;  %v757_v34 = vld [vmem:[#allocation2 + $0x82] sm:$0xff] }
 0x3ad   :  { %v10419_v37 = vpop.permute.xlu1 %2428  ;;  %2674 = vrot.lane.b32.xlu0 %v752_v45, %s8702_s1 }
 0x3ae   :  { %14832 = vst [vmem:[#allocation344_spill] sm:$0xff] %v10419_v37 }
 0x3af   :  { %2672 = vrot.lane.b32.xlu1 %v751_v13, %s8702_s1  ;;  %v10429_v36 = vpop.permute.xlu0 %2434 }
 0x3b0   :  { %14835 = vst [vmem:[#allocation347_spill] sm:$0xff] %v10429_v36  ;;  %v759_v36 = vld [vmem:[#allocation2 + $0x9a] sm:$0xff] }
 0x3b1   :  { %v10425_v19 = vpop.permute.xlu1 %2432  ;;  %2678 = vrot.lane.b32.xlu0 %v754_v54, %s8702_s1 }
 0x3b2   :  { %14834 = vst [vmem:[#allocation346_spill] sm:$0xff] %v10425_v19 }
 0x3b3   :  { %2676 = vrot.lane.b32.xlu1 %v753_v20, %s8702_s1  ;;  %v10435_v13 = vpop.permute.xlu0 %2438  ;;  %v758_v20 = vld [vmem:[#allocation2 + $0x92] sm:$0xff] }
 0x3b4   :  { %14837 = vst [vmem:[#allocation349_spill] sm:$0xff] %v10435_v13  ;;  %v761_v13 = vld [vmem:[#allocation2 + $0xb2] sm:$0xff] }
 0x3b5   :  { %v10431_v37 = vpop.permute.xlu1 %2436  ;;  %2682 = vrot.lane.b32.xlu0 %v756_v14, %s8702_s1 }
 0x3b6   :  { %14836 = vst [vmem:[#allocation348_spill] sm:$0xff] %v10431_v37 }
 0x3b7   :  { %2680 = vrot.lane.b32.xlu1 %v755_v1, %s8702_s1  ;;  %v10441_v45 = vpop.permute.xlu0 %2442  ;;  %v760_v1 = vld [vmem:[#allocation2 + $0xaa] sm:$0xff] }
 0x3b8   :  { %14839 = vst [vmem:[#allocation351_spill] sm:$0xff] %v10441_v45  ;;  %v763_v45 = vld [vmem:[#allocation2 + $0xca] sm:$0xff] }
 0x3b9   :  { %v10437_v57 = vpop.permute.xlu1 %2440  ;;  %2686 = vrot.lane.b32.xlu0 %v758_v20, %s8702_s1 }
 0x3ba   :  { %14838 = vst [vmem:[#allocation350_spill] sm:$0xff] %v10437_v57 }
 0x3bb   :  { %2684 = vrot.lane.b32.xlu1 %v757_v34, %s8702_s1  ;;  %v10447_v54 = vpop.permute.xlu0 %2446  ;;  %v762_v34 = vld [vmem:[#allocation2 + $0xc2] sm:$0xff] }
 0x3bc   :  { %14841 = vst [vmem:[#allocation353_spill] sm:$0xff] %v10447_v54  ;;  %v765_v54 = vld [vmem:[#allocation2 + $0xe2] sm:$0xff] }
 0x3bd   :  { %v10443_v19 = vpop.permute.xlu1 %2444  ;;  %2690 = vrot.lane.b32.xlu0 %v760_v1, %s8702_s1 }
 0x3be   :  { %14840 = vst [vmem:[#allocation352_spill] sm:$0xff] %v10443_v19 }
 0x3bf   :  { %2688 = vrot.lane.b32.xlu1 %v759_v36, %s8702_s1  ;;  %v10453_v14 = vpop.permute.xlu0 %2450  ;;  %v764_v36 = vld [vmem:[#allocation2 + $0xda] sm:$0xff] }
 0x3c0   :  { %14843 = vst [vmem:[#allocation355_spill] sm:$0xff] %v10453_v14  ;;  %v767_v14 = vld [vmem:[#allocation2 + $0xfa] sm:$0xff] }
 0x3c1   :  { %v10449_v37 = vpop.permute.xlu1 %2448  ;;  %2694 = vrot.lane.b32.xlu0 %v762_v34, %s8702_s1 }
 0x3c2   :  { %14842 = vst [vmem:[#allocation354_spill] sm:$0xff] %v10449_v37 }
 0x3c3   :  { %2692 = vrot.lane.b32.xlu1 %v761_v13, %s8702_s1  ;;  %v10459_v20 = vpop.permute.xlu0 %2454  ;;  %v766_v13 = vld [vmem:[#allocation2 + $0xf2] sm:$0xff] }
 0x3c4   :  { %14845 = vst [vmem:[#allocation357_spill] sm:$0xff] %v10459_v20  ;;  %v769_v20 = vld [vmem:[#allocation2 + $0x112] sm:$0xff] }
 0x3c5   :  { %v10455_v57 = vpop.permute.xlu1 %2452  ;;  %2698 = vrot.lane.b32.xlu0 %v764_v36, %s8702_s1 }
 0x3c6   :  { %14844 = vst [vmem:[#allocation356_spill] sm:$0xff] %v10455_v57 }
 0x3c7   :  { %2696 = vrot.lane.b32.xlu1 %v763_v45, %s8702_s1  ;;  %v10465_v1 = vpop.permute.xlu0 %2458  ;;  %v768_v45 = vld [vmem:[#allocation2 + $0x10a] sm:$0xff] }
 0x3c8   :  { %14847 = vst [vmem:[#allocation359_spill] sm:$0xff] %v10465_v1  ;;  %v771_v1 = vld [vmem:[#allocation2 + $0x12a] sm:$0xff] }
 0x3c9   :  { %v10461_v19 = vpop.permute.xlu1 %2456  ;;  %2702 = vrot.lane.b32.xlu0 %v766_v13, %s8702_s1 }
 0x3ca   :  { %14846 = vst [vmem:[#allocation358_spill] sm:$0xff] %v10461_v19 }
 0x3cb   :  { %2700 = vrot.lane.b32.xlu1 %v765_v54, %s8702_s1  ;;  %v10471_v34 = vpop.permute.xlu0 %2462  ;;  %v770_v54 = vld [vmem:[#allocation2 + $0x122] sm:$0xff] }
 0x3cc   :  { %14849 = vst [vmem:[#allocation361_spill] sm:$0xff] %v10471_v34  ;;  %v773_v34 = vld [vmem:[#allocation2 + $0x142] sm:$0xff] }
 0x3cd   :  { %v10467_v37 = vpop.permute.xlu1 %2460  ;;  %2706 = vrot.lane.b32.xlu0 %v768_v45, %s8702_s1 }
 0x3ce   :  { %14848 = vst [vmem:[#allocation360_spill] sm:$0xff] %v10467_v37 }
 0x3cf   :  { %2704 = vrot.lane.b32.xlu1 %v767_v14, %s8702_s1  ;;  %v10477_v36 = vpop.permute.xlu0 %2466  ;;  %v772_v14 = vld [vmem:[#allocation2 + $0x13a] sm:$0xff] }
 0x3d0   :  { %14851 = vst [vmem:[#allocation363_spill] sm:$0xff] %v10477_v36  ;;  %v775_v36 = vld [vmem:[#allocation2 + $0x15a] sm:$0xff] }
 0x3d1   :  { %v10473_v57 = vpop.permute.xlu1 %2464  ;;  %2710 = vrot.lane.b32.xlu0 %v770_v54, %s8702_s1 }
 0x3d2   :  { %14850 = vst [vmem:[#allocation362_spill] sm:$0xff] %v10473_v57 }
 0x3d3   :  { %2708 = vrot.lane.b32.xlu1 %v769_v20, %s8702_s1  ;;  %v10483_v13 = vpop.permute.xlu0 %2470  ;;  %v774_v20 = vld [vmem:[#allocation2 + $0x152] sm:$0xff] }
 0x3d4   :  { %14853 = vst [vmem:[#allocation365_spill] sm:$0xff] %v10483_v13  ;;  %v777_v13 = vld [vmem:[#allocation2 + $0x172] sm:$0xff] }
 0x3d5   :  { %v10479_v19 = vpop.permute.xlu1 %2468  ;;  %2714 = vrot.lane.b32.xlu0 %v772_v14, %s8702_s1 }
 0x3d6   :  { %14852 = vst [vmem:[#allocation364_spill] sm:$0xff] %v10479_v19 }
 0x3d7   :  { %2712 = vrot.lane.b32.xlu1 %v771_v1, %s8702_s1  ;;  %v10489_v45 = vpop.permute.xlu0 %2474  ;;  %v776_v1 = vld [vmem:[#allocation2 + $0x16a] sm:$0xff] }
 0x3d8   :  { %14855 = vst [vmem:[#allocation367_spill] sm:$0xff] %v10489_v45  ;;  %v779_v45 = vld [vmem:[#allocation2 + $0x18a] sm:$0xff] }
 0x3d9   :  { %v10485_v37 = vpop.permute.xlu1 %2472  ;;  %2718 = vrot.lane.b32.xlu0 %v774_v20, %s8702_s1 }
 0x3da   :  { %14854 = vst [vmem:[#allocation366_spill] sm:$0xff] %v10485_v37 }
 0x3db   :  { %2716 = vrot.lane.b32.xlu1 %v773_v34, %s8702_s1  ;;  %v10495_v54 = vpop.permute.xlu0 %2478  ;;  %v778_v34 = vld [vmem:[#allocation2 + $0x182] sm:$0xff] }
 0x3dc   :  { %14857 = vst [vmem:[#allocation369_spill] sm:$0xff] %v10495_v54  ;;  %v781_v54 = vld [vmem:[#allocation2 + $0x1a2] sm:$0xff] }
 0x3dd   :  { %v10491_v57 = vpop.permute.xlu1 %2476  ;;  %2722 = vrot.lane.b32.xlu0 %v776_v1, %s8702_s1 }
 0x3de   :  { %14856 = vst [vmem:[#allocation368_spill] sm:$0xff] %v10491_v57 }
 0x3df   :  { %2720 = vrot.lane.b32.xlu1 %v775_v36, %s8702_s1  ;;  %v10501_v14 = vpop.permute.xlu0 %2482  ;;  %v780_v36 = vld [vmem:[#allocation2 + $0x19a] sm:$0xff] }
 0x3e0   :  { %14859 = vst [vmem:[#allocation371_spill] sm:$0xff] %v10501_v14  ;;  %v783_v14 = vld [vmem:[#allocation2 + $0x1ea] sm:$0xff] }
 0x3e1   :  { %v10497_v19 = vpop.permute.xlu1 %2480  ;;  %2726 = vrot.lane.b32.xlu0 %v778_v34, %s8702_s1 }
 0x3e2   :  { %14858 = vst [vmem:[#allocation370_spill] sm:$0xff] %v10497_v19 }
 0x3e3   :  { %2724 = vrot.lane.b32.xlu1 %v777_v13, %s8702_s1  ;;  %v10507_v20 = vpop.permute.xlu0 %2486  ;;  %v782_v13 = vld [vmem:[#allocation2 + $0x1e2] sm:$0xff] }
 0x3e4   :  { %14861 = vst [vmem:[#allocation373_spill] sm:$0xff] %v10507_v20  ;;  %v785_v20 = vld [vmem:[#allocation2 + $0x202] sm:$0xff] }
 0x3e5   :  { %v10503_v37 = vpop.permute.xlu1 %2484  ;;  %2730 = vrot.lane.b32.xlu0 %v780_v36, %s8702_s1 }
 0x3e6   :  { %14860 = vst [vmem:[#allocation372_spill] sm:$0xff] %v10503_v37 }
 0x3e7   :  { %2728 = vrot.lane.b32.xlu1 %v779_v45, %s8702_s1  ;;  %v10513_v1 = vpop.permute.xlu0 %2490  ;;  %v784_v45 = vld [vmem:[#allocation2 + $0x1fa] sm:$0xff] }
 0x3e8   :  { %14863 = vst [vmem:[#allocation375_spill] sm:$0xff] %v10513_v1  ;;  %v787_v1 = vld [vmem:[#allocation2 + $0x21a] sm:$0xff] }
 0x3e9   :  { %v10509_v57 = vpop.permute.xlu1 %2488  ;;  %2734 = vrot.lane.b32.xlu0 %v782_v13, %s8702_s1 }
 0x3ea   :  { %14862 = vst [vmem:[#allocation374_spill] sm:$0xff] %v10509_v57 }
 0x3eb   :  { %2732 = vrot.lane.b32.xlu1 %v781_v54, %s8702_s1  ;;  %v10519_v34 = vpop.permute.xlu0 %2494  ;;  %v786_v54 = vld [vmem:[#allocation2 + $0x212] sm:$0xff] }
 0x3ec   :  { %14865 = vst [vmem:[#allocation377_spill] sm:$0xff] %v10519_v34  ;;  %v789_v34 = vld [vmem:[#allocation2 + $0x232] sm:$0xff] }
 0x3ed   :  { %v10515_v19 = vpop.permute.xlu1 %2492  ;;  %2738 = vrot.lane.b32.xlu0 %v784_v45, %s8702_s1 }
 0x3ee   :  { %14864 = vst [vmem:[#allocation376_spill] sm:$0xff] %v10515_v19 }
 0x3ef   :  { %2736 = vrot.lane.b32.xlu1 %v783_v14, %s8702_s1  ;;  %v10525_v36 = vpop.permute.xlu0 %2498  ;;  %v788_v14 = vld [vmem:[#allocation2 + $0x22a] sm:$0xff] }
 0x3f0   :  { %14867 = vst [vmem:[#allocation379_spill] sm:$0xff] %v10525_v36  ;;  %v791_v36 = vld [vmem:[#allocation2 + $0x24a] sm:$0xff] }
 0x3f1   :  { %v10521_v37 = vpop.permute.xlu1 %2496  ;;  %2742 = vrot.lane.b32.xlu0 %v786_v54, %s8702_s1 }
 0x3f2   :  { %14866 = vst [vmem:[#allocation378_spill] sm:$0xff] %v10521_v37 }
 0x3f3   :  { %2740 = vrot.lane.b32.xlu1 %v785_v20, %s8702_s1  ;;  %v10531_v13 = vpop.permute.xlu0 %2502  ;;  %v790_v20 = vld [vmem:[#allocation2 + $0x242] sm:$0xff] }
 0x3f4   :  { %14869 = vst [vmem:[#allocation381_spill] sm:$0xff] %v10531_v13  ;;  %v793_v13 = vld [vmem:[#allocation2 + $0x262] sm:$0xff] }
 0x3f5   :  { %v10527_v57 = vpop.permute.xlu1 %2500  ;;  %2746 = vrot.lane.b32.xlu0 %v788_v14, %s8702_s1 }
 0x3f6   :  { %14868 = vst [vmem:[#allocation380_spill] sm:$0xff] %v10527_v57 }
 0x3f7   :  { %2744 = vrot.lane.b32.xlu1 %v787_v1, %s8702_s1  ;;  %v10537_v45 = vpop.permute.xlu0 %2506  ;;  %v792_v1 = vld [vmem:[#allocation2 + $0x25a] sm:$0xff] }
 0x3f8   :  { %14871 = vst [vmem:[#allocation383_spill] sm:$0xff] %v10537_v45  ;;  %v795_v45 = vld [vmem:[#allocation2 + $0x27a] sm:$0xff] }
 0x3f9   :  { %v10533_v19 = vpop.permute.xlu1 %2504  ;;  %2750 = vrot.lane.b32.xlu0 %v790_v20, %s8702_s1 }
 0x3fa   :  { %14870 = vst [vmem:[#allocation382_spill] sm:$0xff] %v10533_v19 }
 0x3fb   :  { %2748 = vrot.lane.b32.xlu1 %v789_v34, %s8702_s1  ;;  %v10543_v54 = vpop.permute.xlu0 %2510  ;;  %v794_v34 = vld [vmem:[#allocation2 + $0x272] sm:$0xff] }
 0x3fc   :  { %14873 = vst [vmem:[#allocation385_spill] sm:$0xff] %v10543_v54  ;;  %v797_v54 = vld [vmem:[#allocation2 + $0x292] sm:$0xff] }
 0x3fd   :  { %v10539_v37 = vpop.permute.xlu1 %2508  ;;  %2754 = vrot.lane.b32.xlu0 %v792_v1, %s8702_s1 }
 0x3fe   :  { %14872 = vst [vmem:[#allocation384_spill] sm:$0xff] %v10539_v37 }
 0x3ff   :  { %2752 = vrot.lane.b32.xlu1 %v791_v36, %s8702_s1  ;;  %v10549_v14 = vpop.permute.xlu0 %2514  ;;  %v796_v36 = vld [vmem:[#allocation2 + $0x28a] sm:$0xff] }
 0x400   :  { %14875 = vst [vmem:[#allocation387_spill] sm:$0xff] %v10549_v14  ;;  %v799_v14 = vld [vmem:[#allocation2 + $0x2aa] sm:$0xff] }
 0x401   :  { %v10545_v57 = vpop.permute.xlu1 %2512  ;;  %2758 = vrot.lane.b32.xlu0 %v794_v34, %s8702_s1 }
 0x402   :  { %14874 = vst [vmem:[#allocation386_spill] sm:$0xff] %v10545_v57 }
 0x403   :  { %2756 = vrot.lane.b32.xlu1 %v793_v13, %s8702_s1  ;;  %v10555_v20 = vpop.permute.xlu0 %2518  ;;  %v798_v13 = vld [vmem:[#allocation2 + $0x2a2] sm:$0xff] }
 0x404   :  { %14877 = vst [vmem:[#allocation389_spill] sm:$0xff] %v10555_v20  ;;  %v801_v20 = vld [vmem:[#allocation2 + $0x2c2] sm:$0xff] }
 0x405   :  { %v10551_v19 = vpop.permute.xlu1 %2516  ;;  %2762 = vrot.lane.b32.xlu0 %v796_v36, %s8702_s1 }
 0x406   :  { %14876 = vst [vmem:[#allocation388_spill] sm:$0xff] %v10551_v19 }
 0x407   :  { %2760 = vrot.lane.b32.xlu1 %v795_v45, %s8702_s1  ;;  %v10561_v1 = vpop.permute.xlu0 %2522  ;;  %v800_v45 = vld [vmem:[#allocation2 + $0x2ba] sm:$0xff] }
 0x408   :  { %14879 = vst [vmem:[#allocation391_spill] sm:$0xff] %v10561_v1  ;;  %v803_v1 = vld [vmem:[#allocation2 + $0x2da] sm:$0xff] }
 0x409   :  { %v10557_v37 = vpop.permute.xlu1 %2520  ;;  %2766 = vrot.lane.b32.xlu0 %v798_v13, %s8702_s1  ;;  %v238_v13 = vld [vmem:[#allocation2 + $0x8] sm:$0xff] }
 0x40a   :  { %14878 = vst [vmem:[#allocation390_spill] sm:$0xff] %v10557_v37 }
 0x40b   :  { %2764 = vrot.lane.b32.xlu1 %v797_v54, %s8702_s1  ;;  %v10567_v34 = vpop.permute.xlu0 %2526  ;;  %v802_v54 = vld [vmem:[#allocation2 + $0x2d2] sm:$0xff] }
 0x40c   :  { %14881 = vst [vmem:[#allocation393_spill] sm:$0xff] %v10567_v34 }
 0x40d   :  { %v10563_v57 = vpop.permute.xlu1 %2524  ;;  %2770 = vrot.lane.b32.xlu0 %v800_v45, %s8702_s1  ;;  %v8573_v45 = vld [vmem:[#allocation2 + $0x18] sm:$0xff] }
 0x40e   :  { %14880 = vst [vmem:[#allocation392_spill] sm:$0xff] %v10563_v57  ;;  %v237_v57 = vld [vmem:[#allocation2] sm:$0xff] }
 0x40f   :  { %2768 = vrot.lane.b32.xlu1 %v799_v14, %s8702_s1  ;;  %v10573_v36 = vpop.permute.xlu0 %2530  ;;  %v804_v14 = vld [vmem:[#allocation2 + $0x2ea] sm:$0xff] }
 0x410   :  { %14883 = vst [vmem:[#allocation395_spill] sm:$0xff] %v10573_v36  ;;  %v2864_v36 = vsel %vm20_vm0, %v8573_v45, %v9206_v58  ;;  %v8577_v58 = vld [vmem:[#allocation2 + $0x48] sm:$0xff] }
 0x411   :  { %v10569_v19 = vpop.permute.xlu1 %2528  ;;  %2774 = vrot.lane.b32.xlu0 %v802_v54, %s8702_s1  ;;  %v8574_v54 = vld [vmem:[#allocation2 + $0x20] sm:$0xff] }
 0x412   :  { %14882 = vst [vmem:[#allocation394_spill] sm:$0xff] %v10569_v19  ;;  %v805_v19 = vld [vmem:[#allocation2 + $0x2f2] sm:$0xff] }
 0x413   :  { %2772 = vrot.lane.b32.xlu1 %v801_v20, %s8702_s1  ;;  %v10579_v34 = vpop.permute.xlu0 %2534  ;;  %v2862_v20 = vsel %vm20_vm0, %v237_v57, %v9204_v56  ;;  %v2867_v56 = vsel %vm20_vm0, %v8576_v29, %v9218_v2  ;;  %v8578_v57 = vld [vmem:[#allocation2 + $0x50] sm:$0xff]  ;;  %v806_v2 = vld [vmem:[#allocation2 + $0x302] sm:$0xff] }
 0x414   :  { %14885 = vst [vmem:[#allocation397_spill] sm:$0xff] %v10579_v34  ;;  %v2866_v34 = vsel %vm20_vm0, %v8575_v7, %v9216_v0  ;;  %v2927_v0 = vsel %vm2926_vm3, %v2862_v20, %v9404_v27  ;;  %v8579_v7 = vld [vmem:[#allocation2 + $0x60] sm:$0xff]  ;;  %v8580_v27 = vld [vmem:[#allocation2 + $0x68] sm:$0xff] }
 0x415   :  { %v10575_v37 = vpop.permute.xlu1 %2532  ;;  %2778 = vrot.lane.b32.xlu0 %v804_v14, %s8702_s1  ;;  %v10609_v29 = vsel %vm20_vm0, %v8579_v7, %v9228_v8  ;;  %v807_v14 = vld [vmem:[#allocation2 + $0x30a] sm:$0xff]  ;;  %v811_v7 = vld [vmem:[#allocation2 + $0x33a] sm:$0xff] }
 0x416   :  { %14884 = vst [vmem:[#allocation396_spill] sm:$0xff] %v10575_v37  ;;  %v2863_v37 = vsel %vm20_vm0, %v238_v13, %v9210_v60  ;;  %v10598_v60 = vsel %vm20_vm0, %v8577_v58, %v9222_v4  ;;  %v2992_v13 = vsel %vm2991_vm4, %v2927_v0, %v9604_v43 }
 0x417   :  { %2776 = vrot.lane.b32.xlu1 %v803_v1, %s8702_s1  ;;  %v2865_v1 = vsel %vm20_vm0, %v8574_v54, %v9212_v62  ;;  %v10602_v62 = vsel %vm20_vm0, %v8578_v57, %v9224_v6  ;;  %v2928_v4 = vsel %vm2926_vm3, %v2863_v37, %v9406_v39  ;;  %v10615_v6 = vpop.permute.xlu0 %2538  ;;  %v3057_v8 = vsel %vm3056_vm5, %v2992_v13, %v9796_v30  ;;  %v8581_v37 = vld [vmem:[#allocation2 + $0x78] sm:$0xff] }
 0x418   :  { %v2993_v20 = vsel %vm2991_vm4, %v2928_v4, %v9606_v5  ;;  %v10629_v43 = vsel %vm20_vm0, %v8581_v37, %v9234_v12  ;;  %v2929_v5 = vsel %vm2926_vm3, %v2864_v36, %v9418_v63  ;;  %v808_v12 = vld [vmem:[#allocation2 + $0x31a] sm:$0xff]  ;;  %v809_v36 = vld [vmem:[#allocation2 + $0x322] sm:$0xff] }
 0x419   :  { %v10587_v28 = vpop.permute.xlu1 %2536  ;;  %v3058_v45 = vsel %vm3056_vm5, %v2993_v20, %v9798_v25  ;;  %2782 = vrot.lane.b32.xlu0 %v806_v2, %s8702_s1  ;;  %v2930_v25 = vsel %vm2926_vm3, %v2865_v1, %v9420_v11  ;;  %v14886_v20 = vld [vmem:[#allocation168_spill] sm:$0xff]  ;;  %v14887_v37 = vld [vmem:[#allocation342_spill] sm:$0xff] }
 0x41a   :  { %v3123_v30 = vsel %vm3121_vm6, %v3058_v45, %v9990_v52  ;;  %v14888_v45 = vld [vmem:[#allocation169_spill] sm:$0xff] }
 0x41b   :  { %2780 = vrot.lane.b32.xlu1 %v805_v19, %s8702_s1  ;;  %v10619_v19 = vsel %vm20_vm0, %v8580_v27, %v9230_v10  ;;  %v3122_v10 = vsel %vm3121_vm6, %v3057_v8, %v9988_v46  ;;  %v2994_v46 = vsel %vm2991_vm4, %v2929_v5, %v9610_v50  ;;  %v3188_v58 = vsel %vm3186_vm7, %v3123_v30, %v10182_v40  ;;  %v2671_v52 = vpop.permute.xlu0 %2670 }
 0x41c   :  { %v3187_v54 = vsel %vm3186_vm7, %v3122_v10, %v10180_v17  ;;  %v2995_v17 = vsel %vm2991_vm4, %v2930_v25, %v9612_v48  ;;  %v3059_v57 = vsel %vm3056_vm5, %v2994_v46, %v9802_v21  ;;  %v3253_v11 = vsel %vm3251_vm8, %v3188_v58, %v10401_v16  ;;  %v14889_v10 = vld [vmem:[#allocation226_spill] sm:$0xff]  ;;  %v14892_v25 = vld [vmem:[#allocation284_spill] sm:$0xff]  ;;  %v14893_v58 = vld [vmem:[#allocation57_spill] sm:$0xff] }
 0x41d   :  { %v10625_v39 = vpop.permute.xlu1 %2540  ;;  %v3252_v63 = vsel %vm3251_vm8, %v3187_v54, %v10396_v38  ;;  %v3060_v40 = vsel %vm3056_vm5, %v2995_v17, %v9804_v32  ;;  %v3124_v38 = vsel %vm3121_vm6, %v3059_v57, %v9994_v53  ;;  %2786 = vrot.lane.b32.xlu0 %v808_v12, %s8702_s1  ;;  %v2931_v48 = vsel %vm2926_vm3, %v2866_v34, %v9424_v3  ;;  %v810_v32 = vld [vmem:[#allocation2 + $0x332] sm:$0xff]  ;;  %v14891_v54 = vld [vmem:[#allocation227_spill] sm:$0xff] }
 0x41e   :  { %v3317_v50 = vsel %vm3316_vm9, %v3252_v63, %v2671_v52  ;;  %v3125_v21 = vsel %vm3121_vm6, %v3060_v40, %v9996_v24  ;;  %v3189_v16 = vsel %vm3186_vm7, %v3124_v38, %v10186_v15  ;;  %v2932_v53 = vsel %vm2926_vm3, %v2867_v56, %v9426_v31  ;;  %v14894_v52 = vld [vmem:[#allocation112_spill] sm:$0xff]  ;;  %v14895_v17 = vld [vmem:[#allocation285_spill] sm:$0xff]  ;;  %v14896_v57 = vld [vmem:[#allocation343_spill] sm:$0xff] }
 0x41f   :  { %2784 = vrot.lane.b32.xlu1 %v807_v14, %s8702_s1  ;;  %8322 = vmatprep.mubr.msk.f32.mxu0 %vm3397_vm10, %v3317_v50  ;;  %v2996_v2 = vsel %vm2991_vm4, %v2931_v48, %v9616_v35  ;;  %v3190_v3 = vsel %vm3186_vm7, %v3125_v21, %v10188_v59  ;;  %v3254_v24 = vsel %vm3251_vm8, %v3189_v16, %v10405_v9  ;;  %v2675_v34 = vpop.permute.xlu0 %2674  ;;  %v14897_v50 = vld [vmem:[#allocation113_spill] sm:$0xff]  ;;  %v14898_v38 = vld [vmem:[#allocation170_spill] sm:$0xff]  ;;  %v14899_v48 = vld [vmem:[#allocation344_spill] sm:$0xff] }
 0x420   :  { %v2997_v15 = vsel %vm2991_vm4, %v2932_v53, %v9618_v61  ;;  %v3061_v4 = vsel %vm3056_vm5, %v2996_v2, %v9808_v42  ;;  %v3255_v31 = vsel %vm3251_vm8, %v3190_v3, %v10407_v22  ;;  %v3319_v56 = vsel %vm3316_vm9, %v3254_v24, %v2675_v34  ;;  %v14900_v53 = vld [vmem:[#allocation3_spill] sm:$0xff]  ;;  %v14902_v34 = vld [vmem:[#allocation228_spill] sm:$0xff] }
 0x421   :  { %v2673_v1 = vpop.permute.xlu1 %2672  ;;  %v3062_v59 = vsel %vm3056_vm5, %v2997_v15, %v9810_v33  ;;  %v3126_v9 = vsel %vm3121_vm6, %v3061_v4, %v10000_v26  ;;  %2790 = vrot.lane.b32.xlu0 %v810_v32, %s8702_s1  ;;  %v2933_v61 = vsel %vm2926_vm3, %v10598_v60, %v9430_v51  ;;  %v812_v33 = vld [vmem:[#allocation2 + $0x34a] sm:$0xff]  ;;  %v2934_v26 = vsel %vm2926_vm3, %v10602_v62, %v9432_v23  ;;  %v8582_v32 = vld [vmem:[#allocation2 + $0x80] sm:$0xff] }
 0x422   :  { %v3318_v0 = vsel %vm3316_vm9, %v3253_v11, %v2673_v1  ;;  %v3127_v42 = vsel %vm3121_vm6, %v3062_v59, %v10002_v49  ;;  %v3191_v22 = vsel %vm3186_vm7, %v3126_v9, %v10192_v41  ;;  %v2998_v14 = vsel %vm2991_vm4, %v2933_v61, %v9622_v47  ;;  %v813_v41 = vld [vmem:[#allocation2 + $0x352] sm:$0xff]  ;;  %v14901_v3 = vld [vmem:[#allocation171_spill] sm:$0xff] }
 0x423   :  { %2788 = vrot.lane.b32.xlu1 %v809_v36, %s8702_s1  ;;  %8323 = vmatmul.mubr.msk.f32.vlgmr.msra.gmra.mrb[0].mxu0 %vm3397_vm10, %v3318_v0  ;;  %v3192_v51 = vsel %vm3186_vm7, %v3127_v42, %v10194_v55  ;;  %v3256_v49 = vsel %vm3251_vm8, %v3191_v22, %v10411_v18  ;;  %v2679_v60 = vpop.permute.xlu0 %2678  ;;  %v2999_v27 = vsel %vm2991_vm4, %v2934_v26, %v9624_v44  ;;  %v14890_v44 = vld [vmem:[#allocation56_spill] sm:$0xff]  ;;  %v8583_v4 = vld [vmem:[#allocation2 + $0x90] sm:$0xff]  ;;  %v14906_v61 = vld [vmem:[#allocation286_spill] sm:$0xff] }
 0x424   :  { %8325 = vmatprep.mubr.msk.f32.mxu0 %vm3397_vm10, %v3319_v56  ;;  %v3063_v8 = vsel %vm3056_vm5, %v2998_v14, %v14886_v20  ;;  %v3257_v23 = vsel %vm3251_vm8, %v3192_v51, %v14887_v37  ;;  %v3321_v62 = vsel %vm3316_vm9, %v3256_v49, %v2679_v60  ;;  %v3064_v55 = vsel %vm3056_vm5, %v2999_v27, %v14888_v45  ;;  %v14905_v9 = vld [vmem:[#allocation229_spill] sm:$0xff]  ;;  %v14907_v22 = vld [vmem:[#allocation59_spill] sm:$0xff]  ;;  %v14908_v26 = vld [vmem:[#allocation114_spill] sm:$0xff] }
 0x425   :  { %v2677_v35 = vpop.permute.xlu1 %2676  ;;  %v3128_v18 = vsel %vm3121_vm6, %v3063_v8, %v14889_v10  ;;  %2794 = vrot.lane.b32.xlu0 %v812_v33, %s8702_s1  ;;  %v2935_v30 = vsel %vm2926_vm3, %v10609_v29, %v14890_v44  ;;  %v3129_v12 = vsel %vm3121_vm6, %v3064_v55, %v14891_v54  ;;  %v2936_v63 = vsel %vm2926_vm3, %v10619_v19, %v14893_v58  ;;  %v14909_v51 = vld [vmem:[#allocation287_spill] sm:$0xff]  ;;  %v14910_v60 = vld [vmem:[#allocation345_spill] sm:$0xff]  ;;  %v14912_v8 = vld [vmem:[#allocation172_spill] sm:$0xff] }
 0x426   :  { %v3320_v13 = vsel %vm3316_vm9, %v3255_v31, %v2677_v35  ;;  %v3193_v46 = vsel %vm3186_vm7, %v3128_v18, %v14892_v25  ;;  %v3000_v36 = vsel %vm2991_vm4, %v2935_v30, %v14894_v52  ;;  %v3194_v29 = vsel %vm3186_vm7, %v3129_v12, %v14895_v17  ;;  %v14903_v31 = vld [vmem:[#allocation4_spill] sm:$0xff]  ;;  %v14904_v35 = vld [vmem:[#allocation58_spill] sm:$0xff]  ;;  %v14911_v27 = vld [vmem:[#allocation115_spill] sm:$0xff] }
 0x427   :  { %2792 = vrot.lane.b32.xlu1 %v811_v7, %s8702_s1  ;;  %8326 = vmatmul.mubr.msk.f32.gmra.mrb[2].mxu0 %vm3397_vm10, %v3320_v13  ;;  %v3258_v11 = vsel %vm3251_vm8, %v3193_v46, %v14896_v57  ;;  %v2683_v1 = vpop.permute.xlu0 %2682  ;;  %v3001_v40 = vsel %vm2991_vm4, %v2936_v63, %v14897_v50  ;;  %v3065_v0 = vsel %vm3056_vm5, %v3000_v36, %v14898_v38  ;;  %v8584_v55 = vld [vmem:[#allocation2 + $0x98] sm:$0xff]  ;;  %v14914_v10 = vld [vmem:[#allocation5_spill] sm:$0xff]  ;;  %v8585_v25 = vld [vmem:[#allocation2 + $0xa8] sm:$0xff] }
 0x428   :  { %8328 = vmatprep.mubr.msk.f32.mxu0 %vm3397_vm10, %v3321_v62  ;;  %v3259_v21 = vsel %vm3251_vm8, %v3194_v29, %v14899_v48  ;;  %v3323_v19 = vsel %vm3316_vm9, %v3258_v11, %v2683_v1  ;;  %v2873_v2 = vsel %vm20_vm0, %v8582_v32, %v14900_v53  ;;  %v3066_v24 = vsel %vm3056_vm5, %v3001_v40, %v14901_v3  ;;  %v14916_v30 = vld [vmem:[#allocation230_spill] sm:$0xff]  ;;  %v14918_v63 = vld [vmem:[#allocation60_spill] sm:$0xff]  ;;  %v14919_v36 = vld [vmem:[#allocation231_spill] sm:$0xff] }
 0x429   :  { %v2681_v47 = vpop.permute.xlu1 %2680  ;;  %v3130_v7 = vsel %vm3121_vm6, %v3065_v0, %v14902_v34  ;;  %v2874_v56 = vsel %vm20_vm0, %v8583_v4, %v14903_v31  ;;  %v2937_v59 = vsel %vm2926_vm3, %v10629_v43, %v14904_v35  ;;  %v3131_v13 = vsel %vm3121_vm6, %v3066_v24, %v14905_v9  ;;  %v14917_v46 = vld [vmem:[#allocation6_spill] sm:$0xff]  ;;  %v14920_v29 = vld [vmem:[#allocation288_spill] sm:$0xff]  ;;  %v14921_v11 = vld [vmem:[#allocation61_spill] sm:$0xff] }
 0x42a   :  { %v3322_v5 = vsel %vm3316_vm9, %v3257_v23, %v2681_v47  ;;  %v3195_v42 = vsel %vm3186_vm7, %v3130_v7, %v14906_v61  ;;  %v2938_v33 = vsel %vm2926_vm3, %v2873_v2, %v14907_v22  ;;  %v3002_v14 = vsel %vm2991_vm4, %v2937_v59, %v14908_v26  ;;  %v14913_v23 = vld [vmem:[#allocation346_spill] sm:$0xff]  ;;  %v14922_v50 = vld [vmem:[#allocation116_spill] sm:$0xff]  ;;  %v14923_v38 = vld [vmem:[#allocation289_spill] sm:$0xff] }
 0x42b   :  { %2796 = vrot.lane.b32.xlu1 %v813_v41, %s8702_s1  ;;  %8329 = vmatmul.mubr.msk.f32.gmra.mrb[4].mxu0 %vm3397_vm10, %v3322_v5  ;;  %v3196_v49 = vsel %vm3186_vm7, %v3131_v13, %v14909_v51  ;;  %v3260_v43 = vsel %vm3251_vm8, %v3195_v42, %v14910_v60  ;;  %v2687_v41 = vpop.permute.xlu0 %2686  ;;  %v3003_v20 = vsel %vm2991_vm4, %v2938_v33, %v14911_v27  ;;  %v14915_v5 = vld [vmem:[#allocation173_spill] sm:$0xff]  ;;  %v14924_v48 = vld [vmem:[#allocation347_spill] sm:$0xff]  ;;  %v14926_v53 = vld [vmem:[#allocation174_spill] sm:$0xff] }
 0x42c   :  { %8331 = vmatprep.mubr.msk.f32.mxu0 %vm3397_vm10, %v3323_v19  ;;  %v3067_v37 = vsel %vm3056_vm5, %v3002_v14, %v14912_v8  ;;  %v3261_v62 = vsel %vm3251_vm8, %v3196_v49, %v14913_v23  ;;  %v3325_v47 = vsel %vm3316_vm9, %v3260_v43, %v2687_v41  ;;  %v2875_v18 = vsel %vm20_vm0, %v8584_v55, %v14914_v10  ;;  %v14927_v3 = vld [vmem:[#allocation348_spill] sm:$0xff]  ;;  %v14928_v4 = vld [vmem:[#allocation7_spill] sm:$0xff]  ;;  %v14932_v33 = vld [vmem:[#allocation62_spill] sm:$0xff] }
 0x42d   :  { %v2685_v16 = vpop.permute.xlu1 %2684  ;;  %v3068_v44 = vsel %vm3056_vm5, %v3003_v20, %v14915_v5  ;;  %v3132_v54 = vsel %vm3121_vm6, %v3067_v37, %v14916_v30  ;;  %v2876_v58 = vsel %vm20_vm0, %v8585_v25, %v14917_v46  ;;  %v2939_v52 = vsel %vm2926_vm3, %v2874_v56, %v14918_v63  ;;  %v14929_v56 = vld [vmem:[#allocation175_spill] sm:$0xff]  ;;  %v14930_v59 = vld [vmem:[#allocation232_spill] sm:$0xff]  ;;  %v14933_v14 = vld [vmem:[#allocation233_spill] sm:$0xff] }
 0x42e   :  { %v3324_v15 = vsel %vm3316_vm9, %v3259_v21, %v2685_v16  ;;  %v3133_v17 = vsel %vm3121_vm6, %v3068_v44, %v14919_v36  ;;  %v3197_v57 = vsel %vm3186_vm7, %v3132_v54, %v14920_v29  ;;  %v2940_v1 = vsel %vm2926_vm3, %v2875_v18, %v14921_v11  ;;  %v14925_v16 = vld [vmem:[#allocation117_spill] sm:$0xff]  ;;  %v8587_v61 = vld [vmem:[#allocation2 + $0xc0] sm:$0xff]  ;;  %v14931_v42 = vld [vmem:[#allocation8_spill] sm:$0xff] }
 0x42f   :  { %8332 = vmatmul.mubr.msk.f32.gmra.mrb[6].mxu0 %vm3397_vm10, %v3324_v15  ;;  %v3004_v40 = vsel %vm2991_vm4, %v2939_v52, %v14922_v50  ;;  %v3198_v0 = vsel %vm3186_vm7, %v3133_v17, %v14923_v38  ;;  %v3262_v21 = vsel %vm3251_vm8, %v3197_v57, %v14924_v48  ;;  %v2691_v19 = vpop.permute.xlu0 %2690  ;;  %v3005_v32 = vsel %vm2991_vm4, %v2940_v1, %v14925_v16  ;;  %v8586_v15 = vld [vmem:[#allocation2 + $0xb0] sm:$0xff]  ;;  %v14934_v49 = vld [vmem:[#allocation290_spill] sm:$0xff]  ;;  %v14935_v43 = vld [vmem:[#allocation63_spill] sm:$0xff] }
 0x430   :  { %8334 = vmatprep.mubr.msk.f32.mxu0 %vm3397_vm10, %v3325_v47  ;;  %v3069_v2 = vsel %vm3056_vm5, %v3004_v40, %v14926_v53  ;;  %v3263_v24 = vsel %vm3251_vm8, %v3198_v0, %v14927_v3  ;;  %v3327_v34 = vsel %vm3316_vm9, %v3262_v21, %v2691_v19  ;;  %v2877_v31 = vsel %vm20_vm0, %v8586_v15, %v14928_v4  ;;  %v14936_v27 = vld [vmem:[#allocation118_spill] sm:$0xff]  ;;  %v14937_v8 = vld [vmem:[#allocation291_spill] sm:$0xff]  ;;  %v14938_v23 = vld [vmem:[#allocation349_spill] sm:$0xff] }
 0x431   :  { %v2689_v45 = vpop.permute.xlu1 %2688  ;;  %v3070_v35 = vsel %vm3056_vm5, %v3005_v32, %v14929_v56  ;;  %v3134_v9 = vsel %vm3121_vm6, %v3069_v2, %v14930_v59  ;;  %v2878_v22 = vsel %vm20_vm0, %v8587_v61, %v14931_v42  ;;  %v2941_v26 = vsel %vm2926_vm3, %v2876_v58, %v14932_v33  ;;  %v14940_v10 = vld [vmem:[#allocation176_spill] sm:$0xff]  ;;  %v14941_v5 = vld [vmem:[#allocation350_spill] sm:$0xff]  ;;  %v14942_v25 = vld [vmem:[#allocation9_spill] sm:$0xff] }
 0x432   :  { %v3326_v12 = vsel %vm3316_vm9, %v3261_v62, %v2689_v45  ;;  %v3135_v51 = vsel %vm3121_vm6, %v3070_v35, %v14933_v14  ;;  %v3199_v60 = vsel %vm3186_vm7, %v3134_v9, %v14934_v49  ;;  %v2942_v41 = vsel %vm2926_vm3, %v2877_v31, %v14935_v43  ;;  %v14939_v45 = vld [vmem:[#allocation119_spill] sm:$0xff]  ;;  %v14943_v58 = vld [vmem:[#allocation177_spill] sm:$0xff]  ;;  %v14944_v52 = vld [vmem:[#allocation234_spill] sm:$0xff] }
 0x433   :  { %8335 = vmatmul.mubr.msk.f32.gmra.mrb[8].mxu0 %vm3397_vm10, %v3326_v12  ;;  %v3006_v20 = vsel %vm2991_vm4, %v2941_v26, %v14936_v27  ;;  %v3200_v37 = vsel %vm3186_vm7, %v3135_v51, %v14937_v8  ;;  %v3264_v62 = vsel %vm3251_vm8, %v3199_v60, %v14938_v23  ;;  %v2695_v47 = vpop.permute.xlu0 %2694  ;;  %v3007_v55 = vsel %vm2991_vm4, %v2942_v41, %v14939_v45  ;;  %v8588_v12 = vld [vmem:[#allocation2 + $0xc8] sm:$0xff]  ;;  %v8589_v29 = vld [vmem:[#allocation2 + $0xd8] sm:$0xff]  ;;  %v14947_v40 = vld [vmem:[#allocation235_spill] sm:$0xff] }
 0x434   :  { %8337 = vmatprep.mubr.msk.f32.mxu0 %vm3397_vm10, %v3327_v34  ;;  %v3071_v18 = vsel %vm3056_vm5, %v3006_v20, %v14940_v10  ;;  %v3265_v44 = vsel %vm3251_vm8, %v3200_v37, %v14941_v5  ;;  %v3329_v30 = vsel %vm3316_vm9, %v3264_v62, %v2695_v47  ;;  %v2879_v46 = vsel %vm20_vm0, %v8588_v12, %v14942_v25  ;;  %v14945_v57 = vld [vmem:[#allocation10_spill] sm:$0xff]  ;;  %v14946_v1 = vld [vmem:[#allocation64_spill] sm:$0xff]  ;;  %v14949_v21 = vld [vmem:[#allocation65_spill] sm:$0xff] }
 0x435   :  { %v2693_v7 = vpop.permute.xlu1 %2692  ;;  %v3072_v63 = vsel %vm3056_vm5, %v3007_v55, %v14943_v58  ;;  %v3136_v36 = vsel %vm3121_vm6, %v3071_v18, %v14944_v52  ;;  %v2880_v11 = vsel %vm20_vm0, %v8589_v29, %v14945_v57  ;;  %v2943_v50 = vsel %vm2926_vm3, %v2878_v22, %v14946_v1  ;;  %v14948_v0 = vld [vmem:[#allocation292_spill] sm:$0xff]  ;;  %v14951_v53 = vld [vmem:[#allocation293_spill] sm:$0xff]  ;;  %v14952_v3 = vld [vmem:[#allocation351_spill] sm:$0xff] }
 0x436   :  { %v3328_v13 = vsel %vm3316_vm9, %v3263_v24, %v2693_v7  ;;  %v3137_v38 = vsel %vm3121_vm6, %v3072_v63, %v14947_v40  ;;  %v3201_v48 = vsel %vm3186_vm7, %v3136_v36, %v14948_v0  ;;  %v2944_v19 = vsel %vm2926_vm3, %v2879_v46, %v14949_v21  ;;  %v14950_v16 = vld [vmem:[#allocation120_spill] sm:$0xff]  ;;  %v14953_v7 = vld [vmem:[#allocation121_spill] sm:$0xff]  ;;  %v14954_v4 = vld [vmem:[#allocation178_spill] sm:$0xff] }
 0x437   :  { %8338 = vmatmul.mubr.msk.f32.gmra.mrb[10].mxu0 %vm3397_vm10, %v3328_v13  ;;  %v3008_v32 = vsel %vm2991_vm4, %v2943_v50, %v14950_v16  ;;  %v3202_v2 = vsel %vm3186_vm7, %v3137_v38, %v14951_v53  ;;  %v3266_v24 = vsel %vm3251_vm8, %v3201_v48, %v14952_v3  ;;  %v2699_v34 = vpop.permute.xlu0 %2698  ;;  %v3009_v15 = vsel %vm2991_vm4, %v2944_v19, %v14953_v7  ;;  %v14955_v56 = vld [vmem:[#allocation352_spill] sm:$0xff]  ;;  %v8590_v13 = vld [vmem:[#allocation2 + $0xe0] sm:$0xff]  ;;  %v8591_v49 = vld [vmem:[#allocation2 + $0xf0] sm:$0xff] }
 0x438   :  { %8340 = vmatprep.mubr.msk.f32.mxu0 %vm3397_vm10, %v3329_v30  ;;  %v3073_v31 = vsel %vm3056_vm5, %v3008_v32, %v14954_v4  ;;  %v3267_v35 = vsel %vm3251_vm8, %v3202_v2, %v14955_v56  ;;  %v3331_v59 = vsel %vm3316_vm9, %v3266_v24, %v2699_v34  ;;  %v14956_v61 = vld [vmem:[#allocation11_spill] sm:$0xff]  ;;  %v14958_v26 = vld [vmem:[#allocation236_spill] sm:$0xff]  ;;  %v14960_v41 = vld [vmem:[#allocation66_spill] sm:$0xff] }
 0x439   :  { %v2697_v54 = vpop.permute.xlu1 %2696  ;;  %v2881_v42 = vsel %vm20_vm0, %v8590_v13, %v14956_v61  ;;  %v14957_v22 = vld [vmem:[#allocation179_spill] sm:$0xff]  ;;  %v3138_v14 = vsel %vm3121_vm6, %v3073_v31, %v14958_v26  ;;  %v14959_v60 = vld [vmem:[#allocation12_spill] sm:$0xff]  ;;  %v2945_v27 = vsel %vm2926_vm3, %v2880_v11, %v14960_v41  ;;  %v14961_v20 = vld [vmem:[#allocation237_spill] sm:$0xff] }
 0x43a   :  { %v3330_v17 = vsel %vm3316_vm9, %v3265_v44, %v2697_v54  ;;  %v3074_v33 = vsel %vm3056_vm5, %v3009_v15, %v14957_v22  ;;  %v2882_v43 = vsel %vm20_vm0, %v8591_v49, %v14959_v60  ;;  %v14962_v37 = vld [vmem:[#allocation294_spill] sm:$0xff]  ;;  %v14963_v62 = vld [vmem:[#allocation67_spill] sm:$0xff]  ;;  %v14966_v5 = vld [vmem:[#allocation353_spill] sm:$0xff] }
 0x43b   :  { %8341 = vmatmul.mubr.msk.f32.gmra.mrb[12].mxu0 %vm3397_vm10, %v3330_v17  ;;  %v3139_v8 = vsel %vm3121_vm6, %v3074_v33, %v14961_v20  ;;  %v3203_v23 = vsel %vm3186_vm7, %v3138_v14, %v14962_v37  ;;  %v2946_v47 = vsel %vm2926_vm3, %v2881_v42, %v14963_v62  ;;  %v14964_v45 = vld [vmem:[#allocation122_spill] sm:$0xff]  ;;  %v14965_v10 = vld [vmem:[#allocation295_spill] sm:$0xff]  ;;  %v2703_v30 = vpop.permute.xlu0 %2702  ;;  %v14968_v25 = vld [vmem:[#allocation180_spill] sm:$0xff] }
 0x43c   :  { %8343 = vmatprep.mubr.msk.f32.mxu0 %vm3397_vm10, %v3331_v59  ;;  %v3010_v55 = vsel %vm2991_vm4, %v2945_v27, %v14964_v45  ;;  %v3204_v18 = vsel %vm3186_vm7, %v3139_v8, %v14965_v10  ;;  %v3268_v44 = vsel %vm3251_vm8, %v3203_v23, %v14966_v5  ;;  %v14967_v54 = vld [vmem:[#allocation123_spill] sm:$0xff]  ;;  %v14969_v58 = vld [vmem:[#allocation354_spill] sm:$0xff]  ;;  %v14970_v29 = vld [vmem:[#allocation13_spill] sm:$0xff] }
 0x43d   :  { %v2701_v9 = vpop.permute.xlu1 %2700  ;;  %v3011_v12 = vsel %vm2991_vm4, %v2946_v47, %v14967_v54  ;;  %v3075_v46 = vsel %vm3056_vm5, %v3010_v55, %v14968_v25  ;;  %v3269_v63 = vsel %vm3251_vm8, %v3204_v18, %v14969_v58  ;;  %v3333_v52 = vsel %vm3316_vm9, %v3268_v44, %v2703_v30  ;;  %v8592_v17 = vld [vmem:[#allocation2 + $0xf8] sm:$0xff]  ;;  %v14971_v11 = vld [vmem:[#allocation181_spill] sm:$0xff]  ;;  %v8593_v0 = vld [vmem:[#allocation2 + $0x108] sm:$0xff] }
 0x43e   :  { %v3332_v51 = vsel %vm3316_vm9, %v3267_v35, %v2701_v9  ;;  %v2883_v57 = vsel %vm20_vm0, %v8592_v17, %v14970_v29  ;;  %v3076_v1 = vsel %vm3056_vm5, %v3011_v12, %v14971_v11  ;;  %v14972_v50 = vld [vmem:[#allocation238_spill] sm:$0xff]  ;;  %v14974_v19 = vld [vmem:[#allocation68_spill] sm:$0xff]  ;;  %v14975_v32 = vld [vmem:[#allocation239_spill] sm:$0xff] }
 0x43f   :  { %8344 = vmatmul.mubr.msk.f32.gmra.mrb[14].mxu0 %vm3397_vm10, %v3332_v51  ;;  %v3140_v40 = vsel %vm3121_vm6, %v3075_v46, %v14972_v50  ;;  %v14973_v48 = vld [vmem:[#allocation14_spill] sm:$0xff]  ;;  %v2947_v16 = vsel %vm2926_vm3, %v2882_v43, %v14974_v19  ;;  %v3141_v53 = vsel %vm3121_vm6, %v3076_v1, %v14975_v32  ;;  %v14976_v2 = vld [vmem:[#allocation296_spill] sm:$0xff]  ;;  %v14977_v24 = vld [vmem:[#allocation69_spill] sm:$0xff]  ;;  %v2707_v59 = vpop.permute.xlu0 %2706 }
 0x440   :  { %8346 = vmatprep.mubr.msk.f32.mxu0 %vm3397_vm10, %v3333_v52  ;;  %v2884_v21 = vsel %vm20_vm0, %v8593_v0, %v14973_v48  ;;  %v3205_v3 = vsel %vm3186_vm7, %v3140_v40, %v14976_v2  ;;  %v2948_v34 = vsel %vm2926_vm3, %v2883_v57, %v14977_v24  ;;  %v14978_v7 = vld [vmem:[#allocation124_spill] sm:$0xff]  ;;  %v14979_v4 = vld [vmem:[#allocation297_spill] sm:$0xff]  ;;  %v14980_v56 = vld [vmem:[#allocation355_spill] sm:$0xff] }
 0x441   :  { %v2705_v36 = vpop.permute.xlu1 %2704  ;;  %v3012_v15 = vsel %vm2991_vm4, %v2947_v16, %v14978_v7  ;;  %v3206_v31 = vsel %vm3186_vm7, %v3141_v53, %v14979_v4  ;;  %v3270_v35 = vsel %vm3251_vm8, %v3205_v3, %v14980_v56  ;;  %v14981_v9 = vld [vmem:[#allocation125_spill] sm:$0xff]  ;;  %v14982_v61 = vld [vmem:[#allocation182_spill] sm:$0xff]  ;;  %v14983_v22 = vld [vmem:[#allocation356_spill] sm:$0xff] }
 0x442   :  { %v3334_v38 = vsel %vm3316_vm9, %v3269_v63, %v2705_v36  ;;  %v3013_v13 = vsel %vm2991_vm4, %v2948_v34, %v14981_v9  ;;  %v3077_v42 = vsel %vm3056_vm5, %v3012_v15, %v14982_v61  ;;  %v3271_v33 = vsel %vm3251_vm8, %v3206_v31, %v14983_v22  ;;  %v8594_v51 = vld [vmem:[#allocation2 + $0x110] sm:$0xff]  ;;  %v14984_v49 = vld [vmem:[#allocation15_spill] sm:$0xff]  ;;  %v14986_v27 = vld [vmem:[#allocation240_spill] sm:$0xff] }
 0x443   :  { %8347 = vmatmul.mubr.msk.f32.gmra.mrb[16].mxu0 %vm3397_vm10, %v3334_v38  ;;  %v3335_v26 = vsel %vm3316_vm9, %v3270_v35, %v2707_v59  ;;  %v2885_v60 = vsel %vm20_vm0, %v8594_v51, %v14984_v49  ;;  %v14985_v43 = vld [vmem:[#allocation183_spill] sm:$0xff]  ;;  %v3142_v20 = vsel %vm3121_vm6, %v3077_v42, %v14986_v27  ;;  %v14987_v23 = vld [vmem:[#allocation16_spill] sm:$0xff]  ;;  %v14988_v47 = vld [vmem:[#allocation70_spill] sm:$0xff]  ;;  %v2711_v52 = vpop.permute.xlu0 %2710 }
 0x444   :  { %v3078_v41 = vsel %vm3056_vm5, %v3013_v13, %v14985_v43  ;;  %8349 = vmatprep.mubr.msk.f32.mxu0 %vm3397_vm10, %v3335_v26  ;;  %v8595_v37 = vld [vmem:[#allocation2 + $0x120] sm:$0xff]  ;;  %v2949_v45 = vsel %vm2926_vm3, %v2884_v21, %v14988_v47  ;;  %v14989_v55 = vld [vmem:[#allocation241_spill] sm:$0xff]  ;;  %v14990_v18 = vld [vmem:[#allocation298_spill] sm:$0xff] }
 0x445   :  { %v2709_v14 = vpop.permute.xlu1 %2708  ;;  %v2886_v62 = vsel %vm20_vm0, %v8595_v37, %v14987_v23  ;;  %v3143_v10 = vsel %vm3121_vm6, %v3078_v41, %v14989_v55  ;;  %v3207_v5 = vsel %vm3186_vm7, %v3142_v20, %v14990_v18  ;;  %v14991_v44 = vld [vmem:[#allocation71_spill] sm:$0xff]  ;;  %v14992_v54 = vld [vmem:[#allocation126_spill] sm:$0xff]  ;;  %v14994_v58 = vld [vmem:[#allocation357_spill] sm:$0xff] }
 0x446   :  { %v3336_v8 = vsel %vm3316_vm9, %v3271_v33, %v2709_v14  ;;  %v2950_v30 = vsel %vm2926_vm3, %v2885_v60, %v14991_v44  ;;  %v3014_v12 = vsel %vm2991_vm4, %v2949_v45, %v14992_v54  ;;  %v14993_v25 = vld [vmem:[#allocation299_spill] sm:$0xff]  ;;  %v3272_v63 = vsel %vm3251_vm8, %v3207_v5, %v14994_v58  ;;  %v14996_v29 = vld [vmem:[#allocation184_spill] sm:$0xff]  ;;  %v14997_v11 = vld [vmem:[#allocation358_spill] sm:$0xff] }
 0x447   :  { %8350 = vmatmul.mubr.msk.f32.gmra.mrb[18].mxu0 %vm3397_vm10, %v3336_v8  ;;  %v3208_v46 = vsel %vm3186_vm7, %v3143_v10, %v14993_v25  ;;  %v14995_v36 = vld [vmem:[#allocation127_spill] sm:$0xff]  ;;  %v3079_v57 = vsel %vm3056_vm5, %v3014_v12, %v14996_v29  ;;  %v3337_v50 = vsel %vm3316_vm9, %v3272_v63, %v2711_v52  ;;  %v8596_v38 = vld [vmem:[#allocation2 + $0x128] sm:$0xff]  ;;  %v14998_v0 = vld [vmem:[#allocation17_spill] sm:$0xff]  ;;  %v2715_v26 = vpop.permute.xlu0 %2714 }
 0x448   :  { %v3015_v17 = vsel %vm2991_vm4, %v2950_v30, %v14995_v36  ;;  %v3273_v1 = vsel %vm3251_vm8, %v3208_v46, %v14997_v11  ;;  %v2887_v48 = vsel %vm20_vm0, %v8596_v38, %v14998_v0  ;;  %v14999_v21 = vld [vmem:[#allocation185_spill] sm:$0xff]  ;;  %v15000_v16 = vld [vmem:[#allocation242_spill] sm:$0xff]  ;;  %8352 = vmatprep.mubr.msk.f32.mxu0 %vm3397_vm10, %v3337_v50  ;;  %v15002_v34 = vld [vmem:[#allocation72_spill] sm:$0xff] }
 0x449   :  { %v2713_v40 = vpop.permute.xlu1 %2712  ;;  %v3080_v19 = vsel %vm3056_vm5, %v3015_v17, %v14999_v21  ;;  %v3144_v32 = vsel %vm3121_vm6, %v3079_v57, %v15000_v16  ;;  %v8597_v2 = vld [vmem:[#allocation2 + $0x138] sm:$0xff]  ;;  %v2951_v7 = vsel %vm2926_vm3, %v2886_v62, %v15002_v34  ;;  %v15003_v15 = vld [vmem:[#allocation243_spill] sm:$0xff]  ;;  %v15004_v31 = vld [vmem:[#allocation300_spill] sm:$0xff] }
 0x44a   :  { %v3338_v53 = vsel %vm3316_vm9, %v3273_v1, %v2713_v40  ;;  %v15001_v3 = vld [vmem:[#allocation18_spill] sm:$0xff]  ;;  %v3145_v4 = vsel %vm3121_vm6, %v3080_v19, %v15003_v15  ;;  %v3209_v56 = vsel %vm3186_vm7, %v3144_v32, %v15004_v31  ;;  %v15005_v35 = vld [vmem:[#allocation73_spill] sm:$0xff]  ;;  %v15006_v9 = vld [vmem:[#allocation128_spill] sm:$0xff] }
 0x44b   :  { %v2888_v24 = vsel %vm20_vm0, %v8597_v2, %v15001_v3  ;;  %8353 = vmatmul.mubr.msk.f32.gmra.mrb[20].mxu0 %vm3397_vm10, %v3338_v53  ;;  %v2952_v59 = vsel %vm2926_vm3, %v2887_v48, %v15005_v35  ;;  %v3016_v13 = vsel %vm2991_vm4, %v2951_v7, %v15006_v9  ;;  %v15007_v61 = vld [vmem:[#allocation301_spill] sm:$0xff]  ;;  %v15008_v22 = vld [vmem:[#allocation359_spill] sm:$0xff]  ;;  %v15010_v49 = vld [vmem:[#allocation186_spill] sm:$0xff]  ;;  %v2719_v50 = vpop.permute.xlu0 %2718 }
 0x44c   :  { %v3210_v42 = vsel %vm3186_vm7, %v3145_v4, %v15007_v61  ;;  %v3274_v33 = vsel %vm3251_vm8, %v3209_v56, %v15008_v22  ;;  %v15009_v14 = vld [vmem:[#allocation129_spill] sm:$0xff]  ;;  %v3081_v60 = vsel %vm3056_vm5, %v3016_v13, %v15010_v49  ;;  %v15011_v43 = vld [vmem:[#allocation360_spill] sm:$0xff]  ;;  %v8598_v8 = vld [vmem:[#allocation2 + $0x140] sm:$0xff] }
 0x44d   :  { %v3017_v51 = vsel %vm2991_vm4, %v2952_v59, %v15009_v14  ;;  %v3275_v41 = vsel %vm3251_vm8, %v3210_v42, %v15011_v43  ;;  %v3339_v27 = vsel %vm3316_vm9, %v3274_v33, %v2715_v26  ;;  %v2717_v20 = vpop.permute.xlu1 %2716  ;;  %v15012_v37 = vld [vmem:[#allocation19_spill] sm:$0xff]  ;;  %v15014_v45 = vld [vmem:[#allocation244_spill] sm:$0xff]  ;;  %v8599_v18 = vld [vmem:[#allocation2 + $0x150] sm:$0xff] }
 0x44e   :  { %v2889_v23 = vsel %vm20_vm0, %v8598_v8, %v15012_v37  ;;  %v15013_v62 = vld [vmem:[#allocation187_spill] sm:$0xff]  ;;  %v3146_v55 = vsel %vm3121_vm6, %v3081_v60, %v15014_v45  ;;  %v3340_v10 = vsel %vm3316_vm9, %v3275_v41, %v2717_v20  ;;  %8355 = vmatprep.mubr.msk.f32.mxu0 %vm3397_vm10, %v3339_v27  ;;  %v15015_v5 = vld [vmem:[#allocation20_spill] sm:$0xff]  ;;  %v15016_v30 = vld [vmem:[#allocation74_spill] sm:$0xff] }
 0x44f   :  { %v3082_v47 = vsel %vm3056_vm5, %v3017_v51, %v15013_v62  ;;  %v2890_v44 = vsel %vm20_vm0, %v8599_v18, %v15015_v5  ;;  %v2953_v54 = vsel %vm2926_vm3, %v2888_v24, %v15016_v30  ;;  %v15017_v12 = vld [vmem:[#allocation245_spill] sm:$0xff]  ;;  %v15018_v46 = vld [vmem:[#allocation302_spill] sm:$0xff]  ;;  %8356 = vmatmul.mubr.msk.f32.gmra.mrb[22].mxu0 %vm3397_vm10, %v3340_v10  ;;  %v15019_v63 = vld [vmem:[#allocation75_spill] sm:$0xff]  ;;  %v2723_v20 = vpop.permute.xlu0 %2722 }
 0x450   :  { %v3147_v25 = vsel %vm3121_vm6, %v3082_v47, %v15017_v12  ;;  %v3211_v58 = vsel %vm3186_vm7, %v3146_v55, %v15018_v46  ;;  %v2954_v52 = vsel %vm2926_vm3, %v2889_v23, %v15019_v63  ;;  %v15020_v36 = vld [vmem:[#allocation130_spill] sm:$0xff]  ;;  %v15021_v29 = vld [vmem:[#allocation303_spill] sm:$0xff]  ;;  %v15022_v11 = vld [vmem:[#allocation361_spill] sm:$0xff] }
 0x451   :  { %v3018_v17 = vsel %vm2991_vm4, %v2953_v54, %v15020_v36  ;;  %v3212_v57 = vsel %vm3186_vm7, %v3147_v25, %v15021_v29  ;;  %v3276_v1 = vsel %vm3251_vm8, %v3211_v58, %v15022_v11  ;;  %v15023_v40 = vld [vmem:[#allocation131_spill] sm:$0xff]  ;;  %v15024_v0 = vld [vmem:[#allocation188_spill] sm:$0xff]  ;;  %v15025_v21 = vld [vmem:[#allocation362_spill] sm:$0xff]  ;;  %v2721_v32 = vpop.permute.xlu1 %2720 }
 0x452   :  { %v3019_v38 = vsel %vm2991_vm4, %v2954_v52, %v15023_v40  ;;  %v3083_v48 = vsel %vm3056_vm5, %v3018_v17, %v15024_v0  ;;  %v3277_v19 = vsel %vm3251_vm8, %v3212_v57, %v15025_v21  ;;  %v3341_v16 = vsel %vm3316_vm9, %v3276_v1, %v2719_v50  ;;  %v8600_v53 = vld [vmem:[#allocation2 + $0x158] sm:$0xff]  ;;  %v15026_v2 = vld [vmem:[#allocation21_spill] sm:$0xff]  ;;  %v8601_v31 = vld [vmem:[#allocation2 + $0x168] sm:$0xff] }
 0x453   :  { %v2891_v3 = vsel %vm20_vm0, %v8600_v53, %v15026_v2  ;;  %v15027_v24 = vld [vmem:[#allocation189_spill] sm:$0xff]  ;;  %v15028_v7 = vld [vmem:[#allocation246_spill] sm:$0xff]  ;;  %v3342_v4 = vsel %vm3316_vm9, %v3277_v19, %v2721_v32  ;;  %8358 = vmatprep.mubr.msk.f32.mxu0 %vm3397_vm10, %v3341_v16  ;;  %v15030_v59 = vld [vmem:[#allocation76_spill] sm:$0xff]  ;;  %v2727_v32 = vpop.permute.xlu0 %2726 }
 0x454   :  { %v3084_v34 = vsel %vm3056_vm5, %v3019_v38, %v15027_v24  ;;  %v3148_v15 = vsel %vm3121_vm6, %v3083_v48, %v15028_v7  ;;  %v15029_v56 = vld [vmem:[#allocation22_spill] sm:$0xff]  ;;  %v2955_v9 = vsel %vm2926_vm3, %v2890_v44, %v15030_v59  ;;  %v15031_v13 = vld [vmem:[#allocation247_spill] sm:$0xff]  ;;  %v15032_v42 = vld [vmem:[#allocation304_spill] sm:$0xff]  ;;  %8359 = vmatmul.mubr.msk.f32.gmra.mrb[24].mxu0 %vm3397_vm10, %v3342_v4 }
 0x455   :  { %v2892_v35 = vsel %vm20_vm0, %v8601_v31, %v15029_v56  ;;  %v3149_v61 = vsel %vm3121_vm6, %v3084_v34, %v15031_v13  ;;  %v3213_v22 = vsel %vm3186_vm7, %v3148_v15, %v15032_v42  ;;  %v269_v33 = vld [vmem:[#allocation2 + $0x1b0] sm:$0xff]  ;;  %v15034_v51 = vld [vmem:[#allocation132_spill] sm:$0xff]  ;;  %v15036_v41 = vld [vmem:[#allocation363_spill] sm:$0xff]  ;;  %v2725_v10 = vpop.permute.xlu1 %2724 }
 0x456   :  { %v15033_v26 = vld [vmem:[#allocation77_spill] sm:$0xff]  ;;  %v3020_v49 = vsel %vm2991_vm4, %v2955_v9, %v15034_v51  ;;  %v3278_v27 = vsel %vm3251_vm8, %v3213_v22, %v15036_v41  ;;  %v15038_v23 = vld [vmem:[#allocation190_spill] sm:$0xff]  ;;  %v15039_v47 = vld [vmem:[#allocation364_spill] sm:$0xff] }
 0x457   :  { %v2956_v14 = vsel %vm2926_vm3, %v2891_v3, %v15033_v26  ;;  %v15035_v60 = vld [vmem:[#allocation305_spill] sm:$0xff]  ;;  %v3085_v62 = vsel %vm3056_vm5, %v3020_v49, %v15038_v23  ;;  %v3343_v55 = vsel %vm3316_vm9, %v3278_v27, %v2723_v20  ;;  %v15040_v5 = vld [vmem:[#allocation23_spill] sm:$0xff]  ;;  %v15042_v12 = vld [vmem:[#allocation248_spill] sm:$0xff] }
 0x458   :  { %v3214_v43 = vsel %vm3186_vm7, %v3149_v61, %v15035_v60  ;;  %v15037_v8 = vld [vmem:[#allocation133_spill] sm:$0xff]  ;;  %v15041_v30 = vld [vmem:[#allocation191_spill] sm:$0xff]  ;;  %v3150_v25 = vsel %vm3121_vm6, %v3085_v62, %v15042_v12  ;;  %8361 = vmatprep.mubr.msk.f32.mxu0 %vm3397_vm10, %v3343_v55  ;;  %v15043_v58 = vld [vmem:[#allocation24_spill] sm:$0xff] }
 0x459   :  { %v3021_v37 = vsel %vm2991_vm4, %v2956_v14, %v15037_v8  ;;  %v3279_v45 = vsel %vm3251_vm8, %v3214_v43, %v15039_v47  ;;  %v8602_v18 = vld [vmem:[#allocation2 + $0x170] sm:$0xff]  ;;  %v2894_v63 = vsel %vm20_vm0, %v269_v33, %v15043_v58  ;;  %v270_v52 = vld [vmem:[#allocation2 + $0x1b8] sm:$0xff]  ;;  %v15047_v50 = vld [vmem:[#allocation79_spill] sm:$0xff]  ;;  %v2729_v4 = vpop.permute.xlu1 %2728 }
 0x45a   :  { %v2893_v44 = vsel %vm20_vm0, %v8602_v18, %v15040_v5  ;;  %v3086_v54 = vsel %vm3056_vm5, %v3021_v37, %v15041_v30  ;;  %v3344_v46 = vsel %vm3316_vm9, %v3279_v45, %v2725_v10  ;;  %v15044_v36 = vld [vmem:[#allocation78_spill] sm:$0xff]  ;;  %v15045_v29 = vld [vmem:[#allocation249_spill] sm:$0xff]  ;;  %v15049_v48 = vld [vmem:[#allocation307_spill] sm:$0xff]  ;;  %v2731_v45 = vpop.permute.xlu0 %2730 }
 0x45b   :  { %v2957_v17 = vsel %vm2926_vm3, %v2892_v35, %v15044_v36  ;;  %v3151_v57 = vsel %vm3121_vm6, %v3086_v54, %v15045_v29  ;;  %v15046_v11 = vld [vmem:[#allocation306_spill] sm:$0xff]  ;;  %8362 = vmatmul.mubr.msk.f32.gmra.mrb[26].mxu0 %vm3397_vm10, %v3344_v46  ;;  %v2958_v40 = vsel %vm2926_vm3, %v2893_v44, %v15047_v50  ;;  %v15050_v19 = vld [vmem:[#allocation365_spill] sm:$0xff]  ;;  %v15051_v53 = vld [vmem:[#allocation135_spill] sm:$0xff] }
 0x45c   :  { %v3215_v1 = vsel %vm3186_vm7, %v3150_v25, %v15046_v11  ;;  %v15048_v38 = vld [vmem:[#allocation134_spill] sm:$0xff]  ;;  %v3216_v21 = vsel %vm3186_vm7, %v3151_v57, %v15049_v48  ;;  %v3023_v2 = vsel %vm2991_vm4, %v2958_v40, %v15051_v53  ;;  %v15052_v3 = vld [vmem:[#allocation192_spill] sm:$0xff]  ;;  %v15054_v31 = vld [vmem:[#allocation25_spill] sm:$0xff] }
 0x45d   :  { %v3022_v0 = vsel %vm2991_vm4, %v2957_v17, %v15048_v38  ;;  %v3280_v16 = vsel %vm3251_vm8, %v3215_v1, %v15050_v19  ;;  %v15053_v34 = vld [vmem:[#allocation366_spill] sm:$0xff]  ;;  %v2895_v56 = vsel %vm20_vm0, %v270_v52, %v15054_v31  ;;  %v15055_v35 = vld [vmem:[#allocation193_spill] sm:$0xff]  ;;  %v8603_v42 = vld [vmem:[#allocation2 + $0x1c8] sm:$0xff]  ;;  %v2733_v12 = vpop.permute.xlu1 %2732 }
 0x45e   :  { %v3087_v24 = vsel %vm3056_vm5, %v3022_v0, %v15052_v3  ;;  %v3281_v7 = vsel %vm3251_vm8, %v3216_v21, %v15053_v34  ;;  %v3345_v15 = vsel %vm3316_vm9, %v3280_v16, %v2727_v32  ;;  %v3088_v59 = vsel %vm3056_vm5, %v3023_v2, %v15055_v35  ;;  %v15056_v9 = vld [vmem:[#allocation250_spill] sm:$0xff]  ;;  %v15058_v26 = vld [vmem:[#allocation80_spill] sm:$0xff]  ;;  %v15059_v51 = vld [vmem:[#allocation251_spill] sm:$0xff] }
 0x45f   :  { %v3152_v13 = vsel %vm3121_vm6, %v3087_v24, %v15056_v9  ;;  %v3346_v61 = vsel %vm3316_vm9, %v3281_v7, %v2729_v4  ;;  %8364 = vmatprep.mubr.msk.f32.mxu0 %vm3397_vm10, %v3345_v15  ;;  %v15057_v22 = vld [vmem:[#allocation26_spill] sm:$0xff]  ;;  %v2959_v14 = vsel %vm2926_vm3, %v2894_v63, %v15058_v26  ;;  %v3153_v49 = vsel %vm3121_vm6, %v3088_v59, %v15059_v51  ;;  %v15060_v60 = vld [vmem:[#allocation308_spill] sm:$0xff]  ;;  %v15061_v41 = vld [vmem:[#allocation81_spill] sm:$0xff]  ;;  %v2735_v7 = vpop.permute.xlu0 %2734 }
 0x460   :  { %v2896_v33 = vsel %vm20_vm0, %v8603_v42, %v15057_v22  ;;  %v3217_v43 = vsel %vm3186_vm7, %v3152_v13, %v15060_v60  ;;  %8365 = vmatmul.mubr.msk.f32.gmra.mrb[28].mxu0 %vm3397_vm10, %v3346_v61  ;;  %v2960_v27 = vsel %vm2926_vm3, %v2895_v56, %v15061_v41  ;;  %v15062_v20 = vld [vmem:[#allocation136_spill] sm:$0xff]  ;;  %v15063_v37 = vld [vmem:[#allocation309_spill] sm:$0xff]  ;;  %v15064_v62 = vld [vmem:[#allocation367_spill] sm:$0xff] }
 0x461   :  { %v3024_v8 = vsel %vm2991_vm4, %v2959_v14, %v15062_v20  ;;  %v3218_v23 = vsel %vm3186_vm7, %v3153_v49, %v15063_v37  ;;  %v3282_v47 = vsel %vm3251_vm8, %v3217_v43, %v15064_v62  ;;  %v15065_v55 = vld [vmem:[#allocation137_spill] sm:$0xff]  ;;  %v15066_v18 = vld [vmem:[#allocation194_spill] sm:$0xff]  ;;  %v15067_v44 = vld [vmem:[#allocation368_spill] sm:$0xff]  ;;  %v2737_v13 = vpop.permute.xlu1 %2736 }
 0x462   :  { %v3025_v10 = vsel %vm2991_vm4, %v2960_v27, %v15065_v55  ;;  %v3089_v5 = vsel %vm3056_vm5, %v3024_v8, %v15066_v18  ;;  %v3283_v30 = vsel %vm3251_vm8, %v3218_v23, %v15067_v44  ;;  %v3347_v54 = vsel %vm3316_vm9, %v3282_v47, %v2731_v45  ;;  %v8604_v25 = vld [vmem:[#allocation2 + $0x1d0] sm:$0xff]  ;;  %v15068_v46 = vld [vmem:[#allocation27_spill] sm:$0xff]  ;;  %v15070_v36 = vld [vmem:[#allocation252_spill] sm:$0xff] }
 0x463   :  { %v2897_v58 = vsel %vm20_vm0, %v8604_v25, %v15068_v46  ;;  %v15069_v63 = vld [vmem:[#allocation195_spill] sm:$0xff]  ;;  %v3154_v17 = vsel %vm3121_vm6, %v3089_v5, %v15070_v36  ;;  %v3348_v29 = vsel %vm3316_vm9, %v3283_v30, %v2733_v12  ;;  %8367 = vmatprep.mubr.msk.f32.mxu0 %vm3397_vm10, %v3347_v54  ;;  %v15071_v11 = vld [vmem:[#allocation28_spill] sm:$0xff]  ;;  %v15072_v50 = vld [vmem:[#allocation82_spill] sm:$0xff]  ;;  %v2739_v54 = vpop.permute.xlu0 %2738 }
 0x464   :  { %v3090_v52 = vsel %vm3056_vm5, %v3025_v10, %v15069_v63  ;;  %v8605_v57 = vld [vmem:[#allocation2 + $0x1e0] sm:$0xff]  ;;  %v2961_v40 = vsel %vm2926_vm3, %v2896_v33, %v15072_v50  ;;  %v15073_v38 = vld [vmem:[#allocation253_spill] sm:$0xff]  ;;  %v15074_v48 = vld [vmem:[#allocation310_spill] sm:$0xff]  ;;  %8368 = vmatmul.mubr.msk.f32.gmra.mrb[30].mxu0 %vm3397_vm10, %v3348_v29 }
 0x465   :  { %v2898_v1 = vsel %vm20_vm0, %v8605_v57, %v15071_v11  ;;  %v3155_v0 = vsel %vm3121_vm6, %v3090_v52, %v15073_v38  ;;  %v3219_v21 = vsel %vm3186_vm7, %v3154_v17, %v15074_v48  ;;  %v15075_v19 = vld [vmem:[#allocation83_spill] sm:$0xff]  ;;  %v15076_v32 = vld [vmem:[#allocation138_spill] sm:$0xff]  ;;  %v15078_v24 = vld [vmem:[#allocation369_spill] sm:$0xff]  ;;  %v2741_v17 = vpop.permute.xlu1 %2740 }
 0x466   :  { %v2962_v16 = vsel %vm2926_vm3, %v2897_v58, %v15075_v19  ;;  %v3026_v53 = vsel %vm2991_vm4, %v2961_v40, %v15076_v32  ;;  %v15077_v2 = vld [vmem:[#allocation311_spill] sm:$0xff]  ;;  %v3284_v34 = vsel %vm3251_vm8, %v3219_v21, %v15078_v24  ;;  %v15080_v31 = vld [vmem:[#allocation196_spill] sm:$0xff]  ;;  %v15081_v35 = vld [vmem:[#allocation370_spill] sm:$0xff] }
 0x467   :  { %v3220_v3 = vsel %vm3186_vm7, %v3155_v0, %v15077_v2  ;;  %v15079_v15 = vld [vmem:[#allocation139_spill] sm:$0xff]  ;;  %v3091_v56 = vsel %vm3056_vm5, %v3026_v53, %v15080_v31  ;;  %v3349_v9 = vsel %vm3316_vm9, %v3284_v34, %v2735_v7  ;;  %v8606_v61 = vld [vmem:[#allocation2 + $0x1e8] sm:$0xff]  ;;  %v15082_v42 = vld [vmem:[#allocation29_spill] sm:$0xff] }
 0x468   :  { %v3027_v4 = vsel %vm2991_vm4, %v2962_v16, %v15079_v15  ;;  %v3285_v59 = vsel %vm3251_vm8, %v3220_v3, %v15081_v35  ;;  %v2899_v22 = vsel %vm20_vm0, %v8606_v61, %v15082_v42  ;;  %v15083_v33 = vld [vmem:[#allocation197_spill] sm:$0xff]  ;;  %v15084_v14 = vld [vmem:[#allocation254_spill] sm:$0xff]  ;;  %8370 = vmatprep.mubr.msk.f32.mxu0 %vm3397_vm10, %v3349_v9  ;;  %v15086_v27 = vld [vmem:[#allocation84_spill] sm:$0xff]  ;;  %v2743_v9 = vpop.permute.xlu0 %2742 }
 0x469   :  { %v3092_v26 = vsel %vm3056_vm5, %v3027_v4, %v15083_v33  ;;  %v3156_v51 = vsel %vm3121_vm6, %v3091_v56, %v15084_v14  ;;  %v3350_v49 = vsel %vm3316_vm9, %v3285_v59, %v2737_v13  ;;  %v8607_v60 = vld [vmem:[#allocation2 + $0x1f8] sm:$0xff]  ;;  %v2963_v20 = vsel %vm2926_vm3, %v2898_v1, %v15086_v27  ;;  %v15087_v8 = vld [vmem:[#allocation255_spill] sm:$0xff]  ;;  %v15088_v23 = vld [vmem:[#allocation312_spill] sm:$0xff] }
 0x46a   :  { %v15085_v43 = vld [vmem:[#allocation30_spill] sm:$0xff]  ;;  %v3157_v37 = vsel %vm3121_vm6, %v3092_v26, %v15087_v8  ;;  %v3221_v62 = vsel %vm3186_vm7, %v3156_v51, %v15088_v23  ;;  %8371 = vmatmul.mubr.msk.f32.gmra.mrb[32].mxu0 %vm3397_vm10, %v3350_v49  ;;  %v15089_v47 = vld [vmem:[#allocation85_spill] sm:$0xff]  ;;  %v15090_v55 = vld [vmem:[#allocation140_spill] sm:$0xff]  ;;  %v2745_v51 = vpop.permute.xlu1 %2744 }
 0x46b   :  { %v2900_v41 = vsel %vm20_vm0, %v8607_v60, %v15085_v43  ;;  %v2964_v45 = vsel %vm2926_vm3, %v2899_v22, %v15089_v47  ;;  %v3028_v10 = vsel %vm2991_vm4, %v2963_v20, %v15090_v55  ;;  %v15091_v18 = vld [vmem:[#allocation313_spill] sm:$0xff]  ;;  %v15092_v44 = vld [vmem:[#allocation371_spill] sm:$0xff]  ;;  %v15094_v46 = vld [vmem:[#allocation198_spill] sm:$0xff] }
 0x46c   :  { %v3222_v5 = vsel %vm3186_vm7, %v3157_v37, %v15091_v18  ;;  %v3286_v30 = vsel %vm3251_vm8, %v3221_v62, %v15092_v44  ;;  %v15093_v12 = vld [vmem:[#allocation141_spill] sm:$0xff]  ;;  %v3093_v58 = vsel %vm3056_vm5, %v3028_v10, %v15094_v46  ;;  %v15095_v63 = vld [vmem:[#allocation372_spill] sm:$0xff]  ;;  %v8608_v29 = vld [vmem:[#allocation2 + $0x200] sm:$0xff] }
 0x46d   :  { %v3029_v25 = vsel %vm2991_vm4, %v2964_v45, %v15093_v12  ;;  %v3287_v52 = vsel %vm3251_vm8, %v3222_v5, %v15095_v63  ;;  %v3351_v36 = vsel %vm3316_vm9, %v3286_v30, %v2739_v54  ;;  %v15096_v57 = vld [vmem:[#allocation31_spill] sm:$0xff]  ;;  %v15098_v40 = vld [vmem:[#allocation256_spill] sm:$0xff]  ;;  %v8609_v48 = vld [vmem:[#allocation2 + $0x210] sm:$0xff] }
 0x46e   :  { %v2901_v11 = vsel %vm20_vm0, %v8608_v29, %v15096_v57  ;;  %v15097_v1 = vld [vmem:[#allocation199_spill] sm:$0xff]  ;;  %v3158_v38 = vsel %vm3121_vm6, %v3093_v58, %v15098_v40  ;;  %v3352_v0 = vsel %vm3316_vm9, %v3287_v52, %v2741_v17  ;;  %8373 = vmatprep.mubr.msk.f32.mxu0 %vm3397_vm10, %v3351_v36  ;;  %v15099_v21 = vld [vmem:[#allocation32_spill] sm:$0xff]  ;;  %v15100_v16 = vld [vmem:[#allocation86_spill] sm:$0xff]  ;;  %v2747_v36 = vpop.permute.xlu0 %2746 }
 0x46f   :  { %v3094_v50 = vsel %vm3056_vm5, %v3029_v25, %v15097_v1  ;;  %v2902_v19 = vsel %vm20_vm0, %v8609_v48, %v15099_v21  ;;  %v2965_v32 = vsel %vm2926_vm3, %v2900_v41, %v15100_v16  ;;  %v15101_v53 = vld [vmem:[#allocation257_spill] sm:$0xff]  ;;  %v15102_v3 = vld [vmem:[#allocation314_spill] sm:$0xff]  ;;  %8374 = vmatmul.mubr.msk.f32.gmra.mrb[34].mxu0 %vm3397_vm10, %v3352_v0  ;;  %v15103_v34 = vld [vmem:[#allocation87_spill] sm:$0xff] }
 0x470   :  { %v3159_v2 = vsel %vm3121_vm6, %v3094_v50, %v15101_v53  ;;  %v3223_v24 = vsel %vm3186_vm7, %v3158_v38, %v15102_v3  ;;  %v2966_v7 = vsel %vm2926_vm3, %v2901_v11, %v15103_v34  ;;  %v15104_v15 = vld [vmem:[#allocation142_spill] sm:$0xff]  ;;  %v15105_v31 = vld [vmem:[#allocation315_spill] sm:$0xff]  ;;  %v15106_v35 = vld [vmem:[#allocation373_spill] sm:$0xff]  ;;  %v2749_v38 = vpop.permute.xlu1 %2748 }
 0x471   :  { %v3030_v4 = vsel %vm2991_vm4, %v2965_v32, %v15104_v15  ;;  %v3224_v56 = vsel %vm3186_vm7, %v3159_v2, %v15105_v31  ;;  %v3288_v59 = vsel %vm3251_vm8, %v3223_v24, %v15106_v35  ;;  %v15107_v13 = vld [vmem:[#allocation143_spill] sm:$0xff]  ;;  %v15108_v42 = vld [vmem:[#allocation200_spill] sm:$0xff]  ;;  %v15109_v33 = vld [vmem:[#allocation374_spill] sm:$0xff] }
 0x472   :  { %v3031_v61 = vsel %vm2991_vm4, %v2966_v7, %v15107_v13  ;;  %v3095_v22 = vsel %vm3056_vm5, %v3030_v4, %v15108_v42  ;;  %v3289_v26 = vsel %vm3251_vm8, %v3224_v56, %v15109_v33  ;;  %v3353_v14 = vsel %vm3316_vm9, %v3288_v59, %v2743_v9  ;;  %v8610_v49 = vld [vmem:[#allocation2 + $0x218] sm:$0xff]  ;;  %v15110_v60 = vld [vmem:[#allocation33_spill] sm:$0xff]  ;;  %v8611_v23 = vld [vmem:[#allocation2 + $0x228] sm:$0xff] }
 0x473   :  { %v2903_v43 = vsel %vm20_vm0, %v8610_v49, %v15110_v60  ;;  %v15111_v41 = vld [vmem:[#allocation201_spill] sm:$0xff]  ;;  %v15112_v20 = vld [vmem:[#allocation258_spill] sm:$0xff]  ;;  %v3354_v37 = vsel %vm3316_vm9, %v3289_v26, %v2745_v51  ;;  %8376 = vmatprep.mubr.msk.f32.mxu0 %vm3397_vm10, %v3353_v14  ;;  %v15114_v45 = vld [vmem:[#allocation88_spill] sm:$0xff]  ;;  %v2751_v14 = vpop.permute.xlu0 %2750 }
 0x474   :  { %v3096_v27 = vsel %vm3056_vm5, %v3031_v61, %v15111_v41  ;;  %v3160_v8 = vsel %vm3121_vm6, %v3095_v22, %v15112_v20  ;;  %v15113_v62 = vld [vmem:[#allocation34_spill] sm:$0xff]  ;;  %v2967_v55 = vsel %vm2926_vm3, %v2902_v19, %v15114_v45  ;;  %v15115_v10 = vld [vmem:[#allocation259_spill] sm:$0xff]  ;;  %v15116_v5 = vld [vmem:[#allocation316_spill] sm:$0xff]  ;;  %8377 = vmatmul.mubr.msk.f32.gmra.mrb[36].mxu0 %vm3397_vm10, %v3354_v37 }
 0x475   :  { %v2904_v47 = vsel %vm20_vm0, %v8611_v23, %v15113_v62  ;;  %v3161_v18 = vsel %vm3121_vm6, %v3096_v27, %v15115_v10  ;;  %v3225_v44 = vsel %vm3186_vm7, %v3160_v8, %v15116_v5  ;;  %v15117_v30 = vld [vmem:[#allocation89_spill] sm:$0xff]  ;;  %v15118_v12 = vld [vmem:[#allocation144_spill] sm:$0xff]  ;;  %v15120_v63 = vld [vmem:[#allocation375_spill] sm:$0xff]  ;;  %v2753_v8 = vpop.permute.xlu1 %2752 }
 0x476   :  { %v2968_v54 = vsel %vm2926_vm3, %v2903_v43, %v15117_v30  ;;  %v3032_v25 = vsel %vm2991_vm4, %v2967_v55, %v15118_v12  ;;  %v15119_v46 = vld [vmem:[#allocation317_spill] sm:$0xff]  ;;  %v3290_v52 = vsel %vm3251_vm8, %v3225_v44, %v15120_v63  ;;  %v15122_v57 = vld [vmem:[#allocation202_spill] sm:$0xff]  ;;  %v15123_v1 = vld [vmem:[#allocation376_spill] sm:$0xff] }
 0x477   :  { %v3226_v58 = vsel %vm3186_vm7, %v3161_v18, %v15119_v46  ;;  %v15121_v17 = vld [vmem:[#allocation145_spill] sm:$0xff]  ;;  %v3097_v11 = vsel %vm3056_vm5, %v3032_v25, %v15122_v57  ;;  %v3355_v40 = vsel %vm3316_vm9, %v3290_v52, %v2747_v36  ;;  %v15124_v48 = vld [vmem:[#allocation35_spill] sm:$0xff]  ;;  %v15126_v32 = vld [vmem:[#allocation260_spill] sm:$0xff] }
 0x478   :  { %v3033_v29 = vsel %vm2991_vm4, %v2968_v54, %v15121_v17  ;;  %v3291_v50 = vsel %vm3251_vm8, %v3226_v58, %v15123_v1  ;;  %v8612_v0 = vld [vmem:[#allocation2 + $0x230] sm:$0xff]  ;;  %v15125_v19 = vld [vmem:[#allocation203_spill] sm:$0xff]  ;;  %v3162_v53 = vsel %vm3121_vm6, %v3097_v11, %v15126_v32  ;;  %8379 = vmatprep.mubr.msk.f32.mxu0 %vm3397_vm10, %v3355_v40  ;;  %v15127_v24 = vld [vmem:[#allocation36_spill] sm:$0xff]  ;;  %v2755_v40 = vpop.permute.xlu0 %2754 }
 0x479   :  { %v2905_v21 = vsel %vm20_vm0, %v8612_v0, %v15124_v48  ;;  %v3098_v16 = vsel %vm3056_vm5, %v3033_v29, %v15125_v19  ;;  %v3356_v2 = vsel %vm3316_vm9, %v3291_v50, %v2749_v38  ;;  %v8613_v3 = vld [vmem:[#allocation2 + $0x240] sm:$0xff]  ;;  %v15128_v7 = vld [vmem:[#allocation90_spill] sm:$0xff]  ;;  %v15129_v4 = vld [vmem:[#allocation261_spill] sm:$0xff] }
 0x47a   :  { %v2906_v34 = vsel %vm20_vm0, %v8613_v3, %v15127_v24  ;;  %v2969_v15 = vsel %vm2926_vm3, %v2904_v47, %v15128_v7  ;;  %v3163_v31 = vsel %vm3121_vm6, %v3098_v16, %v15129_v4  ;;  %v15130_v56 = vld [vmem:[#allocation318_spill] sm:$0xff]  ;;  %8380 = vmatmul.mubr.msk.f32.gmra.mrb[38].mxu0 %vm3397_vm10, %v3356_v2  ;;  %v15131_v59 = vld [vmem:[#allocation91_spill] sm:$0xff]  ;;  %v15134_v33 = vld [vmem:[#allocation377_spill] sm:$0xff] }
 0x47b   :  { %v3227_v35 = vsel %vm3186_vm7, %v3162_v53, %v15130_v56  ;;  %v2970_v9 = vsel %vm2926_vm3, %v2905_v21, %v15131_v59  ;;  %v15132_v13 = vld [vmem:[#allocation146_spill] sm:$0xff]  ;;  %v15133_v42 = vld [vmem:[#allocation319_spill] sm:$0xff]  ;;  %v15136_v60 = vld [vmem:[#allocation204_spill] sm:$0xff]  ;;  %v2757_v53 = vpop.permute.xlu1 %2756 }
 0x47c   :  { %v3034_v61 = vsel %vm2991_vm4, %v2969_v15, %v15132_v13  ;;  %v3228_v22 = vsel %vm3186_vm7, %v3163_v31, %v15133_v42  ;;  %v3292_v26 = vsel %vm3251_vm8, %v3227_v35, %v15134_v33  ;;  %v15135_v51 = vld [vmem:[#allocation147_spill] sm:$0xff]  ;;  %v15137_v41 = vld [vmem:[#allocation378_spill] sm:$0xff]  ;;  %v8614_v37 = vld [vmem:[#allocation2 + $0x248] sm:$0xff] }
 0x47d   :  { %v3035_v49 = vsel %vm2991_vm4, %v2970_v9, %v15135_v51  ;;  %v3099_v43 = vsel %vm3056_vm5, %v3034_v61, %v15136_v60  ;;  %v3293_v27 = vsel %vm3251_vm8, %v3228_v22, %v15137_v41  ;;  %v3357_v20 = vsel %vm3316_vm9, %v3292_v26, %v2751_v14  ;;  %v15138_v23 = vld [vmem:[#allocation37_spill] sm:$0xff]  ;;  %v15140_v55 = vld [vmem:[#allocation262_spill] sm:$0xff]  ;;  %v15142_v54 = vld [vmem:[#allocation92_spill] sm:$0xff] }
 0x47e   :  { %v2907_v62 = vsel %vm20_vm0, %v8614_v37, %v15138_v23  ;;  %v15139_v47 = vld [vmem:[#allocation205_spill] sm:$0xff]  ;;  %v3164_v10 = vsel %vm3121_vm6, %v3099_v43, %v15140_v55  ;;  %v3358_v18 = vsel %vm3316_vm9, %v3293_v27, %v2753_v8  ;;  %8382 = vmatprep.mubr.msk.f32.mxu0 %vm3397_vm10, %v3357_v20  ;;  %v8615_v5 = vld [vmem:[#allocation2 + $0x258] sm:$0xff]  ;;  %v2971_v12 = vsel %vm2926_vm3, %v2906_v34, %v15142_v54  ;;  %v15143_v25 = vld [vmem:[#allocation263_spill] sm:$0xff]  ;;  %v2759_v20 = vpop.permute.xlu0 %2758 }
 0x47f   :  { %v3100_v45 = vsel %vm3056_vm5, %v3035_v49, %v15139_v47  ;;  %v15141_v44 = vld [vmem:[#allocation38_spill] sm:$0xff]  ;;  %v15144_v58 = vld [vmem:[#allocation320_spill] sm:$0xff]  ;;  %8383 = vmatmul.mubr.msk.f32.gmra.mrb[40].mxu0 %vm3397_vm10, %v3358_v18  ;;  %v15145_v52 = vld [vmem:[#allocation93_spill] sm:$0xff] }
 0x480   :  { %v2908_v30 = vsel %vm20_vm0, %v8615_v5, %v15141_v44  ;;  %v3165_v46 = vsel %vm3121_vm6, %v3100_v45, %v15143_v25  ;;  %v3229_v63 = vsel %vm3186_vm7, %v3164_v10, %v15144_v58  ;;  %v2972_v36 = vsel %vm2926_vm3, %v2907_v62, %v15145_v52  ;;  %v15146_v17 = vld [vmem:[#allocation148_spill] sm:$0xff]  ;;  %v15147_v57 = vld [vmem:[#allocation321_spill] sm:$0xff]  ;;  %v15148_v1 = vld [vmem:[#allocation379_spill] sm:$0xff]  ;;  %v2761_v10 = vpop.permute.xlu1 %2760 }
 0x481   :  { %v3036_v29 = vsel %vm2991_vm4, %v2971_v12, %v15146_v17  ;;  %v3230_v11 = vsel %vm3186_vm7, %v3165_v46, %v15147_v57  ;;  %v3294_v50 = vsel %vm3251_vm8, %v3229_v63, %v15148_v1  ;;  %v15149_v38 = vld [vmem:[#allocation149_spill] sm:$0xff]  ;;  %v15150_v48 = vld [vmem:[#allocation206_spill] sm:$0xff]  ;;  %v15151_v19 = vld [vmem:[#allocation380_spill] sm:$0xff] }
 0x482   :  { %v3037_v0 = vsel %vm2991_vm4, %v2972_v36, %v15149_v38  ;;  %v3101_v21 = vsel %vm3056_vm5, %v3036_v29, %v15150_v48  ;;  %v3295_v16 = vsel %vm3251_vm8, %v3230_v11, %v15151_v19  ;;  %v3359_v32 = vsel %vm3316_vm9, %v3294_v50, %v2755_v40  ;;  %v8616_v2 = vld [vmem:[#allocation2 + $0x260] sm:$0xff]  ;;  %v15154_v15 = vld [vmem:[#allocation264_spill] sm:$0xff]  ;;  %v8617_v56 = vld [vmem:[#allocation2 + $0x270] sm:$0xff] }
 0x483   :  { %v15152_v3 = vld [vmem:[#allocation39_spill] sm:$0xff]  ;;  %v3166_v4 = vsel %vm3121_vm6, %v3101_v21, %v15154_v15  ;;  %v3360_v31 = vsel %vm3316_vm9, %v3295_v16, %v2757_v53  ;;  %8385 = vmatprep.mubr.msk.f32.mxu0 %vm3397_vm10, %v3359_v32  ;;  %v15155_v35 = vld [vmem:[#allocation40_spill] sm:$0xff]  ;;  %v15156_v9 = vld [vmem:[#allocation94_spill] sm:$0xff]  ;;  %v2763_v32 = vpop.permute.xlu0 %2762 }
 0x484   :  { %v2909_v24 = vsel %vm20_vm0, %v8616_v2, %v15152_v3  ;;  %v15153_v34 = vld [vmem:[#allocation207_spill] sm:$0xff]  ;;  %v2910_v59 = vsel %vm20_vm0, %v8617_v56, %v15155_v35  ;;  %v2973_v13 = vsel %vm2926_vm3, %v2908_v30, %v15156_v9  ;;  %v15157_v61 = vld [vmem:[#allocation265_spill] sm:$0xff]  ;;  %v15158_v22 = vld [vmem:[#allocation322_spill] sm:$0xff]  ;;  %8386 = vmatmul.mubr.msk.f32.gmra.mrb[42].mxu0 %vm3397_vm10, %v3360_v31 }
 0x485   :  { %v3102_v7 = vsel %vm3056_vm5, %v3037_v0, %v15153_v34  ;;  %v3231_v33 = vsel %vm3186_vm7, %v3166_v4, %v15158_v22  ;;  %v15159_v26 = vld [vmem:[#allocation95_spill] sm:$0xff]  ;;  %v15160_v51 = vld [vmem:[#allocation150_spill] sm:$0xff]  ;;  %v15162_v41 = vld [vmem:[#allocation381_spill] sm:$0xff]  ;;  %v2765_v4 = vpop.permute.xlu1 %2764 }
 0x486   :  { %v3167_v42 = vsel %vm3121_vm6, %v3102_v7, %v15157_v61  ;;  %v2974_v14 = vsel %vm2926_vm3, %v2909_v24, %v15159_v26  ;;  %v3038_v49 = vsel %vm2991_vm4, %v2973_v13, %v15160_v51  ;;  %v15161_v60 = vld [vmem:[#allocation323_spill] sm:$0xff]  ;;  %v3296_v27 = vsel %vm3251_vm8, %v3231_v33, %v15162_v41  ;;  %v15164_v23 = vld [vmem:[#allocation208_spill] sm:$0xff]  ;;  %v15165_v47 = vld [vmem:[#allocation382_spill] sm:$0xff] }
 0x487   :  { %v3232_v43 = vsel %vm3186_vm7, %v3167_v42, %v15161_v60  ;;  %v15163_v8 = vld [vmem:[#allocation151_spill] sm:$0xff]  ;;  %v3103_v62 = vsel %vm3056_vm5, %v3038_v49, %v15164_v23  ;;  %v3361_v55 = vsel %vm3316_vm9, %v3296_v27, %v2759_v20  ;;  %v8618_v18 = vld [vmem:[#allocation2 + $0x278] sm:$0xff]  ;;  %v15166_v5 = vld [vmem:[#allocation41_spill] sm:$0xff] }
 0x488   :  { %v3039_v37 = vsel %vm2991_vm4, %v2974_v14, %v15163_v8  ;;  %v3297_v45 = vsel %vm3251_vm8, %v3232_v43, %v15165_v47  ;;  %v2911_v44 = vsel %vm20_vm0, %v8618_v18, %v15166_v5  ;;  %v15167_v30 = vld [vmem:[#allocation209_spill] sm:$0xff]  ;;  %v15168_v12 = vld [vmem:[#allocation266_spill] sm:$0xff]  ;;  %8388 = vmatprep.mubr.msk.f32.mxu0 %vm3397_vm10, %v3361_v55  ;;  %v8619_v58 = vld [vmem:[#allocation2 + $0x288] sm:$0xff] }
 0x489   :  { %v3104_v54 = vsel %vm3056_vm5, %v3039_v37, %v15167_v30  ;;  %v3168_v25 = vsel %vm3121_vm6, %v3103_v62, %v15168_v12  ;;  %v3362_v46 = vsel %vm3316_vm9, %v3297_v45, %v2761_v10  ;;  %v15169_v63 = vld [vmem:[#allocation42_spill] sm:$0xff]  ;;  %v15170_v36 = vld [vmem:[#allocation96_spill] sm:$0xff]  ;;  %v15171_v29 = vld [vmem:[#allocation267_spill] sm:$0xff]  ;;  %v2767_v45 = vpop.permute.xlu0 %2766  ;;  %v2769_v12 = vpop.permute.xlu1 %2768 }
 0x48a   :  { %v2912_v52 = vsel %vm20_vm0, %v8619_v58, %v15169_v63  ;;  %v2975_v17 = vsel %vm2926_vm3, %v2910_v59, %v15170_v36  ;;  %v3169_v57 = vsel %vm3121_vm6, %v3104_v54, %v15171_v29  ;;  %v15172_v11 = vld [vmem:[#allocation324_spill] sm:$0xff]  ;;  %8389 = vmatmul.mubr.msk.f32.gmra.mrb[44].mxu0 %vm3397_vm10, %v3362_v46  ;;  %v15173_v50 = vld [vmem:[#allocation97_spill] sm:$0xff]  ;;  %v15176_v19 = vld [vmem:[#allocation383_spill] sm:$0xff] }
 0x48b   :  { %v3233_v1 = vsel %vm3186_vm7, %v3168_v25, %v15172_v11  ;;  %v2976_v40 = vsel %vm2926_vm3, %v2911_v44, %v15173_v50  ;;  %v15174_v38 = vld [vmem:[#allocation152_spill] sm:$0xff]  ;;  %v15175_v48 = vld [vmem:[#allocation325_spill] sm:$0xff]  ;;  %v15178_v3 = vld [vmem:[#allocation210_spill] sm:$0xff] }
 0x48c   :  { %v3040_v0 = vsel %vm2991_vm4, %v2975_v17, %v15174_v38  ;;  %v3234_v21 = vsel %vm3186_vm7, %v3169_v57, %v15175_v48  ;;  %v3298_v16 = vsel %vm3251_vm8, %v3233_v1, %v15176_v19  ;;  %v15177_v53 = vld [vmem:[#allocation153_spill] sm:$0xff]  ;;  %v15179_v34 = vld [vmem:[#allocation384_spill] sm:$0xff]  ;;  %v15180_v56 = vld [vmem:[#allocation43_spill] sm:$0xff] }
 0x48d   :  { %v3041_v2 = vsel %vm2991_vm4, %v2976_v40, %v15177_v53  ;;  %v3105_v24 = vsel %vm3056_vm5, %v3040_v0, %v15178_v3  ;;  %v3299_v7 = vsel %vm3251_vm8, %v3234_v21, %v15179_v34  ;;  %v3363_v15 = vsel %vm3316_vm9, %v3298_v16, %v2763_v32  ;;  %v8620_v31 = vld [vmem:[#allocation2 + $0x290] sm:$0xff]  ;;  %v15181_v59 = vld [vmem:[#allocation211_spill] sm:$0xff]  ;;  %v15182_v13 = vld [vmem:[#allocation268_spill] sm:$0xff] }
 0x48e   :  { %v2913_v35 = vsel %vm20_vm0, %v8620_v31, %v15180_v56  ;;  %v3106_v9 = vsel %vm3056_vm5, %v3041_v2, %v15181_v59  ;;  %v3170_v61 = vsel %vm3121_vm6, %v3105_v24, %v15182_v13  ;;  %v3364_v42 = vsel %vm3316_vm9, %v3299_v7, %v2765_v4  ;;  %8391 = vmatprep.mubr.msk.f32.mxu0 %vm3397_vm10, %v3363_v15  ;;  %v4168_v22 = vld [vmem:[#allocation2 + $0x9] sm:$0xff]  ;;  %v15183_v33 = vld [vmem:[#allocation98_spill] sm:$0xff]  ;;  %v4167_v43 = vld [vmem:[#allocation2 + $0x1] sm:$0xff]  ;;  %v2771_v7 = vpop.permute.xlu0 %2770  ;;  %v2773_v13 = vpop.permute.xlu1 %2772 }
 0x48f   :  { %v2977_v26 = vsel %vm2926_vm3, %v2912_v52, %v15183_v33  ;;  %v15184_v14 = vld [vmem:[#allocation269_spill] sm:$0xff]  ;;  %v15185_v49 = vld [vmem:[#allocation326_spill] sm:$0xff]  ;;  %8392 = vmatmul.mubr.msk.f32.gmra.mrb[46].mxu0 %vm3397_vm10, %v3364_v42  ;;  %4745 = vrot.lane.b32.xlu1 %v4168_v22, %s8695_s12  ;;  %v15186_v41 = vld [vmem:[#allocation99_spill] sm:$0xff] }
 0x490   :  { %v3171_v51 = vsel %vm3121_vm6, %v3106_v9, %v15184_v14  ;;  %v3235_v60 = vsel %vm3186_vm7, %v3170_v61, %v15185_v49  ;;  %v2978_v27 = vsel %vm2926_vm3, %v2913_v35, %v15186_v41  ;;  %v15187_v20 = vld [vmem:[#allocation154_spill] sm:$0xff]  ;;  %v15188_v37 = vld [vmem:[#allocation327_spill] sm:$0xff]  ;;  %v15189_v62 = vld [vmem:[#allocation385_spill] sm:$0xff]  ;;  %4743 = vrot.lane.b32.xlu0 %v4167_v43, %s8695_s12 }
 0x491   :  { %v3042_v8 = vsel %vm2991_vm4, %v2977_v26, %v15187_v20  ;;  %v3236_v23 = vsel %vm3186_vm7, %v3171_v51, %v15188_v37  ;;  %v3300_v47 = vsel %vm3251_vm8, %v3235_v60, %v15189_v62  ;;  %v15190_v55 = vld [vmem:[#allocation155_spill] sm:$0xff]  ;;  %v15191_v18 = vld [vmem:[#allocation212_spill] sm:$0xff]  ;;  %v15192_v44 = vld [vmem:[#allocation386_spill] sm:$0xff] }
 0x492   :  { %v3043_v10 = vsel %vm2991_vm4, %v2978_v27, %v15190_v55  ;;  %v3107_v5 = vsel %vm3056_vm5, %v3042_v8, %v15191_v18  ;;  %v3301_v30 = vsel %vm3251_vm8, %v3236_v23, %v15192_v44  ;;  %v3365_v54 = vsel %vm3316_vm9, %v3300_v47, %v2767_v45  ;;  %v8621_v25 = vld [vmem:[#allocation2 + $0x2a0] sm:$0xff]  ;;  %v15193_v46 = vld [vmem:[#allocation44_spill] sm:$0xff]  ;;  %v15194_v63 = vld [vmem:[#allocation213_spill] sm:$0xff] }
 0x493   :  { %v2914_v58 = vsel %vm20_vm0, %v8621_v25, %v15193_v46  ;;  %v3108_v52 = vsel %vm3056_vm5, %v3043_v10, %v15194_v63  ;;  %v15195_v36 = vld [vmem:[#allocation270_spill] sm:$0xff]  ;;  %v3366_v29 = vsel %vm3316_vm9, %v3301_v30, %v2769_v12  ;;  %8394 = vmatprep.mubr.msk.f32.mxu0 %vm3397_vm10, %v3365_v54  ;;  %v8622_v57 = vld [vmem:[#allocation2 + $0x2a8] sm:$0xff]  ;;  %v15196_v11 = vld [vmem:[#allocation45_spill] sm:$0xff]  ;;  %v2775_v54 = vpop.permute.xlu0 %2774 }
 0x494   :  { %v3172_v17 = vsel %vm3121_vm6, %v3107_v5, %v15195_v36  ;;  %v2915_v1 = vsel %vm20_vm0, %v8622_v57, %v15196_v11  ;;  %v15197_v50 = vld [vmem:[#allocation100_spill] sm:$0xff]  ;;  %v15198_v38 = vld [vmem:[#allocation271_spill] sm:$0xff]  ;;  %8395 = vmatmul.mubr.msk.f32.gmra.mrb[48].mxu0 %vm3397_vm10, %v3366_v29  ;;  %v15200_v19 = vld [vmem:[#allocation101_spill] sm:$0xff] }
 0x495   :  { %v2979_v40 = vsel %vm2926_vm3, %v2914_v58, %v15197_v50  ;;  %v3173_v0 = vsel %vm3121_vm6, %v3108_v52, %v15198_v38  ;;  %v15199_v48 = vld [vmem:[#allocation328_spill] sm:$0xff]  ;;  %v2980_v16 = vsel %vm2926_vm3, %v2915_v1, %v15200_v19  ;;  %v15202_v2 = vld [vmem:[#allocation329_spill] sm:$0xff]  ;;  %v15203_v24 = vld [vmem:[#allocation387_spill] sm:$0xff] }
 0x496   :  { %v3237_v21 = vsel %vm3186_vm7, %v3172_v17, %v15199_v48  ;;  %v15201_v32 = vld [vmem:[#allocation156_spill] sm:$0xff]  ;;  %v3238_v3 = vsel %vm3186_vm7, %v3173_v0, %v15202_v2  ;;  %v15204_v15 = vld [vmem:[#allocation157_spill] sm:$0xff]  ;;  %v15205_v31 = vld [vmem:[#allocation214_spill] sm:$0xff]  ;;  %v2777_v17 = vpop.permute.xlu1 %2776 }
 0x497   :  { %v3044_v53 = vsel %vm2991_vm4, %v2979_v40, %v15201_v32  ;;  %v3302_v34 = vsel %vm3251_vm8, %v3237_v21, %v15203_v24  ;;  %v3045_v4 = vsel %vm2991_vm4, %v2980_v16, %v15204_v15  ;;  %v15206_v35 = vld [vmem:[#allocation388_spill] sm:$0xff]  ;;  %v8623_v61 = vld [vmem:[#allocation2 + $0x2b8] sm:$0xff]  ;;  %v15208_v33 = vld [vmem:[#allocation215_spill] sm:$0xff] }
 0x498   :  { %v3109_v56 = vsel %vm3056_vm5, %v3044_v53, %v15205_v31  ;;  %v3303_v59 = vsel %vm3251_vm8, %v3238_v3, %v15206_v35  ;;  %v3367_v9 = vsel %vm3316_vm9, %v3302_v34, %v2771_v7  ;;  %v15207_v42 = vld [vmem:[#allocation46_spill] sm:$0xff]  ;;  %v3110_v26 = vsel %vm3056_vm5, %v3045_v4, %v15208_v33  ;;  %v15209_v14 = vld [vmem:[#allocation272_spill] sm:$0xff]  ;;  %v8624_v60 = vld [vmem:[#allocation2 + $0x2c0] sm:$0xff] }
 0x499   :  { %v2916_v22 = vsel %vm20_vm0, %v8623_v61, %v15207_v42  ;;  %v3174_v51 = vsel %vm3121_vm6, %v3109_v56, %v15209_v14  ;;  %v3368_v49 = vsel %vm3316_vm9, %v3303_v59, %v2773_v13  ;;  %8397 = vmatprep.mubr.msk.f32.mxu0 %vm3397_vm10, %v3367_v9  ;;  %v15210_v43 = vld [vmem:[#allocation47_spill] sm:$0xff]  ;;  %v15211_v27 = vld [vmem:[#allocation102_spill] sm:$0xff]  ;;  %v15212_v8 = vld [vmem:[#allocation273_spill] sm:$0xff]  ;;  %v2779_v9 = vpop.permute.xlu0 %2778 }
 0x49a   :  { %v2917_v41 = vsel %vm20_vm0, %v8624_v60, %v15210_v43  ;;  %v2981_v20 = vsel %vm2926_vm3, %v2916_v22, %v15211_v27  ;;  %v3175_v37 = vsel %vm3121_vm6, %v3110_v26, %v15212_v8  ;;  %v15213_v23 = vld [vmem:[#allocation330_spill] sm:$0xff]  ;;  %8398 = vmatmul.mubr.msk.f32.gmra.mrb[50].mxu0 %vm3397_vm10, %v3368_v49  ;;  %v15214_v47 = vld [vmem:[#allocation103_spill] sm:$0xff]  ;;  %v15217_v44 = vld [vmem:[#allocation389_spill] sm:$0xff] }
 0x49b   :  { %v3239_v62 = vsel %vm3186_vm7, %v3174_v51, %v15213_v23  ;;  %v2982_v45 = vsel %vm2926_vm3, %v2917_v41, %v15214_v47  ;;  %v15215_v55 = vld [vmem:[#allocation158_spill] sm:$0xff]  ;;  %v15216_v18 = vld [vmem:[#allocation331_spill] sm:$0xff]  ;;  %v15219_v46 = vld [vmem:[#allocation216_spill] sm:$0xff]  ;;  %v2781_v51 = vpop.permute.xlu1 %2780 }
 0x49c   :  { %v3046_v10 = vsel %vm2991_vm4, %v2981_v20, %v15215_v55  ;;  %v3240_v5 = vsel %vm3186_vm7, %v3175_v37, %v15216_v18  ;;  %v3304_v30 = vsel %vm3251_vm8, %v3239_v62, %v15217_v44  ;;  %v15218_v12 = vld [vmem:[#allocation159_spill] sm:$0xff]  ;;  %v15220_v63 = vld [vmem:[#allocation390_spill] sm:$0xff]  ;;  %v8625_v29 = vld [vmem:[#allocation2 + $0x2d0] sm:$0xff] }
 0x49d   :  { %v3047_v25 = vsel %vm2991_vm4, %v2982_v45, %v15218_v12  ;;  %v3111_v58 = vsel %vm3056_vm5, %v3046_v10, %v15219_v46  ;;  %v3305_v52 = vsel %vm3251_vm8, %v3240_v5, %v15220_v63  ;;  %v3369_v36 = vsel %vm3316_vm9, %v3304_v30, %v2775_v54  ;;  %v15221_v57 = vld [vmem:[#allocation48_spill] sm:$0xff]  ;;  %v15222_v1 = vld [vmem:[#allocation217_spill] sm:$0xff]  ;;  %v15223_v40 = vld [vmem:[#allocation274_spill] sm:$0xff] }
 0x49e   :  { %v2918_v11 = vsel %vm20_vm0, %v8625_v29, %v15221_v57  ;;  %v3112_v50 = vsel %vm3056_vm5, %v3047_v25, %v15222_v1  ;;  %v3176_v38 = vsel %vm3121_vm6, %v3111_v58, %v15223_v40  ;;  %v3370_v0 = vsel %vm3316_vm9, %v3305_v52, %v2777_v17  ;;  %8400 = vmatprep.mubr.msk.f32.mxu0 %vm3397_vm10, %v3369_v36  ;;  %v8626_v48 = vld [vmem:[#allocation2 + $0x2d8] sm:$0xff]  ;;  %v15224_v21 = vld [vmem:[#allocation49_spill] sm:$0xff]  ;;  %v15225_v16 = vld [vmem:[#allocation104_spill] sm:$0xff]  ;;  %v2783_v36 = vpop.permute.xlu0 %2782 }
 0x49f   :  { %v2919_v19 = vsel %vm20_vm0, %v8626_v48, %v15224_v21  ;;  %v2983_v32 = vsel %vm2926_vm3, %v2918_v11, %v15225_v16  ;;  %v15226_v53 = vld [vmem:[#allocation275_spill] sm:$0xff]  ;;  %v15227_v3 = vld [vmem:[#allocation332_spill] sm:$0xff]  ;;  %8401 = vmatmul.mubr.msk.f32.gmra.mrb[52].mxu0 %vm3397_vm10, %v3370_v0  ;;  %v15228_v34 = vld [vmem:[#allocation105_spill] sm:$0xff] }
 0x4a0   :  { %v3177_v2 = vsel %vm3121_vm6, %v3112_v50, %v15226_v53  ;;  %v3241_v24 = vsel %vm3186_vm7, %v3176_v38, %v15227_v3  ;;  %v2984_v7 = vsel %vm2926_vm3, %v2919_v19, %v15228_v34  ;;  %v15229_v15 = vld [vmem:[#allocation160_spill] sm:$0xff]  ;;  %v15230_v31 = vld [vmem:[#allocation333_spill] sm:$0xff]  ;;  %v15231_v35 = vld [vmem:[#allocation391_spill] sm:$0xff]  ;;  %v2785_v38 = vpop.permute.xlu1 %2784 }
 0x4a1   :  { %v3048_v4 = vsel %vm2991_vm4, %v2983_v32, %v15229_v15  ;;  %v3242_v56 = vsel %vm3186_vm7, %v3177_v2, %v15230_v31  ;;  %v3306_v59 = vsel %vm3251_vm8, %v3241_v24, %v15231_v35  ;;  %v15232_v13 = vld [vmem:[#allocation161_spill] sm:$0xff]  ;;  %v15233_v42 = vld [vmem:[#allocation218_spill] sm:$0xff]  ;;  %v15234_v33 = vld [vmem:[#allocation392_spill] sm:$0xff] }
 0x4a2   :  { %v3049_v61 = vsel %vm2991_vm4, %v2984_v7, %v15232_v13  ;;  %v3113_v22 = vsel %vm3056_vm5, %v3048_v4, %v15233_v42  ;;  %v3307_v26 = vsel %vm3251_vm8, %v3242_v56, %v15234_v33  ;;  %v3371_v14 = vsel %vm3316_vm9, %v3306_v59, %v2779_v9  ;;  %v8627_v49 = vld [vmem:[#allocation2 + $0x2e8] sm:$0xff]  ;;  %v15235_v60 = vld [vmem:[#allocation50_spill] sm:$0xff]  ;;  %v15236_v41 = vld [vmem:[#allocation219_spill] sm:$0xff] }
 0x4a3   :  { %v2920_v43 = vsel %vm20_vm0, %v8627_v49, %v15235_v60  ;;  %v3114_v27 = vsel %vm3056_vm5, %v3049_v61, %v15236_v41  ;;  %v15237_v20 = vld [vmem:[#allocation276_spill] sm:$0xff]  ;;  %v3372_v37 = vsel %vm3316_vm9, %v3307_v26, %v2781_v51  ;;  %8403 = vmatprep.mubr.msk.f32.mxu0 %vm3397_vm10, %v3371_v14  ;;  %v8628_v23 = vld [vmem:[#allocation2 + $0x2f0] sm:$0xff]  ;;  %v15238_v62 = vld [vmem:[#allocation51_spill] sm:$0xff]  ;;  %v2787_v14 = vpop.permute.xlu0 %2786 }
 0x4a4   :  { %v3178_v8 = vsel %vm3121_vm6, %v3113_v22, %v15237_v20  ;;  %v2921_v47 = vsel %vm20_vm0, %v8628_v23, %v15238_v62  ;;  %v15239_v45 = vld [vmem:[#allocation106_spill] sm:$0xff]  ;;  %v15240_v10 = vld [vmem:[#allocation277_spill] sm:$0xff]  ;;  %8404 = vmatmul.mubr.msk.f32.gmra.mrb[54].mxu0 %vm3397_vm10, %v3372_v37  ;;  %v15242_v30 = vld [vmem:[#allocation107_spill] sm:$0xff] }
 0x4a5   :  { %v2985_v55 = vsel %vm2926_vm3, %v2920_v43, %v15239_v45  ;;  %v3179_v18 = vsel %vm3121_vm6, %v3114_v27, %v15240_v10  ;;  %v15241_v5 = vld [vmem:[#allocation334_spill] sm:$0xff]  ;;  %v2986_v54 = vsel %vm2926_vm3, %v2921_v47, %v15242_v30  ;;  %v15244_v46 = vld [vmem:[#allocation335_spill] sm:$0xff]  ;;  %v15245_v63 = vld [vmem:[#allocation393_spill] sm:$0xff] }
 0x4a6   :  { %v3243_v44 = vsel %vm3186_vm7, %v3178_v8, %v15241_v5  ;;  %v15243_v12 = vld [vmem:[#allocation162_spill] sm:$0xff]  ;;  %v3244_v58 = vsel %vm3186_vm7, %v3179_v18, %v15244_v46  ;;  %v15246_v17 = vld [vmem:[#allocation163_spill] sm:$0xff]  ;;  %v15247_v57 = vld [vmem:[#allocation220_spill] sm:$0xff]  ;;  %v2789_v8 = vpop.permute.xlu1 %2788 }
 0x4a7   :  { %v3050_v25 = vsel %vm2991_vm4, %v2985_v55, %v15243_v12  ;;  %v3308_v52 = vsel %vm3251_vm8, %v3243_v44, %v15245_v63  ;;  %v3051_v29 = vsel %vm2991_vm4, %v2986_v54, %v15246_v17  ;;  %v15248_v1 = vld [vmem:[#allocation394_spill] sm:$0xff]  ;;  %v8629_v0 = vld [vmem:[#allocation2 + $0x300] sm:$0xff]  ;;  %v15249_v48 = vld [vmem:[#allocation52_spill] sm:$0xff] }
 0x4a8   :  { %v3115_v11 = vsel %vm3056_vm5, %v3050_v25, %v15247_v57  ;;  %v3309_v50 = vsel %vm3251_vm8, %v3244_v58, %v15248_v1  ;;  %v3373_v40 = vsel %vm3316_vm9, %v3308_v52, %v2783_v36  ;;  %v2922_v21 = vsel %vm20_vm0, %v8629_v0, %v15249_v48  ;;  %v15250_v19 = vld [vmem:[#allocation221_spill] sm:$0xff]  ;;  %v15251_v32 = vld [vmem:[#allocation278_spill] sm:$0xff]  ;;  %v8630_v3 = vld [vmem:[#allocation2 + $0x308] sm:$0xff] }
 0x4a9   :  { %v3116_v16 = vsel %vm3056_vm5, %v3051_v29, %v15250_v19  ;;  %v3180_v53 = vsel %vm3121_vm6, %v3115_v11, %v15251_v32  ;;  %v3374_v2 = vsel %vm3316_vm9, %v3309_v50, %v2785_v38  ;;  %8406 = vmatprep.mubr.msk.f32.mxu0 %vm3397_vm10, %v3373_v40  ;;  %v15252_v24 = vld [vmem:[#allocation53_spill] sm:$0xff]  ;;  %v15253_v7 = vld [vmem:[#allocation108_spill] sm:$0xff]  ;;  %v15254_v4 = vld [vmem:[#allocation279_spill] sm:$0xff]  ;;  %v2791_v40 = vpop.permute.xlu0 %2790 }
 0x4aa   :  { %v2923_v34 = vsel %vm20_vm0, %v8630_v3, %v15252_v24  ;;  %v2987_v15 = vsel %vm2926_vm3, %v2922_v21, %v15253_v7  ;;  %v3181_v31 = vsel %vm3121_vm6, %v3116_v16, %v15254_v4  ;;  %v15255_v56 = vld [vmem:[#allocation336_spill] sm:$0xff]  ;;  %8407 = vmatmul.mubr.msk.f32.gmra.mrb[56].mxu0 %vm3397_vm10, %v3374_v2  ;;  %v15256_v59 = vld [vmem:[#allocation109_spill] sm:$0xff]  ;;  %v15259_v33 = vld [vmem:[#allocation395_spill] sm:$0xff]  ;;  %v2793_v32 = vpop.permute.xlu1 %2792 }
 0x4ab   :  { %v3245_v35 = vsel %vm3186_vm7, %v3180_v53, %v15255_v56  ;;  %v2988_v9 = vsel %vm2926_vm3, %v2923_v34, %v15256_v59  ;;  %v15257_v13 = vld [vmem:[#allocation164_spill] sm:$0xff]  ;;  %v15258_v42 = vld [vmem:[#allocation337_spill] sm:$0xff]  ;;  %v15261_v60 = vld [vmem:[#allocation222_spill] sm:$0xff] }
 0x4ac   :  { %v3052_v61 = vsel %vm2991_vm4, %v2987_v15, %v15257_v13  ;;  %v3246_v22 = vsel %vm3186_vm7, %v3181_v31, %v15258_v42  ;;  %v3310_v26 = vsel %vm3251_vm8, %v3245_v35, %v15259_v33  ;;  %v15260_v51 = vld [vmem:[#allocation165_spill] sm:$0xff]  ;;  %v15262_v41 = vld [vmem:[#allocation396_spill] sm:$0xff]  ;;  %v8631_v37 = vld [vmem:[#allocation2 + $0x318] sm:$0xff] }
 0x4ad   :  { %v3053_v49 = vsel %vm2991_vm4, %v2988_v9, %v15260_v51  ;;  %v3117_v43 = vsel %vm3056_vm5, %v3052_v61, %v15261_v60  ;;  %v3311_v27 = vsel %vm3251_vm8, %v3246_v22, %v15262_v41  ;;  %v3375_v20 = vsel %vm3316_vm9, %v3310_v26, %v2787_v14  ;;  %v15263_v23 = vld [vmem:[#allocation54_spill] sm:$0xff]  ;;  %v15264_v47 = vld [vmem:[#allocation223_spill] sm:$0xff]  ;;  %v15265_v55 = vld [vmem:[#allocation280_spill] sm:$0xff]  ;;  %v2795_v59 = vpop.permute.xlu0 %2794 }
 0x4ae   :  { %v2924_v62 = vsel %vm20_vm0, %v8631_v37, %v15263_v23  ;;  %v3118_v45 = vsel %vm3056_vm5, %v3053_v49, %v15264_v47  ;;  %v3182_v10 = vsel %vm3121_vm6, %v3117_v43, %v15265_v55  ;;  %v3376_v18 = vsel %vm3316_vm9, %v3311_v27, %v2789_v8  ;;  %8409 = vmatprep.mubr.msk.f32.mxu0 %vm3397_vm10, %v3375_v20  ;;  %v8632_v5 = vld [vmem:[#allocation2 + $0x320] sm:$0xff]  ;;  %v15267_v54 = vld [vmem:[#allocation110_spill] sm:$0xff]  ;;  %v15268_v25 = vld [vmem:[#allocation281_spill] sm:$0xff]  ;;  %v2797_v61 = vpop.permute.xlu1 %2796 }
 0x4af   :  { %v15266_v44 = vld [vmem:[#allocation55_spill] sm:$0xff]  ;;  %v2989_v12 = vsel %vm2926_vm3, %v2924_v62, %v15267_v54  ;;  %v3183_v46 = vsel %vm3121_vm6, %v3118_v45, %v15268_v25  ;;  %v15269_v58 = vld [vmem:[#allocation338_spill] sm:$0xff]  ;;  %8410 = vmatmul.mubr.msk.f32.gmra.mrb[58].mxu0 %vm3397_vm10, %v3376_v18  ;;  %v15273_v1 = vld [vmem:[#allocation397_spill] sm:$0xff] }
 0x4b0   :  { %v2925_v30 = vsel %vm20_vm0, %v8632_v5, %v15266_v44  ;;  %v3247_v63 = vsel %vm3186_vm7, %v3182_v10, %v15269_v58  ;;  %v15270_v52 = vld [vmem:[#allocation111_spill] sm:$0xff]  ;;  %v15271_v17 = vld [vmem:[#allocation166_spill] sm:$0xff]  ;;  %v15275_v48 = vld [vmem:[#allocation224_spill] sm:$0xff] }
 0x4b1   :  { %v2990_v36 = vsel %vm2926_vm3, %v2925_v30, %v15270_v52  ;;  %v3054_v29 = vsel %vm2991_vm4, %v2989_v12, %v15271_v17  ;;  %v15272_v57 = vld [vmem:[#allocation339_spill] sm:$0xff]  ;;  %v3312_v50 = vsel %vm3251_vm8, %v3247_v63, %v15273_v1  ;;  %v15276_v53 = vld [vmem:[#allocation225_spill] sm:$0xff]  ;;  %v15277_v3 = vld [vmem:[#allocation282_spill] sm:$0xff] }
 0x4b2   :  { %v3248_v11 = vsel %vm3186_vm7, %v3183_v46, %v15272_v57  ;;  %v15274_v38 = vld [vmem:[#allocation167_spill] sm:$0xff]  ;;  %v3119_v21 = vsel %vm3056_vm5, %v3054_v29, %v15275_v48  ;;  %v3377_v16 = vsel %vm3316_vm9, %v3312_v50, %v2791_v40  ;;  %v15279_v4 = vld [vmem:[#allocation340_spill] sm:$0xff] }
 0x4b3   :  { %v3055_v0 = vsel %vm2991_vm4, %v2990_v36, %v15274_v38  ;;  %v3313_v19 = vsel %vm3251_vm8, %v3248_v11, %v10587_v28  ;;  %v3184_v24 = vsel %vm3121_vm6, %v3119_v21, %v15277_v3  ;;  %8412 = vmatprep.mubr.msk.f32.mxu0 %vm3397_vm10, %v3377_v16  ;;  %v15278_v7 = vld [vmem:[#allocation283_spill] sm:$0xff]  ;;  %v15280_v28 = vld [vmem:[#allocation341_spill] sm:$0xff] }
 0x4b4   :  { %v3120_v2 = vsel %vm3056_vm5, %v3055_v0, %v15276_v53  ;;  %v3378_v34 = vsel %vm3316_vm9, %v3313_v19, %v2793_v32  ;;  %v3249_v31 = vsel %vm3186_vm7, %v3184_v24, %v15279_v4  ;;  %v11641_v22 = vld [vmem:[%s14481_s2] ss:$0 sm:$0xff] }
 0x4b5   :  { %v3185_v15 = vsel %vm3121_vm6, %v3120_v2, %v15278_v7  ;;  %8413 = vmatmul.mubr.msk.f32.gmra.mrb[60].mxu0 %vm3397_vm10, %v3378_v34  ;;  %v3314_v35 = vsel %vm3251_vm8, %v3249_v31, %v10615_v6 }
 0x4b6   :  { %v3250_v56 = vsel %vm3186_vm7, %v3185_v15, %v15280_v28  ;;  %v3379_v13 = vsel %vm3316_vm9, %v3314_v35, %v2795_v59 }
 0x4b7   :  { %v3315_v9 = vsel %vm3251_vm8, %v3250_v56, %v10625_v39  ;;  %8415 = vmatprep.mubr.msk.f32.mxu0 %vm3397_vm10, %v3379_v13 }
 0x4b8   :  { %v3380_v42 = vsel %vm3316_vm9, %v3315_v9, %v2797_v61 }
 0x4b9   :  { %8416 = vmatmul.mubr.msk.f32.gmra.mrb[62].mxu0 %vm3397_vm10, %v3380_v42 }
 0x4f6   :  { %v8324_v33 = vpop.f32.mrb[0].mxu0 }
 0x4f7   :  { %v3662_v6 = vadd.f32 %v8324_v33, %v11641_v22  ;;  %v3656_v26 = vpop.f32.mrb[1].mxu0 }
 0x4f8   :  { %v3657_v39 = vadd.f32 %v11641_v22, %v3656_v26 }
 0x4f9   :  { %v3976_v14 = vmax.f32 %v3662_v6, 0.0 }
 0x4fa   :  { %v3975_v51 = vmax.f32 %v3657_v39, 0.0  ;;  %v8327_v49 = vpop.f32.mrb[2].mxu0 }
 0x4fb   :  { %4040 = vst.msk [vmem:[#allocation2 + $0x21] sm:$0xff] %vm20_vm0, %v3976_v14  ;;  %v3672_v60 = vadd.f32 %v8327_v49, %v11641_v22  ;;  %v3666_v43 = vpop.f32.mrb[3].mxu0 }
 0x4fc   :  { %4039 = vst.msk [vmem:[#allocation2 + $0x19] sm:$0xff] %vm20_vm0, %v3975_v51  ;;  %v3667_v41 = vadd.f32 %v11641_v22, %v3666_v43 }
 0x4fd   :  { %v3978_v27 = vmax.f32 %v3672_v60, 0.0 }
 0x4fe   :  { %v3977_v20 = vmax.f32 %v3667_v41, 0.0  ;;  %v8330_v8 = vpop.f32.mrb[4].mxu0 }
 0x4ff   :  { %4042 = vst.msk [vmem:[#allocation2 + $0x39] sm:$0xff] %vm20_vm0, %v3978_v27  ;;  %v3682_v37 = vadd.f32 %v8330_v8, %v11641_v22  ;;  %v3676_v23 = vpop.f32.mrb[5].mxu0 }
 0x500   :  { %4041 = vst.msk [vmem:[#allocation2 + $0x31] sm:$0xff] %vm20_vm0, %v3977_v20  ;;  %v3677_v62 = vadd.f32 %v11641_v22, %v3676_v23 }
 0x501   :  { %v3980_v47 = vmax.f32 %v3682_v37, 0.0 }
 0x502   :  { %v3979_v45 = vmax.f32 %v3677_v62, 0.0  ;;  %v8333_v55 = vpop.f32.mrb[6].mxu0  ;;  %v4170_v10 = vld [vmem:[#allocation2 + $0x21] sm:$0xff] }
 0x503   :  { %4044 = vst.msk [vmem:[#allocation2 + $0x51] sm:$0xff] %vm20_vm0, %v3980_v47  ;;  %v3692_v18 = vadd.f32 %v8333_v55, %v11641_v22  ;;  %4749 = vrot.lane.b32.xlu1 %v4170_v10, %s8695_s12  ;;  %v3686_v5 = vpop.f32.mrb[7].mxu0  ;;  %v4169_v44 = vld [vmem:[#allocation2 + $0x19] sm:$0xff] }
 0x504   :  { %4043 = vst.msk [vmem:[#allocation2 + $0x49] sm:$0xff] %vm20_vm0, %v3979_v45  ;;  %v3687_v30 = vadd.f32 %v11641_v22, %v3686_v5  ;;  %4747 = vrot.lane.b32.xlu0 %v4169_v44, %s8695_s12 }
 0x505   :  { %v3982_v54 = vmax.f32 %v3692_v18, 0.0 }
 0x506   :  { %v3981_v12 = vmax.f32 %v3687_v30, 0.0  ;;  %v8336_v25 = vpop.f32.mrb[8].mxu0  ;;  %v4172_v46 = vld [vmem:[#allocation2 + $0x39] sm:$0xff] }
 0x507   :  { %4046 = vst.msk [vmem:[#allocation2 + $0x69] sm:$0xff] %vm20_vm0, %v3982_v54  ;;  %v3702_v58 = vadd.f32 %v8336_v25, %v11641_v22  ;;  %4753 = vrot.lane.b32.xlu1 %v4172_v46, %s8695_s12  ;;  %v3696_v63 = vpop.f32.mrb[9].mxu0  ;;  %v4171_v52 = vld [vmem:[#allocation2 + $0x31] sm:$0xff] }
 0x508   :  { %4045 = vst.msk [vmem:[#allocation2 + $0x61] sm:$0xff] %vm20_vm0, %v3981_v12  ;;  %v3697_v36 = vadd.f32 %v11641_v22, %v3696_v63  ;;  %4751 = vrot.lane.b32.xlu0 %v4171_v52, %s8695_s12 }
 0x509   :  { %v3984_v17 = vmax.f32 %v3702_v58, 0.0 }
 0x50a   :  { %v3983_v29 = vmax.f32 %v3697_v36, 0.0  ;;  %v8339_v57 = vpop.f32.mrb[10].mxu0  ;;  %v4174_v11 = vld [vmem:[#allocation2 + $0x51] sm:$0xff] }
 0x50b   :  { %4048 = vst.msk [vmem:[#allocation2 + $0x81] sm:$0xff] %vm20_vm0, %v3984_v17  ;;  %v3712_v1 = vadd.f32 %v8339_v57, %v11641_v22  ;;  %4757 = vrot.lane.b32.xlu1 %v4174_v11, %s8695_s12  ;;  %v3706_v50 = vpop.f32.mrb[11].mxu0  ;;  %v4173_v40 = vld [vmem:[#allocation2 + $0x49] sm:$0xff] }
 0x50c   :  { %4047 = vst.msk [vmem:[#allocation2 + $0x79] sm:$0xff] %vm20_vm0, %v3983_v29  ;;  %v3707_v38 = vadd.f32 %v11641_v22, %v3706_v50  ;;  %4755 = vrot.lane.b32.xlu0 %v4173_v40, %s8695_s12 }
 0x50d   :  { %v3986_v0 = vmax.f32 %v3712_v1, 0.0 }
 0x50e   :  { %v3985_v48 = vmax.f32 %v3707_v38, 0.0  ;;  %v8342_v21 = vpop.f32.mrb[12].mxu0  ;;  %v4176_v19 = vld [vmem:[#allocation2 + $0x69] sm:$0xff] }
 0x50f   :  { %4050 = vst.msk [vmem:[#allocation2 + $0x99] sm:$0xff] %vm20_vm0, %v3986_v0  ;;  %v3722_v16 = vadd.f32 %v8342_v21, %v11641_v22  ;;  %4761 = vrot.lane.b32.xlu1 %v4176_v19, %s8695_s12  ;;  %v3716_v32 = vpop.f32.mrb[13].mxu0  ;;  %v4175_v53 = vld [vmem:[#allocation2 + $0x61] sm:$0xff] }
 0x510   :  { %4049 = vst.msk [vmem:[#allocation2 + $0x91] sm:$0xff] %vm20_vm0, %v3985_v48  ;;  %v3717_v2 = vadd.f32 %v11641_v22, %v3716_v32  ;;  %4759 = vrot.lane.b32.xlu0 %v4175_v53, %s8695_s12 }
 0x511   :  { %v3988_v3 = vmax.f32 %v3722_v16, 0.0 }
 0x512   :  { %v3987_v24 = vmax.f32 %v3717_v2, 0.0  ;;  %v8345_v34 = vpop.f32.mrb[14].mxu0  ;;  %v4178_v7 = vld [vmem:[#allocation2 + $0x81] sm:$0xff] }
 0x513   :  { %4052 = vst.msk [vmem:[#allocation2 + $0xb1] sm:$0xff] %vm20_vm0, %v3988_v3  ;;  %v3732_v15 = vadd.f32 %v8345_v34, %v11641_v22  ;;  %4765 = vrot.lane.b32.xlu1 %v4178_v7, %s8695_s12  ;;  %v3726_v4 = vpop.f32.mrb[15].mxu0  ;;  %v4177_v31 = vld [vmem:[#allocation2 + $0x79] sm:$0xff] }
 0x514   :  { %4051 = vst.msk [vmem:[#allocation2 + $0xa9] sm:$0xff] %vm20_vm0, %v3987_v24  ;;  %v3727_v28 = vadd.f32 %v11641_v22, %v3726_v4  ;;  %4763 = vrot.lane.b32.xlu0 %v4177_v31, %s8695_s12 }
 0x515   :  { %v3990_v56 = vmax.f32 %v3732_v15, 0.0 }
 0x516   :  { %v3989_v35 = vmax.f32 %v3727_v28, 0.0  ;;  %v8348_v59 = vpop.f32.mrb[16].mxu0  ;;  %v4180_v9 = vld [vmem:[#allocation2 + $0x99] sm:$0xff] }
 0x517   :  { %4054 = vst.msk [vmem:[#allocation2 + $0xc9] sm:$0xff] %vm20_vm0, %v3990_v56  ;;  %v3742_v13 = vadd.f32 %v8348_v59, %v11641_v22  ;;  %4769 = vrot.lane.b32.xlu1 %v4180_v9, %s8695_s12  ;;  %v3736_v61 = vpop.f32.mrb[17].mxu0  ;;  %v4179_v42 = vld [vmem:[#allocation2 + $0x91] sm:$0xff] }
 0x518   :  { %4053 = vst.msk [vmem:[#allocation2 + $0xc1] sm:$0xff] %vm20_vm0, %v3989_v35  ;;  %v3737_v33 = vadd.f32 %v11641_v22, %v3736_v61  ;;  %4767 = vrot.lane.b32.xlu0 %v4179_v42, %s8695_s12 }
 0x519   :  { %v3992_v6 = vmax.f32 %v3742_v13, 0.0 }
 0x51a   :  { %v3991_v26 = vmax.f32 %v3737_v33, 0.0  ;;  %v8351_v39 = vpop.f32.mrb[18].mxu0  ;;  %v4182_v14 = vld [vmem:[#allocation2 + $0xb1] sm:$0xff] }
 0x51b   :  { %4056 = vst.msk [vmem:[#allocation2 + $0xe1] sm:$0xff] %vm20_vm0, %v3992_v6  ;;  %v3752_v51 = vadd.f32 %v8351_v39, %v11641_v22  ;;  %4773 = vrot.lane.b32.xlu1 %v4182_v14, %s8695_s12  ;;  %v3746_v49 = vpop.f32.mrb[19].mxu0  ;;  %v4181_v60 = vld [vmem:[#allocation2 + $0xa9] sm:$0xff] }
 0x51c   :  { %4055 = vst.msk [vmem:[#allocation2 + $0xd9] sm:$0xff] %vm20_vm0, %v3991_v26  ;;  %v3747_v43 = vadd.f32 %v11641_v22, %v3746_v49  ;;  %4771 = vrot.lane.b32.xlu0 %v4181_v60, %s8695_s12 }
 0x51d   :  { %v3994_v41 = vmax.f32 %v3752_v51, 0.0 }
 0x51e   :  { %v3993_v27 = vmax.f32 %v3747_v43, 0.0  ;;  %v8354_v20 = vpop.f32.mrb[20].mxu0  ;;  %v4184_v8 = vld [vmem:[#allocation2 + $0xc9] sm:$0xff] }
 0x51f   :  { %4058 = vst.msk [vmem:[#allocation2 + $0xf9] sm:$0xff] %vm20_vm0, %v3994_v41  ;;  %v3762_v37 = vadd.f32 %v8354_v20, %v11641_v22  ;;  %4777 = vrot.lane.b32.xlu1 %v4184_v8, %s8695_s12  ;;  %v3756_v23 = vpop.f32.mrb[21].mxu0  ;;  %v4183_v62 = vld [vmem:[#allocation2 + $0xc1] sm:$0xff]  ;;  %v4199_v8 = vld [vmem:[#allocation2 + $0x1b1] sm:$0xff] }
 0x520   :  { %4057 = vst.msk [vmem:[#allocation2 + $0xf1] sm:$0xff] %vm20_vm0, %v3993_v27  ;;  %v3757_v47 = vadd.f32 %v11641_v22, %v3756_v23  ;;  %4775 = vrot.lane.b32.xlu0 %v4183_v62, %s8695_s12  ;;  %v4200_v27 = vld [vmem:[#allocation2 + $0x1b9] sm:$0xff] }
 0x521   :  { %v3996_v45 = vmax.f32 %v3762_v37, 0.0 }
 0x522   :  { %v3995_v55 = vmax.f32 %v3757_v47, 0.0  ;;  %v8357_v10 = vpop.f32.mrb[22].mxu0  ;;  %v4186_v18 = vld [vmem:[#allocation2 + $0xe1] sm:$0xff] }
 0x523   :  { %4060 = vst.msk [vmem:[#allocation2 + $0x111] sm:$0xff] %vm20_vm0, %v3996_v45  ;;  %v3772_v5 = vadd.f32 %v8357_v10, %v11641_v22  ;;  %4781 = vrot.lane.b32.xlu1 %v4186_v18, %s8695_s12  ;;  %v3766_v44 = vpop.f32.mrb[23].mxu0  ;;  %v4185_v30 = vld [vmem:[#allocation2 + $0xd9] sm:$0xff] }
 0x524   :  { %4059 = vst.msk [vmem:[#allocation2 + $0x109] sm:$0xff] %vm20_vm0, %v3995_v55  ;;  %v3767_v54 = vadd.f32 %v11641_v22, %v3766_v44  ;;  %4779 = vrot.lane.b32.xlu0 %v4185_v30, %s8695_s12 }
 0x525   :  { %v3998_v12 = vmax.f32 %v3772_v5, 0.0 }
 0x526   :  { %v3997_v25 = vmax.f32 %v3767_v54, 0.0  ;;  %v4188_v58 = vld [vmem:[#allocation2 + $0xf9] sm:$0xff] }
 0x527   :  { %v8360_v46 = vpop.f32.mrb[24].mxu0  ;;  %4062 = vst.msk [vmem:[#allocation2 + $0x129] sm:$0xff] %vm20_vm0, %v3998_v12  ;;  %4785 = vrot.lane.b32.xlu1 %v4188_v58, %s8695_s12  ;;  %v4187_v36 = vld [vmem:[#allocation2 + $0xf1] sm:$0xff] }
 0x528   :  { %v3782_v63 = vadd.f32 %v8360_v46, %v11641_v22  ;;  %v3776_v52 = vpop.f32.mrb[25].mxu0  ;;  %4061 = vst.msk [vmem:[#allocation2 + $0x121] sm:$0xff] %vm20_vm0, %v3997_v25  ;;  %4783 = vrot.lane.b32.xlu0 %v4187_v36, %s8695_s12 }
 0x529   :  { %v3777_v17 = vadd.f32 %v11641_v22, %v3776_v52 }
 0x52a   :  { %v4000_v29 = vmax.f32 %v3782_v63, 0.0  ;;  %v4190_v1 = vld [vmem:[#allocation2 + $0x111] sm:$0xff] }
 0x52b   :  { %v3999_v57 = vmax.f32 %v3777_v17, 0.0  ;;  %4789 = vrot.lane.b32.xlu1 %v4190_v1, %s8695_s12  ;;  %v4189_v38 = vld [vmem:[#allocation2 + $0x109] sm:$0xff] }
 0x52c   :  { %4064 = vst.msk [vmem:[#allocation2 + $0x141] sm:$0xff] %vm20_vm0, %v4000_v29  ;;  %4787 = vrot.lane.b32.xlu0 %v4189_v38, %s8695_s12 }
 0x52d   :  { %4063 = vst.msk [vmem:[#allocation2 + $0x139] sm:$0xff] %vm20_vm0, %v3999_v57 }
 0x52e   :  { %v8363_v11 = vpop.f32.mrb[26].mxu0  ;;  %v4192_v16 = vld [vmem:[#allocation2 + $0x129] sm:$0xff] }
 0x52f   :  { %v3792_v50 = vadd.f32 %v8363_v11, %v11641_v22  ;;  %v3786_v40 = vpop.f32.mrb[27].mxu0  ;;  %4793 = vrot.lane.b32.xlu1 %v4192_v16, %s8695_s12  ;;  %v4191_v2 = vld [vmem:[#allocation2 + $0x121] sm:$0xff] }
 0x530   :  { %v3787_v0 = vadd.f32 %v11641_v22, %v3786_v40  ;;  %4791 = vrot.lane.b32.xlu0 %v4191_v2, %s8695_s12 }
 0x531   :  { %v4002_v48 = vmax.f32 %v3792_v50, 0.0 }
 0x532   :  { %v4001_v21 = vmax.f32 %v3787_v0, 0.0 }
 0x533   :  { %v8366_v19 = vpop.f32.mrb[28].mxu0  ;;  %4066 = vst.msk [vmem:[#allocation2 + $0x159] sm:$0xff] %vm20_vm0, %v4002_v48  ;;  %v4194_v15 = vld [vmem:[#allocation2 + $0x141] sm:$0xff] }
 0x534   :  { %v3802_v32 = vadd.f32 %v8366_v19, %v11641_v22  ;;  %v3796_v53 = vpop.f32.mrb[29].mxu0  ;;  %4065 = vst.msk [vmem:[#allocation2 + $0x151] sm:$0xff] %vm20_vm0, %v4001_v21  ;;  %4797 = vrot.lane.b32.xlu1 %v4194_v15, %s8695_s12  ;;  %v4193_v28 = vld [vmem:[#allocation2 + $0x139] sm:$0xff] }
 0x535   :  { %v3797_v3 = vadd.f32 %v11641_v22, %v3796_v53  ;;  %4795 = vrot.lane.b32.xlu0 %v4193_v28, %s8695_s12 }
 0x536   :  { %v4004_v24 = vmax.f32 %v3802_v32, 0.0 }
 0x537   :  { %v4003_v34 = vmax.f32 %v3797_v3, 0.0  ;;  %v8369_v7 = vpop.f32.mrb[30].mxu0 }
 0x538   :  { %4068 = vst.msk [vmem:[#allocation2 + $0x171] sm:$0xff] %vm20_vm0, %v4004_v24  ;;  %v3812_v4 = vadd.f32 %v8369_v7, %v11641_v22  ;;  %v3806_v31 = vpop.f32.mrb[31].mxu0 }
 0x539   :  { %4067 = vst.msk [vmem:[#allocation2 + $0x169] sm:$0xff] %vm20_vm0, %v4003_v34  ;;  %v3807_v56 = vadd.f32 %v11641_v22, %v3806_v31 }
 0x53a   :  { %v4006_v35 = vmax.f32 %v3812_v4, 0.0  ;;  %v4196_v13 = vld [vmem:[#allocation2 + $0x159] sm:$0xff] }
 0x53b   :  { %v4005_v59 = vmax.f32 %v3807_v56, 0.0  ;;  %4801 = vrot.lane.b32.xlu1 %v4196_v13, %s8695_s12  ;;  %v4195_v33 = vld [vmem:[#allocation2 + $0x151] sm:$0xff] }
 0x53c   :  { %4070 = vst.msk [vmem:[#allocation2 + $0x189] sm:$0xff] %vm20_vm0, %v4006_v35  ;;  %4799 = vrot.lane.b32.xlu0 %v4195_v33, %s8695_s12 }
 0x53d   :  { %v8372_v9 = vpop.f32.mrb[32].mxu0  ;;  %4069 = vst.msk [vmem:[#allocation2 + $0x181] sm:$0xff] %vm20_vm0, %v4005_v59 }
 0x53e   :  { %v3822_v61 = vadd.f32 %v8372_v9, %v11641_v22  ;;  %v3816_v42 = vpop.f32.mrb[33].mxu0 }
 0x53f   :  { %v3817_v6 = vadd.f32 %v11641_v22, %v3816_v42  ;;  %v4198_v51 = vld [vmem:[#allocation2 + $0x171] sm:$0xff] }
 0x540   :  { %v4008_v26 = vmax.f32 %v3822_v61, 0.0  ;;  %4805 = vrot.lane.b32.xlu1 %v4198_v51, %s8695_s12  ;;  %v4197_v43 = vld [vmem:[#allocation2 + $0x169] sm:$0xff] }
 0x541   :  { %v4007_v39 = vmax.f32 %v3817_v6, 0.0  ;;  %4803 = vrot.lane.b32.xlu0 %v4197_v43, %s8695_s12 }
 0x542   :  { %v8375_v14 = vpop.f32.mrb[34].mxu0  ;;  %4072 = vst.msk [vmem:[#allocation2 + $0x1d1] sm:$0xff] %vm20_vm0, %v4008_v26 }
 0x543   :  { %v3832_v49 = vadd.f32 %v8375_v14, %v11641_v22  ;;  %v3826_v60 = vpop.f32.mrb[35].mxu0  ;;  %4071 = vst.msk [vmem:[#allocation2 + $0x1c9] sm:$0xff] %vm20_vm0, %v4007_v39 }
 0x544   :  { %v3827_v41 = vadd.f32 %v11641_v22, %v3826_v60  ;;  %4809 = vrot.lane.b32.xlu1 %v4200_v27, %s8695_s12 }
 0x545   :  { %v4010_v20 = vmax.f32 %v3832_v49, 0.0  ;;  %4807 = vrot.lane.b32.xlu0 %v4199_v8, %s8695_s12 }
 0x546   :  { %v4009_v37 = vmax.f32 %v3827_v41, 0.0 }
 0x547   :  { %v8378_v23 = vpop.f32.mrb[36].mxu0  ;;  %4074 = vst.msk [vmem:[#allocation2 + $0x1e9] sm:$0xff] %vm20_vm0, %v4010_v20 }
 0x548   :  { %v3842_v62 = vadd.f32 %v8378_v23, %v11641_v22  ;;  %v3836_v47 = vpop.f32.mrb[37].mxu0  ;;  %4073 = vst.msk [vmem:[#allocation2 + $0x1e1] sm:$0xff] %vm20_vm0, %v4009_v37 }
 0x549   :  { %v3837_v45 = vadd.f32 %v11641_v22, %v3836_v47  ;;  %v4202_v5 = vld [vmem:[#allocation2 + $0x1d1] sm:$0xff] }
 0x54a   :  { %v4012_v55 = vmax.f32 %v3842_v62, 0.0  ;;  %4813 = vrot.lane.b32.xlu1 %v4202_v5, %s8695_s12  ;;  %v4201_v54 = vld [vmem:[#allocation2 + $0x1c9] sm:$0xff] }
 0x54b   :  { %v4011_v10 = vmax.f32 %v3837_v45, 0.0  ;;  %4811 = vrot.lane.b32.xlu0 %v4201_v54, %s8695_s12 }
 0x54c   :  { %4076 = vst.msk [vmem:[#allocation2 + $0x201] sm:$0xff] %vm20_vm0, %v4012_v55 }
 0x54d   :  { %v8381_v18 = vpop.f32.mrb[38].mxu0  ;;  %4075 = vst.msk [vmem:[#allocation2 + $0x1f9] sm:$0xff] %vm20_vm0, %v4011_v10 }
 0x54e   :  { %v3852_v44 = vadd.f32 %v8381_v18, %v11641_v22  ;;  %v3846_v30 = vpop.f32.mrb[39].mxu0  ;;  %v4204_v63 = vld [vmem:[#allocation2 + $0x1e9] sm:$0xff] }
 0x54f   :  { %v3847_v12 = vadd.f32 %v11641_v22, %v3846_v30  ;;  %4817 = vrot.lane.b32.xlu1 %v4204_v63, %s8695_s12  ;;  %v4203_v17 = vld [vmem:[#allocation2 + $0x1e1] sm:$0xff] }
 0x550   :  { %v4014_v25 = vmax.f32 %v3852_v44, 0.0  ;;  %4815 = vrot.lane.b32.xlu0 %v4203_v17, %s8695_s12 }
 0x551   :  { %v4013_v46 = vmax.f32 %v3847_v12, 0.0 }
 0x552   :  { %v8384_v58 = vpop.f32.mrb[40].mxu0  ;;  %4078 = vst.msk [vmem:[#allocation2 + $0x219] sm:$0xff] %vm20_vm0, %v4014_v25 }
 0x553   :  { %v3862_v52 = vadd.f32 %v8384_v58, %v11641_v22  ;;  %v3856_v36 = vpop.f32.mrb[41].mxu0  ;;  %4077 = vst.msk [vmem:[#allocation2 + $0x211] sm:$0xff] %vm20_vm0, %v4013_v46  ;;  %v4206_v50 = vld [vmem:[#allocation2 + $0x201] sm:$0xff] }
 0x554   :  { %v3857_v29 = vadd.f32 %v11641_v22, %v3856_v36  ;;  %4821 = vrot.lane.b32.xlu1 %v4206_v50, %s8695_s12  ;;  %v4205_v0 = vld [vmem:[#allocation2 + $0x1f9] sm:$0xff] }
 0x555   :  { %v4016_v57 = vmax.f32 %v3862_v52, 0.0  ;;  %4819 = vrot.lane.b32.xlu0 %v4205_v0, %s8695_s12 }
 0x556   :  { %v4015_v11 = vmax.f32 %v3857_v29, 0.0 }
 0x557   :  { %v8387_v1 = vpop.f32.mrb[42].mxu0  ;;  %4080 = vst.msk [vmem:[#allocation2 + $0x231] sm:$0xff] %vm20_vm0, %v4016_v57 }
 0x558   :  { %v3872_v40 = vadd.f32 %v8387_v1, %v11641_v22  ;;  %v3866_v38 = vpop.f32.mrb[43].mxu0  ;;  %4079 = vst.msk [vmem:[#allocation2 + $0x229] sm:$0xff] %vm20_vm0, %v4015_v11 }
 0x559   :  { %v3867_v48 = vadd.f32 %v11641_v22, %v3866_v38  ;;  %v4208_v32 = vld [vmem:[#allocation2 + $0x219] sm:$0xff] }
 0x55a   :  { %v4018_v21 = vmax.f32 %v3872_v40, 0.0  ;;  %4825 = vrot.lane.b32.xlu1 %v4208_v32, %s8695_s12  ;;  %v4207_v3 = vld [vmem:[#allocation2 + $0x211] sm:$0xff] }
 0x55b   :  { %v4017_v19 = vmax.f32 %v3867_v48, 0.0  ;;  %4823 = vrot.lane.b32.xlu0 %v4207_v3, %s8695_s12 }
 0x55c   :  { %4082 = vst.msk [vmem:[#allocation2 + $0x249] sm:$0xff] %vm20_vm0, %v4018_v21 }
 0x55d   :  { %v8390_v16 = vpop.f32.mrb[44].mxu0  ;;  %4081 = vst.msk [vmem:[#allocation2 + $0x241] sm:$0xff] %vm20_vm0, %v4017_v19 }
 0x55e   :  { %v3882_v53 = vadd.f32 %v8390_v16, %v11641_v22  ;;  %v3876_v2 = vpop.f32.mrb[45].mxu0  ;;  %v4210_v4 = vld [vmem:[#allocation2 + $0x231] sm:$0xff] }
 0x55f   :  { %v3877_v24 = vadd.f32 %v11641_v22, %v3876_v2  ;;  %4829 = vrot.lane.b32.xlu1 %v4210_v4, %s8695_s12  ;;  %v4209_v56 = vld [vmem:[#allocation2 + $0x229] sm:$0xff] }
 0x560   :  { %v4020_v34 = vmax.f32 %v3882_v53, 0.0  ;;  %4827 = vrot.lane.b32.xlu0 %v4209_v56, %s8695_s12 }
 0x561   :  { %v4019_v7 = vmax.f32 %v3877_v24, 0.0 }
 0x562   :  { %v8393_v15 = vpop.f32.mrb[46].mxu0  ;;  %4084 = vst.msk [vmem:[#allocation2 + $0x261] sm:$0xff] %vm20_vm0, %v4020_v34  ;;  %v11818_v34 = vpop.permute.xlu1 %4745 }
 0x563   :  { %v3892_v31 = vadd.f32 %v8393_v15, %v11641_v22  ;;  %v3886_v28 = vpop.f32.mrb[47].mxu0  ;;  %4083 = vst.msk [vmem:[#allocation2 + $0x259] sm:$0xff] %vm20_vm0, %v4019_v7  ;;  %v4212_v61 = vld [vmem:[#allocation2 + $0x249] sm:$0xff]  ;;  %v11823_v15 = vpop.permute.xlu0 %4743 }
 0x564   :  { %v3887_v35 = vadd.f32 %v11641_v22, %v3886_v28  ;;  %4833 = vrot.lane.b32.xlu1 %v4212_v61, %s8695_s12  ;;  %v4211_v6 = vld [vmem:[#allocation2 + $0x241] sm:$0xff] }
 0x565   :  { %v4022_v59 = vmax.f32 %v3892_v31, 0.0  ;;  %4831 = vrot.lane.b32.xlu0 %v4211_v6, %s8695_s12 }
 0x566   :  { %v4021_v9 = vmax.f32 %v3887_v35, 0.0 }
 0x567   :  { %v8396_v13 = vpop.f32.mrb[48].mxu0  ;;  %4086 = vst.msk [vmem:[#allocation2 + $0x279] sm:$0xff] %vm20_vm0, %v4022_v59 }
 0x568   :  { %v3902_v42 = vadd.f32 %v8396_v13, %v11641_v22  ;;  %v3896_v33 = vpop.f32.mrb[49].mxu0  ;;  %4085 = vst.msk [vmem:[#allocation2 + $0x271] sm:$0xff] %vm20_vm0, %v4021_v9 }
 0x569   :  { %v3897_v26 = vadd.f32 %v11641_v22, %v3896_v33  ;;  %v4214_v49 = vld [vmem:[#allocation2 + $0x261] sm:$0xff] }
 0x56a   :  { %v4024_v39 = vmax.f32 %v3902_v42, 0.0  ;;  %4837 = vrot.lane.b32.xlu1 %v4214_v49, %s8695_s12  ;;  %v4213_v41 = vld [vmem:[#allocation2 + $0x259] sm:$0xff] }
 0x56b   :  { %v4023_v14 = vmax.f32 %v3897_v26, 0.0  ;;  %4835 = vrot.lane.b32.xlu0 %v4213_v41, %s8695_s12  ;;  %v4231_v41 = vld [vmem:[#allocation2 + $0x2] sm:$0xff] }
 0x56c   :  { %4088 = vst.msk [vmem:[#allocation2 + $0x291] sm:$0xff] %vm20_vm0, %v4024_v39 }
 0x56d   :  { %v8399_v51 = vpop.f32.mrb[50].mxu0  ;;  %4087 = vst.msk [vmem:[#allocation2 + $0x289] sm:$0xff] %vm20_vm0, %v4023_v14 }
 0x56e   :  { %v3912_v60 = vadd.f32 %v8399_v51, %v11641_v22  ;;  %v3906_v43 = vpop.f32.mrb[51].mxu0  ;;  %v4216_v23 = vld [vmem:[#allocation2 + $0x279] sm:$0xff] }
 0x56f   :  { %v3907_v27 = vadd.f32 %v11641_v22, %v3906_v43  ;;  %4841 = vrot.lane.b32.xlu1 %v4216_v23, %s8695_s12  ;;  %v4215_v45 = vld [vmem:[#allocation2 + $0x271] sm:$0xff]  ;;  %v4233_v23 = vld [vmem:[#allocation2 + $0x1a] sm:$0xff] }
 0x570   :  { %v4026_v20 = vmax.f32 %v3912_v60, 0.0  ;;  %4839 = vrot.lane.b32.xlu0 %v4215_v45, %s8695_s12  ;;  %v4232_v60 = vld [vmem:[#allocation2 + $0xa] sm:$0xff]  ;;  %v4236_v45 = vld [vmem:[#allocation2 + $0x3a] sm:$0xff] }
 0x571   :  { %v4025_v8 = vmax.f32 %v3907_v27, 0.0 }
 0x572   :  { %v8402_v37 = vpop.f32.mrb[52].mxu0  ;;  %4090 = vst.msk [vmem:[#allocation2 + $0x2a9] sm:$0xff] %vm20_vm0, %v4026_v20 }
 0x573   :  { %v3922_v62 = vadd.f32 %v8402_v37, %v11641_v22  ;;  %v3916_v47 = vpop.f32.mrb[53].mxu0  ;;  %4089 = vst.msk [vmem:[#allocation2 + $0x2a1] sm:$0xff] %vm20_vm0, %v4025_v8  ;;  %v4218_v44 = vld [vmem:[#allocation2 + $0x291] sm:$0xff]  ;;  %v4234_v37 = vld [vmem:[#allocation2 + $0x22] sm:$0xff] }
 0x574   :  { %v3917_v55 = vadd.f32 %v11641_v22, %v3916_v47  ;;  %4845 = vrot.lane.b32.xlu1 %v4218_v44, %s8695_s12  ;;  %v4217_v12 = vld [vmem:[#allocation2 + $0x289] sm:$0xff] }
 0x575   :  { %v4028_v10 = vmax.f32 %v3922_v62, 0.0  ;;  %4843 = vrot.lane.b32.xlu0 %v4217_v12, %s8695_s12  ;;  %v11831_v42 = vpop.permute.xlu1 %4749  ;;  %v4237_v44 = vld [vmem:[#allocation2 + $0x4a] sm:$0xff] }
 0x576   :  { %v4027_v18 = vmax.f32 %v3917_v55, 0.0  ;;  %v11833_v6 = vpop.permute.xlu0 %4747  ;;  %v4235_v55 = vld [vmem:[#allocation2 + $0x32] sm:$0xff]  ;;  %v4240_v12 = vld [vmem:[#allocation2 + $0x6a] sm:$0xff] }
 0x577   :  { %v8405_v5 = vpop.f32.mrb[54].mxu0  ;;  %4092 = vst.msk [vmem:[#allocation2 + $0x2c1] sm:$0xff] %vm20_vm0, %v4028_v10 }
 0x578   :  { %v3932_v30 = vadd.f32 %v8405_v5, %v11641_v22  ;;  %v3926_v54 = vpop.f32.mrb[55].mxu0  ;;  %4091 = vst.msk [vmem:[#allocation2 + $0x2b9] sm:$0xff] %vm20_vm0, %v4027_v18  ;;  %v4238_v5 = vld [vmem:[#allocation2 + $0x52] sm:$0xff] }
 0x579   :  { %v3927_v25 = vadd.f32 %v11641_v22, %v3926_v54  ;;  %v4220_v52 = vld [vmem:[#allocation2 + $0x2a9] sm:$0xff]  ;;  %v11839_v14 = vpop.permute.xlu1 %4753 }
 0x57a   :  { %v4030_v46 = vmax.f32 %v3932_v30, 0.0  ;;  %4849 = vrot.lane.b32.xlu1 %v4220_v52, %s8695_s12  ;;  %v4219_v29 = vld [vmem:[#allocation2 + $0x2a1] sm:$0xff] }
 0x57b   :  { %v4029_v58 = vmax.f32 %v3927_v25, 0.0  ;;  %4847 = vrot.lane.b32.xlu0 %v4219_v29, %s8695_s12  ;;  %v4239_v25 = vld [vmem:[#allocation2 + $0x62] sm:$0xff]  ;;  %v4241_v52 = vld [vmem:[#allocation2 + $0x7a] sm:$0xff] }
 0x57c   :  { %4094 = vst.msk [vmem:[#allocation2 + $0x2d9] sm:$0xff] %vm20_vm0, %v4030_v46  ;;  %v4244_v29 = vld [vmem:[#allocation2 + $0x9a] sm:$0xff] }
 0x57d   :  { %v8408_v63 = vpop.f32.mrb[56].mxu0  ;;  %4093 = vst.msk [vmem:[#allocation2 + $0x2d1] sm:$0xff] %vm20_vm0, %v4029_v58  ;;  %v11845_v43 = vpop.permute.xlu1 %4757 }
 0x57e   :  { %v3942_v36 = vadd.f32 %v8408_v63, %v11641_v22  ;;  %v3936_v17 = vpop.f32.mrb[57].mxu0  ;;  %v4222_v40 = vld [vmem:[#allocation2 + $0x2c1] sm:$0xff]  ;;  %15281 = vst [vmem:[#allocation168_spill] sm:$0xff] %v11845_v43  ;;  %v12602_v43 = vld [vmem:[#allocation2 + $0x172] sm:$0xff] }
 0x57f   :  { %v3937_v57 = vadd.f32 %v11641_v22, %v3936_v17  ;;  %4853 = vrot.lane.b32.xlu1 %v4222_v40, %s8695_s12  ;;  %v4221_v48 = vld [vmem:[#allocation2 + $0x2b9] sm:$0xff]  ;;  %v4242_v63 = vld [vmem:[#allocation2 + $0x82] sm:$0xff]  ;;  %v4245_v40 = vld [vmem:[#allocation2 + $0xaa] sm:$0xff]  ;;  %15487 = vst [vmem:[#allocation371_spill] sm:$0xff] %v12602_v43 }
 0x580   :  { %v4032_v11 = vmax.f32 %v3942_v36, 0.0  ;;  %4851 = vrot.lane.b32.xlu0 %v4221_v48, %s8695_s12  ;;  %v4248_v48 = vld [vmem:[#allocation2 + $0xca] sm:$0xff] }
 0x581   :  { %v4031_v1 = vmax.f32 %v3937_v57, 0.0  ;;  %v11851_v20 = vpop.permute.xlu1 %4761  ;;  %v4243_v57 = vld [vmem:[#allocation2 + $0x92] sm:$0xff] }
 0x582   :  { %v8411_v50 = vpop.f32.mrb[58].mxu0  ;;  %4096 = vst.msk [vmem:[#allocation2 + $0x2f1] sm:$0xff] %vm20_vm0, %v4032_v11  ;;  %15283 = vst [vmem:[#allocation169_spill] sm:$0xff] %v11851_v20  ;;  %v12554_v20 = vld [vmem:[#allocation2 + $0x112] sm:$0xff] }
 0x583   :  { %v3952_v38 = vadd.f32 %v8411_v50, %v11641_v22  ;;  %v3946_v0 = vpop.f32.mrb[59].mxu0  ;;  %4095 = vst.msk [vmem:[#allocation2 + $0x2e9] sm:$0xff] %vm20_vm0, %v4031_v1  ;;  %v4224_v53 = vld [vmem:[#allocation2 + $0x2d9] sm:$0xff] }
 0x584   :  { %v3947_v21 = vadd.f32 %v11641_v22, %v3946_v0  ;;  %4857 = vrot.lane.b32.xlu1 %v4224_v53, %s8695_s12  ;;  %v4223_v24 = vld [vmem:[#allocation2 + $0x2d1] sm:$0xff]  ;;  %v4249_v53 = vld [vmem:[#allocation2 + $0xda] sm:$0xff] }
 0x585   :  { %v4034_v19 = vmax.f32 %v3952_v38, 0.0  ;;  %4855 = vrot.lane.b32.xlu0 %v4223_v24, %s8695_s12  ;;  %v11857_v62 = vpop.permute.xlu1 %4765  ;;  %v4246_v50 = vld [vmem:[#allocation2 + $0xb2] sm:$0xff]  ;;  %v4252_v24 = vld [vmem:[#allocation2 + $0xfa] sm:$0xff] }
 0x586   :  { %v4033_v16 = vmax.f32 %v3947_v21, 0.0  ;;  %15285 = vst [vmem:[#allocation56_spill] sm:$0xff] %v11857_v62  ;;  %v4247_v21 = vld [vmem:[#allocation2 + $0xc2] sm:$0xff]  ;;  %v12506_v62 = vld [vmem:[#allocation2 + $0xb2] sm:$0xff] }
 0x587   :  { %4098 = vst.msk [vmem:[#allocation2 + $0x309] sm:$0xff] %vm20_vm0, %v4034_v19 }
 0x588   :  { %v8414_v32 = vpop.f32.mrb[60].mxu0  ;;  %4097 = vst.msk [vmem:[#allocation2 + $0x301] sm:$0xff] %vm20_vm0, %v4033_v16 }
 0x589   :  { %v3962_v2 = vadd.f32 %v8414_v32, %v11641_v22  ;;  %v3956_v3 = vpop.f32.mrb[61].mxu0  ;;  %v4226_v56 = vld [vmem:[#allocation2 + $0x2f1] sm:$0xff]  ;;  %v11863_v10 = vpop.permute.xlu1 %4769  ;;  %v4250_v32 = vld [vmem:[#allocation2 + $0xe2] sm:$0xff] }
 0x58a   :  { %v3957_v7 = vadd.f32 %v11641_v22, %v3956_v3  ;;  %4861 = vrot.lane.b32.xlu1 %v4226_v56, %s8695_s12  ;;  %v4225_v9 = vld [vmem:[#allocation2 + $0x2e9] sm:$0xff]  ;;  %15287 = vst [vmem:[#allocation284_spill] sm:$0xff] %v11863_v10 }
 0x58b   :  { %v4036_v4 = vmax.f32 %v3962_v2, 0.0  ;;  %4859 = vrot.lane.b32.xlu0 %v4225_v9, %s8695_s12  ;;  %v4253_v56 = vld [vmem:[#allocation2 + $0x10a] sm:$0xff]  ;;  %v12474_v10 = vld [vmem:[#allocation2 + $0x62] sm:$0xff] }
 0x58c   :  { %v4035_v31 = vmax.f32 %v3957_v7, 0.0  ;;  %v8417_v28 = vpop.f32.mrb[62].mxu0  ;;  %v4251_v7 = vld [vmem:[#allocation2 + $0xf2] sm:$0xff]  ;;  %v4256_v9 = vld [vmem:[#allocation2 + $0x12a] sm:$0xff] }
 0x58d   :  { %4100 = vst.msk [vmem:[#allocation2 + $0x321] sm:$0xff] %vm20_vm0, %v4036_v4  ;;  %v3972_v35 = vadd.f32 %v8417_v28, %v11641_v22  ;;  %v3966_v59 = vpop.f32.mrb[63].mxu0  ;;  %v11869_v30 = vpop.permute.xlu1 %4773  ;;  %v4254_v28 = vld [vmem:[#allocation2 + $0x112] sm:$0xff] }
 0x58e   :  { %4099 = vst.msk [vmem:[#allocation2 + $0x319] sm:$0xff] %vm20_vm0, %v4035_v31  ;;  %v3967_v13 = vadd.f32 %v11641_v22, %v3966_v59  ;;  %v4228_v26 = vld [vmem:[#allocation2 + $0x309] sm:$0xff]  ;;  %v11841_v22 = vpop.permute.xlu0 %4751  ;;  %15289 = vst [vmem:[#allocation112_spill] sm:$0xff] %v11869_v30 }
 0x58f   :  { %v4038_v61 = vmax.f32 %v3972_v35, 0.0  ;;  %4865 = vrot.lane.b32.xlu1 %v4228_v26, %s8695_s12  ;;  %v4227_v39 = vld [vmem:[#allocation2 + $0x301] sm:$0xff] }
 0x590   :  { %v4037_v33 = vmax.f32 %v3967_v13, 0.0  ;;  %4863 = vrot.lane.b32.xlu0 %v4227_v39, %s8695_s12  ;;  %v4255_v13 = vld [vmem:[#allocation2 + $0x122] sm:$0xff]  ;;  %v4257_v39 = vld [vmem:[#allocation2 + $0x13a] sm:$0xff] }
 0x591   :  { %4102 = vst.msk [vmem:[#allocation2 + $0x339] sm:$0xff] %vm20_vm0, %v4038_v61  ;;  %v11875_v46 = vpop.permute.xlu1 %4777  ;;  %v4258_v26 = vld [vmem:[#allocation2 + $0x142] sm:$0xff] }
 0x592   :  { %4101 = vst.msk [vmem:[#allocation2 + $0x331] sm:$0xff] %vm20_vm0, %v4037_v33  ;;  %v11847_v27 = vpop.permute.xlu0 %4755  ;;  %15291 = vst [vmem:[#allocation343_spill] sm:$0xff] %v11875_v46  ;;  %v4372_v46 = vld [vmem:[#allocation2 + $0xb1] sm:$0xff] }
 0x593   :  { %15282 = vst [vmem:[#allocation342_spill] sm:$0xff] %v11847_v27  ;;  %v7244_v27 = vld [vmem:[%s14482_s3 + $0x28] sm:$0xff] }
 0x594   :  { %v4230_v51 = vld [vmem:[#allocation2 + $0x321] sm:$0xff] }
 0x595   :  { %4869 = vrot.lane.b32.xlu1 %v4230_v51, %s8695_s12  ;;  %v4229_v49 = vld [vmem:[#allocation2 + $0x319] sm:$0xff]  ;;  %v11881_v36 = vpop.permute.xlu1 %4781 }
 0x596   :  { %4867 = vrot.lane.b32.xlu0 %v4229_v49, %s8695_s12  ;;  %v11853_v8 = vpop.permute.xlu0 %4759  ;;  %15293 = vst [vmem:[#allocation170_spill] sm:$0xff] %v11881_v36 }
 0x597   :  { %15284 = vst [vmem:[#allocation226_spill] sm:$0xff] %v11853_v8  ;;  %v12578_v8 = vld [vmem:[#allocation2 + $0x142] sm:$0xff] }
 0x599   :  { %5001 = vrot.lane.b32.xlu1 %v4232_v60, %s8696_s17  ;;  %v11887_v11 = vpop.permute.xlu1 %4785  ;;  %v4260_v60 = vld [vmem:[#allocation2 + $0x15a] sm:$0xff] }
 0x59a   :  { %4999 = vrot.lane.b32.xlu0 %v4231_v41, %s8696_s17  ;;  %v11859_v47 = vpop.permute.xlu0 %4763  ;;  %15295 = vst [vmem:[#allocation3_spill] sm:$0xff] %v11887_v11  ;;  %v4259_v41 = vld [vmem:[#allocation2 + $0x152] sm:$0xff] }
 0x59b   :  { %15286 = vst [vmem:[#allocation227_spill] sm:$0xff] %v11859_v47  ;;  %v12530_v47 = vld [vmem:[#allocation2 + $0xe2] sm:$0xff] }
 0x59d   :  { %5005 = vrot.lane.b32.xlu1 %v4234_v37, %s8696_s17  ;;  %v11893_v38 = vpop.permute.xlu1 %4789 }
 0x59e   :  { %5003 = vrot.lane.b32.xlu0 %v4233_v23, %s8696_s17  ;;  %v11865_v18 = vpop.permute.xlu0 %4767  ;;  %15297 = vst [vmem:[#allocation228_spill] sm:$0xff] %v11893_v38 }
 0x59f   :  { %15288 = vst [vmem:[#allocation57_spill] sm:$0xff] %v11865_v18  ;;  %v12482_v18 = vld [vmem:[#allocation2 + $0x82] sm:$0xff] }
 0x5a1   :  { %5009 = vrot.lane.b32.xlu1 %v4236_v45, %s8696_s17  ;;  %v11899_v19 = vpop.permute.xlu1 %4793  ;;  %v4262_v45 = vld [vmem:[#allocation2 + $0x172] sm:$0xff] }
 0x5a2   :  { %5007 = vrot.lane.b32.xlu0 %v4235_v55, %s8696_s17  ;;  %v11871_v54 = vpop.permute.xlu0 %4771  ;;  %15299 = vst [vmem:[#allocation58_spill] sm:$0xff] %v11899_v19  ;;  %v4261_v55 = vld [vmem:[#allocation2 + $0x16a] sm:$0xff] }
 0x5a3   :  { %15290 = vst [vmem:[#allocation285_spill] sm:$0xff] %v11871_v54 }
 0x5a5   :  { %5013 = vrot.lane.b32.xlu1 %v4238_v5, %s8696_s17  ;;  %v4264_v5 = vld [vmem:[#allocation2 + $0x1ba] sm:$0xff] }
 0x5a6   :  { %5011 = vrot.lane.b32.xlu0 %v4237_v44, %s8696_s17  ;;  %v11877_v58 = vpop.permute.xlu0 %4775  ;;  %v11905_v2 = vpop.permute.xlu1 %4797 }
 0x5a7   :  { %15292 = vst [vmem:[#allocation113_spill] sm:$0xff] %v11877_v58  ;;  %15301 = vst [vmem:[#allocation286_spill] sm:$0xff] %v11905_v2  ;;  %v4129_v2 = vld [vmem:[#allocation2 + $0x138] sm:$0xff] }
 0x5a8   :  { %v4422_v58 = vld [vmem:[#allocation2 + $0x339] sm:$0xff] }
 0x5a9   :  { %5017 = vrot.lane.b32.xlu1 %v4240_v12, %s8696_s17  ;;  %v4263_v12 = vld [vmem:[#allocation2 + $0x1b2] sm:$0xff] }
 0x5aa   :  { %5015 = vrot.lane.b32.xlu0 %v4239_v25, %s8696_s17  ;;  %v11883_v17 = vpop.permute.xlu0 %4779 }
 0x5ab   :  { %15294 = vst [vmem:[#allocation344_spill] sm:$0xff] %v11883_v17 }
 0x5ad   :  { %5021 = vrot.lane.b32.xlu1 %v4242_v63, %s8696_s17  ;;  %v11911_v4 = vpop.permute.xlu1 %4801 }
 0x5ae   :  { %5019 = vrot.lane.b32.xlu0 %v4241_v52, %s8696_s17  ;;  %v11889_v1 = vpop.permute.xlu0 %4783  ;;  %15303 = vst [vmem:[#allocation114_spill] sm:$0xff] %v11911_v4 }
 0x5af   :  { %15296 = vst [vmem:[#allocation171_spill] sm:$0xff] %v11889_v1  ;;  %v4367_v1 = vld [vmem:[#allocation2 + $0x79] sm:$0xff] }
 0x5b1   :  { %5025 = vrot.lane.b32.xlu1 %v4244_v29, %s8696_s17  ;;  %v4266_v29 = vld [vmem:[#allocation2 + $0x1d2] sm:$0xff] }
 0x5b2   :  { %5023 = vrot.lane.b32.xlu0 %v4243_v57, %s8696_s17  ;;  %v11895_v0 = vpop.permute.xlu0 %4787  ;;  %v11917_v35 = vpop.permute.xlu1 %4805  ;;  %v4265_v57 = vld [vmem:[#allocation2 + $0x1ca] sm:$0xff] }
 0x5b3   :  { %15298 = vst [vmem:[#allocation4_spill] sm:$0xff] %v11895_v0  ;;  %15305 = vst [vmem:[#allocation345_spill] sm:$0xff] %v11917_v35  ;;  %v12264_v0 = vld [vmem:[#allocation2 + $0x61] sm:$0xff] }
 0x5b5   :  { %5029 = vrot.lane.b32.xlu1 %v4246_v50, %s8696_s17 }
 0x5b6   :  { %5027 = vrot.lane.b32.xlu0 %v4245_v40, %s8696_s17  ;;  %v11901_v16 = vpop.permute.xlu0 %4791  ;;  %v11923_v61 = vpop.permute.xlu1 %4809 }
 0x5b7   :  { %15300 = vst [vmem:[#allocation229_spill] sm:$0xff] %v11901_v16  ;;  %15307 = vst [vmem:[#allocation172_spill] sm:$0xff] %v11923_v61  ;;  %v12251_v16 = vld [vmem:[#allocation2 + $0x51] sm:$0xff] }
 0x5b9   :  { %5033 = vrot.lane.b32.xlu1 %v4248_v48, %s8696_s17  ;;  %v4268_v48 = vld [vmem:[#allocation2 + $0x1ea] sm:$0xff] }
 0x5ba   :  { %5031 = vrot.lane.b32.xlu0 %v4247_v21, %s8696_s17  ;;  %v11907_v3 = vpop.permute.xlu0 %4795  ;;  %v4267_v21 = vld [vmem:[#allocation2 + $0x1e2] sm:$0xff] }
 0x5bb   :  { %15302 = vst [vmem:[#allocation59_spill] sm:$0xff] %v11907_v3 }
 0x5bc   :  { %v11929_v51 = vpop.permute.xlu1 %4813 }
 0x5bd   :  { %5037 = vrot.lane.b32.xlu1 %v4250_v32, %s8696_s17  ;;  %15309 = vst [vmem:[#allocation5_spill] sm:$0xff] %v11929_v51 }
 0x5be   :  { %5035 = vrot.lane.b32.xlu0 %v4249_v53, %s8696_s17  ;;  %v11913_v31 = vpop.permute.xlu0 %4799 }
 0x5bf   :  { %15304 = vst [vmem:[#allocation287_spill] sm:$0xff] %v11913_v31  ;;  %v4127_v31 = vld [vmem:[#allocation2 + $0x120] sm:$0xff] }
 0x5c1   :  { %5041 = vrot.lane.b32.xlu1 %v4252_v24, %s8696_s17  ;;  %v11935_v37 = vpop.permute.xlu1 %4817  ;;  %v4270_v24 = vld [vmem:[#allocation2 + $0x202] sm:$0xff] }
 0x5c2   :  { %5039 = vrot.lane.b32.xlu0 %v4251_v7, %s8696_s17  ;;  %v11919_v59 = vpop.permute.xlu0 %4803  ;;  %15311 = vst [vmem:[#allocation230_spill] sm:$0xff] %v11935_v37  ;;  %v4269_v7 = vld [vmem:[#allocation2 + $0x1fa] sm:$0xff] }
 0x5c3   :  { %15306 = vst [vmem:[#allocation115_spill] sm:$0xff] %v11919_v59  ;;  %v4125_v59 = vld [vmem:[#allocation2 + $0x108] sm:$0xff] }
 0x5c5   :  { %5045 = vrot.lane.b32.xlu1 %v4254_v28, %s8696_s17 }
 0x5c6   :  { %5043 = vrot.lane.b32.xlu0 %v4253_v56, %s8696_s17  ;;  %v11925_v33 = vpop.permute.xlu0 %4807  ;;  %v11941_v44 = vpop.permute.xlu1 %4821 }
 0x5c7   :  { %15308 = vst [vmem:[#allocation346_spill] sm:$0xff] %v11925_v33  ;;  %15313 = vst [vmem:[#allocation60_spill] sm:$0xff] %v11941_v44  ;;  %v4123_v33 = vld [vmem:[#allocation2 + $0xf0] sm:$0xff] }
 0x5c9   :  { %5049 = vrot.lane.b32.xlu1 %v4256_v9, %s8696_s17  ;;  %v4272_v9 = vld [vmem:[#allocation2 + $0x21a] sm:$0xff] }
 0x5ca   :  { %5047 = vrot.lane.b32.xlu0 %v4255_v13, %s8696_s17  ;;  %v11931_v49 = vpop.permute.xlu0 %4811  ;;  %v4271_v13 = vld [vmem:[#allocation2 + $0x212] sm:$0xff] }
 0x5cb   :  { %15310 = vst [vmem:[#allocation173_spill] sm:$0xff] %v11931_v49  ;;  %v4121_v49 = vld [vmem:[#allocation2 + $0xd8] sm:$0xff] }
 0x5cc   :  { %v11947_v63 = vpop.permute.xlu1 %4825 }
 0x5cd   :  { %5053 = vrot.lane.b32.xlu1 %v4258_v26, %s8696_s17  ;;  %15315 = vst [vmem:[#allocation288_spill] sm:$0xff] %v11947_v63 }
 0x5ce   :  { %5051 = vrot.lane.b32.xlu0 %v4257_v39, %s8696_s17  ;;  %v11937_v23 = vpop.permute.xlu0 %4815 }
 0x5cf   :  { %15312 = vst [vmem:[#allocation6_spill] sm:$0xff] %v11937_v23  ;;  %v4119_v23 = vld [vmem:[#allocation2 + $0xc0] sm:$0xff] }
 0x5d1   :  { %5057 = vrot.lane.b32.xlu1 %v4260_v60, %s8696_s17  ;;  %v11953_v50 = vpop.permute.xlu1 %4829  ;;  %v4274_v60 = vld [vmem:[#allocation2 + $0x232] sm:$0xff] }
 0x5d2   :  { %5055 = vrot.lane.b32.xlu0 %v4259_v41, %s8696_s17  ;;  %v11943_v25 = vpop.permute.xlu0 %4819  ;;  %15317 = vst [vmem:[#allocation116_spill] sm:$0xff] %v11953_v50  ;;  %v4273_v41 = vld [vmem:[#allocation2 + $0x22a] sm:$0xff] }
 0x5d3   :  { %15314 = vst [vmem:[#allocation231_spill] sm:$0xff] %v11943_v25  ;;  %v4117_v25 = vld [vmem:[#allocation2 + $0xa8] sm:$0xff] }
 0x5d5   :  { %5061 = vrot.lane.b32.xlu1 %v4262_v45, %s8696_s17 }
 0x5d6   :  { %5059 = vrot.lane.b32.xlu0 %v4261_v55, %s8696_s17  ;;  %v11949_v52 = vpop.permute.xlu0 %4823  ;;  %v11959_v32 = vpop.permute.xlu1 %4833 }
 0x5d7   :  { %15316 = vst [vmem:[#allocation61_spill] sm:$0xff] %v11949_v52  ;;  %15319 = vst [vmem:[#allocation347_spill] sm:$0xff] %v11959_v32  ;;  %v4115_v52 = vld [vmem:[#allocation2 + $0x90] sm:$0xff] }
 0x5d9   :  { %5065 = vrot.lane.b32.xlu1 %v4264_v5, %s8696_s17  ;;  %v4276_v5 = vld [vmem:[#allocation2 + $0x24a] sm:$0xff] }
 0x5da   :  { %5063 = vrot.lane.b32.xlu0 %v4263_v12, %s8696_s17  ;;  %v11955_v40 = vpop.permute.xlu0 %4827  ;;  %v4275_v12 = vld [vmem:[#allocation2 + $0x242] sm:$0xff] }
 0x5db   :  { %15318 = vst [vmem:[#allocation289_spill] sm:$0xff] %v11955_v40  ;;  %v4113_v40 = vld [vmem:[#allocation2 + $0x78] sm:$0xff] }
 0x5dc   :  { %v11965_v28 = vpop.permute.xlu1 %4837 }
 0x5dd   :  { %5069 = vrot.lane.b32.xlu1 %v4266_v29, %s8696_s17  ;;  %15321 = vst [vmem:[#allocation174_spill] sm:$0xff] %v11965_v28 }
 0x5de   :  { %5067 = vrot.lane.b32.xlu0 %v4265_v57, %s8696_s17  ;;  %v11961_v53 = vpop.permute.xlu0 %4831 }
 0x5df   :  { %15320 = vst [vmem:[#allocation117_spill] sm:$0xff] %v11961_v53  ;;  %v4111_v53 = vld [vmem:[#allocation2 + $0x60] sm:$0xff] }
 0x5e1   :  { %5073 = vrot.lane.b32.xlu1 %v4268_v48, %s8696_s17  ;;  %v11971_v26 = vpop.permute.xlu1 %4841  ;;  %v4278_v48 = vld [vmem:[#allocation2 + $0x262] sm:$0xff] }
 0x5e2   :  { %5071 = vrot.lane.b32.xlu0 %v4267_v21, %s8696_s17  ;;  %v11967_v56 = vpop.permute.xlu0 %4835  ;;  %15323 = vst [vmem:[#allocation7_spill] sm:$0xff] %v11971_v26  ;;  %v4277_v21 = vld [vmem:[#allocation2 + $0x25a] sm:$0xff] }
 0x5e3   :  { %15322 = vst [vmem:[#allocation348_spill] sm:$0xff] %v11967_v56  ;;  %v4109_v56 = vld [vmem:[#allocation2 + $0x48] sm:$0xff] }
 0x5e5   :  { %5077 = vrot.lane.b32.xlu1 %v4270_v24, %s8696_s17 }
 0x5e6   :  { %5075 = vrot.lane.b32.xlu0 %v4269_v7, %s8696_s17  ;;  %v11973_v39 = vpop.permute.xlu0 %4839  ;;  %v11977_v45 = vpop.permute.xlu1 %4845 }
 0x5e7   :  { %15324 = vst [vmem:[#allocation175_spill] sm:$0xff] %v11973_v39  ;;  %15325 = vst [vmem:[#allocation232_spill] sm:$0xff] %v11977_v45  ;;  %v4107_v39 = vld [vmem:[#allocation2 + $0x30] sm:$0xff] }
 0x5e9   :  { %5081 = vrot.lane.b32.xlu1 %v4272_v9, %s8696_s17  ;;  %v4280_v9 = vld [vmem:[#allocation2 + $0x27a] sm:$0xff] }
 0x5ea   :  { %5079 = vrot.lane.b32.xlu0 %v4271_v13, %s8696_s17  ;;  %v11979_v55 = vpop.permute.xlu0 %4843  ;;  %v4279_v13 = vld [vmem:[#allocation2 + $0x272] sm:$0xff] }
 0x5eb   :  { %15326 = vst [vmem:[#allocation8_spill] sm:$0xff] %v11979_v55  ;;  %v4105_v55 = vld [vmem:[#allocation2 + $0x18] sm:$0xff] }
 0x5ec   :  { %v11983_v29 = vpop.permute.xlu1 %4849 }
 0x5ed   :  { %5085 = vrot.lane.b32.xlu1 %v4274_v60, %s8696_s17  ;;  %15327 = vst [vmem:[#allocation62_spill] sm:$0xff] %v11983_v29  ;;  %v4294_v29 = vld [vmem:[#allocation2 + $0x322] sm:$0xff] }
 0x5ee   :  { %5083 = vrot.lane.b32.xlu0 %v4273_v41, %s8696_s17  ;;  %v11985_v57 = vpop.permute.xlu0 %4847 }
 0x5ef   :  { %15328 = vst [vmem:[#allocation233_spill] sm:$0xff] %v11985_v57  ;;  %v4106_v57 = vld [vmem:[#allocation2 + $0x20] sm:$0xff] }
 0x5f1   :  { %5089 = vrot.lane.b32.xlu1 %v4276_v5, %s8696_s17  ;;  %v11989_v24 = vpop.permute.xlu1 %4853  ;;  %v4282_v5 = vld [vmem:[#allocation2 + $0x292] sm:$0xff] }
 0x5f2   :  { %5087 = vrot.lane.b32.xlu0 %v4275_v12, %s8696_s17  ;;  %15329 = vst [vmem:[#allocation290_spill] sm:$0xff] %v11989_v24  ;;  %v11991_v7 = vpop.permute.xlu0 %4851  ;;  %v4281_v12 = vld [vmem:[#allocation2 + $0x28a] sm:$0xff] }
 0x5f3   :  { %15330 = vst [vmem:[#allocation63_spill] sm:$0xff] %v11991_v7  ;;  %v4284_v24 = vld [vmem:[#allocation2 + $0x2aa] sm:$0xff] }
 0x5f5   :  { %5093 = vrot.lane.b32.xlu1 %v4278_v48, %s8696_s17 }
 0x5f6   :  { %5091 = vrot.lane.b32.xlu0 %v4277_v21, %s8696_s17  ;;  %v11995_v60 = vpop.permute.xlu1 %4857 }
 0x5f7   :  { %15331 = vst [vmem:[#allocation118_spill] sm:$0xff] %v11995_v60  ;;  %v11997_v41 = vpop.permute.xlu0 %4855 }
 0x5f8   :  { %15332 = vst [vmem:[#allocation291_spill] sm:$0xff] %v11997_v41  ;;  %v4286_v41 = vld [vmem:[#allocation2 + $0x2c2] sm:$0xff] }
 0x5f9   :  { %5097 = vrot.lane.b32.xlu1 %v4280_v9, %s8696_s17  ;;  %v4283_v9 = vld [vmem:[#allocation2 + $0x2a2] sm:$0xff] }
 0x5fa   :  { %5095 = vrot.lane.b32.xlu0 %v4279_v13, %s8696_s17 }
 0x5fc   :  { %v12001_v48 = vpop.permute.xlu1 %4861 }
 0x5fd   :  { %5101 = vrot.lane.b32.xlu1 %v4282_v5, %s8696_s17  ;;  %15333 = vst [vmem:[#allocation349_spill] sm:$0xff] %v12001_v48  ;;  %v12003_v21 = vpop.permute.xlu0 %4859  ;;  %v4285_v5 = vld [vmem:[#allocation2 + $0x2ba] sm:$0xff] }
 0x5fe   :  { %5099 = vrot.lane.b32.xlu0 %v4281_v12, %s8696_s17  ;;  %15334 = vst [vmem:[#allocation119_spill] sm:$0xff] %v12003_v21  ;;  %v4288_v21 = vld [vmem:[#allocation2 + $0x2da] sm:$0xff] }
 0x601   :  { %5105 = vrot.lane.b32.xlu1 %v4284_v24, %s8696_s17  ;;  %v12007_v13 = vpop.permute.xlu1 %4865  ;;  %v4287_v24 = vld [vmem:[#allocation2 + $0x2d2] sm:$0xff] }
 0x602   :  { %5103 = vrot.lane.b32.xlu0 %v4283_v9, %s8696_s17  ;;  %15335 = vst [vmem:[#allocation176_spill] sm:$0xff] %v12007_v13  ;;  %v12009_v60 = vpop.permute.xlu0 %4863 }
 0x603   :  { %15336 = vst [vmem:[#allocation350_spill] sm:$0xff] %v12009_v60  ;;  %v4290_v60 = vld [vmem:[#allocation2 + $0x2f2] sm:$0xff] }
 0x605   :  { %5109 = vrot.lane.b32.xlu1 %v4286_v41, %s8696_s17  ;;  %v4289_v41 = vld [vmem:[#allocation2 + $0x2ea] sm:$0xff] }
 0x606   :  { %5107 = vrot.lane.b32.xlu0 %v4285_v5, %s8696_s17 }
 0x607   :  { %v12013_v12 = vpop.permute.xlu1 %4869 }
 0x608   :  { %15337 = vst [vmem:[#allocation9_spill] sm:$0xff] %v12013_v12  ;;  %v12015_v48 = vpop.permute.xlu0 %4867 }
 0x609   :  { %15338 = vst [vmem:[#allocation177_spill] sm:$0xff] %v12015_v48  ;;  %5113 = vrot.lane.b32.xlu1 %v4288_v21, %s8696_s17  ;;  %v4292_v48 = vld [vmem:[#allocation2 + $0x30a] sm:$0xff]  ;;  %v4291_v21 = vld [vmem:[#allocation2 + $0x302] sm:$0xff] }
 0x60a   :  { %5111 = vrot.lane.b32.xlu0 %v4287_v24, %s8696_s17 }
 0x60b   :  { %v12019_v9 = vpop.permute.xlu1 %5001 }
 0x60c   :  { %v12021_v13 = vpop.permute.xlu0 %4999 }
 0x60d   :  { %5117 = vrot.lane.b32.xlu1 %v4290_v60, %s8696_s17  ;;  %v4293_v60 = vld [vmem:[#allocation2 + $0x31a] sm:$0xff] }
 0x60e   :  { %5115 = vrot.lane.b32.xlu0 %v4289_v41, %s8696_s17 }
 0x60f   :  { %v12025_v5 = vpop.permute.xlu1 %5005 }
 0x610   :  { %v12027_v12 = vpop.permute.xlu0 %5003 }
 0x611   :  { %5121 = vrot.lane.b32.xlu1 %v4292_v48, %s8696_s17 }
 0x612   :  { %5119 = vrot.lane.b32.xlu0 %v4291_v21, %s8696_s17  ;;  %v4108_v21 = vld [vmem:[#allocation2 + $0x38] sm:$0xff] }
 0x613   :  { %v12031_v24 = vpop.permute.xlu1 %5009 }
 0x614   :  { %v12033_v7 = vpop.permute.xlu0 %5007 }
 0x615   :  { %5125 = vrot.lane.b32.xlu1 %v4294_v29, %s8696_s17 }
 0x616   :  { %5123 = vrot.lane.b32.xlu0 %v4293_v60, %s8696_s17  ;;  %v4110_v60 = vld [vmem:[#allocation2 + $0x50] sm:$0xff] }
 0x617   :  { %v12037_v41 = vpop.permute.xlu1 %5013 }
 0x618   :  { %15339 = vst [vmem:[#allocation234_spill] sm:$0xff] %v12037_v41  ;;  %v12039_v45 = vpop.permute.xlu0 %5011 }
 0x619   :  { %15340 = vst [vmem:[#allocation10_spill] sm:$0xff] %v12039_v45  ;;  %5257 = vrot.lane.b32.xlu1 %v4106_v57, %s8697_s26  ;;  %v4112_v57 = vld [vmem:[#allocation2 + $0x68] sm:$0xff] }
 0x61a   :  { %5255 = vrot.lane.b32.xlu0 %v4105_v55, %s8697_s26  ;;  %v4457_v45 = vld [vmem:[#allocation2 + $0x1e2] sm:$0xff] }
 0x61b   :  { %v12043_v48 = vpop.permute.xlu1 %5017 }
 0x61c   :  { %15341 = vst [vmem:[#allocation64_spill] sm:$0xff] %v12043_v48  ;;  %v12045_v26 = vpop.permute.xlu0 %5015 }
 0x61d   :  { %15342 = vst [vmem:[#allocation235_spill] sm:$0xff] %v12045_v26  ;;  %5261 = vrot.lane.b32.xlu1 %v4108_v21, %s8697_s26  ;;  %v4114_v21 = vld [vmem:[#allocation2 + $0x80] sm:$0xff] }
 0x61e   :  { %5259 = vrot.lane.b32.xlu0 %v4107_v39, %s8697_s26 }
 0x61f   :  { %v12049_v29 = vpop.permute.xlu1 %5021 }
 0x620   :  { %15343 = vst [vmem:[#allocation292_spill] sm:$0xff] %v12049_v29  ;;  %v12051_v28 = vpop.permute.xlu0 %5019 }
 0x621   :  { %15344 = vst [vmem:[#allocation65_spill] sm:$0xff] %v12051_v28  ;;  %5265 = vrot.lane.b32.xlu1 %v4110_v60, %s8697_s26  ;;  %v4116_v60 = vld [vmem:[#allocation2 + $0x98] sm:$0xff] }
 0x622   :  { %5263 = vrot.lane.b32.xlu0 %v4109_v56, %s8697_s26 }
 0x623   :  { %v12055_v55 = vpop.permute.xlu1 %5025 }
 0x624   :  { %15345 = vst [vmem:[#allocation120_spill] sm:$0xff] %v12055_v55  ;;  %v12057_v32 = vpop.permute.xlu0 %5023  ;;  %v12470_v55 = vld [vmem:[#allocation2 + $0x6a] sm:$0xff] }
 0x625   :  { %15346 = vst [vmem:[#allocation293_spill] sm:$0xff] %v12057_v32  ;;  %5269 = vrot.lane.b32.xlu1 %v4112_v57, %s8697_s26  ;;  %v4118_v57 = vld [vmem:[#allocation2 + $0xb0] sm:$0xff] }
 0x626   :  { %5267 = vrot.lane.b32.xlu0 %v4111_v53, %s8697_s26 }
 0x627   :  { %v12061_v39 = vpop.permute.xlu1 %5029 }
 0x628   :  { %15347 = vst [vmem:[#allocation351_spill] sm:$0xff] %v12061_v39  ;;  %v12063_v50 = vpop.permute.xlu0 %5027  ;;  %v4424_v39 = vld [vmem:[#allocation2 + $0x22] sm:$0xff] }
 0x629   :  { %15348 = vst [vmem:[#allocation121_spill] sm:$0xff] %v12063_v50  ;;  %5273 = vrot.lane.b32.xlu1 %v4114_v21, %s8697_s26  ;;  %v4120_v21 = vld [vmem:[#allocation2 + $0xc8] sm:$0xff]  ;;  %v12458_v50 = vld [vmem:[#allocation2 + $0x52] sm:$0xff] }
 0x62a   :  { %5271 = vrot.lane.b32.xlu0 %v4113_v40, %s8697_s26 }
 0x62b   :  { %v12067_v56 = vpop.permute.xlu1 %5033 }
 0x62c   :  { %15349 = vst [vmem:[#allocation178_spill] sm:$0xff] %v12067_v56  ;;  %v12069_v63 = vpop.permute.xlu0 %5031 }
 0x62d   :  { %15350 = vst [vmem:[#allocation352_spill] sm:$0xff] %v12069_v63  ;;  %5277 = vrot.lane.b32.xlu1 %v4116_v60, %s8697_s26  ;;  %v4122_v60 = vld [vmem:[#allocation2 + $0xe0] sm:$0xff] }
 0x62e   :  { %5275 = vrot.lane.b32.xlu0 %v4115_v52, %s8697_s26 }
 0x62f   :  { %v12073_v53 = vpop.permute.xlu1 %5037 }
 0x630   :  { %15351 = vst [vmem:[#allocation11_spill] sm:$0xff] %v12073_v53  ;;  %v12075_v44 = vpop.permute.xlu0 %5035 }
 0x631   :  { %15352 = vst [vmem:[#allocation179_spill] sm:$0xff] %v12075_v44  ;;  %5281 = vrot.lane.b32.xlu1 %v4118_v57, %s8697_s26  ;;  %v4124_v57 = vld [vmem:[#allocation2 + $0xf8] sm:$0xff] }
 0x632   :  { %5279 = vrot.lane.b32.xlu0 %v4117_v25, %s8697_s26  ;;  %v4369_v44 = vld [vmem:[#allocation2 + $0x91] sm:$0xff] }
 0x633   :  { %v12079_v40 = vpop.permute.xlu1 %5041 }
 0x634   :  { %15353 = vst [vmem:[#allocation236_spill] sm:$0xff] %v12079_v40  ;;  %v12081_v37 = vpop.permute.xlu0 %5039 }
 0x635   :  { %15354 = vst [vmem:[#allocation12_spill] sm:$0xff] %v12081_v37  ;;  %5285 = vrot.lane.b32.xlu1 %v4120_v21, %s8697_s26  ;;  %v4126_v21 = vld [vmem:[#allocation2 + $0x110] sm:$0xff]  ;;  %v4368_v37 = vld [vmem:[#allocation2 + $0x81] sm:$0xff] }
 0x636   :  { %5283 = vrot.lane.b32.xlu0 %v4119_v23, %s8697_s26 }
 0x637   :  { %v12085_v52 = vpop.permute.xlu1 %5045 }
 0x638   :  { %15355 = vst [vmem:[#allocation66_spill] sm:$0xff] %v12085_v52  ;;  %v12087_v51 = vpop.permute.xlu0 %5043 }
 0x639   :  { %15356 = vst [vmem:[#allocation237_spill] sm:$0xff] %v12087_v51  ;;  %5289 = vrot.lane.b32.xlu1 %v4122_v60, %s8697_s26  ;;  %v4128_v60 = vld [vmem:[#allocation2 + $0x128] sm:$0xff] }
 0x63a   :  { %5287 = vrot.lane.b32.xlu0 %v4121_v49, %s8697_s26  ;;  %v4366_v51 = vld [vmem:[#allocation2 + $0x69] sm:$0xff] }
 0x63b   :  { %v12091_v25 = vpop.permute.xlu1 %5049 }
 0x63c   :  { %15357 = vst [vmem:[#allocation294_spill] sm:$0xff] %v12091_v25  ;;  %v12093_v61 = vpop.permute.xlu0 %5047  ;;  %v4360_v25 = vld [vmem:[#allocation2 + $0x21] sm:$0xff] }
 0x63d   :  { %15358 = vst [vmem:[#allocation67_spill] sm:$0xff] %v12093_v61  ;;  %5293 = vrot.lane.b32.xlu1 %v4124_v57, %s8697_s26  ;;  %v4130_v57 = vld [vmem:[#allocation2 + $0x140] sm:$0xff] }
 0x63e   :  { %5291 = vrot.lane.b32.xlu0 %v4123_v33, %s8697_s26  ;;  %v12239_v61 = vld [vmem:[#allocation2 + $0x39] sm:$0xff] }
 0x63f   :  { %v12097_v23 = vpop.permute.xlu1 %5053 }
 0x640   :  { %15359 = vst [vmem:[#allocation122_spill] sm:$0xff] %v12097_v23  ;;  %v12099_v35 = vpop.permute.xlu0 %5051 }
 0x641   :  { %15360 = vst [vmem:[#allocation295_spill] sm:$0xff] %v12099_v35  ;;  %5297 = vrot.lane.b32.xlu1 %v4126_v21, %s8697_s26  ;;  %v4132_v21 = vld [vmem:[#allocation2 + $0x158] sm:$0xff] }
 0x642   :  { %5295 = vrot.lane.b32.xlu0 %v4125_v59, %s8697_s26  ;;  %v4358_v35 = vld [vmem:[#allocation2 + $0x338] sm:$0xff] }
 0x643   :  { %v12103_v49 = vpop.permute.xlu1 %5057 }
 0x644   :  { %15361 = vst [vmem:[#allocation353_spill] sm:$0xff] %v12103_v49  ;;  %v12105_v4 = vpop.permute.xlu0 %5055 }
 0x645   :  { %15362 = vst [vmem:[#allocation123_spill] sm:$0xff] %v12105_v4  ;;  %5301 = vrot.lane.b32.xlu1 %v4128_v60, %s8697_s26  ;;  %v4131_v4 = vld [vmem:[#allocation2 + $0x150] sm:$0xff] }
 0x646   :  { %5299 = vrot.lane.b32.xlu0 %v4127_v31, %s8697_s26  ;;  %v4134_v60 = vld [vmem:[#allocation2 + $0x170] sm:$0xff] }
 0x647   :  { %v12109_v33 = vpop.permute.xlu1 %5061 }
 0x648   :  { %15363 = vst [vmem:[#allocation180_spill] sm:$0xff] %v12109_v33  ;;  %v12111_v23 = vpop.permute.xlu0 %5059 }
 0x649   :  { %15364 = vst [vmem:[#allocation354_spill] sm:$0xff] %v12111_v23  ;;  %5305 = vrot.lane.b32.xlu1 %v4130_v57, %s8697_s26  ;;  %v4133_v23 = vld [vmem:[#allocation2 + $0x168] sm:$0xff] }
 0x64a   :  { %5303 = vrot.lane.b32.xlu0 %v4129_v2, %s8697_s26 }
 0x64b   :  { %v12115_v59 = vpop.permute.xlu1 %5065 }
 0x64c   :  { %15365 = vst [vmem:[#allocation13_spill] sm:$0xff] %v12115_v59  ;;  %v12117_v49 = vpop.permute.xlu0 %5063  ;;  %v4326_v59 = vld [vmem:[#allocation2 + $0x188] sm:$0xff] }
 0x64d   :  { %15366 = vst [vmem:[#allocation181_spill] sm:$0xff] %v12117_v49  ;;  %5309 = vrot.lane.b32.xlu1 %v4132_v21, %s8697_s26  ;;  %v4325_v21 = vld [vmem:[#allocation2 + $0x180] sm:$0xff] }
 0x64e   :  { %5307 = vrot.lane.b32.xlu0 %v4131_v4, %s8697_s26 }
 0x64f   :  { %v12121_v31 = vpop.permute.xlu1 %5069 }
 0x650   :  { %15367 = vst [vmem:[#allocation238_spill] sm:$0xff] %v12121_v31  ;;  %v12123_v33 = vpop.permute.xlu0 %5067  ;;  %v4138_v31 = vld [vmem:[#allocation2 + $0x1d0] sm:$0xff] }
 0x651   :  { %15368 = vst [vmem:[#allocation14_spill] sm:$0xff] %v12123_v33  ;;  %5313 = vrot.lane.b32.xlu1 %v4134_v60, %s8697_s26  ;;  %v4137_v33 = vld [vmem:[#allocation2 + $0x1c8] sm:$0xff] }
 0x652   :  { %5311 = vrot.lane.b32.xlu0 %v4133_v23, %s8697_s26  ;;  %v4140_v60 = vld [vmem:[#allocation2 + $0x1e8] sm:$0xff] }
 0x653   :  { %v12127_v2 = vpop.permute.xlu1 %5073 }
 0x654   :  { %15369 = vst [vmem:[#allocation68_spill] sm:$0xff] %v12127_v2  ;;  %v12129_v57 = vpop.permute.xlu0 %5071 }
 0x655   :  { %15370 = vst [vmem:[#allocation239_spill] sm:$0xff] %v12129_v57  ;;  %5317 = vrot.lane.b32.xlu1 %v4326_v59, %s8697_s26  ;;  %v4139_v57 = vld [vmem:[#allocation2 + $0x1e0] sm:$0xff] }
 0x656   :  { %5315 = vrot.lane.b32.xlu0 %v4325_v21, %s8697_s26  ;;  %v4142_v21 = vld [vmem:[#allocation2 + $0x200] sm:$0xff] }
 0x657   :  { %v12133_v4 = vpop.permute.xlu1 %5077 }
 0x658   :  { %15371 = vst [vmem:[#allocation296_spill] sm:$0xff] %v12133_v4  ;;  %v12135_v49 = vpop.permute.xlu0 %5075 }
 0x659   :  { %15372 = vst [vmem:[#allocation69_spill] sm:$0xff] %v12135_v49  ;;  %5321 = vrot.lane.b32.xlu1 %v4138_v31, %s8697_s26  ;;  %v4141_v49 = vld [vmem:[#allocation2 + $0x1f8] sm:$0xff] }
 0x65a   :  { %5319 = vrot.lane.b32.xlu0 %v4137_v33, %s8697_s26  ;;  %v4144_v31 = vld [vmem:[#allocation2 + $0x218] sm:$0xff] }
 0x65b   :  { %v12139_v23 = vpop.permute.xlu1 %5081 }
 0x65c   :  { %15373 = vst [vmem:[#allocation124_spill] sm:$0xff] %v12139_v23  ;;  %v12141_v2 = vpop.permute.xlu0 %5079 }
 0x65d   :  { %15374 = vst [vmem:[#allocation297_spill] sm:$0xff] %v12141_v2  ;;  %5325 = vrot.lane.b32.xlu1 %v4140_v60, %s8697_s26  ;;  %v4143_v2 = vld [vmem:[#allocation2 + $0x210] sm:$0xff] }
 0x65e   :  { %5323 = vrot.lane.b32.xlu0 %v4139_v57, %s8697_s26  ;;  %v4146_v60 = vld [vmem:[#allocation2 + $0x230] sm:$0xff] }
 0x65f   :  { %v12145_v59 = vpop.permute.xlu1 %5085 }
 0x660   :  { %15375 = vst [vmem:[#allocation355_spill] sm:$0xff] %v12145_v59  ;;  %v12147_v4 = vpop.permute.xlu0 %5083 }
 0x661   :  { %15376 = vst [vmem:[#allocation125_spill] sm:$0xff] %v12147_v4  ;;  %5329 = vrot.lane.b32.xlu1 %v4142_v21, %s8697_s26  ;;  %v4145_v4 = vld [vmem:[#allocation2 + $0x228] sm:$0xff] }
 0x662   :  { %5327 = vrot.lane.b32.xlu0 %v4141_v49, %s8697_s26  ;;  %v4148_v21 = vld [vmem:[#allocation2 + $0x248] sm:$0xff] }
 0x663   :  { %v12151_v33 = vpop.permute.xlu1 %5089 }
 0x664   :  { %15377 = vst [vmem:[#allocation182_spill] sm:$0xff] %v12151_v33  ;;  %v12153_v23 = vpop.permute.xlu0 %5087 }
 0x665   :  { %15378 = vst [vmem:[#allocation356_spill] sm:$0xff] %v12153_v23  ;;  %5333 = vrot.lane.b32.xlu1 %v4144_v31, %s8697_s26  ;;  %v4147_v23 = vld [vmem:[#allocation2 + $0x240] sm:$0xff] }
 0x666   :  { %5331 = vrot.lane.b32.xlu0 %v4143_v2, %s8697_s26  ;;  %v4150_v31 = vld [vmem:[#allocation2 + $0x260] sm:$0xff] }
 0x667   :  { %v12157_v57 = vpop.permute.xlu1 %5093 }
 0x668   :  { %15379 = vst [vmem:[#allocation15_spill] sm:$0xff] %v12157_v57  ;;  %v12159_v59 = vpop.permute.xlu0 %5091 }
 0x669   :  { %15380 = vst [vmem:[#allocation183_spill] sm:$0xff] %v12159_v59  ;;  %5337 = vrot.lane.b32.xlu1 %v4146_v60, %s8697_s26  ;;  %v4149_v59 = vld [vmem:[#allocation2 + $0x258] sm:$0xff] }
 0x66a   :  { %5335 = vrot.lane.b32.xlu0 %v4145_v4, %s8697_s26  ;;  %v4152_v60 = vld [vmem:[#allocation2 + $0x278] sm:$0xff] }
 0x66b   :  { %v12163_v49 = vpop.permute.xlu1 %5097 }
 0x66c   :  { %15381 = vst [vmem:[#allocation240_spill] sm:$0xff] %v12163_v49  ;;  %v12165_v33 = vpop.permute.xlu0 %5095 }
 0x66d   :  { %15382 = vst [vmem:[#allocation16_spill] sm:$0xff] %v12165_v33  ;;  %5341 = vrot.lane.b32.xlu1 %v4148_v21, %s8697_s26  ;;  %v4151_v33 = vld [vmem:[#allocation2 + $0x270] sm:$0xff] }
 0x66e   :  { %5339 = vrot.lane.b32.xlu0 %v4147_v23, %s8697_s26  ;;  %v4154_v21 = vld [vmem:[#allocation2 + $0x290] sm:$0xff] }
 0x66f   :  { %v12169_v2 = vpop.permute.xlu1 %5101 }
 0x670   :  { %15383 = vst [vmem:[#allocation70_spill] sm:$0xff] %v12169_v2  ;;  %v12171_v57 = vpop.permute.xlu0 %5099 }
 0x671   :  { %15384 = vst [vmem:[#allocation241_spill] sm:$0xff] %v12171_v57  ;;  %5345 = vrot.lane.b32.xlu1 %v4150_v31, %s8697_s26  ;;  %v4153_v57 = vld [vmem:[#allocation2 + $0x288] sm:$0xff] }
 0x672   :  { %5343 = vrot.lane.b32.xlu0 %v4149_v59, %s8697_s26  ;;  %v4156_v31 = vld [vmem:[#allocation2 + $0x2a8] sm:$0xff] }
 0x673   :  { %v12175_v4 = vpop.permute.xlu1 %5105 }
 0x674   :  { %15385 = vst [vmem:[#allocation298_spill] sm:$0xff] %v12175_v4  ;;  %v12177_v49 = vpop.permute.xlu0 %5103 }
 0x675   :  { %15386 = vst [vmem:[#allocation71_spill] sm:$0xff] %v12177_v49  ;;  %5349 = vrot.lane.b32.xlu1 %v4152_v60, %s8697_s26  ;;  %v4155_v49 = vld [vmem:[#allocation2 + $0x2a0] sm:$0xff] }
 0x676   :  { %5347 = vrot.lane.b32.xlu0 %v4151_v33, %s8697_s26  ;;  %v4158_v60 = vld [vmem:[#allocation2 + $0x2c0] sm:$0xff] }
 0x677   :  { %v12181_v23 = vpop.permute.xlu1 %5109 }
 0x678   :  { %15387 = vst [vmem:[#allocation126_spill] sm:$0xff] %v12181_v23  ;;  %v12183_v2 = vpop.permute.xlu0 %5107 }
 0x679   :  { %15388 = vst [vmem:[#allocation299_spill] sm:$0xff] %v12183_v2  ;;  %5353 = vrot.lane.b32.xlu1 %v4154_v21, %s8697_s26  ;;  %v4157_v2 = vld [vmem:[#allocation2 + $0x2b8] sm:$0xff] }
 0x67a   :  { %5351 = vrot.lane.b32.xlu0 %v4153_v57, %s8697_s26  ;;  %v4160_v21 = vld [vmem:[#allocation2 + $0x2d8] sm:$0xff] }
 0x67b   :  { %v12187_v59 = vpop.permute.xlu1 %5113 }
 0x67c   :  { %15389 = vst [vmem:[#allocation357_spill] sm:$0xff] %v12187_v59  ;;  %v12189_v4 = vpop.permute.xlu0 %5111 }
 0x67d   :  { %15390 = vst [vmem:[#allocation127_spill] sm:$0xff] %v12189_v4  ;;  %5357 = vrot.lane.b32.xlu1 %v4156_v31, %s8697_s26  ;;  %v4159_v4 = vld [vmem:[#allocation2 + $0x2d0] sm:$0xff] }
 0x67e   :  { %5355 = vrot.lane.b32.xlu0 %v4155_v49, %s8697_s26  ;;  %v4162_v31 = vld [vmem:[#allocation2 + $0x2f0] sm:$0xff] }
 0x67f   :  { %v12193_v33 = vpop.permute.xlu1 %5117 }
 0x680   :  { %15391 = vst [vmem:[#allocation184_spill] sm:$0xff] %v12193_v33  ;;  %v12195_v23 = vpop.permute.xlu0 %5115 }
 0x681   :  { %15392 = vst [vmem:[#allocation358_spill] sm:$0xff] %v12195_v23  ;;  %5361 = vrot.lane.b32.xlu1 %v4158_v60, %s8697_s26  ;;  %v4161_v23 = vld [vmem:[#allocation2 + $0x2e8] sm:$0xff] }
 0x682   :  { %5359 = vrot.lane.b32.xlu0 %v4157_v2, %s8697_s26  ;;  %v4164_v60 = vld [vmem:[#allocation2 + $0x308] sm:$0xff] }
 0x683   :  { %v12199_v57 = vpop.permute.xlu1 %5121 }
 0x684   :  { %15393 = vst [vmem:[#allocation17_spill] sm:$0xff] %v12199_v57  ;;  %v12201_v59 = vpop.permute.xlu0 %5119 }
 0x685   :  { %15394 = vst [vmem:[#allocation185_spill] sm:$0xff] %v12201_v59  ;;  %5365 = vrot.lane.b32.xlu1 %v4160_v21, %s8697_s26  ;;  %v4163_v59 = vld [vmem:[#allocation2 + $0x300] sm:$0xff] }
 0x686   :  { %5363 = vrot.lane.b32.xlu0 %v4159_v4, %s8697_s26  ;;  %v4166_v21 = vld [vmem:[#allocation2 + $0x320] sm:$0xff] }
 0x687   :  { %v12205_v49 = vpop.permute.xlu1 %5125 }
 0x688   :  { %15395 = vst [vmem:[#allocation242_spill] sm:$0xff] %v12205_v49  ;;  %v12207_v33 = vpop.permute.xlu0 %5123 }
 0x689   :  { %15396 = vst [vmem:[#allocation18_spill] sm:$0xff] %v12207_v33  ;;  %5369 = vrot.lane.b32.xlu1 %v4162_v31, %s8697_s26  ;;  %v4165_v33 = vld [vmem:[#allocation2 + $0x318] sm:$0xff] }
 0x68a   :  { %5367 = vrot.lane.b32.xlu0 %v4161_v23, %s8697_s26 }
 0x68b   :  { %v12211_v2 = vpop.permute.xlu1 %5257 }
 0x68c   :  { %v12213_v57 = vpop.permute.xlu0 %5255 }
 0x68d   :  { %5373 = vrot.lane.b32.xlu1 %v4164_v60, %s8697_s26  ;;  %v4357_v60 = vld [vmem:[#allocation2 + $0x330] sm:$0xff] }
 0x68e   :  { %5371 = vrot.lane.b32.xlu0 %v4163_v59, %s8697_s26 }
 0x68f   :  { %v12217_v4 = vpop.permute.xlu1 %5261 }
 0x690   :  { %v12219_v49 = vpop.permute.xlu0 %5259 }
 0x691   :  { %5377 = vrot.lane.b32.xlu1 %v4166_v21, %s8697_s26  ;;  %v4359_v21 = vld [vmem:[#allocation2 + $0x19] sm:$0xff] }
 0x692   :  { %5375 = vrot.lane.b32.xlu0 %v4165_v33, %s8697_s26 }
 0x693   :  { %v12223_v23 = vpop.permute.xlu1 %5265 }
 0x694   :  { %v12225_v31 = vpop.permute.xlu0 %5263 }
 0x695   :  { %5381 = vrot.lane.b32.xlu1 %v4358_v35, %s8697_s26  ;;  %v12243_v35 = vld [vmem:[#allocation2 + $0x31] sm:$0xff] }
 0x696   :  { %5379 = vrot.lane.b32.xlu0 %v4357_v60, %s8697_s26 }
 0x697   :  { %v12229_v59 = vpop.permute.xlu1 %5269 }
 0x698   :  { %15397 = vst [vmem:[#allocation72_spill] sm:$0xff] %v12229_v59  ;;  %v12231_v3 = vpop.permute.xlu0 %5267  ;;  %v12590_v59 = vld [vmem:[#allocation2 + $0x15a] sm:$0xff] }
 0x699   :  { %15398 = vst [vmem:[#allocation243_spill] sm:$0xff] %v12231_v3  ;;  %5513 = vrot.lane.b32.xlu1 %v4360_v25, %s8698_s27  ;;  %15483 = vst [vmem:[#allocation312_spill] sm:$0xff] %v12590_v59  ;;  %v4456_v3 = vld [vmem:[#allocation2 + $0x1d2] sm:$0xff] }
 0x69a   :  { %5511 = vrot.lane.b32.xlu0 %v4359_v21, %s8698_s27  ;;  %v12255_v21 = vld [vmem:[#allocation2 + $0x49] sm:$0xff] }
 0x69b   :  { %v12235_v33 = vpop.permute.xlu1 %5273 }
 0x69c   :  { %15399 = vst [vmem:[#allocation300_spill] sm:$0xff] %v12235_v33  ;;  %v12237_v19 = vpop.permute.xlu0 %5271  ;;  %v12542_v33 = vld [vmem:[#allocation2 + $0xfa] sm:$0xff] }
 0x69d   :  { %15400 = vst [vmem:[#allocation73_spill] sm:$0xff] %v12237_v19  ;;  %5517 = vrot.lane.b32.xlu1 %v12239_v61, %s8698_s27  ;;  %v12566_v19 = vld [vmem:[#allocation2 + $0x12a] sm:$0xff] }
 0x69e   :  { %5515 = vrot.lane.b32.xlu0 %v12243_v35, %s8698_s27 }
 0x69f   :  { %v12247_v60 = vpop.permute.xlu1 %5277 }
 0x6a0   :  { %15401 = vst [vmem:[#allocation128_spill] sm:$0xff] %v12247_v60  ;;  %v12249_v25 = vpop.permute.xlu0 %5275  ;;  %v12494_v60 = vld [vmem:[#allocation2 + $0x9a] sm:$0xff] }
 0x6a1   :  { %15402 = vst [vmem:[#allocation301_spill] sm:$0xff] %v12249_v25  ;;  %5521 = vrot.lane.b32.xlu1 %v12251_v16, %s8698_s27  ;;  %v12518_v25 = vld [vmem:[#allocation2 + $0xca] sm:$0xff] }
 0x6a2   :  { %5519 = vrot.lane.b32.xlu0 %v12255_v21, %s8698_s27 }
 0x6a3   :  { %v12259_v52 = vpop.permute.xlu1 %5281 }
 0x6a4   :  { %15403 = vst [vmem:[#allocation359_spill] sm:$0xff] %v12259_v52  ;;  %v12261_v38 = vpop.permute.xlu0 %5279 }
 0x6a5   :  { %15404 = vst [vmem:[#allocation129_spill] sm:$0xff] %v12261_v38  ;;  %5525 = vrot.lane.b32.xlu1 %v4366_v51, %s8698_s27  ;;  %v4370_v51 = vld [vmem:[#allocation2 + $0x99] sm:$0xff] }
 0x6a6   :  { %5523 = vrot.lane.b32.xlu0 %v12264_v0, %s8698_s27 }
 0x6a7   :  { %v12268_v40 = vpop.permute.xlu1 %5285 }
 0x6a8   :  { %15405 = vst [vmem:[#allocation186_spill] sm:$0xff] %v12268_v40  ;;  %v12270_v11 = vpop.permute.xlu0 %5283 }
 0x6a9   :  { %15406 = vst [vmem:[#allocation360_spill] sm:$0xff] %v12270_v11  ;;  %5529 = vrot.lane.b32.xlu1 %v4368_v37, %s8698_s27  ;;  %v4371_v37 = vld [vmem:[#allocation2 + $0xa9] sm:$0xff]  ;;  %v12446_v11 = vld [vmem:[#allocation2 + $0x3a] sm:$0xff] }
 0x6aa   :  { %5527 = vrot.lane.b32.xlu0 %v4367_v1, %s8698_s27 }
 0x6ab   :  { %v12274_v53 = vpop.permute.xlu1 %5289 }
 0x6ac   :  { %15407 = vst [vmem:[#allocation19_spill] sm:$0xff] %v12274_v53  ;;  %v12276_v36 = vpop.permute.xlu0 %5287 }
 0x6ad   :  { %15408 = vst [vmem:[#allocation187_spill] sm:$0xff] %v12276_v36  ;;  %5533 = vrot.lane.b32.xlu1 %v4370_v51, %s8698_s27  ;;  %v4374_v36 = vld [vmem:[#allocation2 + $0xc9] sm:$0xff]  ;;  %v4373_v51 = vld [vmem:[#allocation2 + $0xc1] sm:$0xff] }
 0x6ae   :  { %5531 = vrot.lane.b32.xlu0 %v4369_v44, %s8698_s27 }
 0x6af   :  { %v12280_v17 = vpop.permute.xlu1 %5293 }
 0x6b0   :  { %15409 = vst [vmem:[#allocation244_spill] sm:$0xff] %v12280_v17  ;;  %v12282_v56 = vpop.permute.xlu0 %5291 }
 0x6b1   :  { %15410 = vst [vmem:[#allocation20_spill] sm:$0xff] %v12282_v56  ;;  %5537 = vrot.lane.b32.xlu1 %v4372_v46, %s8698_s27  ;;  %v4376_v56 = vld [vmem:[#allocation2 + $0xe1] sm:$0xff]  ;;  %v4375_v46 = vld [vmem:[#allocation2 + $0xd9] sm:$0xff] }
 0x6b2   :  { %5535 = vrot.lane.b32.xlu0 %v4371_v37, %s8698_s27 }
 0x6b3   :  { %v12286_v1 = vpop.permute.xlu1 %5297 }
 0x6b4   :  { %15411 = vst [vmem:[#allocation74_spill] sm:$0xff] %v12286_v1  ;;  %v12288_v53 = vpop.permute.xlu0 %5295 }
 0x6b5   :  { %15412 = vst [vmem:[#allocation245_spill] sm:$0xff] %v12288_v53  ;;  %5541 = vrot.lane.b32.xlu1 %v4374_v36, %s8698_s27  ;;  %v4378_v53 = vld [vmem:[#allocation2 + $0xf9] sm:$0xff]  ;;  %v4377_v36 = vld [vmem:[#allocation2 + $0xf1] sm:$0xff] }
 0x6b6   :  { %5539 = vrot.lane.b32.xlu0 %v4373_v51, %s8698_s27 }
 0x6b7   :  { %v12292_v44 = vpop.permute.xlu1 %5301 }
 0x6b8   :  { %15413 = vst [vmem:[#allocation302_spill] sm:$0xff] %v12292_v44  ;;  %v12294_v17 = vpop.permute.xlu0 %5299 }
 0x6b9   :  { %15414 = vst [vmem:[#allocation75_spill] sm:$0xff] %v12294_v17  ;;  %5545 = vrot.lane.b32.xlu1 %v4376_v56, %s8698_s27  ;;  %v4380_v17 = vld [vmem:[#allocation2 + $0x111] sm:$0xff]  ;;  %v4379_v56 = vld [vmem:[#allocation2 + $0x109] sm:$0xff] }
 0x6ba   :  { %5543 = vrot.lane.b32.xlu0 %v4375_v46, %s8698_s27 }
 0x6bb   :  { %v12298_v37 = vpop.permute.xlu1 %5305 }
 0x6bc   :  { %15415 = vst [vmem:[#allocation130_spill] sm:$0xff] %v12298_v37  ;;  %v12300_v1 = vpop.permute.xlu0 %5303 }
 0x6bd   :  { %15416 = vst [vmem:[#allocation303_spill] sm:$0xff] %v12300_v1  ;;  %5549 = vrot.lane.b32.xlu1 %v4378_v53, %s8698_s27  ;;  %v4382_v1 = vld [vmem:[#allocation2 + $0x129] sm:$0xff]  ;;  %v4381_v53 = vld [vmem:[#allocation2 + $0x121] sm:$0xff] }
 0x6be   :  { %5547 = vrot.lane.b32.xlu0 %v4377_v36, %s8698_s27 }
 0x6bf   :  { %v12304_v51 = vpop.permute.xlu1 %5309 }
 0x6c0   :  { %15417 = vst [vmem:[#allocation361_spill] sm:$0xff] %v12304_v51  ;;  %v12306_v44 = vpop.permute.xlu0 %5307 }
 0x6c1   :  { %15418 = vst [vmem:[#allocation131_spill] sm:$0xff] %v12306_v44  ;;  %5553 = vrot.lane.b32.xlu1 %v4380_v17, %s8698_s27  ;;  %v4384_v44 = vld [vmem:[#allocation2 + $0x141] sm:$0xff]  ;;  %v4383_v17 = vld [vmem:[#allocation2 + $0x139] sm:$0xff] }
 0x6c2   :  { %5551 = vrot.lane.b32.xlu0 %v4379_v56, %s8698_s27 }
 0x6c3   :  { %v12310_v46 = vpop.permute.xlu1 %5313 }
 0x6c4   :  { %15419 = vst [vmem:[#allocation188_spill] sm:$0xff] %v12310_v46  ;;  %v12312_v37 = vpop.permute.xlu0 %5311 }
 0x6c5   :  { %15420 = vst [vmem:[#allocation362_spill] sm:$0xff] %v12312_v37  ;;  %5557 = vrot.lane.b32.xlu1 %v4382_v1, %s8698_s27  ;;  %v4386_v37 = vld [vmem:[#allocation2 + $0x159] sm:$0xff]  ;;  %v4385_v1 = vld [vmem:[#allocation2 + $0x151] sm:$0xff] }
 0x6c6   :  { %5555 = vrot.lane.b32.xlu0 %v4381_v53, %s8698_s27 }
 0x6c7   :  { %v12316_v36 = vpop.permute.xlu1 %5317 }
 0x6c8   :  { %15421 = vst [vmem:[#allocation21_spill] sm:$0xff] %v12316_v36  ;;  %v12318_v51 = vpop.permute.xlu0 %5315 }
 0x6c9   :  { %15422 = vst [vmem:[#allocation189_spill] sm:$0xff] %v12318_v51  ;;  %5561 = vrot.lane.b32.xlu1 %v4384_v44, %s8698_s27  ;;  %v4388_v51 = vld [vmem:[#allocation2 + $0x171] sm:$0xff]  ;;  %v4387_v44 = vld [vmem:[#allocation2 + $0x169] sm:$0xff] }
 0x6ca   :  { %5559 = vrot.lane.b32.xlu0 %v4383_v17, %s8698_s27 }
 0x6cb   :  { %v12322_v56 = vpop.permute.xlu1 %5321 }
 0x6cc   :  { %15423 = vst [vmem:[#allocation246_spill] sm:$0xff] %v12322_v56  ;;  %v12324_v46 = vpop.permute.xlu0 %5319 }
 0x6cd   :  { %15424 = vst [vmem:[#allocation22_spill] sm:$0xff] %v12324_v46  ;;  %5565 = vrot.lane.b32.xlu1 %v4386_v37, %s8698_s27  ;;  %v4390_v46 = vld [vmem:[#allocation2 + $0x189] sm:$0xff]  ;;  %v4389_v37 = vld [vmem:[#allocation2 + $0x181] sm:$0xff] }
 0x6ce   :  { %5563 = vrot.lane.b32.xlu0 %v4385_v1, %s8698_s27 }
 0x6cf   :  { %v12328_v53 = vpop.permute.xlu1 %5325 }
 0x6d0   :  { %15425 = vst [vmem:[#allocation76_spill] sm:$0xff] %v12328_v53  ;;  %v12330_v36 = vpop.permute.xlu0 %5323 }
 0x6d1   :  { %15426 = vst [vmem:[#allocation247_spill] sm:$0xff] %v12330_v36  ;;  %5569 = vrot.lane.b32.xlu1 %v4388_v51, %s8698_s27  ;;  %v4392_v36 = vld [vmem:[#allocation2 + $0x1d1] sm:$0xff]  ;;  %v4391_v51 = vld [vmem:[#allocation2 + $0x1c9] sm:$0xff] }
 0x6d2   :  { %5567 = vrot.lane.b32.xlu0 %v4387_v44, %s8698_s27 }
 0x6d3   :  { %v12334_v17 = vpop.permute.xlu1 %5329 }
 0x6d4   :  { %15427 = vst [vmem:[#allocation304_spill] sm:$0xff] %v12334_v17  ;;  %v12336_v56 = vpop.permute.xlu0 %5327 }
 0x6d5   :  { %15428 = vst [vmem:[#allocation77_spill] sm:$0xff] %v12336_v56  ;;  %5573 = vrot.lane.b32.xlu1 %v4390_v46, %s8698_s27  ;;  %v4394_v56 = vld [vmem:[#allocation2 + $0x1e9] sm:$0xff]  ;;  %v4393_v46 = vld [vmem:[#allocation2 + $0x1e1] sm:$0xff] }
 0x6d6   :  { %5571 = vrot.lane.b32.xlu0 %v4389_v37, %s8698_s27 }
 0x6d7   :  { %v12340_v1 = vpop.permute.xlu1 %5333 }
 0x6d8   :  { %15429 = vst [vmem:[#allocation132_spill] sm:$0xff] %v12340_v1  ;;  %v12342_v53 = vpop.permute.xlu0 %5331 }
 0x6d9   :  { %15430 = vst [vmem:[#allocation305_spill] sm:$0xff] %v12342_v53  ;;  %5577 = vrot.lane.b32.xlu1 %v4392_v36, %s8698_s27  ;;  %v4396_v53 = vld [vmem:[#allocation2 + $0x201] sm:$0xff]  ;;  %v4395_v36 = vld [vmem:[#allocation2 + $0x1f9] sm:$0xff] }
 0x6da   :  { %5575 = vrot.lane.b32.xlu0 %v4391_v51, %s8698_s27 }
 0x6db   :  { %v12346_v44 = vpop.permute.xlu1 %5337 }
 0x6dc   :  { %15431 = vst [vmem:[#allocation363_spill] sm:$0xff] %v12346_v44  ;;  %v12348_v17 = vpop.permute.xlu0 %5335 }
 0x6dd   :  { %15432 = vst [vmem:[#allocation133_spill] sm:$0xff] %v12348_v17  ;;  %5581 = vrot.lane.b32.xlu1 %v4394_v56, %s8698_s27  ;;  %v4398_v17 = vld [vmem:[#allocation2 + $0x219] sm:$0xff]  ;;  %v4397_v56 = vld [vmem:[#allocation2 + $0x211] sm:$0xff] }
 0x6de   :  { %5579 = vrot.lane.b32.xlu0 %v4393_v46, %s8698_s27 }
 0x6df   :  { %v12352_v37 = vpop.permute.xlu1 %5341 }
 0x6e0   :  { %15433 = vst [vmem:[#allocation190_spill] sm:$0xff] %v12352_v37  ;;  %v12354_v1 = vpop.permute.xlu0 %5339 }
 0x6e1   :  { %15434 = vst [vmem:[#allocation364_spill] sm:$0xff] %v12354_v1  ;;  %5585 = vrot.lane.b32.xlu1 %v4396_v53, %s8698_s27  ;;  %v4400_v1 = vld [vmem:[#allocation2 + $0x231] sm:$0xff]  ;;  %v4399_v53 = vld [vmem:[#allocation2 + $0x229] sm:$0xff] }
 0x6e2   :  { %5583 = vrot.lane.b32.xlu0 %v4395_v36, %s8698_s27 }
 0x6e3   :  { %v12358_v51 = vpop.permute.xlu1 %5345 }
 0x6e4   :  { %15435 = vst [vmem:[#allocation23_spill] sm:$0xff] %v12358_v51  ;;  %v12360_v44 = vpop.permute.xlu0 %5343 }
 0x6e5   :  { %15436 = vst [vmem:[#allocation191_spill] sm:$0xff] %v12360_v44  ;;  %5589 = vrot.lane.b32.xlu1 %v4398_v17, %s8698_s27  ;;  %v4402_v44 = vld [vmem:[#allocation2 + $0x249] sm:$0xff]  ;;  %v4401_v17 = vld [vmem:[#allocation2 + $0x241] sm:$0xff] }
 0x6e6   :  { %5587 = vrot.lane.b32.xlu0 %v4397_v56, %s8698_s27 }
 0x6e7   :  { %v12364_v46 = vpop.permute.xlu1 %5349 }
 0x6e8   :  { %15437 = vst [vmem:[#allocation248_spill] sm:$0xff] %v12364_v46  ;;  %v12366_v37 = vpop.permute.xlu0 %5347 }
 0x6e9   :  { %15438 = vst [vmem:[#allocation24_spill] sm:$0xff] %v12366_v37  ;;  %5593 = vrot.lane.b32.xlu1 %v4400_v1, %s8698_s27  ;;  %v4404_v37 = vld [vmem:[#allocation2 + $0x261] sm:$0xff]  ;;  %v4403_v1 = vld [vmem:[#allocation2 + $0x259] sm:$0xff] }
 0x6ea   :  { %5591 = vrot.lane.b32.xlu0 %v4399_v53, %s8698_s27 }
 0x6eb   :  { %v12370_v36 = vpop.permute.xlu1 %5353 }
 0x6ec   :  { %15439 = vst [vmem:[#allocation78_spill] sm:$0xff] %v12370_v36  ;;  %v12372_v51 = vpop.permute.xlu0 %5351 }
 0x6ed   :  { %15440 = vst [vmem:[#allocation249_spill] sm:$0xff] %v12372_v51  ;;  %5597 = vrot.lane.b32.xlu1 %v4402_v44, %s8698_s27  ;;  %v4406_v51 = vld [vmem:[#allocation2 + $0x279] sm:$0xff]  ;;  %v4405_v44 = vld [vmem:[#allocation2 + $0x271] sm:$0xff] }
 0x6ee   :  { %5595 = vrot.lane.b32.xlu0 %v4401_v17, %s8698_s27 }
 0x6ef   :  { %v12376_v56 = vpop.permute.xlu1 %5357 }
 0x6f0   :  { %15441 = vst [vmem:[#allocation306_spill] sm:$0xff] %v12376_v56  ;;  %v12378_v46 = vpop.permute.xlu0 %5355 }
 0x6f1   :  { %15442 = vst [vmem:[#allocation79_spill] sm:$0xff] %v12378_v46  ;;  %5601 = vrot.lane.b32.xlu1 %v4404_v37, %s8698_s27  ;;  %v4408_v46 = vld [vmem:[#allocation2 + $0x291] sm:$0xff]  ;;  %v4407_v37 = vld [vmem:[#allocation2 + $0x289] sm:$0xff] }
 0x6f2   :  { %5599 = vrot.lane.b32.xlu0 %v4403_v1, %s8698_s27 }
 0x6f3   :  { %v12382_v53 = vpop.permute.xlu1 %5361 }
 0x6f4   :  { %15443 = vst [vmem:[#allocation134_spill] sm:$0xff] %v12382_v53  ;;  %v12384_v36 = vpop.permute.xlu0 %5359 }
 0x6f5   :  { %15444 = vst [vmem:[#allocation307_spill] sm:$0xff] %v12384_v36  ;;  %5605 = vrot.lane.b32.xlu1 %v4406_v51, %s8698_s27  ;;  %v4410_v36 = vld [vmem:[#allocation2 + $0x2a9] sm:$0xff]  ;;  %v4409_v51 = vld [vmem:[#allocation2 + $0x2a1] sm:$0xff] }
 0x6f6   :  { %5603 = vrot.lane.b32.xlu0 %v4405_v44, %s8698_s27 }
 0x6f7   :  { %v12388_v17 = vpop.permute.xlu1 %5365 }
 0x6f8   :  { %15445 = vst [vmem:[#allocation365_spill] sm:$0xff] %v12388_v17  ;;  %v12390_v56 = vpop.permute.xlu0 %5363 }
 0x6f9   :  { %15446 = vst [vmem:[#allocation135_spill] sm:$0xff] %v12390_v56  ;;  %5609 = vrot.lane.b32.xlu1 %v4408_v46, %s8698_s27  ;;  %v4412_v56 = vld [vmem:[#allocation2 + $0x2c1] sm:$0xff]  ;;  %v4411_v46 = vld [vmem:[#allocation2 + $0x2b9] sm:$0xff] }
 0x6fa   :  { %5607 = vrot.lane.b32.xlu0 %v4407_v37, %s8698_s27 }
 0x6fb   :  { %v12394_v1 = vpop.permute.xlu1 %5369 }
 0x6fc   :  { %15447 = vst [vmem:[#allocation192_spill] sm:$0xff] %v12394_v1  ;;  %v12396_v53 = vpop.permute.xlu0 %5367 }
 0x6fd   :  { %15448 = vst [vmem:[#allocation366_spill] sm:$0xff] %v12396_v53  ;;  %5613 = vrot.lane.b32.xlu1 %v4410_v36, %s8698_s27  ;;  %v4414_v53 = vld [vmem:[#allocation2 + $0x2d9] sm:$0xff]  ;;  %v4413_v36 = vld [vmem:[#allocation2 + $0x2d1] sm:$0xff] }
 0x6fe   :  { %5611 = vrot.lane.b32.xlu0 %v4409_v51, %s8698_s27 }
 0x6ff   :  { %v12400_v44 = vpop.permute.xlu1 %5373 }
 0x700   :  { %15449 = vst [vmem:[#allocation25_spill] sm:$0xff] %v12400_v44  ;;  %v12402_v17 = vpop.permute.xlu0 %5371 }
 0x701   :  { %15450 = vst [vmem:[#allocation193_spill] sm:$0xff] %v12402_v17  ;;  %5617 = vrot.lane.b32.xlu1 %v4412_v56, %s8698_s27  ;;  %v4416_v17 = vld [vmem:[#allocation2 + $0x2f1] sm:$0xff]  ;;  %v4415_v56 = vld [vmem:[#allocation2 + $0x2e9] sm:$0xff] }
 0x702   :  { %5615 = vrot.lane.b32.xlu0 %v4411_v46, %s8698_s27 }
 0x703   :  { %v12406_v37 = vpop.permute.xlu1 %5377 }
 0x704   :  { %15451 = vst [vmem:[#allocation250_spill] sm:$0xff] %v12406_v37  ;;  %v12408_v1 = vpop.permute.xlu0 %5375 }
 0x705   :  { %15452 = vst [vmem:[#allocation26_spill] sm:$0xff] %v12408_v1  ;;  %5621 = vrot.lane.b32.xlu1 %v4414_v53, %s8698_s27  ;;  %v4418_v1 = vld [vmem:[#allocation2 + $0x309] sm:$0xff]  ;;  %v4417_v53 = vld [vmem:[#allocation2 + $0x301] sm:$0xff] }
 0x706   :  { %5619 = vrot.lane.b32.xlu0 %v4413_v36, %s8698_s27 }
 0x707   :  { %v12412_v51 = vpop.permute.xlu1 %5381 }
 0x708   :  { %15453 = vst [vmem:[#allocation80_spill] sm:$0xff] %v12412_v51  ;;  %v12414_v44 = vpop.permute.xlu0 %5379 }
 0x709   :  { %15454 = vst [vmem:[#allocation251_spill] sm:$0xff] %v12414_v44  ;;  %5625 = vrot.lane.b32.xlu1 %v4416_v17, %s8698_s27  ;;  %v4420_v44 = vld [vmem:[#allocation2 + $0x321] sm:$0xff]  ;;  %v4419_v17 = vld [vmem:[#allocation2 + $0x319] sm:$0xff] }
 0x70a   :  { %5623 = vrot.lane.b32.xlu0 %v4415_v56, %s8698_s27 }
 0x70b   :  { %v12418_v46 = vpop.permute.xlu1 %5513 }
 0x70c   :  { %v12420_v37 = vpop.permute.xlu0 %5511 }
 0x70d   :  { %5629 = vrot.lane.b32.xlu1 %v4418_v1, %s8698_s27  ;;  %v4421_v1 = vld [vmem:[#allocation2 + $0x331] sm:$0xff] }
 0x70e   :  { %5627 = vrot.lane.b32.xlu0 %v4417_v53, %s8698_s27 }
 0x70f   :  { %v12424_v36 = vpop.permute.xlu1 %5517 }
 0x710   :  { %v12426_v51 = vpop.permute.xlu0 %5515 }
 0x711   :  { %5633 = vrot.lane.b32.xlu1 %v4420_v44, %s8698_s27  ;;  %v4423_v44 = vld [vmem:[#allocation2 + $0x1a] sm:$0xff] }
 0x712   :  { %5631 = vrot.lane.b32.xlu0 %v4419_v17, %s8698_s27 }
 0x713   :  { %v12430_v56 = vpop.permute.xlu1 %5521 }
 0x714   :  { %v12432_v63 = vpop.permute.xlu0 %5519 }
 0x715   :  { %5637 = vrot.lane.b32.xlu1 %v4422_v58, %s8698_s27  ;;  %v12450_v58 = vld [vmem:[#allocation2 + $0x32] sm:$0xff] }
 0x716   :  { %5635 = vrot.lane.b32.xlu0 %v4421_v1, %s8698_s27 }
 0x717   :  { %v12436_v53 = vpop.permute.xlu1 %5525 }
 0x718   :  { %15455 = vst [vmem:[#allocation308_spill] sm:$0xff] %v12436_v53  ;;  %v12438_v40 = vpop.permute.xlu0 %5523 }
 0x719   :  { %15456 = vst [vmem:[#allocation81_spill] sm:$0xff] %v12438_v40  ;;  %5769 = vrot.lane.b32.xlu1 %v4424_v39, %s8699_s28  ;;  %v12614_v40 = vld [vmem:[#allocation2 + $0x18a] sm:$0xff] }
 0x71a   :  { %5767 = vrot.lane.b32.xlu0 %v4423_v44, %s8699_s28  ;;  %v12462_v44 = vld [vmem:[#allocation2 + $0x4a] sm:$0xff]  ;;  %15491 = vst [vmem:[#allocation31_spill] sm:$0xff] %v12614_v40 }
 0x71b   :  { %v12442_v17 = vpop.permute.xlu1 %5529 }
 0x71c   :  { %15457 = vst [vmem:[#allocation136_spill] sm:$0xff] %v12442_v17  ;;  %v12444_v30 = vpop.permute.xlu0 %5527 }
 0x71d   :  { %15458 = vst [vmem:[#allocation309_spill] sm:$0xff] %v12444_v30  ;;  %5773 = vrot.lane.b32.xlu1 %v12446_v11, %s8699_s28 }
 0x71e   :  { %5771 = vrot.lane.b32.xlu0 %v12450_v58, %s8699_s28 }
 0x71f   :  { %v12454_v1 = vpop.permute.xlu1 %5533 }
 0x720   :  { %15459 = vst [vmem:[#allocation367_spill] sm:$0xff] %v12454_v1  ;;  %v12456_v39 = vpop.permute.xlu0 %5531 }
 0x721   :  { %15460 = vst [vmem:[#allocation137_spill] sm:$0xff] %v12456_v39  ;;  %5777 = vrot.lane.b32.xlu1 %v12458_v50, %s8699_s28 }
 0x722   :  { %5775 = vrot.lane.b32.xlu0 %v12462_v44, %s8699_s28 }
 0x723   :  { %v12466_v54 = vpop.permute.xlu1 %5537 }
 0x724   :  { %15461 = vst [vmem:[#allocation194_spill] sm:$0xff] %v12466_v54  ;;  %v12468_v52 = vpop.permute.xlu0 %5535  ;;  %v12486_v54 = vld [vmem:[#allocation2 + $0x7a] sm:$0xff] }
 0x725   :  { %15462 = vst [vmem:[#allocation368_spill] sm:$0xff] %v12468_v52  ;;  %5781 = vrot.lane.b32.xlu1 %v12470_v55, %s8699_s28 }
 0x726   :  { %5779 = vrot.lane.b32.xlu0 %v12474_v10, %s8699_s28 }
 0x727   :  { %v12478_v38 = vpop.permute.xlu1 %5541 }
 0x728   :  { %15463 = vst [vmem:[#allocation27_spill] sm:$0xff] %v12478_v38  ;;  %v12480_v32 = vpop.permute.xlu0 %5539  ;;  %v12498_v38 = vld [vmem:[#allocation2 + $0x92] sm:$0xff] }
 0x729   :  { %15464 = vst [vmem:[#allocation195_spill] sm:$0xff] %v12480_v32  ;;  %5785 = vrot.lane.b32.xlu1 %v12482_v18, %s8699_s28 }
 0x72a   :  { %5783 = vrot.lane.b32.xlu0 %v12486_v54, %s8699_s28 }
 0x72b   :  { %v12490_v52 = vpop.permute.xlu1 %5545 }
 0x72c   :  { %15465 = vst [vmem:[#allocation252_spill] sm:$0xff] %v12490_v52  ;;  %v12492_v1 = vpop.permute.xlu0 %5543  ;;  %v12510_v52 = vld [vmem:[#allocation2 + $0xaa] sm:$0xff] }
 0x72d   :  { %15466 = vst [vmem:[#allocation28_spill] sm:$0xff] %v12492_v1  ;;  %5789 = vrot.lane.b32.xlu1 %v12494_v60, %s8699_s28 }
 0x72e   :  { %5787 = vrot.lane.b32.xlu0 %v12498_v38, %s8699_s28 }
 0x72f   :  { %v12502_v32 = vpop.permute.xlu1 %5549 }
 0x730   :  { %15467 = vst [vmem:[#allocation82_spill] sm:$0xff] %v12502_v32  ;;  %v12504_v29 = vpop.permute.xlu0 %5547  ;;  %v12522_v32 = vld [vmem:[#allocation2 + $0xc2] sm:$0xff] }
 0x731   :  { %15468 = vst [vmem:[#allocation253_spill] sm:$0xff] %v12504_v29  ;;  %5793 = vrot.lane.b32.xlu1 %v12506_v62, %s8699_s28 }
 0x732   :  { %5791 = vrot.lane.b32.xlu0 %v12510_v52, %s8699_s28 }
 0x733   :  { %v12514_v1 = vpop.permute.xlu1 %5553 }
 0x734   :  { %15469 = vst [vmem:[#allocation310_spill] sm:$0xff] %v12514_v1  ;;  %v12516_v39 = vpop.permute.xlu0 %5551  ;;  %v12534_v1 = vld [vmem:[#allocation2 + $0xda] sm:$0xff] }
 0x735   :  { %15470 = vst [vmem:[#allocation83_spill] sm:$0xff] %v12516_v39  ;;  %5797 = vrot.lane.b32.xlu1 %v12518_v25, %s8699_s28 }
 0x736   :  { %5795 = vrot.lane.b32.xlu0 %v12522_v32, %s8699_s28 }
 0x737   :  { %v12526_v29 = vpop.permute.xlu1 %5557 }
 0x738   :  { %15471 = vst [vmem:[#allocation138_spill] sm:$0xff] %v12526_v29  ;;  %v12528_v28 = vpop.permute.xlu0 %5555  ;;  %v12546_v29 = vld [vmem:[#allocation2 + $0xf2] sm:$0xff] }
 0x739   :  { %15472 = vst [vmem:[#allocation311_spill] sm:$0xff] %v12528_v28  ;;  %5801 = vrot.lane.b32.xlu1 %v12530_v47, %s8699_s28 }
 0x73a   :  { %5799 = vrot.lane.b32.xlu0 %v12534_v1, %s8699_s28 }
 0x73b   :  { %v12538_v39 = vpop.permute.xlu1 %5561 }
 0x73c   :  { %15473 = vst [vmem:[#allocation369_spill] sm:$0xff] %v12538_v39  ;;  %v12540_v17 = vpop.permute.xlu0 %5559  ;;  %v12558_v39 = vld [vmem:[#allocation2 + $0x10a] sm:$0xff] }
 0x73d   :  { %15474 = vst [vmem:[#allocation139_spill] sm:$0xff] %v12540_v17  ;;  %5805 = vrot.lane.b32.xlu1 %v12542_v33, %s8699_s28 }
 0x73e   :  { %5803 = vrot.lane.b32.xlu0 %v12546_v29, %s8699_s28 }
 0x73f   :  { %v12550_v28 = vpop.permute.xlu1 %5565 }
 0x740   :  { %15475 = vst [vmem:[#allocation196_spill] sm:$0xff] %v12550_v28  ;;  %v12552_v48 = vpop.permute.xlu0 %5563  ;;  %v12570_v28 = vld [vmem:[#allocation2 + $0x122] sm:$0xff] }
 0x741   :  { %15476 = vst [vmem:[#allocation370_spill] sm:$0xff] %v12552_v48  ;;  %5809 = vrot.lane.b32.xlu1 %v12554_v20, %s8699_s28 }
 0x742   :  { %5807 = vrot.lane.b32.xlu0 %v12558_v39, %s8699_s28 }
 0x743   :  { %v12562_v17 = vpop.permute.xlu1 %5569 }
 0x744   :  { %15477 = vst [vmem:[#allocation29_spill] sm:$0xff] %v12562_v17  ;;  %v12564_v30 = vpop.permute.xlu0 %5567  ;;  %v12582_v17 = vld [vmem:[#allocation2 + $0x13a] sm:$0xff] }
 0x745   :  { %15478 = vst [vmem:[#allocation197_spill] sm:$0xff] %v12564_v30  ;;  %5813 = vrot.lane.b32.xlu1 %v12566_v19, %s8699_s28 }
 0x746   :  { %5811 = vrot.lane.b32.xlu0 %v12570_v28, %s8699_s28 }
 0x747   :  { %v12574_v48 = vpop.permute.xlu1 %5573 }
 0x748   :  { %15479 = vst [vmem:[#allocation254_spill] sm:$0xff] %v12574_v48  ;;  %v12576_v26 = vpop.permute.xlu0 %5571  ;;  %v12594_v48 = vld [vmem:[#allocation2 + $0x152] sm:$0xff] }
 0x749   :  { %15480 = vst [vmem:[#allocation30_spill] sm:$0xff] %v12576_v26  ;;  %5817 = vrot.lane.b32.xlu1 %v12578_v8, %s8699_s28  ;;  %15484 = vst [vmem:[#allocation85_spill] sm:$0xff] %v12594_v48 }
 0x74a   :  { %5815 = vrot.lane.b32.xlu0 %v12582_v17, %s8699_s28 }
 0x74b   :  { %v12586_v30 = vpop.permute.xlu1 %5577 }
 0x74c   :  { %15481 = vst [vmem:[#allocation84_spill] sm:$0xff] %v12586_v30  ;;  %v12588_v53 = vpop.permute.xlu0 %5575  ;;  %v12606_v30 = vld [vmem:[#allocation2 + $0x16a] sm:$0xff] }
 0x74d   :  { %15482 = vst [vmem:[#allocation255_spill] sm:$0xff] %v12588_v53  ;;  %5821 = vrot.lane.b32.xlu1 %v12590_v59, %s8699_s28  ;;  %15488 = vst [vmem:[#allocation141_spill] sm:$0xff] %v12606_v30 }
 0x74e   :  { %5819 = vrot.lane.b32.xlu0 %v12594_v48, %s8699_s28  ;;  %v4471_v48 = vld [vmem:[#allocation2 + $0x28a] sm:$0xff] }
 0x74f   :  { %v12598_v26 = vpop.permute.xlu1 %5581 }
 0x750   :  { %15485 = vst [vmem:[#allocation140_spill] sm:$0xff] %v12598_v26  ;;  %v12600_v41 = vpop.permute.xlu0 %5579  ;;  %v12618_v26 = vld [vmem:[#allocation2 + $0x182] sm:$0xff] }
 0x751   :  { %15486 = vst [vmem:[#allocation313_spill] sm:$0xff] %v12600_v41  ;;  %5825 = vrot.lane.b32.xlu1 %v12602_v43, %s8699_s28  ;;  %15492 = vst [vmem:[#allocation199_spill] sm:$0xff] %v12618_v26 }
 0x752   :  { %5823 = vrot.lane.b32.xlu0 %v12606_v30, %s8699_s28 }
 0x753   :  { %v12610_v53 = vpop.permute.xlu1 %5585 }
 0x754   :  { %15489 = vst [vmem:[#allocation198_spill] sm:$0xff] %v12610_v53  ;;  %v12612_v59 = vpop.permute.xlu0 %5583  ;;  %v4455_v53 = vld [vmem:[#allocation2 + $0x1ca] sm:$0xff] }
 0x755   :  { %15490 = vst [vmem:[#allocation372_spill] sm:$0xff] %v12612_v59  ;;  %5829 = vrot.lane.b32.xlu1 %v12614_v40, %s8699_s28  ;;  %v4458_v40 = vld [vmem:[#allocation2 + $0x1ea] sm:$0xff] }
 0x756   :  { %5827 = vrot.lane.b32.xlu0 %v12618_v26, %s8699_s28 }
 0x757   :  { %v12622_v41 = vpop.permute.xlu1 %5589 }
 0x758   :  { %15493 = vst [vmem:[#allocation256_spill] sm:$0xff] %v12622_v41  ;;  %v12624_v43 = vpop.permute.xlu0 %5587 }
 0x759   :  { %15494 = vst [vmem:[#allocation32_spill] sm:$0xff] %v12624_v43  ;;  %5833 = vrot.lane.b32.xlu1 %v4456_v3, %s8699_s28  ;;  %v4460_v43 = vld [vmem:[#allocation2 + $0x202] sm:$0xff]  ;;  %v4459_v3 = vld [vmem:[#allocation2 + $0x1fa] sm:$0xff] }
 0x75a   :  { %5831 = vrot.lane.b32.xlu0 %v4455_v53, %s8699_s28 }
 0x75b   :  { %v12628_v59 = vpop.permute.xlu1 %5593 }
 0x75c   :  { %15495 = vst [vmem:[#allocation86_spill] sm:$0xff] %v12628_v59  ;;  %v12630_v30 = vpop.permute.xlu0 %5591 }
 0x75d   :  { %15496 = vst [vmem:[#allocation257_spill] sm:$0xff] %v12630_v30  ;;  %5837 = vrot.lane.b32.xlu1 %v4458_v40, %s8699_s28  ;;  %v4462_v30 = vld [vmem:[#allocation2 + $0x21a] sm:$0xff]  ;;  %v4461_v40 = vld [vmem:[#allocation2 + $0x212] sm:$0xff] }
 0x75e   :  { %5835 = vrot.lane.b32.xlu0 %v4457_v45, %s8699_s28 }
 0x75f   :  { %v12634_v26 = vpop.permute.xlu1 %5597 }
 0x760   :  { %15497 = vst [vmem:[#allocation314_spill] sm:$0xff] %v12634_v26  ;;  %v12636_v41 = vpop.permute.xlu0 %5595 }
 0x761   :  { %15498 = vst [vmem:[#allocation87_spill] sm:$0xff] %v12636_v41  ;;  %5841 = vrot.lane.b32.xlu1 %v4460_v43, %s8699_s28  ;;  %v4464_v41 = vld [vmem:[#allocation2 + $0x232] sm:$0xff]  ;;  %v4463_v43 = vld [vmem:[#allocation2 + $0x22a] sm:$0xff] }
 0x762   :  { %5839 = vrot.lane.b32.xlu0 %v4459_v3, %s8699_s28 }
 0x763   :  { %v12640_v53 = vpop.permute.xlu1 %5601 }
 0x764   :  { %15499 = vst [vmem:[#allocation142_spill] sm:$0xff] %v12640_v53  ;;  %v12642_v59 = vpop.permute.xlu0 %5599 }
 0x765   :  { %15500 = vst [vmem:[#allocation315_spill] sm:$0xff] %v12642_v59  ;;  %5845 = vrot.lane.b32.xlu1 %v4462_v30, %s8699_s28  ;;  %v4466_v59 = vld [vmem:[#allocation2 + $0x24a] sm:$0xff]  ;;  %v4465_v30 = vld [vmem:[#allocation2 + $0x242] sm:$0xff] }
 0x766   :  { %5843 = vrot.lane.b32.xlu0 %v4461_v40, %s8699_s28 }
 0x767   :  { %v12646_v45 = vpop.permute.xlu1 %5605 }
 0x768   :  { %15501 = vst [vmem:[#allocation373_spill] sm:$0xff] %v12646_v45  ;;  %v12648_v26 = vpop.permute.xlu0 %5603 }
 0x769   :  { %15502 = vst [vmem:[#allocation143_spill] sm:$0xff] %v12648_v26  ;;  %5849 = vrot.lane.b32.xlu1 %v4464_v41, %s8699_s28  ;;  %v4468_v26 = vld [vmem:[#allocation2 + $0x262] sm:$0xff]  ;;  %v4467_v41 = vld [vmem:[#allocation2 + $0x25a] sm:$0xff] }
 0x76a   :  { %5847 = vrot.lane.b32.xlu0 %v4463_v43, %s8699_s28 }
 0x76b   :  { %v12652_v3 = vpop.permute.xlu1 %5609 }
 0x76c   :  { %15503 = vst [vmem:[#allocation200_spill] sm:$0xff] %v12652_v3  ;;  %v12654_v53 = vpop.permute.xlu0 %5607 }
 0x76d   :  { %15504 = vst [vmem:[#allocation374_spill] sm:$0xff] %v12654_v53  ;;  %5853 = vrot.lane.b32.xlu1 %v4466_v59, %s8699_s28  ;;  %v4470_v53 = vld [vmem:[#allocation2 + $0x27a] sm:$0xff]  ;;  %v4469_v59 = vld [vmem:[#allocation2 + $0x272] sm:$0xff] }
 0x76e   :  { %5851 = vrot.lane.b32.xlu0 %v4465_v30, %s8699_s28  ;;  %v7239_v30 = vld [vmem:[%s14482_s3] sm:$0xff] }
 0x76f   :  { %v12658_v40 = vpop.permute.xlu1 %5613 }
 0x770   :  { %15505 = vst [vmem:[#allocation33_spill] sm:$0xff] %v12658_v40  ;;  %v12660_v45 = vpop.permute.xlu0 %5611  ;;  %v7240_v40 = vld [vmem:[%s14482_s3 + $0x8] sm:$0xff] }
 0x771   :  { %15506 = vst [vmem:[#allocation201_spill] sm:$0xff] %v12660_v45  ;;  %5857 = vrot.lane.b32.xlu1 %v4468_v26, %s8699_s28  ;;  %v8548_v26 = vpack.c.bf16 %v7240_v40, %v7239_v30  ;;  %v7242_v45 = vld [vmem:[%s14482_s3 + $0x18] sm:$0xff] }
 0x772   :  { %5855 = vrot.lane.b32.xlu0 %v4467_v41, %s8699_s28 }
 0x773   :  { %v12664_v43 = vpop.permute.xlu1 %5617  ;;  %8549 = vmatprep.subr.bf16.mxu1 %v8548_v26 }
 0x774   :  { %15507 = vst [vmem:[#allocation258_spill] sm:$0xff] %v12664_v43  ;;  %v12666_v3 = vpop.permute.xlu0 %5615  ;;  %8551 = vmatpush3.bf16.msra.mxu1 %v8548_v26  ;;  %v7245_v26 = vld [vmem:[%s14482_s3 + $0x30] sm:$0xff] }
 0x775   :  { %15508 = vst [vmem:[#allocation34_spill] sm:$0xff] %v12666_v3  ;;  %5861 = vrot.lane.b32.xlu1 %v4470_v53, %s8699_s28  ;;  %v4472_v3 = vld [vmem:[#allocation2 + $0x292] sm:$0xff] }
 0x776   :  { %5859 = vrot.lane.b32.xlu0 %v4469_v59, %s8699_s28  ;;  %v7241_v53 = vld [vmem:[%s14482_s3 + $0x10] sm:$0xff] }
 0x777   :  { %v12676_v41 = vpop.permute.xlu1 %5621  ;;  %v8552_v59 = vpack.c.bf16 %v7242_v45, %v7241_v53  ;;  %v7246_v53 = vld [vmem:[%s14482_s3 + $0x38] sm:$0xff] }
 0x778   :  { %15509 = vst [vmem:[#allocation88_spill] sm:$0xff] %v12676_v41  ;;  %v12678_v43 = vpop.permute.xlu0 %5619  ;;  %v4474_v41 = vld [vmem:[#allocation2 + $0x2aa] sm:$0xff] }
 0x779   :  { %15510 = vst [vmem:[#allocation259_spill] sm:$0xff] %v12678_v43  ;;  %5865 = vrot.lane.b32.xlu1 %v4472_v3, %s8699_s28  ;;  %8553 = vmatprep.subr.bf16.mxu1 %v8552_v59  ;;  %v7243_v43 = vld [vmem:[%s14482_s3 + $0x20] sm:$0xff] }
 0x77a   :  { %5863 = vrot.lane.b32.xlu0 %v4471_v48, %s8699_s28  ;;  %v4473_v3 = vld [vmem:[#allocation2 + $0x2a2] sm:$0xff]  ;;  %8555 = vmatpush3.bf16.msra.mxu1 %v8552_v59  ;;  %v8556_v45 = vpack.c.bf16 %v7244_v27, %v7243_v43  ;;  %v4475_v27 = vld [vmem:[#allocation2 + $0x2ba] sm:$0xff] }
 0x77b   :  { %v12688_v40 = vpop.permute.xlu1 %5625 }
 0x77c   :  { %15511 = vst [vmem:[#allocation316_spill] sm:$0xff] %v12688_v40  ;;  %v12690_v30 = vpop.permute.xlu0 %5623  ;;  %8557 = vmatprep.subr.bf16.mxu1 %v8556_v45 }
 0x77d   :  { %15512 = vst [vmem:[#allocation89_spill] sm:$0xff] %v12690_v30  ;;  %5869 = vrot.lane.b32.xlu1 %v4474_v41, %s8699_s28  ;;  %v4476_v30 = vld [vmem:[#allocation2 + $0x2c2] sm:$0xff]  ;;  %v8560_v41 = vpack.c.bf16 %v7246_v53, %v7245_v26  ;;  %v4488_v26 = vld [vmem:[#allocation2 + $0x38] sm:$0xff] }
 0x77e   :  { %5867 = vrot.lane.b32.xlu0 %v4473_v3, %s8699_s28  ;;  %8559 = vmatpush3.bf16.msra.mxu1 %v8556_v45  ;;  %v4487_v3 = vld [vmem:[#allocation2 + $0x30] sm:$0xff] }
 0x77f   :  { %v12700_v48 = vpop.permute.xlu1 %5629  ;;  %8561 = vmatprep.subr.bf16.mxu1 %v8560_v41 }
 0x780   :  { %15513 = vst [vmem:[#allocation144_spill] sm:$0xff] %v12700_v48  ;;  %v12708_v40 = vpop.permute.xlu0 %5627  ;;  %v7247_v48 = vld [vmem:[%s14482_s3 + $0x40] sm:$0xff] }
 0x781   :  { %15514 = vst [vmem:[#allocation317_spill] sm:$0xff] %v12708_v40  ;;  %5873 = vrot.lane.b32.xlu1 %v4476_v30, %s8699_s28  ;;  %v4477_v40 = vld [vmem:[#allocation2 + $0x2d2] sm:$0xff] }
 0x782   :  { %5871 = vrot.lane.b32.xlu0 %v4475_v27, %s8699_s28  ;;  %8563 = vmatpush3.bf16.msra.mxu1 %v8560_v41 }
 0x783   :  { %v12712_v43 = vpop.permute.xlu1 %5633  ;;  %8434 = vmatprep.subr.mxu1 %v7247_v48 }
 0x784   :  { %15515 = vst [vmem:[#allocation375_spill] sm:$0xff] %v12712_v43  ;;  %v12714_v59 = vpop.permute.xlu0 %5631 }
 0x785   :  { %15516 = vst [vmem:[#allocation145_spill] sm:$0xff] %v12714_v59  ;;  %6023 = vrot.lane.b32.xlu1 %v4487_v3, %s8700_s29  ;;  %v4489_v3 = vld [vmem:[#allocation2 + $0x48] sm:$0xff]  ;;  %v4493_v59 = vld [vmem:[#allocation2 + $0x78] sm:$0xff] }
 0x786   :  { %5875 = vrot.lane.b32.xlu0 %v4477_v40, %s8699_s28  ;;  %8435 = vmatpush3.msra.mxu1 %v7247_v48 }
 0x787   :  { %v12721_v30 = vpop.permute.xlu1 %5637 }
 0x788   :  { %15517 = vst [vmem:[#allocation202_spill] sm:$0xff] %v12721_v30  ;;  %v12723_v45 = vpop.permute.xlu0 %5635  ;;  %v4491_v30 = vld [vmem:[#allocation2 + $0x60] sm:$0xff] }
 0x789   :  { %15518 = vst [vmem:[#allocation376_spill] sm:$0xff] %v12723_v45  ;;  %6279 = vrot.lane.b32.xlu1 %v12243_v35, %s8701_s30 }
 0x78a   :  { %6025 = vrot.lane.b32.xlu0 %v4488_v26, %s8700_s29 }
 0x78b   :  { %v12728_v53 = vpop.permute.xlu1 %5769 }
 0x78c   :  { %v12730_v27 = vpop.permute.xlu0 %5767 }
 0x78d   :  { %6535 = vrot.lane.b32.xlu1 %v12450_v58, %s8702_s1  ;;  %v4490_v58 = vld [vmem:[#allocation2 + $0x50] sm:$0xff] }
 0x78e   :  { %6281 = vrot.lane.b32.xlu0 %v12239_v61, %s8701_s30 }
 0x78f   :  { %v12736_v40 = vpop.permute.xlu1 %5773 }
 0x790   :  { %v12738_v41 = vpop.permute.xlu0 %5771 }
 0x791   :  { %6027 = vrot.lane.b32.xlu1 %v4489_v3, %s8700_s29 }
 0x792   :  { %6537 = vrot.lane.b32.xlu0 %v12446_v11, %s8702_s1 }
 0x793   :  { %v12743_v35 = vpop.permute.xlu1 %5777 }
 0x794   :  { %v12745_v48 = vpop.permute.xlu0 %5775 }
 0x795   :  { %6283 = vrot.lane.b32.xlu1 %v12255_v21, %s8701_s30 }
 0x796   :  { %6029 = vrot.lane.b32.xlu0 %v4490_v58, %s8700_s29 }
 0x797   :  { %v12750_v61 = vpop.permute.xlu1 %5781 }
 0x798   :  { %v12752_v26 = vpop.permute.xlu0 %5779 }
 0x799   :  { %6539 = vrot.lane.b32.xlu1 %v12462_v44, %s8702_s1  ;;  %v4492_v44 = vld [vmem:[#allocation2 + $0x68] sm:$0xff] }
 0x79a   :  { %6285 = vrot.lane.b32.xlu0 %v12251_v16, %s8701_s30 }
 0x79b   :  { %v12758_v11 = vpop.permute.xlu1 %5785 }
 0x79c   :  { %v12760_v3 = vpop.permute.xlu0 %5783 }
 0x79d   :  { %6031 = vrot.lane.b32.xlu1 %v4491_v30, %s8700_s29  ;;  %v4556_v30 = vld [vmem:[#allocation2 + $0x69] sm:$0xff] }
 0x79e   :  { %6541 = vrot.lane.b32.xlu0 %v12458_v50, %s8702_s1 }
 0x79f   :  { %v12765_v21 = vpop.permute.xlu1 %5789 }
 0x7a0   :  { %v12767_v58 = vpop.permute.xlu0 %5787 }
 0x7a1   :  { %6287 = vrot.lane.b32.xlu1 %v12264_v0, %s8701_s30 }
 0x7a2   :  { %6033 = vrot.lane.b32.xlu0 %v4492_v44, %s8700_s29 }
 0x7a3   :  { %v12772_v16 = vpop.permute.xlu1 %5793 }
 0x7a4   :  { %15519 = vst [vmem:[#allocation35_spill] sm:$0xff] %v12772_v16  ;;  %v12774_v45 = vpop.permute.xlu0 %5791  ;;  %v4557_v16 = vld [vmem:[#allocation2 + $0x79] sm:$0xff] }
 0x7a5   :  { %6543 = vrot.lane.b32.xlu1 %v12474_v10, %s8702_s1  ;;  %v4494_v10 = vld [vmem:[#allocation2 + $0x80] sm:$0xff] }
 0x7a6   :  { %6289 = vrot.lane.b32.xlu0 %v4556_v30, %s8701_s30 }
 0x7a7   :  { %v12779_v50 = vpop.permute.xlu1 %5797 }
 0x7a8   :  { %15520 = vst [vmem:[#allocation203_spill] sm:$0xff] %v12779_v50  ;;  %v12781_v43 = vpop.permute.xlu0 %5795 }
 0x7a9   :  { %6035 = vrot.lane.b32.xlu1 %v4493_v59, %s8700_s29  ;;  %v4558_v59 = vld [vmem:[#allocation2 + $0x81] sm:$0xff] }
 0x7aa   :  { %6545 = vrot.lane.b32.xlu0 %v12470_v55, %s8702_s1 }
 0x7ab   :  { %v12786_v0 = vpop.permute.xlu1 %5801 }
 0x7ac   :  { %15521 = vst [vmem:[#allocation260_spill] sm:$0xff] %v12786_v0  ;;  %v12788_v44 = vpop.permute.xlu0 %5799 }
 0x7ad   :  { %15522 = vst [vmem:[#allocation36_spill] sm:$0xff] %v12788_v44  ;;  %6291 = vrot.lane.b32.xlu1 %v4557_v16, %s8701_s30  ;;  %v4495_v44 = vld [vmem:[#allocation2 + $0x90] sm:$0xff] }
 0x7ae   :  { %6037 = vrot.lane.b32.xlu0 %v4494_v10, %s8700_s29 }
 0x7af   :  { %v12792_v30 = vpop.permute.xlu1 %5805 }
 0x7b0   :  { %15523 = vst [vmem:[#allocation90_spill] sm:$0xff] %v12792_v30  ;;  %v12794_v50 = vpop.permute.xlu0 %5803  ;;  %v4559_v30 = vld [vmem:[#allocation2 + $0x91] sm:$0xff] }
 0x7b1   :  { %6547 = vrot.lane.b32.xlu1 %v12486_v54, %s8702_s1  ;;  %v4496_v54 = vld [vmem:[#allocation2 + $0x98] sm:$0xff] }
 0x7b2   :  { %6293 = vrot.lane.b32.xlu0 %v4558_v59, %s8701_s30 }
 0x7b3   :  { %v12799_v55 = vpop.permute.xlu1 %5809 }
 0x7b4   :  { %15524 = vst [vmem:[#allocation261_spill] sm:$0xff] %v12799_v55  ;;  %v12801_v0 = vpop.permute.xlu0 %5807 }
 0x7b5   :  { %6039 = vrot.lane.b32.xlu1 %v4495_v44, %s8700_s29  ;;  %v4560_v44 = vld [vmem:[#allocation2 + $0x99] sm:$0xff] }
 0x7b6   :  { %6549 = vrot.lane.b32.xlu0 %v12482_v18, %s8702_s1 }
 0x7b7   :  { %v12806_v16 = vpop.permute.xlu1 %5813 }
 0x7b8   :  { %15525 = vst [vmem:[#allocation318_spill] sm:$0xff] %v12806_v16  ;;  %v12808_v10 = vpop.permute.xlu0 %5811 }
 0x7b9   :  { %15526 = vst [vmem:[#allocation91_spill] sm:$0xff] %v12808_v10  ;;  %6295 = vrot.lane.b32.xlu1 %v4559_v30, %s8701_s30  ;;  %v4497_v10 = vld [vmem:[#allocation2 + $0xa8] sm:$0xff] }
 0x7ba   :  { %6041 = vrot.lane.b32.xlu0 %v4496_v54, %s8700_s29 }
 0x7bb   :  { %v12812_v59 = vpop.permute.xlu1 %5817 }
 0x7bc   :  { %15527 = vst [vmem:[#allocation146_spill] sm:$0xff] %v12812_v59  ;;  %v12814_v55 = vpop.permute.xlu0 %5815  ;;  %v4561_v59 = vld [vmem:[#allocation2 + $0xa9] sm:$0xff] }
 0x7bd   :  { %6551 = vrot.lane.b32.xlu1 %v12498_v38, %s8702_s1  ;;  %v4498_v38 = vld [vmem:[#allocation2 + $0xb0] sm:$0xff] }
 0x7be   :  { %6297 = vrot.lane.b32.xlu0 %v4560_v44, %s8701_s30 }
 0x7bf   :  { %v12819_v18 = vpop.permute.xlu1 %5821 }
 0x7c0   :  { %15528 = vst [vmem:[#allocation319_spill] sm:$0xff] %v12819_v18  ;;  %v12821_v16 = vpop.permute.xlu0 %5819 }
 0x7c1   :  { %6043 = vrot.lane.b32.xlu1 %v4497_v10, %s8700_s29  ;;  %v4562_v10 = vld [vmem:[#allocation2 + $0xb1] sm:$0xff] }
 0x7c2   :  { %6553 = vrot.lane.b32.xlu0 %v12494_v60, %s8702_s1 }
 0x7c3   :  { %v12826_v30 = vpop.permute.xlu1 %5825 }
 0x7c4   :  { %15529 = vst [vmem:[#allocation377_spill] sm:$0xff] %v12826_v30  ;;  %v12828_v54 = vpop.permute.xlu0 %5823 }
 0x7c5   :  { %15530 = vst [vmem:[#allocation147_spill] sm:$0xff] %v12828_v54  ;;  %6299 = vrot.lane.b32.xlu1 %v4561_v59, %s8701_s30  ;;  %v4499_v54 = vld [vmem:[#allocation2 + $0xc0] sm:$0xff] }
 0x7c6   :  { %6045 = vrot.lane.b32.xlu0 %v4498_v38, %s8700_s29 }
 0x7c7   :  { %v12832_v44 = vpop.permute.xlu1 %5829 }
 0x7c8   :  { %15531 = vst [vmem:[#allocation204_spill] sm:$0xff] %v12832_v44  ;;  %v12834_v18 = vpop.permute.xlu0 %5827  ;;  %v4563_v44 = vld [vmem:[#allocation2 + $0xc1] sm:$0xff] }
 0x7c9   :  { %6555 = vrot.lane.b32.xlu1 %v12510_v52, %s8702_s1  ;;  %v4500_v52 = vld [vmem:[#allocation2 + $0xc8] sm:$0xff] }
 0x7ca   :  { %6301 = vrot.lane.b32.xlu0 %v4562_v10, %s8701_s30 }
 0x7cb   :  { %v12839_v60 = vpop.permute.xlu1 %5833 }
 0x7cc   :  { %15532 = vst [vmem:[#allocation378_spill] sm:$0xff] %v12839_v60  ;;  %v12841_v30 = vpop.permute.xlu0 %5831 }
 0x7cd   :  { %6047 = vrot.lane.b32.xlu1 %v4499_v54, %s8700_s29  ;;  %v4564_v54 = vld [vmem:[#allocation2 + $0xc9] sm:$0xff] }
 0x7ce   :  { %6557 = vrot.lane.b32.xlu0 %v12506_v62, %s8702_s1 }
 0x7cf   :  { %v12846_v59 = vpop.permute.xlu1 %5837 }
 0x7d0   :  { %15533 = vst [vmem:[#allocation37_spill] sm:$0xff] %v12846_v59  ;;  %v12848_v38 = vpop.permute.xlu0 %5835 }
 0x7d1   :  { %15534 = vst [vmem:[#allocation205_spill] sm:$0xff] %v12848_v38  ;;  %6303 = vrot.lane.b32.xlu1 %v4563_v44, %s8701_s30  ;;  %v4501_v38 = vld [vmem:[#allocation2 + $0xd8] sm:$0xff] }
 0x7d2   :  { %6049 = vrot.lane.b32.xlu0 %v4500_v52, %s8700_s29 }
 0x7d3   :  { %v12852_v10 = vpop.permute.xlu1 %5841 }
 0x7d4   :  { %15535 = vst [vmem:[#allocation262_spill] sm:$0xff] %v12852_v10  ;;  %v12854_v60 = vpop.permute.xlu0 %5839  ;;  %v4565_v10 = vld [vmem:[#allocation2 + $0xd9] sm:$0xff] }
 0x7d5   :  { %6559 = vrot.lane.b32.xlu1 %v12522_v32, %s8702_s1  ;;  %v4502_v32 = vld [vmem:[#allocation2 + $0xe0] sm:$0xff] }
 0x7d6   :  { %6305 = vrot.lane.b32.xlu0 %v4564_v54, %s8701_s30 }
 0x7d7   :  { %v12859_v62 = vpop.permute.xlu1 %5845 }
 0x7d8   :  { %15536 = vst [vmem:[#allocation38_spill] sm:$0xff] %v12859_v62  ;;  %v12861_v59 = vpop.permute.xlu0 %5843 }
 0x7d9   :  { %6051 = vrot.lane.b32.xlu1 %v4501_v38, %s8700_s29  ;;  %v4566_v38 = vld [vmem:[#allocation2 + $0xe1] sm:$0xff] }
 0x7da   :  { %6561 = vrot.lane.b32.xlu0 %v12518_v25, %s8702_s1 }
 0x7db   :  { %v12866_v44 = vpop.permute.xlu1 %5849 }
 0x7dc   :  { %15537 = vst [vmem:[#allocation92_spill] sm:$0xff] %v12866_v44  ;;  %v12868_v52 = vpop.permute.xlu0 %5847 }
 0x7dd   :  { %15538 = vst [vmem:[#allocation263_spill] sm:$0xff] %v12868_v52  ;;  %6307 = vrot.lane.b32.xlu1 %v4565_v10, %s8701_s30  ;;  %v4503_v52 = vld [vmem:[#allocation2 + $0xf0] sm:$0xff] }
 0x7de   :  { %6053 = vrot.lane.b32.xlu0 %v4502_v32, %s8700_s29 }
 0x7df   :  { %v12872_v54 = vpop.permute.xlu1 %5853 }
 0x7e0   :  { %15539 = vst [vmem:[#allocation320_spill] sm:$0xff] %v12872_v54  ;;  %v12874_v62 = vpop.permute.xlu0 %5851  ;;  %v4567_v54 = vld [vmem:[#allocation2 + $0xf1] sm:$0xff] }
 0x7e1   :  { %6563 = vrot.lane.b32.xlu1 %v12534_v1, %s8702_s1  ;;  %v4504_v1 = vld [vmem:[#allocation2 + $0xf8] sm:$0xff] }
 0x7e2   :  { %6309 = vrot.lane.b32.xlu0 %v4566_v38, %s8701_s30 }
 0x7e3   :  { %v12879_v25 = vpop.permute.xlu1 %5857 }
 0x7e4   :  { %15540 = vst [vmem:[#allocation93_spill] sm:$0xff] %v12879_v25  ;;  %v12881_v44 = vpop.permute.xlu0 %5855 }
 0x7e5   :  { %15541 = vst [vmem:[#allocation148_spill] sm:$0xff] %v12881_v44  ;;  %6055 = vrot.lane.b32.xlu1 %v4503_v52, %s8700_s29  ;;  %v4568_v52 = vld [vmem:[#allocation2 + $0xf9] sm:$0xff] }
 0x7e6   :  { %6565 = vrot.lane.b32.xlu0 %v12530_v47, %s8702_s1  ;;  %v4507_v44 = vld [vmem:[#allocation2 + $0x120] sm:$0xff] }
 0x7e7   :  { %v12886_v10 = vpop.permute.xlu1 %5861 }
 0x7e8   :  { %15542 = vst [vmem:[#allocation321_spill] sm:$0xff] %v12886_v10  ;;  %v12888_v32 = vpop.permute.xlu0 %5859 }
 0x7e9   :  { %15543 = vst [vmem:[#allocation379_spill] sm:$0xff] %v12888_v32  ;;  %6311 = vrot.lane.b32.xlu1 %v4567_v54, %s8701_s30  ;;  %v4505_v32 = vld [vmem:[#allocation2 + $0x108] sm:$0xff] }
 0x7ea   :  { %6057 = vrot.lane.b32.xlu0 %v4504_v1, %s8700_s29 }
 0x7eb   :  { %v12892_v38 = vpop.permute.xlu1 %5865 }
 0x7ec   :  { %15544 = vst [vmem:[#allocation149_spill] sm:$0xff] %v12892_v38  ;;  %v12894_v25 = vpop.permute.xlu0 %5863  ;;  %v4569_v38 = vld [vmem:[#allocation2 + $0x109] sm:$0xff] }
 0x7ed   :  { %15545 = vst [vmem:[#allocation206_spill] sm:$0xff] %v12894_v25  ;;  %6567 = vrot.lane.b32.xlu1 %v12546_v29, %s8702_s1  ;;  %v4506_v29 = vld [vmem:[#allocation2 + $0x110] sm:$0xff]  ;;  %v4103_v25 = vld [vmem:[#allocation2] sm:$0xff] }
 0x7ee   :  { %6313 = vrot.lane.b32.xlu0 %v4568_v52, %s8701_s30 }
 0x7ef   :  { %v12899_v47 = vpop.permute.xlu1 %5869 }
 0x7f0   :  { %15546 = vst [vmem:[#allocation380_spill] sm:$0xff] %v12899_v47  ;;  %v12901_v10 = vpop.permute.xlu0 %5867 }
 0x7f1   :  { %15547 = vst [vmem:[#allocation39_spill] sm:$0xff] %v12901_v10  ;;  %6059 = vrot.lane.b32.xlu1 %v4505_v32, %s8700_s29  ;;  %v6727_v32 = vsel %vm20_vm0, %v4103_v25, %v11823_v15 }
 0x7f2   :  { %6569 = vrot.lane.b32.xlu0 %v12542_v33, %s8702_s1  ;;  %v4570_v33 = vld [vmem:[#allocation2 + $0x111] sm:$0xff] }
 0x7f3   :  { %v12906_v54 = vpop.permute.xlu1 %5873 }
 0x7f4   :  { %15548 = vst [vmem:[#allocation207_spill] sm:$0xff] %v12906_v54  ;;  %v12908_v1 = vpop.permute.xlu0 %5871  ;;  %v6791_v54 = vsel %vm2926_vm3, %v6727_v32, %v12021_v13 }
 0x7f5   :  { %15549 = vst [vmem:[#allocation264_spill] sm:$0xff] %v12908_v1  ;;  %6315 = vrot.lane.b32.xlu1 %v4569_v38, %s8701_s30  ;;  %v4104_v38 = vld [vmem:[#allocation2 + $0x8] sm:$0xff]  ;;  %v6855_v1 = vsel %vm2991_vm4, %v6791_v54, %v12213_v57 }
 0x7f6   :  { %6061 = vrot.lane.b32.xlu0 %v4506_v29, %s8700_s29  ;;  %v6728_v13 = vsel %vm20_vm0, %v4104_v38, %v11818_v34 }
 0x7f7   :  { %v6024_v52 = vpop.permute.xlu1 %6023  ;;  %v6792_v57 = vsel %vm2926_vm3, %v6728_v13, %v12019_v9 }
 0x7f8   :  { %v12912_v47 = vpop.permute.xlu0 %5875  ;;  %v6856_v54 = vsel %vm2991_vm4, %v6792_v57, %v12211_v2  ;;  %v8634_v57 = vld [vmem:[#allocation2 + $0x20] sm:$0xff] }
 0x7f9   :  { %15550 = vst [vmem:[#allocation40_spill] sm:$0xff] %v12912_v47  ;;  %6571 = vrot.lane.b32.xlu1 %v12558_v39, %s8702_s1  ;;  %v6919_v47 = vsel %vm3056_vm5, %v6855_v1, %v12420_v37  ;;  %v6920_v34 = vsel %vm3056_vm5, %v6856_v54, %v12418_v46 }
 0x7fa   :  { %6317 = vrot.lane.b32.xlu0 %v4570_v33, %s8701_s30  ;;  %v6983_v15 = vsel %vm3121_vm6, %v6919_v47, %v12730_v27  ;;  %v4571_v47 = vld [vmem:[#allocation2 + $0x121] sm:$0xff]  ;;  %v6984_v9 = vsel %vm3121_vm6, %v6920_v34, %v12728_v53  ;;  %v8633_v33 = vld [vmem:[#allocation2 + $0x18] sm:$0xff] }
 0x7fb   :  { %v6280_v29 = vpop.permute.xlu1 %6279  ;;  %v7047_v39 = vsel %vm3186_vm7, %v6983_v15, %v6024_v52  ;;  %v6729_v46 = vsel %vm20_vm0, %v8633_v33, %v11833_v6 }
 0x7fc   :  { %v6026_v10 = vpop.permute.xlu0 %6025  ;;  %v7111_v37 = vsel %vm3251_vm8, %v7047_v39, %v6280_v29  ;;  %v4572_v29 = vld [vmem:[#allocation2 + $0x129] sm:$0xff]  ;;  %v6793_v53 = vsel %vm2926_vm3, %v6729_v46, %v12027_v12  ;;  %v4509_v39 = vld [vmem:[#allocation2 + $0x138] sm:$0xff]  ;;  %v6730_v12 = vsel %vm20_vm0, %v8634_v57, %v11831_v42 }
 0x7fd   :  { %6063 = vrot.lane.b32.xlu1 %v4507_v44, %s8700_s29  ;;  %v7048_v1 = vsel %vm3186_vm7, %v6984_v9, %v6026_v10  ;;  %v6857_v10 = vsel %vm2991_vm4, %v6793_v53, %v12219_v49  ;;  %v6794_v49 = vsel %vm2926_vm3, %v6730_v12, %v12025_v5  ;;  %v8635_v9 = vld [vmem:[#allocation2 + $0x30] sm:$0xff]  ;;  %v8637_v57 = vld [vmem:[#allocation2 + $0x48] sm:$0xff]  ;;  %v15551_v12 = vld [vmem:[#allocation342_spill] sm:$0xff] }
 0x7fe   :  { %6573 = vrot.lane.b32.xlu0 %v12554_v20, %s8702_s1  ;;  %v4508_v20 = vld [vmem:[#allocation2 + $0x128] sm:$0xff]  ;;  %v6921_v6 = vsel %vm3056_vm5, %v6857_v10, %v12426_v51  ;;  %v4511_v46 = vld [vmem:[#allocation2 + $0x150] sm:$0xff] }
 0x7ff   :  { %v6536_v25 = vpop.permute.xlu1 %6535 }
 0x800   :  { %v6282_v27 = vpop.permute.xlu0 %6281  ;;  %v7175_v44 = vsel %vm3316_vm9, %v7111_v37, %v6536_v25 }
 0x801   :  { %6319 = vrot.lane.b32.xlu1 %v4571_v47, %s8701_s30  ;;  %8436 = vmatprep.mubr.msk.f32.mxu1 %vm3397_vm10, %v7175_v44  ;;  %v7112_v52 = vsel %vm3251_vm8, %v7048_v1, %v6282_v27  ;;  %v4573_v47 = vld [vmem:[#allocation2 + $0x139] sm:$0xff] }
 0x802   :  { %6065 = vrot.lane.b32.xlu0 %v4508_v20, %s8700_s29 }
 0x803   :  { %v6028_v2 = vpop.permute.xlu1 %6027 }
 0x804   :  { %v6538_v32 = vpop.permute.xlu0 %6537 }
 0x805   :  { %v7176_v38 = vsel %vm3316_vm9, %v7112_v52, %v6538_v32  ;;  %6575 = vrot.lane.b32.xlu1 %v12570_v28, %s8702_s1  ;;  %v6985_v28 = vsel %vm3121_vm6, %v6921_v6, %v12738_v41  ;;  %v6858_v41 = vsel %vm2991_vm4, %v6794_v49, %v12217_v4  ;;  %v4575_v6 = vld [vmem:[#allocation2 + $0x151] sm:$0xff] }
 0x806   :  { %6321 = vrot.lane.b32.xlu0 %v4572_v29, %s8701_s30  ;;  %8437 = vmatmul.mubr.msk.f32.vlgmr.msra.gmra.mrb[0].mxu1 %vm3397_vm10, %v7176_v38  ;;  %v7049_v37 = vsel %vm3186_vm7, %v6985_v28, %v6028_v2  ;;  %v6922_v42 = vsel %vm3056_vm5, %v6858_v41, %v12424_v36  ;;  %v6731_v36 = vsel %vm20_vm0, %v8635_v9, %v11841_v22  ;;  %v4574_v2 = vld [vmem:[#allocation2 + $0x141] sm:$0xff]  ;;  %v8636_v38 = vld [vmem:[#allocation2 + $0x38] sm:$0xff]  ;;  %v15552_v49 = vld [vmem:[#allocation85_spill] sm:$0xff] }
 0x807   :  { %v6284_v15 = vpop.permute.xlu1 %6283  ;;  %v6986_v5 = vsel %vm3121_vm6, %v6922_v42, %v12736_v40  ;;  %v6795_v40 = vsel %vm2926_vm3, %v6731_v36, %v12033_v7  ;;  %v6732_v7 = vsel %vm20_vm0, %v8636_v38, %v11839_v14  ;;  %v15554_v41 = vld [vmem:[#allocation243_spill] sm:$0xff]  ;;  %v15557_v36 = vld [vmem:[#allocation312_spill] sm:$0xff] }
 0x808   :  { %v6030_v13 = vpop.permute.xlu0 %6029  ;;  %v7113_v51 = vsel %vm3251_vm8, %v7049_v37, %v6284_v15  ;;  %v6859_v52 = vsel %vm2991_vm4, %v6795_v40, %v12225_v31  ;;  %v6796_v31 = vsel %vm2926_vm3, %v6732_v7, %v12031_v24  ;;  %v4514_v7 = vld [vmem:[#allocation2 + $0x170] sm:$0xff] }
 0x809   :  { %6067 = vrot.lane.b32.xlu1 %v4509_v39, %s8700_s29  ;;  %v7050_v44 = vsel %vm3186_vm7, %v6986_v5, %v6030_v13  ;;  %v6923_v22 = vsel %vm3056_vm5, %v6859_v52, %v12432_v63  ;;  %v4513_v5 = vld [vmem:[#allocation2 + $0x168] sm:$0xff] }
 0x80a   :  { %6577 = vrot.lane.b32.xlu0 %v12566_v19, %s8702_s1  ;;  %v4510_v19 = vld [vmem:[#allocation2 + $0x140] sm:$0xff] }
 0x80b   :  { %v6540_v25 = vpop.permute.xlu1 %6539 }
 0x80c   :  { %v7177_v54 = vsel %vm3316_vm9, %v7113_v51, %v6540_v25  ;;  %v6286_v27 = vpop.permute.xlu0 %6285  ;;  %v4576_v51 = vld [vmem:[#allocation2 + $0x159] sm:$0xff] }
 0x80d   :  { %6323 = vrot.lane.b32.xlu1 %v4573_v47, %s8701_s30  ;;  %8439 = vmatprep.mubr.msk.f32.mxu1 %vm3397_vm10, %v7177_v54  ;;  %v7114_v34 = vsel %vm3251_vm8, %v7050_v44, %v6286_v27  ;;  %v15553_v25 = vld [vmem:[#allocation10_spill] sm:$0xff]  ;;  %v15555_v47 = vld [vmem:[#allocation81_spill] sm:$0xff] }
 0x80e   :  { %6069 = vrot.lane.b32.xlu0 %v4510_v19, %s8700_s29 }
 0x80f   :  { %v6032_v4 = vpop.permute.xlu1 %6031 }
 0x810   :  { %v6542_v20 = vpop.permute.xlu0 %6541 }
 0x811   :  { %v7178_v1 = vsel %vm3316_vm9, %v7114_v34, %v6542_v20  ;;  %6579 = vrot.lane.b32.xlu1 %v12582_v17, %s8702_s1  ;;  %v6987_v17 = vsel %vm3121_vm6, %v6923_v22, %v12745_v48  ;;  %v6860_v48 = vsel %vm2991_vm4, %v6796_v31, %v12223_v23  ;;  %v15556_v34 = vld [vmem:[#allocation168_spill] sm:$0xff] }
 0x812   :  { %6325 = vrot.lane.b32.xlu0 %v4574_v2, %s8701_s30  ;;  %8440 = vmatmul.mubr.msk.f32.gmra.mrb[2].mxu1 %vm3397_vm10, %v7178_v1  ;;  %v7051_v29 = vsel %vm3186_vm7, %v6987_v17, %v6032_v4  ;;  %v6924_v14 = vsel %vm3056_vm5, %v6860_v48, %v12430_v56  ;;  %v6733_v56 = vsel %vm20_vm0, %v8637_v57, %v15551_v12  ;;  %v8638_v4 = vld [vmem:[#allocation2 + $0x50] sm:$0xff]  ;;  %v15558_v1 = vld [vmem:[#allocation234_spill] sm:$0xff]  ;;  %v15560_v17 = vld [vmem:[#allocation308_spill] sm:$0xff] }
 0x813   :  { %v6288_v32 = vpop.permute.xlu1 %6287  ;;  %v6988_v24 = vsel %vm3121_vm6, %v6924_v14, %v12743_v35  ;;  %v6797_v35 = vsel %vm2926_vm3, %v6733_v56, %v15553_v25  ;;  %v6734_v20 = vsel %vm20_vm0, %v8638_v4, %v15556_v34  ;;  %v15565_v57 = vld [vmem:[#allocation309_spill] sm:$0xff]  ;;  %v4579_v34 = vld [vmem:[#allocation2 + $0x181] sm:$0xff] }
 0x814   :  { %v6034_v33 = vpop.permute.xlu0 %6033  ;;  %v7115_v63 = vsel %vm3251_vm8, %v7051_v29, %v6288_v32  ;;  %v6861_v54 = vsel %vm2991_vm4, %v6797_v35, %v15554_v41  ;;  %v6798_v2 = vsel %vm2926_vm3, %v6734_v20, %v15558_v1  ;;  %v15559_v32 = vld [vmem:[#allocation72_spill] sm:$0xff]  ;;  %v15566_v25 = vld [vmem:[#allocation169_spill] sm:$0xff] }
 0x815   :  { %6071 = vrot.lane.b32.xlu1 %v4511_v46, %s8700_s29  ;;  %v7052_v13 = vsel %vm3186_vm7, %v6988_v24, %v6034_v33  ;;  %v6925_v42 = vsel %vm3056_vm5, %v6861_v54, %v15555_v47  ;;  %v4577_v46 = vld [vmem:[#allocation2 + $0x169] sm:$0xff]  ;;  %v4578_v24 = vld [vmem:[#allocation2 + $0x171] sm:$0xff]  ;;  %v15567_v54 = vld [vmem:[#allocation371_spill] sm:$0xff] }
 0x816   :  { %6581 = vrot.lane.b32.xlu0 %v12578_v8, %s8702_s1  ;;  %v4512_v8 = vld [vmem:[#allocation2 + $0x158] sm:$0xff]  ;;  %v6989_v44 = vsel %vm3121_vm6, %v6925_v42, %v12752_v26  ;;  %v6862_v26 = vsel %vm2991_vm4, %v6798_v2, %v15559_v32  ;;  %v15570_v20 = vld [vmem:[#allocation136_spill] sm:$0xff] }
 0x817   :  { %v6544_v53 = vpop.permute.xlu1 %6543  ;;  %v6926_v38 = vsel %vm3056_vm5, %v6862_v26, %v15560_v17  ;;  %v8641_v26 = vld [vmem:[#allocation2 + $0x78] sm:$0xff]  ;;  %v15572_v17 = vld [vmem:[#allocation199_spill] sm:$0xff] }
 0x818   :  { %v7179_v10 = vsel %vm3316_vm9, %v7115_v63, %v6544_v53  ;;  %v6290_v15 = vpop.permute.xlu0 %6289  ;;  %v6990_v29 = vsel %vm3121_vm6, %v6926_v38, %v12750_v61  ;;  %v4580_v38 = vld [vmem:[#allocation2 + $0x189] sm:$0xff] }
 0x819   :  { %6327 = vrot.lane.b32.xlu1 %v4575_v6, %s8701_s30  ;;  %8442 = vmatprep.mubr.msk.f32.mxu1 %vm3397_vm10, %v7179_v10  ;;  %v7116_v39 = vsel %vm3251_vm8, %v7052_v13, %v6290_v15  ;;  %v8639_v10 = vld [vmem:[#allocation2 + $0x60] sm:$0xff]  ;;  %v15561_v15 = vld [vmem:[#allocation226_spill] sm:$0xff] }
 0x81a   :  { %6073 = vrot.lane.b32.xlu0 %v4512_v8, %s8700_s29  ;;  %v6735_v6 = vsel %vm20_vm0, %v8639_v10, %v15561_v15  ;;  %v15562_v8 = vld [vmem:[#allocation141_spill] sm:$0xff]  ;;  %v15563_v13 = vld [vmem:[#allocation235_spill] sm:$0xff] }
 0x81b   :  { %v6036_v23 = vpop.permute.xlu1 %6035  ;;  %v6799_v61 = vsel %vm2926_vm3, %v6735_v6, %v15563_v13 }
 0x81c   :  { %v6546_v28 = vpop.permute.xlu0 %6545  ;;  %v7053_v9 = vsel %vm3186_vm7, %v6989_v44, %v6036_v23  ;;  %v15564_v23 = vld [vmem:[#allocation73_spill] sm:$0xff] }
 0x81d   :  { %v7180_v37 = vsel %vm3316_vm9, %v7116_v39, %v6546_v28  ;;  %6583 = vrot.lane.b32.xlu1 %v15552_v49, %s8702_s1  ;;  %v6863_v39 = vsel %vm2991_vm4, %v6799_v61, %v15564_v23  ;;  %v15577_v61 = vld [vmem:[#allocation31_spill] sm:$0xff] }
 0x81e   :  { %6329 = vrot.lane.b32.xlu0 %v4576_v51, %s8701_s30  ;;  %8443 = vmatmul.mubr.msk.f32.gmra.mrb[4].mxu1 %vm3397_vm10, %v7180_v37  ;;  %v6927_v12 = vsel %vm3056_vm5, %v6863_v39, %v15565_v57  ;;  %v4515_v37 = vld [vmem:[#allocation2 + $0x180] sm:$0xff]  ;;  %v8640_v51 = vld [vmem:[#allocation2 + $0x68] sm:$0xff] }
 0x81f   :  { %v6292_v27 = vpop.permute.xlu1 %6291  ;;  %v6991_v49 = vsel %vm3121_vm6, %v6927_v12, %v12760_v3  ;;  %v6736_v35 = vsel %vm20_vm0, %v8640_v51, %v15566_v25  ;;  %v4581_v23 = vld [vmem:[#allocation2 + $0x199] sm:$0xff]  ;;  %v15578_v39 = vld [vmem:[#allocation292_spill] sm:$0xff] }
 0x820   :  { %v6038_v19 = vpop.permute.xlu0 %6037  ;;  %v7117_v40 = vsel %vm3251_vm8, %v7053_v9, %v6292_v27  ;;  %v15568_v27 = vld [vmem:[#allocation64_spill] sm:$0xff]  ;;  %v15580_v25 = vld [vmem:[#allocation367_spill] sm:$0xff] }
 0x821   :  { %6075 = vrot.lane.b32.xlu1 %v4513_v5, %s8700_s29  ;;  %v7054_v31 = vsel %vm3186_vm7, %v6990_v29, %v6038_v19  ;;  %v6800_v47 = vsel %vm2926_vm3, %v6736_v35, %v15568_v27  ;;  %v15569_v5 = vld [vmem:[#allocation300_spill] sm:$0xff]  ;;  %v4517_v29 = vld [vmem:[#allocation2 + $0x198] sm:$0xff] }
 0x822   :  { %6585 = vrot.lane.b32.xlu0 %v15557_v36, %s8702_s1  ;;  %v6864_v3 = vsel %vm2991_vm4, %v6800_v47, %v15569_v5  ;;  %v4516_v36 = vld [vmem:[#allocation2 + $0x188] sm:$0xff] }
 0x823   :  { %v6548_v52 = vpop.permute.xlu1 %6547  ;;  %v6928_v9 = vsel %vm3056_vm5, %v6864_v3, %v15570_v20  ;;  %v8643_v3 = vld [vmem:[#allocation2 + $0x90] sm:$0xff] }
 0x824   :  { %v7181_v22 = vsel %vm3316_vm9, %v7117_v40, %v6548_v52  ;;  %v6294_v33 = vpop.permute.xlu0 %6293  ;;  %v6992_v1 = vsel %vm3121_vm6, %v6928_v9, %v12758_v11  ;;  %v15582_v20 = vld [vmem:[#allocation293_spill] sm:$0xff] }
 0x825   :  { %6331 = vrot.lane.b32.xlu1 %v4577_v46, %s8701_s30  ;;  %8445 = vmatprep.mubr.msk.f32.mxu1 %vm3397_vm10, %v7181_v22  ;;  %v7118_v53 = vsel %vm3251_vm8, %v7054_v31, %v6294_v33  ;;  %v15571_v22 = vld [vmem:[#allocation227_spill] sm:$0xff]  ;;  %v15574_v31 = vld [vmem:[#allocation301_spill] sm:$0xff] }
 0x826   :  { %6077 = vrot.lane.b32.xlu0 %v4514_v7, %s8700_s29  ;;  %v6737_v33 = vsel %vm20_vm0, %v8641_v26, %v15571_v22  ;;  %v15573_v7 = vld [vmem:[#allocation65_spill] sm:$0xff]  ;;  %v4519_v26 = vld [vmem:[#allocation2 + $0x1e0] sm:$0xff] }
 0x827   :  { %v6040_v63 = vpop.permute.xlu1 %6039  ;;  %v6801_v11 = vsel %vm2926_vm3, %v6737_v33, %v15573_v7  ;;  %v15583_v9 = vld [vmem:[#allocation129_spill] sm:$0xff]  ;;  %v8644_v33 = vld [vmem:[#allocation2 + $0x98] sm:$0xff]  ;;  %v15586_v7 = vld [vmem:[#allocation120_spill] sm:$0xff] }
 0x828   :  { %v6550_v48 = vpop.permute.xlu0 %6549  ;;  %v7055_v41 = vsel %vm3186_vm7, %v6991_v49, %v6040_v63  ;;  %v6865_v63 = vsel %vm2991_vm4, %v6801_v11, %v15574_v31 }
 0x829   :  { %v7182_v14 = vsel %vm3316_vm9, %v7118_v53, %v6550_v48  ;;  %6587 = vrot.lane.b32.xlu1 %v15562_v8, %s8702_s1  ;;  %v15575_v48 = vld [vmem:[#allocation137_spill] sm:$0xff]  ;;  %v15576_v8 = vld [vmem:[#allocation56_spill] sm:$0xff] }
 0x82a   :  { %6333 = vrot.lane.b32.xlu0 %v4578_v24, %s8701_s30  ;;  %8446 = vmatmul.mubr.msk.f32.gmra.mrb[6].mxu1 %vm3397_vm10, %v7182_v14  ;;  %v6929_v10 = vsel %vm3056_vm5, %v6865_v63, %v15575_v48  ;;  %v8642_v14 = vld [vmem:[#allocation2 + $0x80] sm:$0xff] }
 0x82b   :  { %v6296_v28 = vpop.permute.xlu1 %6295  ;;  %v6993_v6 = vsel %vm3121_vm6, %v6929_v10, %v12767_v58  ;;  %v6738_v24 = vsel %vm20_vm0, %v8642_v14, %v15576_v8  ;;  %v15579_v58 = vld [vmem:[#allocation128_spill] sm:$0xff]  ;;  %v15587_v63 = vld [vmem:[#allocation359_spill] sm:$0xff] }
 0x82c   :  { %v6042_v56 = vpop.permute.xlu0 %6041  ;;  %v7119_v42 = vsel %vm3251_vm8, %v7055_v41, %v6296_v28  ;;  %v6802_v28 = vsel %vm2926_vm3, %v6738_v24, %v15578_v39  ;;  %v4583_v10 = vld [vmem:[#allocation2 + $0x1e1] sm:$0xff] }
 0x82d   :  { %6079 = vrot.lane.b32.xlu1 %v4515_v37, %s8700_s29  ;;  %v7056_v2 = vsel %vm3186_vm7, %v6992_v1, %v6042_v56  ;;  %v4518_v56 = vld [vmem:[#allocation2 + $0x1a0] sm:$0xff]  ;;  %v6866_v37 = vsel %vm2991_vm4, %v6802_v28, %v15579_v58  ;;  %v4520_v14 = vld [vmem:[#allocation2 + $0x1e8] sm:$0xff] }
 0x82e   :  { %6589 = vrot.lane.b32.xlu0 %v15567_v54, %s8702_s1  ;;  %v6930_v35 = vsel %vm3056_vm5, %v6866_v37, %v15580_v25  ;;  %v4645_v54 = vld [vmem:[#allocation2 + $0x19a] sm:$0xff]  ;;  %v4647_v28 = vld [vmem:[#allocation2 + $0x1e2] sm:$0xff] }
 0x82f   :  { %v6552_v19 = vpop.permute.xlu1 %6551  ;;  %v6994_v41 = vsel %vm3121_vm6, %v6930_v35, %v12765_v21  ;;  %v15589_v8 = vld [vmem:[#allocation35_spill] sm:$0xff]  ;;  %v4584_v37 = vld [vmem:[#allocation2 + $0x1e9] sm:$0xff] }
 0x830   :  { %v7183_v44 = vsel %vm3316_vm9, %v7119_v42, %v6552_v19  ;;  %v6298_v4 = vpop.permute.xlu0 %6297  ;;  %v4582_v42 = vld [vmem:[#allocation2 + $0x1a1] sm:$0xff] }
 0x831   :  { %6335 = vrot.lane.b32.xlu1 %v4579_v34, %s8701_s30  ;;  %8448 = vmatprep.mubr.msk.f32.mxu1 %vm3397_vm10, %v7183_v44  ;;  %v7120_v52 = vsel %vm3251_vm8, %v7056_v2, %v6298_v4  ;;  %v15581_v44 = vld [vmem:[#allocation57_spill] sm:$0xff]  ;;  %v4646_v2 = vld [vmem:[#allocation2 + $0x1a2] sm:$0xff] }
 0x832   :  { %6081 = vrot.lane.b32.xlu0 %v4516_v36, %s8700_s29  ;;  %v6739_v4 = vsel %vm20_vm0, %v8643_v3, %v15581_v44  ;;  %v15592_v25 = vld [vmem:[#allocation360_spill] sm:$0xff]  ;;  %v8646_v3 = vld [vmem:[#allocation2 + $0xb0] sm:$0xff] }
 0x833   :  { %v6044_v40 = vpop.permute.xlu1 %6043  ;;  %v6803_v21 = vsel %vm2926_vm3, %v6739_v4, %v15582_v20  ;;  %v15594_v44 = vld [vmem:[#allocation112_spill] sm:$0xff]  ;;  %v15595_v20 = vld [vmem:[#allocation351_spill] sm:$0xff] }
 0x834   :  { %v6554_v32 = vpop.permute.xlu0 %6553  ;;  %v7057_v13 = vsel %vm3186_vm7, %v6993_v6, %v6044_v40  ;;  %v6867_v36 = vsel %vm2991_vm4, %v6803_v21, %v15583_v9  ;;  %v15584_v40 = vld [vmem:[#allocation368_spill] sm:$0xff]  ;;  %v6742_v4 = vsel %vm20_vm0, %v8646_v3, %v15594_v44  ;;  %v4524_v3 = vld [vmem:[#allocation2 + $0x218] sm:$0xff] }
 0x835   :  { %v7184_v46 = vsel %vm3316_vm9, %v7120_v52, %v6554_v32  ;;  %6591 = vrot.lane.b32.xlu1 %v15572_v17, %s8702_s1  ;;  %v6931_v52 = vsel %vm3056_vm5, %v6867_v36, %v15584_v40  ;;  %v6806_v21 = vsel %vm2926_vm3, %v6742_v4, %v15595_v20  ;;  %v15608_v44 = vld [vmem:[#allocation260_spill] sm:$0xff] }
 0x836   :  { %6337 = vrot.lane.b32.xlu0 %v4580_v38, %s8701_s30  ;;  %8449 = vmatmul.mubr.msk.f32.gmra.mrb[8].mxu1 %vm3397_vm10, %v7184_v46  ;;  %v6995_v22 = vsel %vm3121_vm6, %v6931_v52, %v12774_v45  ;;  %v15585_v46 = vld [vmem:[#allocation284_spill] sm:$0xff]  ;;  %v4585_v52 = vld [vmem:[#allocation2 + $0x1f9] sm:$0xff] }
 0x837   :  { %v6300_v53 = vpop.permute.xlu1 %6299  ;;  %v6740_v17 = vsel %vm20_vm0, %v8644_v33, %v15585_v46  ;;  %v15598_v33 = vld [vmem:[#allocation203_spill] sm:$0xff] }
 0x838   :  { %v6046_v15 = vpop.permute.xlu0 %6045  ;;  %v7121_v57 = vsel %vm3251_vm8, %v7057_v13, %v6300_v53  ;;  %v6804_v11 = vsel %vm2926_vm3, %v6740_v17, %v15586_v7 }
 0x839   :  { %6083 = vrot.lane.b32.xlu1 %v4517_v29, %s8700_s29  ;;  %v7058_v27 = vsel %vm3186_vm7, %v6994_v41, %v6046_v15  ;;  %v6868_v53 = vsel %vm2991_vm4, %v6804_v11, %v15587_v63  ;;  %v15588_v15 = vld [vmem:[#allocation194_spill] sm:$0xff]  ;;  %v15599_v63 = vld [vmem:[#allocation113_spill] sm:$0xff] }
 0x83a   :  { %6593 = vrot.lane.b32.xlu0 %v15577_v61, %s8702_s1  ;;  %v6932_v6 = vsel %vm3056_vm5, %v6868_v53, %v15588_v15 }
 0x83b   :  { %v6556_v12 = vpop.permute.xlu1 %6555  ;;  %v6996_v24 = vsel %vm3121_vm6, %v6932_v6, %v15589_v8  ;;  %v15601_v6 = vld [vmem:[#allocation187_spill] sm:$0xff] }
 0x83c   :  { %v7185_v49 = vsel %vm3316_vm9, %v7121_v57, %v6556_v12  ;;  %v6302_v51 = vpop.permute.xlu0 %6301  ;;  %v8645_v57 = vld [vmem:[#allocation2 + $0xa8] sm:$0xff]  ;;  %v15590_v12 = vld [vmem:[#allocation285_spill] sm:$0xff] }
 0x83d   :  { %6339 = vrot.lane.b32.xlu1 %v4581_v23, %s8701_s30  ;;  %8451 = vmatprep.mubr.msk.f32.mxu1 %vm3397_vm10, %v7185_v49  ;;  %v7122_v19 = vsel %vm3251_vm8, %v7058_v27, %v6302_v51  ;;  %v15591_v49 = vld [vmem:[#allocation121_spill] sm:$0xff] }
 0x83e   :  { %6085 = vrot.lane.b32.xlu0 %v4518_v56, %s8700_s29  ;;  %v6741_v56 = vsel %vm20_vm0, %v8645_v57, %v15590_v12  ;;  %v4650_v57 = vld [vmem:[#allocation2 + $0x202] sm:$0xff] }
 0x83f   :  { %v6048_v47 = vpop.permute.xlu1 %6047  ;;  %v6805_v51 = vsel %vm2926_vm3, %v6741_v56, %v15591_v49  ;;  %v8648_v12 = vld [vmem:[#allocation2 + $0xc8] sm:$0xff]  ;;  %v15604_v56 = vld [vmem:[#allocation343_spill] sm:$0xff]  ;;  %v15605_v49 = vld [vmem:[#allocation178_spill] sm:$0xff] }
 0x840   :  { %v6558_v5 = vpop.permute.xlu0 %6557  ;;  %v7059_v38 = vsel %vm3186_vm7, %v6995_v22, %v6048_v47  ;;  %v6869_v35 = vsel %vm2991_vm4, %v6805_v51, %v15592_v25  ;;  %v4522_v22 = vld [vmem:[#allocation2 + $0x200] sm:$0xff] }
 0x841   :  { %v7186_v34 = vsel %vm3316_vm9, %v7122_v19, %v6558_v5  ;;  %6595 = vrot.lane.b32.xlu1 %v4645_v54, %s8702_s1  ;;  %v15593_v54 = vld [vmem:[#allocation195_spill] sm:$0xff]  ;;  %v4648_v5 = vld [vmem:[#allocation2 + $0x1ea] sm:$0xff] }
 0x842   :  { %6341 = vrot.lane.b32.xlu0 %v4582_v42, %s8701_s30  ;;  %8452 = vmatmul.mubr.msk.f32.gmra.mrb[10].mxu1 %vm3397_vm10, %v7186_v34  ;;  %v6933_v27 = vsel %vm3056_vm5, %v6869_v35, %v15593_v54  ;;  %v4521_v42 = vld [vmem:[#allocation2 + $0x1f8] sm:$0xff] }
 0x843   :  { %v6304_v1 = vpop.permute.xlu1 %6303  ;;  %v6997_v19 = vsel %vm3121_vm6, %v6933_v27, %v12781_v43 }
 0x844   :  { %v6050_v32 = vpop.permute.xlu0 %6049  ;;  %v7123_v29 = vsel %vm3251_vm8, %v7059_v38, %v6304_v1  ;;  %v15596_v1 = vld [vmem:[#allocation186_spill] sm:$0xff] }
 0x845   :  { %6087 = vrot.lane.b32.xlu1 %v4519_v26, %s8700_s29  ;;  %v7060_v13 = vsel %vm3186_vm7, %v6996_v24, %v6050_v32  ;;  %v6870_v43 = vsel %vm2991_vm4, %v6806_v21, %v15596_v1  ;;  %v15597_v32 = vld [vmem:[#allocation27_spill] sm:$0xff]  ;;  %v15602_v24 = vld [vmem:[#allocation28_spill] sm:$0xff]  ;;  %v8649_v1 = vld [vmem:[#allocation2 + $0xd8] sm:$0xff] }
 0x846   :  { %6597 = vrot.lane.b32.xlu0 %v4646_v2, %s8702_s1  ;;  %v6934_v26 = vsel %vm3056_vm5, %v6870_v43, %v15597_v32  ;;  %v15609_v43 = vld [vmem:[#allocation344_spill] sm:$0xff]  ;;  %v15610_v32 = vld [vmem:[#allocation179_spill] sm:$0xff] }
 0x847   :  { %v6560_v31 = vpop.permute.xlu1 %6559  ;;  %v6998_v46 = vsel %vm3121_vm6, %v6934_v26, %v15598_v33 }
 0x848   :  { %v7187_v45 = vsel %vm3316_vm9, %v7123_v29, %v6560_v31  ;;  %v6306_v48 = vpop.permute.xlu0 %6305  ;;  %v4649_v29 = vld [vmem:[#allocation2 + $0x1fa] sm:$0xff] }
 0x849   :  { %6343 = vrot.lane.b32.xlu1 %v4583_v10, %s8701_s30  ;;  %8454 = vmatprep.mubr.msk.f32.mxu1 %vm3397_vm10, %v7187_v45  ;;  %v7124_v23 = vsel %vm3251_vm8, %v7060_v13, %v6306_v48  ;;  %v8647_v31 = vld [vmem:[#allocation2 + $0xc0] sm:$0xff]  ;;  %v15600_v10 = vld [vmem:[#allocation352_spill] sm:$0xff] }
 0x84a   :  { %6089 = vrot.lane.b32.xlu0 %v4520_v14, %s8700_s29  ;;  %v6743_v53 = vsel %vm20_vm0, %v8647_v31, %v15599_v63  ;;  %v4586_v48 = vld [vmem:[#allocation2 + $0x201] sm:$0xff] }
 0x84b   :  { %v6052_v61 = vpop.permute.xlu1 %6051  ;;  %v6807_v15 = vsel %vm2926_vm3, %v6743_v53, %v15600_v10  ;;  %v4652_v31 = vld [vmem:[#allocation2 + $0x21a] sm:$0xff] }
 0x84c   :  { %v6562_v39 = vpop.permute.xlu0 %6561  ;;  %v7061_v34 = vsel %vm3186_vm7, %v6997_v19, %v6052_v61  ;;  %v6871_v14 = vsel %vm2991_vm4, %v6807_v15, %v15601_v6  ;;  %v15607_v19 = vld [vmem:[#allocation252_spill] sm:$0xff]  ;;  %v8650_v63 = vld [vmem:[#allocation2 + $0xe0] sm:$0xff]  ;;  %v15613_v53 = vld [vmem:[#allocation170_spill] sm:$0xff] }
 0x84d   :  { %v7188_v58 = vsel %vm3316_vm9, %v7124_v23, %v6562_v39  ;;  %6599 = vrot.lane.b32.xlu1 %v4647_v28, %s8702_s1  ;;  %v6935_v13 = vsel %vm3056_vm5, %v6871_v14, %v15602_v24  ;;  %v4523_v23 = vld [vmem:[#allocation2 + $0x210] sm:$0xff]  ;;  %v15603_v39 = vld [vmem:[#allocation36_spill] sm:$0xff]  ;;  %v15614_v10 = vld [vmem:[#allocation11_spill] sm:$0xff] }
 0x84e   :  { %6345 = vrot.lane.b32.xlu0 %v4584_v37, %s8701_s30  ;;  %8455 = vmatmul.mubr.msk.f32.gmra.mrb[12].mxu1 %vm3397_vm10, %v7188_v58  ;;  %v6999_v28 = vsel %vm3121_vm6, %v6935_v13, %v15603_v39  ;;  %v6744_v58 = vsel %vm20_vm0, %v8648_v12, %v15604_v56 }
 0x84f   :  { %v6308_v41 = vpop.permute.xlu1 %6307  ;;  %v6808_v51 = vsel %vm2926_vm3, %v6744_v58, %v15605_v49 }
 0x850   :  { %v6054_v47 = vpop.permute.xlu0 %6053  ;;  %v7125_v9 = vsel %vm3251_vm8, %v7061_v34, %v6308_v41  ;;  %v15606_v41 = vld [vmem:[#allocation19_spill] sm:$0xff] }
 0x851   :  { %6091 = vrot.lane.b32.xlu1 %v4521_v42, %s8700_s29  ;;  %v7062_v17 = vsel %vm3186_vm7, %v6998_v46, %v6054_v47  ;;  %v6872_v54 = vsel %vm2991_vm4, %v6808_v51, %v15606_v41  ;;  %v4587_v42 = vld [vmem:[#allocation2 + $0x211] sm:$0xff] }
 0x852   :  { %6601 = vrot.lane.b32.xlu0 %v4648_v5, %s8702_s1  ;;  %v6936_v5 = vsel %vm3056_vm5, %v6872_v54, %v15607_v19  ;;  %v4653_v51 = vld [vmem:[#allocation2 + $0x22a] sm:$0xff] }
 0x853   :  { %v6564_v36 = vpop.permute.xlu1 %6563  ;;  %v7000_v4 = vsel %vm3121_vm6, %v6936_v5, %v15608_v44  ;;  %v15620_v19 = vld [vmem:[#allocation245_spill] sm:$0xff]  ;;  %v15621_v44 = vld [vmem:[#allocation83_spill] sm:$0xff] }
 0x854   :  { %v7189_v2 = vsel %vm3316_vm9, %v7125_v9, %v6564_v36  ;;  %v6310_v40 = vpop.permute.xlu0 %6309  ;;  %v4651_v36 = vld [vmem:[#allocation2 + $0x212] sm:$0xff] }
 0x855   :  { %6347 = vrot.lane.b32.xlu1 %v4585_v52, %s8701_s30  ;;  %8457 = vmatprep.mubr.msk.f32.mxu1 %vm3397_vm10, %v7189_v2  ;;  %v7126_v7 = vsel %vm3251_vm8, %v7062_v17, %v6310_v40  ;;  %v6745_v2 = vsel %vm20_vm0, %v8649_v1, %v15609_v43  ;;  %v4588_v52 = vld [vmem:[#allocation2 + $0x219] sm:$0xff]  ;;  %v15612_v17 = vld [vmem:[#allocation253_spill] sm:$0xff] }
 0x856   :  { %6093 = vrot.lane.b32.xlu0 %v4522_v22, %s8700_s29  ;;  %v6809_v26 = vsel %vm2926_vm3, %v6745_v2, %v15610_v32  ;;  %v15611_v22 = vld [vmem:[#allocation20_spill] sm:$0xff]  ;;  %v15622_v1 = vld [vmem:[#allocation3_spill] sm:$0xff] }
 0x857   :  { %v6056_v38 = vpop.permute.xlu1 %6055  ;;  %v6873_v33 = vsel %vm2991_vm4, %v6809_v26, %v15611_v22  ;;  %v15624_v22 = vld [vmem:[#allocation74_spill] sm:$0xff] }
 0x858   :  { %v6566_v11 = vpop.permute.xlu0 %6565  ;;  %v7063_v37 = vsel %vm3186_vm7, %v6999_v28, %v6056_v38  ;;  %v6937_v38 = vsel %vm3056_vm5, %v6873_v33, %v15612_v17  ;;  %v4526_v28 = vld [vmem:[#allocation2 + $0x230] sm:$0xff]  ;;  %v4591_v17 = vld [vmem:[#allocation2 + $0x241] sm:$0xff] }
 0x859   :  { %v7190_v45 = vsel %vm3316_vm9, %v7126_v7, %v6566_v11  ;;  %6603 = vrot.lane.b32.xlu1 %v4649_v29, %s8702_s1  ;;  %v4525_v11 = vld [vmem:[#allocation2 + $0x228] sm:$0xff]  ;;  %v7001_v29 = vsel %vm3121_vm6, %v6937_v38, %v12794_v50  ;;  %v15625_v38 = vld [vmem:[#allocation310_spill] sm:$0xff] }
 0x85a   :  { %6349 = vrot.lane.b32.xlu0 %v4586_v48, %s8701_s30  ;;  %8458 = vmatmul.mubr.msk.f32.gmra.mrb[14].mxu1 %vm3397_vm10, %v7190_v45  ;;  %v6746_v45 = vsel %vm20_vm0, %v8650_v63, %v15613_v53 }
 0x85b   :  { %v6312_v8 = vpop.permute.xlu1 %6311  ;;  %v6810_v15 = vsel %vm2926_vm3, %v6746_v45, %v15614_v10  ;;  %v4655_v10 = vld [vmem:[#allocation2 + $0x242] sm:$0xff] }
 0x85c   :  { %v6058_v61 = vpop.permute.xlu0 %6057  ;;  %v7127_v25 = vsel %vm3251_vm8, %v7063_v37, %v6312_v8  ;;  %v15615_v8 = vld [vmem:[#allocation244_spill] sm:$0xff] }
 0x85d   :  { %6095 = vrot.lane.b32.xlu1 %v4523_v23, %s8700_s29  ;;  %v7064_v34 = vsel %vm3186_vm7, %v7000_v4, %v6058_v61  ;;  %v6874_v50 = vsel %vm2991_vm4, %v6810_v15, %v15615_v8  ;;  %v4589_v61 = vld [vmem:[#allocation2 + $0x229] sm:$0xff]  ;;  %v15616_v23 = vld [vmem:[#allocation82_spill] sm:$0xff] }
 0x85e   :  { %6605 = vrot.lane.b32.xlu0 %v4650_v57, %s8702_s1  ;;  %v6938_v39 = vsel %vm3056_vm5, %v6874_v50, %v15616_v23  ;;  %v15617_v57 = vld [vmem:[#allocation90_spill] sm:$0xff]  ;;  %v8653_v15 = vld [vmem:[#allocation2 + $0x108] sm:$0xff] }
 0x85f   :  { %v6568_v35 = vpop.permute.xlu1 %6567  ;;  %v7002_v12 = vsel %vm3121_vm6, %v6938_v39, %v15617_v57  ;;  %v4592_v50 = vld [vmem:[#allocation2 + $0x249] sm:$0xff] }
 0x860   :  { %v7191_v27 = vsel %vm3316_vm9, %v7127_v25, %v6568_v35  ;;  %v6314_v47 = vpop.permute.xlu0 %6313  ;;  %v8651_v25 = vld [vmem:[#allocation2 + $0xf0] sm:$0xff]  ;;  %v15618_v35 = vld [vmem:[#allocation171_spill] sm:$0xff] }
 0x861   :  { %6351 = vrot.lane.b32.xlu1 %v4587_v42, %s8701_s30  ;;  %8460 = vmatprep.mubr.msk.f32.mxu1 %vm3397_vm10, %v7191_v27  ;;  %v7128_v21 = vsel %vm3251_vm8, %v7064_v34, %v6314_v47  ;;  %v6747_v41 = vsel %vm20_vm0, %v8651_v25, %v15618_v35  ;;  %v4590_v27 = vld [vmem:[#allocation2 + $0x231] sm:$0xff]  ;;  %v15619_v47 = vld [vmem:[#allocation12_spill] sm:$0xff] }
 0x862   :  { %6097 = vrot.lane.b32.xlu0 %v4524_v3, %s8700_s29  ;;  %v6811_v42 = vsel %vm2926_vm3, %v6747_v41, %v15619_v47  ;;  %v15632_v25 = vld [vmem:[#allocation228_spill] sm:$0xff] }
 0x863   :  { %v6060_v20 = vpop.permute.xlu1 %6059  ;;  %v6875_v5 = vsel %vm2991_vm4, %v6811_v42, %v15620_v19  ;;  %v15634_v19 = vld [vmem:[#allocation302_spill] sm:$0xff] }
 0x864   :  { %v6570_v9 = vpop.permute.xlu0 %6569  ;;  %v7065_v48 = vsel %vm3186_vm7, %v7001_v29, %v6060_v20  ;;  %v6939_v4 = vsel %vm3056_vm5, %v6875_v5, %v15621_v44  ;;  %v4527_v20 = vld [vmem:[#allocation2 + $0x240] sm:$0xff]  ;;  %v15626_v29 = vld [vmem:[#allocation261_spill] sm:$0xff] }
 0x865   :  { %v7192_v40 = vsel %vm3316_vm9, %v7128_v21, %v6570_v9  ;;  %6607 = vrot.lane.b32.xlu1 %v4651_v36, %s8702_s1  ;;  %v7003_v21 = vsel %vm3121_vm6, %v6939_v4, %v12801_v0  ;;  %v4654_v9 = vld [vmem:[#allocation2 + $0x232] sm:$0xff] }
 0x866   :  { %6353 = vrot.lane.b32.xlu0 %v4588_v52, %s8701_s30  ;;  %8461 = vmatmul.mubr.msk.f32.gmra.mrb[16].mxu1 %vm3397_vm10, %v7192_v40  ;;  %v8652_v36 = vld [vmem:[#allocation2 + $0xf8] sm:$0xff]  ;;  %v15623_v40 = vld [vmem:[#allocation236_spill] sm:$0xff] }
 0x867   :  { %v6316_v46 = vpop.permute.xlu1 %6315  ;;  %v6748_v43 = vsel %vm20_vm0, %v8652_v36, %v15622_v1  ;;  %v4593_v4 = vld [vmem:[#allocation2 + $0x259] sm:$0xff] }
 0x868   :  { %v6062_v7 = vpop.permute.xlu0 %6061  ;;  %v7129_v6 = vsel %vm3251_vm8, %v7065_v48, %v6316_v46  ;;  %v6812_v52 = vsel %vm2926_vm3, %v6748_v43, %v15623_v40 }
 0x869   :  { %6099 = vrot.lane.b32.xlu1 %v4525_v11, %s8700_s29  ;;  %v7066_v56 = vsel %vm3186_vm7, %v7002_v12, %v6062_v7  ;;  %v6876_v0 = vsel %vm2991_vm4, %v6812_v52, %v15624_v22  ;;  %v4528_v11 = vld [vmem:[#allocation2 + $0x248] sm:$0xff]  ;;  %v4657_v52 = vld [vmem:[#allocation2 + $0x25a] sm:$0xff] }
 0x86a   :  { %6609 = vrot.lane.b32.xlu0 %v4652_v31, %s8702_s1  ;;  %v6940_v7 = vsel %vm3056_vm5, %v6876_v0, %v15625_v38  ;;  %v15639_v38 = vld [vmem:[#allocation303_spill] sm:$0xff] }
 0x86b   :  { %v6572_v14 = vpop.permute.xlu1 %6571  ;;  %v7004_v31 = vsel %vm3121_vm6, %v6940_v7, %v15626_v29  ;;  %v15640_v29 = vld [vmem:[#allocation139_spill] sm:$0xff] }
 0x86c   :  { %v7193_v24 = vsel %vm3316_vm9, %v7129_v6, %v6572_v14  ;;  %v6318_v13 = vpop.permute.xlu0 %6317  ;;  %v15627_v6 = vld [vmem:[#allocation4_spill] sm:$0xff] }
 0x86d   :  { %6355 = vrot.lane.b32.xlu1 %v4589_v61, %s8701_s30  ;;  %8463 = vmatprep.mubr.msk.f32.mxu1 %vm3397_vm10, %v7193_v24  ;;  %v7130_v37 = vsel %vm3251_vm8, %v7066_v56, %v6318_v13  ;;  %v6749_v14 = vsel %vm20_vm0, %v8653_v15, %v15627_v6  ;;  %v15628_v24 = vld [vmem:[#allocation237_spill] sm:$0xff]  ;;  %v15629_v61 = vld [vmem:[#allocation75_spill] sm:$0xff]  ;;  %v4529_v56 = vld [vmem:[#allocation2 + $0x258] sm:$0xff] }
 0x86e   :  { %6101 = vrot.lane.b32.xlu0 %v4526_v28, %s8700_s29  ;;  %v6813_v13 = vsel %vm2926_vm3, %v6749_v14, %v15628_v24  ;;  %v15630_v28 = vld [vmem:[#allocation311_spill] sm:$0xff]  ;;  %v15641_v15 = vld [vmem:[#allocation58_spill] sm:$0xff] }
 0x86f   :  { %v6064_v58 = vpop.permute.xlu1 %6063  ;;  %v6877_v23 = vsel %vm2991_vm4, %v6813_v13, %v15629_v61  ;;  %v15643_v61 = vld [vmem:[#allocation130_spill] sm:$0xff] }
 0x870   :  { %v6574_v49 = vpop.permute.xlu0 %6573  ;;  %v7067_v2 = vsel %vm3186_vm7, %v7003_v21, %v6064_v58  ;;  %v6941_v57 = vsel %vm3056_vm5, %v6877_v23, %v15630_v28  ;;  %v15631_v58 = vld [vmem:[#allocation91_spill] sm:$0xff]  ;;  %v4595_v28 = vld [vmem:[#allocation2 + $0x271] sm:$0xff] }
 0x871   :  { %v7194_v54 = vsel %vm3316_vm9, %v7130_v37, %v6574_v49  ;;  %6611 = vrot.lane.b32.xlu1 %v4653_v51, %s8702_s1  ;;  %v7005_v37 = vsel %vm3121_vm6, %v6941_v57, %v15631_v58  ;;  %v4656_v49 = vld [vmem:[#allocation2 + $0x24a] sm:$0xff]  ;;  %v4530_v21 = vld [vmem:[#allocation2 + $0x260] sm:$0xff]  ;;  %v15645_v58 = vld [vmem:[#allocation146_spill] sm:$0xff] }
 0x872   :  { %6357 = vrot.lane.b32.xlu0 %v4590_v27, %s8701_s30  ;;  %8464 = vmatmul.mubr.msk.f32.gmra.mrb[18].mxu1 %vm3397_vm10, %v7194_v54  ;;  %v8654_v51 = vld [vmem:[#allocation2 + $0x110] sm:$0xff]  ;;  %v15633_v54 = vld [vmem:[#allocation66_spill] sm:$0xff] }
 0x873   :  { %v6320_v3 = vpop.permute.xlu1 %6319  ;;  %v6750_v35 = vsel %vm20_vm0, %v8654_v51, %v15632_v25  ;;  %v15644_v57 = vld [vmem:[#allocation369_spill] sm:$0xff] }
 0x874   :  { %v6066_v34 = vpop.permute.xlu0 %6065  ;;  %v7131_v32 = vsel %vm3251_vm8, %v7067_v2, %v6320_v3  ;;  %v6814_v27 = vsel %vm2926_vm3, %v6750_v35, %v15633_v54  ;;  %v8657_v54 = vld [vmem:[#allocation2 + $0x138] sm:$0xff] }
 0x875   :  { %6103 = vrot.lane.b32.xlu1 %v4527_v20, %s8700_s29  ;;  %v7068_v63 = vsel %vm3186_vm7, %v7004_v31, %v6066_v34  ;;  %v6878_v5 = vsel %vm2991_vm4, %v6814_v27, %v15634_v19  ;;  %v15635_v34 = vld [vmem:[#allocation138_spill] sm:$0xff]  ;;  %v15646_v27 = vld [vmem:[#allocation59_spill] sm:$0xff] }
 0x876   :  { %6613 = vrot.lane.b32.xlu0 %v4654_v9, %s8702_s1  ;;  %v6942_v20 = vsel %vm3056_vm5, %v6878_v5, %v15635_v34  ;;  %v15636_v9 = vld [vmem:[#allocation318_spill] sm:$0xff]  ;;  %v15647_v5 = vld [vmem:[#allocation295_spill] sm:$0xff] }
 0x877   :  { %v6576_v26 = vpop.permute.xlu1 %6575  ;;  %v7006_v36 = vsel %vm3121_vm6, %v6942_v20, %v15636_v9  ;;  %v4596_v19 = vld [vmem:[#allocation2 + $0x279] sm:$0xff] }
 0x878   :  { %v7195_v33 = vsel %vm3316_vm9, %v7131_v32, %v6576_v26  ;;  %v6322_v46 = vpop.permute.xlu0 %6321  ;;  %v8655_v32 = vld [vmem:[#allocation2 + $0x120] sm:$0xff]  ;;  %v15637_v26 = vld [vmem:[#allocation229_spill] sm:$0xff]  ;;  %v15649_v20 = vld [vmem:[#allocation370_spill] sm:$0xff] }
 0x879   :  { %6359 = vrot.lane.b32.xlu1 %v4591_v17, %s8701_s30  ;;  %8466 = vmatprep.mubr.msk.f32.mxu1 %vm3397_vm10, %v7195_v33  ;;  %v7132_v45 = vsel %vm3251_vm8, %v7068_v63, %v6322_v46  ;;  %v6751_v22 = vsel %vm20_vm0, %v8655_v32, %v15637_v26  ;;  %v4594_v33 = vld [vmem:[#allocation2 + $0x261] sm:$0xff]  ;;  %v15651_v26 = vld [vmem:[#allocation122_spill] sm:$0xff] }
 0x87a   :  { %6105 = vrot.lane.b32.xlu0 %v4528_v11, %s8700_s29  ;;  %v15638_v46 = vld [vmem:[#allocation67_spill] sm:$0xff] }
 0x87b   :  { %v6068_v53 = vpop.permute.xlu1 %6067  ;;  %v6815_v17 = vsel %vm2926_vm3, %v6751_v22, %v15638_v46  ;;  %v15652_v46 = vld [vmem:[#allocation361_spill] sm:$0xff] }
 0x87c   :  { %v6578_v48 = vpop.permute.xlu0 %6577  ;;  %v7069_v41 = vsel %vm3186_vm7, %v7005_v37, %v6068_v53  ;;  %v6879_v7 = vsel %vm2991_vm4, %v6815_v17, %v15639_v38  ;;  %v4531_v53 = vld [vmem:[#allocation2 + $0x270] sm:$0xff] }
 0x87d   :  { %v7196_v8 = vsel %vm3316_vm9, %v7132_v45, %v6578_v48  ;;  %6615 = vrot.lane.b32.xlu1 %v4655_v10, %s8702_s1  ;;  %v6943_v31 = vsel %vm3056_vm5, %v6879_v7, %v15640_v29  ;;  %v4658_v48 = vld [vmem:[#allocation2 + $0x262] sm:$0xff] }
 0x87e   :  { %6361 = vrot.lane.b32.xlu0 %v4592_v50, %s8701_s30  ;;  %8467 = vmatmul.mubr.msk.f32.gmra.mrb[20].mxu1 %vm3397_vm10, %v7196_v8  ;;  %v7007_v45 = vsel %vm3121_vm6, %v6943_v31, %v12814_v55  ;;  %v8656_v10 = vld [vmem:[#allocation2 + $0x128] sm:$0xff]  ;;  %v15642_v8 = vld [vmem:[#allocation294_spill] sm:$0xff]  ;;  %v4534_v31 = vld [vmem:[#allocation2 + $0x290] sm:$0xff] }
 0x87f   :  { %v6324_v39 = vpop.permute.xlu1 %6323  ;;  %v6752_v6 = vsel %vm20_vm0, %v8656_v10, %v15641_v15  ;;  %v4597_v7 = vld [vmem:[#allocation2 + $0x289] sm:$0xff] }
 0x880   :  { %v6070_v12 = vpop.permute.xlu0 %6069  ;;  %v7133_v47 = vsel %vm3251_vm8, %v7069_v41, %v6324_v39  ;;  %v6816_v50 = vsel %vm2926_vm3, %v6752_v6, %v15642_v8  ;;  %v4659_v41 = vld [vmem:[#allocation2 + $0x272] sm:$0xff]  ;;  %v4661_v6 = vld [vmem:[#allocation2 + $0x28a] sm:$0xff]  ;;  %v15655_v8 = vld [vmem:[#allocation287_spill] sm:$0xff] }
 0x881   :  { %6107 = vrot.lane.b32.xlu1 %v4529_v56, %s8700_s29  ;;  %v7070_v1 = vsel %vm3186_vm7, %v7006_v36, %v6070_v12  ;;  %v6880_v55 = vsel %vm2991_vm4, %v6816_v50, %v15643_v61  ;;  %v4532_v56 = vld [vmem:[#allocation2 + $0x278] sm:$0xff]  ;;  %v4533_v36 = vld [vmem:[#allocation2 + $0x288] sm:$0xff]  ;;  %v15656_v61 = vld [vmem:[#allocation123_spill] sm:$0xff] }
 0x882   :  { %6617 = vrot.lane.b32.xlu0 %v4656_v49, %s8702_s1  ;;  %v6944_v12 = vsel %vm3056_vm5, %v6880_v55, %v15644_v57  ;;  %v15658_v57 = vld [vmem:[#allocation197_spill] sm:$0xff] }
 0x883   :  { %v6580_v42 = vpop.permute.xlu1 %6579  ;;  %v7008_v37 = vsel %vm3121_vm6, %v6944_v12, %v15645_v58  ;;  %v4535_v58 = vld [vmem:[#allocation2 + $0x2a0] sm:$0xff] }
 0x884   :  { %v7197_v3 = vsel %vm3316_vm9, %v7133_v47, %v6580_v42  ;;  %v6326_v44 = vpop.permute.xlu0 %6325  ;;  %v6753_v47 = vsel %vm20_vm0, %v8657_v54, %v15646_v27  ;;  %v15661_v27 = vld [vmem:[#allocation353_spill] sm:$0xff] }
 0x885   :  { %6363 = vrot.lane.b32.xlu1 %v4593_v4, %s8701_s30  ;;  %8469 = vmatprep.mubr.msk.f32.mxu1 %vm3397_vm10, %v7197_v3  ;;  %v7134_v2 = vsel %vm3251_vm8, %v7070_v1, %v6326_v44  ;;  %v6817_v3 = vsel %vm2926_vm3, %v6753_v47, %v15647_v5  ;;  %v15648_v44 = vld [vmem:[#allocation131_spill] sm:$0xff]  ;;  %v15662_v5 = vld [vmem:[#allocation188_spill] sm:$0xff] }
 0x886   :  { %6109 = vrot.lane.b32.xlu0 %v4530_v21, %s8700_s29  ;;  %v6881_v4 = vsel %vm2991_vm4, %v6817_v3, %v15648_v44 }
 0x887   :  { %v6072_v43 = vpop.permute.xlu1 %6071  ;;  %v6945_v21 = vsel %vm3056_vm5, %v6881_v4, %v15649_v20  ;;  %v15663_v20 = vld [vmem:[#allocation29_spill] sm:$0xff] }
 0x888   :  { %v6582_v40 = vpop.permute.xlu0 %6581  ;;  %v7071_v14 = vsel %vm3186_vm7, %v7007_v45, %v6072_v43  ;;  %v7009_v1 = vsel %vm3121_vm6, %v6945_v21, %v12821_v16  ;;  %v4660_v43 = vld [vmem:[#allocation2 + $0x27a] sm:$0xff] }
 0x889   :  { %v7198_v0 = vsel %vm3316_vm9, %v7134_v2, %v6582_v40  ;;  %6619 = vrot.lane.b32.xlu1 %v4657_v52, %s8702_s1  ;;  %v8658_v2 = vld [vmem:[#allocation2 + $0x140] sm:$0xff]  ;;  %v15650_v40 = vld [vmem:[#allocation286_spill] sm:$0xff] }
 0x88a   :  { %6365 = vrot.lane.b32.xlu0 %v4594_v33, %s8701_s30  ;;  %8470 = vmatmul.mubr.msk.f32.gmra.mrb[22].mxu1 %vm3397_vm10, %v7198_v0  ;;  %v6754_v52 = vsel %vm20_vm0, %v8658_v2, %v15650_v40 }
 0x88b   :  { %v6328_v11 = vpop.permute.xlu1 %6327  ;;  %v6818_v22 = vsel %vm2926_vm3, %v6754_v52, %v15651_v26  ;;  %v8661_v26 = vld [vmem:[#allocation2 + $0x168] sm:$0xff] }
 0x88c   :  { %v6074_v63 = vpop.permute.xlu0 %6073  ;;  %v7135_v24 = vsel %vm3251_vm8, %v7071_v14, %v6328_v11  ;;  %v6882_v16 = vsel %vm2991_vm4, %v6818_v22, %v15652_v46  ;;  %v15653_v11 = vld [vmem:[#allocation196_spill] sm:$0xff]  ;;  %v8659_v14 = vld [vmem:[#allocation2 + $0x150] sm:$0xff]  ;;  %v15665_v22 = vld [vmem:[#allocation115_spill] sm:$0xff] }
 0x88d   :  { %6111 = vrot.lane.b32.xlu1 %v4531_v53, %s8700_s29  ;;  %v7072_v49 = vsel %vm3186_vm7, %v7008_v37, %v6074_v63  ;;  %v6946_v29 = vsel %vm3056_vm5, %v6882_v16, %v15653_v11  ;;  %v15654_v63 = vld [vmem:[#allocation319_spill] sm:$0xff]  ;;  %v6755_v50 = vsel %vm20_vm0, %v8659_v14, %v15655_v8  ;;  %v4600_v46 = vld [vmem:[#allocation2 + $0x2a9] sm:$0xff]  ;;  %v15666_v16 = vld [vmem:[#allocation354_spill] sm:$0xff] }
 0x88e   :  { %6621 = vrot.lane.b32.xlu0 %v4658_v48, %s8702_s1  ;;  %v7010_v53 = vsel %vm3121_vm6, %v6946_v29, %v15654_v63  ;;  %v6819_v55 = vsel %vm2926_vm3, %v6755_v50, %v15656_v61  ;;  %v15659_v37 = vld [vmem:[#allocation147_spill] sm:$0xff]  ;;  %v15668_v29 = vld [vmem:[#allocation30_spill] sm:$0xff]  ;;  %v15670_v8 = vld [vmem:[#allocation180_spill] sm:$0xff] }
 0x88f   :  { %v6584_v13 = vpop.permute.xlu1 %6583  ;;  %v15671_v61 = vld [vmem:[#allocation21_spill] sm:$0xff] }
 0x890   :  { %v7199_v23 = vsel %vm3316_vm9, %v7135_v24, %v6584_v13  ;;  %v6330_v39 = vpop.permute.xlu0 %6329  ;;  %v4598_v13 = vld [vmem:[#allocation2 + $0x291] sm:$0xff] }
 0x891   :  { %6367 = vrot.lane.b32.xlu1 %v4595_v28, %s8701_s30  ;;  %8472 = vmatprep.mubr.msk.f32.mxu1 %vm3397_vm10, %v7199_v23  ;;  %v7136_v25 = vsel %vm3251_vm8, %v7072_v49, %v6330_v39  ;;  %v15657_v23 = vld [vmem:[#allocation362_spill] sm:$0xff] }
 0x892   :  { %6113 = vrot.lane.b32.xlu0 %v4532_v56, %s8700_s29  ;;  %v6883_v39 = vsel %vm2991_vm4, %v6819_v55, %v15657_v23 }
 0x893   :  { %v6076_v51 = vpop.permute.xlu1 %6075  ;;  %v6947_v12 = vsel %vm3056_vm5, %v6883_v39, %v15658_v57  ;;  %v4601_v39 = vld [vmem:[#allocation2 + $0x2b9] sm:$0xff] }
 0x894   :  { %v6586_v35 = vpop.permute.xlu0 %6585  ;;  %v7073_v32 = vsel %vm3186_vm7, %v7009_v1, %v6076_v51  ;;  %v7011_v49 = vsel %vm3121_vm6, %v6947_v12, %v15659_v37  ;;  %v4662_v51 = vld [vmem:[#allocation2 + $0x292] sm:$0xff]  ;;  %v4538_v12 = vld [vmem:[#allocation2 + $0x2c0] sm:$0xff] }
 0x895   :  { %v7200_v42 = vsel %vm3316_vm9, %v7136_v25, %v6586_v35  ;;  %6623 = vrot.lane.b32.xlu1 %v4659_v41, %s8702_s1  ;;  %v8660_v25 = vld [vmem:[#allocation2 + $0x158] sm:$0xff] }
 0x896   :  { %6369 = vrot.lane.b32.xlu0 %v4596_v19, %s8701_s30  ;;  %8473 = vmatmul.mubr.msk.f32.gmra.mrb[24].mxu1 %vm3397_vm10, %v7200_v42  ;;  %v15660_v35 = vld [vmem:[#allocation114_spill] sm:$0xff] }
 0x897   :  { %v6332_v34 = vpop.permute.xlu1 %6331  ;;  %v6756_v41 = vsel %vm20_vm0, %v8660_v25, %v15660_v35 }
 0x898   :  { %v6078_v9 = vpop.permute.xlu0 %6077  ;;  %v7137_v0 = vsel %vm3251_vm8, %v7073_v32, %v6332_v34  ;;  %v6820_v47 = vsel %vm2926_vm3, %v6756_v41, %v15661_v27  ;;  %v4599_v34 = vld [vmem:[#allocation2 + $0x2a1] sm:$0xff] }
 0x899   :  { %6115 = vrot.lane.b32.xlu1 %v4533_v36, %s8700_s29  ;;  %v7074_v45 = vsel %vm3186_vm7, %v7010_v53, %v6078_v9  ;;  %v6884_v3 = vsel %vm2991_vm4, %v6820_v47, %v15662_v5  ;;  %v4536_v9 = vld [vmem:[#allocation2 + $0x2a8] sm:$0xff]  ;;  %v15664_v36 = vld [vmem:[#allocation377_spill] sm:$0xff]  ;;  %v4537_v53 = vld [vmem:[#allocation2 + $0x2b8] sm:$0xff] }
 0x89a   :  { %6625 = vrot.lane.b32.xlu0 %v4660_v43, %s8702_s1  ;;  %v6948_v21 = vsel %vm3056_vm5, %v6884_v3, %v15663_v20  ;;  %v4663_v32 = vld [vmem:[#allocation2 + $0x2a2] sm:$0xff]  ;;  %v4665_v41 = vld [vmem:[#allocation2 + $0x2ba] sm:$0xff] }
 0x89b   :  { %v6588_v33 = vpop.permute.xlu1 %6587  ;;  %v7012_v1 = vsel %vm3121_vm6, %v6948_v21, %v15664_v36  ;;  %v4136_v3 = vld [vmem:[#allocation2 + $0x1b8] sm:$0xff]  ;;  %v15677_v20 = vld [vmem:[#allocation255_spill] sm:$0xff]  ;;  %v4539_v36 = vld [vmem:[#allocation2 + $0x2d0] sm:$0xff] }
 0x89c   :  { %v7201_v17 = vsel %vm3316_vm9, %v7137_v0, %v6588_v33  ;;  %v6334_v38 = vpop.permute.xlu0 %6333  ;;  %v6757_v0 = vsel %vm20_vm0, %v8661_v26, %v15665_v22 }
 0x89d   :  { %6371 = vrot.lane.b32.xlu1 %v4597_v7, %s8701_s30  ;;  %8475 = vmatprep.mubr.msk.f32.mxu1 %vm3397_vm10, %v7201_v17  ;;  %v7138_v10 = vsel %vm3251_vm8, %v7074_v45, %v6334_v38  ;;  %v6821_v17 = vsel %vm2926_vm3, %v6757_v0, %v15666_v16  ;;  %v15667_v38 = vld [vmem:[#allocation189_spill] sm:$0xff] }
 0x89e   :  { %6117 = vrot.lane.b32.xlu0 %v4534_v31, %s8700_s29  ;;  %v6885_v7 = vsel %vm2991_vm4, %v6821_v17, %v15667_v38  ;;  %v4603_v17 = vld [vmem:[#allocation2 + $0x2d1] sm:$0xff]  ;;  %v15681_v38 = vld [vmem:[#allocation84_spill] sm:$0xff] }
 0x89f   :  { %v6080_v48 = vpop.permute.xlu1 %6079  ;;  %v6949_v31 = vsel %vm3056_vm5, %v6885_v7, %v15668_v29  ;;  %v15682_v29 = vld [vmem:[#allocation378_spill] sm:$0xff] }
 0x8a0   :  { %v6590_v15 = vpop.permute.xlu0 %6589  ;;  %v7075_v54 = vsel %vm3186_vm7, %v7011_v49, %v6080_v48  ;;  %v7013_v45 = vsel %vm3121_vm6, %v6949_v31, %v12834_v18  ;;  %v4664_v48 = vld [vmem:[#allocation2 + $0x2aa] sm:$0xff] }
 0x8a1   :  { %v7202_v24 = vsel %vm3316_vm9, %v7138_v10, %v6590_v15  ;;  %6627 = vrot.lane.b32.xlu1 %v4661_v6, %s8702_s1  ;;  %v8662_v10 = vld [vmem:[#allocation2 + $0x170] sm:$0xff] }
 0x8a2   :  { %6373 = vrot.lane.b32.xlu0 %v4598_v13, %s8701_s30  ;;  %8476 = vmatmul.mubr.msk.f32.gmra.mrb[26].mxu1 %vm3397_vm10, %v7202_v24  ;;  %v15669_v15 = vld [vmem:[#allocation345_spill] sm:$0xff] }
 0x8a3   :  { %v6336_v28 = vpop.permute.xlu1 %6335  ;;  %v6758_v6 = vsel %vm20_vm0, %v8662_v10, %v15669_v15  ;;  %v4667_v10 = vld [vmem:[#allocation2 + $0x2d2] sm:$0xff]  ;;  %v8663_v15 = vld [vmem:[#allocation2 + $0x1c8] sm:$0xff] }
 0x8a4   :  { %v6082_v56 = vpop.permute.xlu0 %6081  ;;  %v7139_v42 = vsel %vm3251_vm8, %v7075_v54, %v6336_v28  ;;  %v6822_v50 = vsel %vm2926_vm3, %v6758_v6, %v15670_v8  ;;  %v15672_v28 = vld [vmem:[#allocation254_spill] sm:$0xff]  ;;  %v15683_v6 = vld [vmem:[#allocation173_spill] sm:$0xff] }
 0x8a5   :  { %6119 = vrot.lane.b32.xlu1 %v4535_v58, %s8700_s29  ;;  %v7076_v43 = vsel %vm3186_vm7, %v7012_v1, %v6082_v56  ;;  %v6886_v18 = vsel %vm2991_vm4, %v6822_v50, %v15671_v61  ;;  %v4135_v56 = vld [vmem:[#allocation2 + $0x1b0] sm:$0xff]  ;;  %v15673_v58 = vld [vmem:[#allocation204_spill] sm:$0xff]  ;;  %v15674_v54 = vld [vmem:[#allocation346_spill] sm:$0xff] }
 0x8a6   :  { %6629 = vrot.lane.b32.xlu0 %v4662_v51, %s8702_s1  ;;  %v6950_v57 = vsel %vm3056_vm5, %v6886_v18, %v15672_v28  ;;  %v6759_v27 = vsel %vm20_vm0, %v4135_v56, %v15674_v54  ;;  %v4604_v50 = vld [vmem:[#allocation2 + $0x2d9] sm:$0xff] }
 0x8a7   :  { %v6592_v19 = vpop.permute.xlu1 %6591  ;;  %v7014_v37 = vsel %vm3121_vm6, %v6950_v57, %v15673_v58  ;;  %v15685_v61 = vld [vmem:[#allocation247_spill] sm:$0xff]  ;;  %v8664_v58 = vld [vmem:[#allocation2 + $0x1d0] sm:$0xff] }
 0x8a8   :  { %v7203_v44 = vsel %vm3316_vm9, %v7139_v42, %v6592_v19  ;;  %v6338_v4 = vpop.permute.xlu0 %6337  ;;  %v4602_v42 = vld [vmem:[#allocation2 + $0x2c1] sm:$0xff]  ;;  %v15675_v19 = vld [vmem:[#allocation181_spill] sm:$0xff] }
 0x8a9   :  { %6375 = vrot.lane.b32.xlu1 %v4599_v34, %s8701_s30  ;;  %8478 = vmatprep.mubr.msk.f32.mxu1 %vm3397_vm10, %v7203_v44  ;;  %v7140_v40 = vsel %vm3251_vm8, %v7076_v43, %v6338_v4  ;;  %v6823_v5 = vsel %vm2926_vm3, %v6759_v27, %v15675_v19  ;;  %v15676_v44 = vld [vmem:[#allocation22_spill] sm:$0xff]  ;;  %v4666_v43 = vld [vmem:[#allocation2 + $0x2c2] sm:$0xff] }
 0x8aa   :  { %6121 = vrot.lane.b32.xlu0 %v4536_v9, %s8700_s29  ;;  %v6887_v4 = vsel %vm2991_vm4, %v6823_v5, %v15676_v44  ;;  %v4478_v57 = vld [vmem:[#allocation2 + $0x2da] sm:$0xff]  ;;  %v15690_v27 = vld [vmem:[#allocation76_spill] sm:$0xff]  ;;  %v4542_v5 = vld [vmem:[#allocation2 + $0x2f0] sm:$0xff] }
 0x8ab   :  { %v6084_v2 = vpop.permute.xlu1 %6083  ;;  %v6951_v21 = vsel %vm3056_vm5, %v6887_v4, %v15677_v20  ;;  %v4541_v4 = vld [vmem:[#allocation2 + $0x2e8] sm:$0xff] }
 0x8ac   :  { %v6594_v52 = vpop.permute.xlu0 %6593  ;;  %v7077_v14 = vsel %vm3186_vm7, %v7013_v45, %v6084_v2  ;;  %v7015_v1 = vsel %vm3121_vm6, %v6951_v21, %v12841_v30  ;;  %v15678_v2 = vld [vmem:[#allocation172_spill] sm:$0xff] }
 0x8ad   :  { %v7204_v33 = vsel %vm3316_vm9, %v7140_v40, %v6594_v52  ;;  %6631 = vrot.lane.b32.xlu1 %v4663_v32, %s8702_s1  ;;  %v6760_v40 = vsel %vm20_vm0, %v4136_v3, %v15678_v2  ;;  %v15679_v32 = vld [vmem:[#allocation13_spill] sm:$0xff]  ;;  %v15691_v3 = vld [vmem:[#allocation140_spill] sm:$0xff]  ;;  %v8665_v2 = vld [vmem:[#allocation2 + $0x1e0] sm:$0xff] }
 0x8ae   :  { %6377 = vrot.lane.b32.xlu0 %v4600_v46, %s8701_s30  ;;  %8479 = vmatmul.mubr.msk.f32.gmra.mrb[28].mxu1 %vm3397_vm10, %v7204_v33  ;;  %v6824_v26 = vsel %vm2926_vm3, %v6760_v40, %v15679_v32  ;;  %v15680_v33 = vld [vmem:[#allocation246_spill] sm:$0xff] }
 0x8af   :  { %v6340_v11 = vpop.permute.xlu1 %6339  ;;  %v6888_v46 = vsel %vm2991_vm4, %v6824_v26, %v15680_v33  ;;  %v15693_v40 = vld [vmem:[#allocation6_spill] sm:$0xff]  ;;  %v4605_v26 = vld [vmem:[#allocation2 + $0x2e9] sm:$0xff] }
 0x8b0   :  { %v6086_v63 = vpop.permute.xlu0 %6085  ;;  %v7141_v24 = vsel %vm3251_vm8, %v7077_v14, %v6340_v11  ;;  %v6952_v7 = vsel %vm3056_vm5, %v6888_v46, %v15681_v38  ;;  %v4540_v11 = vld [vmem:[#allocation2 + $0x2d8] sm:$0xff]  ;;  %v6761_v14 = vsel %vm20_vm0, %v8663_v15, %v15683_v6  ;;  %v15695_v33 = vld [vmem:[#allocation77_spill] sm:$0xff]  ;;  %v15699_v6 = vld [vmem:[#allocation304_spill] sm:$0xff] }
 0x8b1   :  { %6123 = vrot.lane.b32.xlu1 %v4537_v53, %s8700_s29  ;;  %v7078_v49 = vsel %vm3186_vm7, %v7014_v37, %v6086_v63  ;;  %v7016_v31 = vsel %vm3121_vm6, %v6952_v7, %v15682_v29  ;;  %v15688_v37 = vld [vmem:[#allocation5_spill] sm:$0xff]  ;;  %v8666_v29 = vld [vmem:[#allocation2 + $0x1e8] sm:$0xff] }
 0x8b2   :  { %6633 = vrot.lane.b32.xlu0 %v4664_v48, %s8702_s1  ;;  %v4479_v7 = vld [vmem:[#allocation2 + $0x2ea] sm:$0xff] }
 0x8b3   :  { %v6596_v13 = vpop.permute.xlu1 %6595 }
 0x8b4   :  { %v7205_v55 = vsel %vm3316_vm9, %v7141_v24, %v6596_v13  ;;  %v6342_v23 = vpop.permute.xlu0 %6341  ;;  %v15684_v24 = vld [vmem:[#allocation14_spill] sm:$0xff] }
 0x8b5   :  { %6379 = vrot.lane.b32.xlu1 %v4601_v39, %s8701_s30  ;;  %8481 = vmatprep.mubr.msk.f32.mxu1 %vm3397_vm10, %v7205_v55  ;;  %v7142_v25 = vsel %vm3251_vm8, %v7078_v49, %v6342_v23  ;;  %v6825_v13 = vsel %vm2926_vm3, %v6761_v14, %v15684_v24  ;;  %v15686_v23 = vld [vmem:[#allocation313_spill] sm:$0xff]  ;;  %v6762_v49 = vsel %vm20_vm0, %v8664_v58, %v15688_v37 }
 0x8b6   :  { %6125 = vrot.lane.b32.xlu0 %v4538_v12, %s8700_s29  ;;  %v6889_v18 = vsel %vm2991_vm4, %v6825_v13, %v15685_v61  ;;  %v15687_v12 = vld [vmem:[#allocation205_spill] sm:$0xff]  ;;  %v15700_v13 = vld [vmem:[#allocation198_spill] sm:$0xff] }
 0x8b7   :  { %v6088_v51 = vpop.permute.xlu1 %6087  ;;  %v6953_v39 = vsel %vm3056_vm5, %v6889_v18, %v15686_v23  ;;  %v4480_v24 = vld [vmem:[#allocation2 + $0x2f2] sm:$0xff] }
 0x8b8   :  { %v6598_v35 = vpop.permute.xlu0 %6597  ;;  %v7079_v52 = vsel %vm3186_vm7, %v7015_v1, %v6088_v51  ;;  %v7017_v56 = vsel %vm3121_vm6, %v6953_v39, %v15687_v12  ;;  %v15701_v23 = vld [vmem:[#allocation262_spill] sm:$0xff]  ;;  %v7832_v12 = vld [vmem:[%s14479_s0] sm:$0xff] }
 0x8b9   :  { %v7206_v47 = vsel %vm3316_vm9, %v7142_v25, %v6598_v35  ;;  %6635 = vrot.lane.b32.xlu1 %v4665_v41, %s8702_s1  ;;  %v15689_v25 = vld [vmem:[#allocation238_spill] sm:$0xff] }
 0x8ba   :  { %6381 = vrot.lane.b32.xlu0 %v4602_v42, %s8701_s30  ;;  %8482 = vmatmul.mubr.msk.f32.gmra.mrb[30].mxu1 %vm3397_vm10, %v7206_v47  ;;  %v6826_v35 = vsel %vm2926_vm3, %v6762_v49, %v15689_v25 }
 0x8bb   :  { %v6344_v34 = vpop.permute.xlu1 %6343  ;;  %v6890_v47 = vsel %vm2991_vm4, %v6826_v35, %v15690_v27  ;;  %v4544_v35 = vld [vmem:[#allocation2 + $0x308] sm:$0xff] }
 0x8bc   :  { %v6090_v9 = vpop.permute.xlu0 %6089  ;;  %v7143_v22 = vsel %vm3251_vm8, %v7079_v52, %v6344_v34  ;;  %v6954_v44 = vsel %vm3056_vm5, %v6890_v47, %v15691_v3  ;;  %v15692_v34 = vld [vmem:[#allocation37_spill] sm:$0xff]  ;;  %v6763_v52 = vsel %vm20_vm0, %v8665_v2, %v15693_v40  ;;  %v8668_v2 = vld [vmem:[#allocation2 + $0x200] sm:$0xff]  ;;  %v15706_v40 = vld [vmem:[#allocation60_spill] sm:$0xff] }
 0x8bd   :  { %6127 = vrot.lane.b32.xlu1 %v4539_v36, %s8700_s29  ;;  %v7080_v63 = vsel %vm3186_vm7, %v7016_v31, %v6090_v9  ;;  %v7018_v20 = vsel %vm3121_vm6, %v6954_v44, %v15692_v34  ;;  %v15697_v31 = vld [vmem:[#allocation230_spill] sm:$0xff]  ;;  %v15704_v44 = vld [vmem:[#allocation305_spill] sm:$0xff] }
 0x8be   :  { %6637 = vrot.lane.b32.xlu0 %v4666_v43, %s8702_s1  ;;  %v4606_v43 = vld [vmem:[#allocation2 + $0x2f1] sm:$0xff] }
 0x8bf   :  { %v6600_v0 = vpop.permute.xlu1 %6599 }
 0x8c0   :  { %v7207_v30 = vsel %vm3316_vm9, %v7143_v22, %v6600_v0  ;;  %v6346_v16 = vpop.permute.xlu0 %6345  ;;  %v15694_v22 = vld [vmem:[#allocation239_spill] sm:$0xff] }
 0x8c1   :  { %6383 = vrot.lane.b32.xlu1 %v4603_v17, %s8701_s30  ;;  %8484 = vmatprep.mubr.msk.f32.mxu1 %vm3397_vm10, %v7207_v30  ;;  %v7144_v45 = vsel %vm3251_vm8, %v7080_v63, %v6346_v16  ;;  %v6827_v0 = vsel %vm2926_vm3, %v6763_v52, %v15694_v22  ;;  %v15696_v16 = vld [vmem:[#allocation372_spill] sm:$0xff]  ;;  %v6764_v63 = vsel %vm20_vm0, %v8666_v29, %v15697_v31  ;;  %v7835_v29 = vld [vmem:[%s14479_s0 + $0x18] sm:$0xff] }
 0x8c2   :  { %6129 = vrot.lane.b32.xlu0 %v4540_v11, %s8700_s29  ;;  %v6891_v46 = vsel %vm2991_vm4, %v6827_v0, %v15695_v33  ;;  %v6766_v52 = vsel %vm20_vm0, %v8668_v2, %v15706_v40  ;;  %v15710_v31 = vld [vmem:[#allocation38_spill] sm:$0xff]  ;;  %v7837_v2 = vld [vmem:[%s14479_s0 + $0x28] sm:$0xff] }
 0x8c3   :  { %v6092_v53 = vpop.permute.xlu1 %6091  ;;  %v6955_v17 = vsel %vm3056_vm5, %v6891_v46, %v15696_v16  ;;  %v15708_v46 = vld [vmem:[#allocation132_spill] sm:$0xff]  ;;  %v4609_v40 = vld [vmem:[#allocation2 + $0x319] sm:$0xff] }
 0x8c4   :  { %v6602_v48 = vpop.permute.xlu0 %6601  ;;  %v7081_v51 = vsel %vm3186_vm7, %v7017_v56, %v6092_v53  ;;  %v7019_v11 = vsel %vm3121_vm6, %v6955_v17, %v12854_v60  ;;  %v13561_v60 = vld [vmem:[%s14483_s4] ss:$0 sm:$0xff]  ;;  %v4481_v17 = vld [vmem:[#allocation2 + $0x302] sm:$0xff] }
 0x8c5   :  { %v7208_v8 = vsel %vm3316_vm9, %v7144_v45, %v6602_v48  ;;  %6639 = vrot.lane.b32.xlu1 %v4667_v10, %s8702_s1  ;;  %v15698_v45 = vld [vmem:[#allocation68_spill] sm:$0xff] }
 0x8c6   :  { %6385 = vrot.lane.b32.xlu0 %v4604_v50, %s8701_s30  ;;  %8485 = vmatmul.mubr.msk.f32.gmra.mrb[32].mxu1 %vm3397_vm10, %v7208_v8  ;;  %v6828_v48 = vsel %vm2926_vm3, %v6764_v63, %v15698_v45 }
 0x8c7   :  { %v6348_v55 = vpop.permute.xlu1 %6347  ;;  %v6892_v14 = vsel %vm2991_vm4, %v6828_v48, %v15699_v6  ;;  %v7834_v48 = vld [vmem:[%s14479_s0 + $0x10] sm:$0xff] }
 0x8c8   :  { %v6094_v28 = vpop.permute.xlu0 %6093  ;;  %v7145_v41 = vsel %vm3251_vm8, %v7081_v51, %v6348_v55  ;;  %v6956_v61 = vsel %vm3056_vm5, %v6892_v14, %v15700_v13  ;;  %v7833_v55 = vld [vmem:[%s14479_s0 + $0x8] sm:$0xff]  ;;  %v8669_v13 = vld [vmem:[#allocation2 + $0x210] sm:$0xff] }
 0x8c9   :  { %5877 = vrot.lane.b32.xlu1 %v4478_v57, %s8699_s28  ;;  %v7082_v21 = vsel %vm3186_vm7, %v7018_v20, %v6094_v28  ;;  %v7020_v39 = vsel %vm3121_vm6, %v6956_v61, %v15701_v23  ;;  %v15705_v20 = vld [vmem:[#allocation32_spill] sm:$0xff]  ;;  %v15711_v61 = vld [vmem:[#allocation61_spill] sm:$0xff] }
 0x8ca   :  { %6641 = vrot.lane.b32.xlu0 %v4478_v57, %s8702_s1 }
 0x8cb   :  { %v6604_v54 = vpop.permute.xlu1 %6603 }
 0x8cc   :  { %v7209_v42 = vsel %vm3316_vm9, %v7145_v41, %v6604_v54  ;;  %v6350_v19 = vpop.permute.xlu0 %6349  ;;  %v8667_v41 = vld [vmem:[#allocation2 + $0x1f8] sm:$0xff]  ;;  %v15702_v54 = vld [vmem:[#allocation231_spill] sm:$0xff] }
 0x8cd   :  { %6133 = vrot.lane.b32.xlu1 %v4542_v5, %s8700_s29  ;;  %8487 = vmatprep.mubr.msk.f32.mxu1 %vm3397_vm10, %v7209_v42  ;;  %v7146_v36 = vsel %vm3251_vm8, %v7082_v21, %v6350_v19  ;;  %v6765_v27 = vsel %vm20_vm0, %v8667_v41, %v15702_v54  ;;  %v4543_v19 = vld [vmem:[#allocation2 + $0x300] sm:$0xff]  ;;  %v15703_v5 = vld [vmem:[#allocation69_spill] sm:$0xff]  ;;  %v4545_v41 = vld [vmem:[#allocation2 + $0x318] sm:$0xff] }
 0x8ce   :  { %6131 = vrot.lane.b32.xlu0 %v4541_v4, %s8700_s29  ;;  %v6829_v3 = vsel %vm2926_vm3, %v6765_v27, %v15703_v5  ;;  %v8670_v54 = vld [vmem:[#allocation2 + $0x218] sm:$0xff]  ;;  %v15716_v27 = vld [vmem:[#allocation288_spill] sm:$0xff] }
 0x8cf   :  { %v6096_v9 = vpop.permute.xlu1 %6095  ;;  %v6893_v4 = vsel %vm2991_vm4, %v6829_v3, %v15704_v44 }
 0x8d0   :  { %v6606_v1 = vpop.permute.xlu0 %6605  ;;  %v7083_v53 = vsel %vm3186_vm7, %v7019_v11, %v6096_v9  ;;  %v6957_v21 = vsel %vm3056_vm5, %v6893_v4, %v15705_v20  ;;  %v15718_v4 = vld [vmem:[#allocation363_spill] sm:$0xff] }
 0x8d1   :  { %v7210_v32 = vsel %vm3316_vm9, %v7146_v36, %v6606_v1  ;;  %6389 = vrot.lane.b32.xlu1 %v4606_v43, %s8701_s30  ;;  %v4608_v36 = vld [vmem:[#allocation2 + $0x309] sm:$0xff]  ;;  %v7021_v1 = vsel %vm3121_vm6, %v6957_v21, %v12861_v59  ;;  %v4607_v43 = vld [vmem:[#allocation2 + $0x301] sm:$0xff] }
 0x8d2   :  { %6387 = vrot.lane.b32.xlu0 %v4605_v26, %s8701_s30  ;;  %8488 = vmatmul.mubr.msk.f32.gmra.mrb[34].mxu1 %vm3397_vm10, %v7210_v32  ;;  %v15707_v26 = vld [vmem:[#allocation296_spill] sm:$0xff] }
 0x8d3   :  { %v6352_v30 = vpop.permute.xlu1 %6351  ;;  %v6830_v22 = vsel %vm2926_vm3, %v6766_v52, %v15707_v26  ;;  %v15720_v52 = vld [vmem:[#allocation92_spill] sm:$0xff] }
 0x8d4   :  { %v6098_v38 = vpop.permute.xlu0 %6097  ;;  %v7147_v10 = vsel %vm3251_vm8, %v7083_v53, %v6352_v30  ;;  %v6894_v59 = vsel %vm2991_vm4, %v6830_v22, %v15708_v46 }
 0x8d5   :  { %5879 = vrot.lane.b32.xlu1 %v4479_v7, %s8699_s28  ;;  %v7084_v56 = vsel %vm3186_vm7, %v7020_v39, %v6098_v38  ;;  %v15709_v38 = vld [vmem:[#allocation256_spill] sm:$0xff]  ;;  %v15712_v39 = vld [vmem:[#allocation297_spill] sm:$0xff] }
 0x8d6   :  { %6643 = vrot.lane.b32.xlu0 %v4479_v7, %s8702_s1  ;;  %v6958_v7 = vsel %vm3056_vm5, %v6894_v59, %v15709_v38  ;;  %v4483_v38 = vld [vmem:[#allocation2 + $0x31a] sm:$0xff] }
 0x8d7   :  { %v6608_v15 = vpop.permute.xlu1 %6607  ;;  %v7022_v63 = vsel %vm3121_vm6, %v6958_v7, %v15710_v31  ;;  %v8671_v7 = vld [vmem:[#allocation2 + $0x228] sm:$0xff] }
 0x8d8   :  { %v7211_v8 = vsel %vm3316_vm9, %v7147_v10, %v6608_v15  ;;  %v6354_v50 = vpop.permute.xlu0 %6353 }
 0x8d9   :  { %5881 = vrot.lane.b32.xlu1 %v4480_v24, %s8699_s28  ;;  %v8438_v18 = vpop.f32.mrb[0].mxu1  ;;  %8490 = vmatprep.mubr.msk.f32.mxu1 %vm3397_vm10, %v7211_v8  ;;  %v7148_v49 = vsel %vm3251_vm8, %v7084_v56, %v6354_v50 }
 0x8da   :  { %v7519_v28 = vadd.f32 %v8438_v18, %v13561_v60  ;;  %v7513_v57 = vpop.f32.mrb[1].mxu1  ;;  %6645 = vrot.lane.b32.xlu0 %v4480_v24, %s8702_s1  ;;  %v4482_v24 = vld [vmem:[#allocation2 + $0x30a] sm:$0xff]  ;;  %v6767_v18 = vsel %vm20_vm0, %v8669_v13, %v15711_v61 }
 0x8db   :  { %v7514_v58 = vadd.f32 %v13561_v60, %v7513_v57  ;;  %v6100_v37 = vpop.permute.xlu1 %6099  ;;  %v15713_v57 = vld [vmem:[#allocation133_spill] sm:$0xff]  ;;  %v15725_v61 = vld [vmem:[#allocation116_spill] sm:$0xff] }
 0x8dc   :  { %v7897_v51 = vadd.f32 %v7833_v55, %v7519_v28  ;;  %v6610_v25 = vpop.permute.xlu0 %6609  ;;  %v7085_v32 = vsel %vm3186_vm7, %v7021_v1, %v6100_v37  ;;  %v6831_v28 = vsel %vm2926_vm3, %v6767_v18, %v15712_v39  ;;  %v8672_v13 = vld [vmem:[#allocation2 + $0x230] sm:$0xff] }
 0x8dd   :  { %v7896_v47 = vadd.f32 %v7832_v12, %v7514_v58  ;;  %v7212_v42 = vsel %vm3316_vm9, %v7148_v49, %v6610_v25  ;;  %6137 = vrot.lane.b32.xlu1 %v4544_v35, %s8700_s29  ;;  %v6895_v12 = vsel %vm2991_vm4, %v6831_v28, %v15713_v57  ;;  %v15714_v58 = vld [vmem:[#allocation257_spill] sm:$0xff]  ;;  %v15715_v25 = vld [vmem:[#allocation263_spill] sm:$0xff]  ;;  %v6770_v18 = vsel %vm20_vm0, %v8672_v13, %v15725_v61  ;;  %v7841_v13 = vld [vmem:[%s14479_s0 + $0x48] sm:$0xff] }
 0x8de   :  { %7961 = vst.msk [vmem:[%s14484_s5 + $0x8] sm:$0xff] %vm20_vm0, %v7897_v51  ;;  %6135 = vrot.lane.b32.xlu0 %v4543_v19, %s8700_s29  ;;  %8491 = vmatmul.mubr.msk.f32.gmra.mrb[36].mxu1 %vm3397_vm10, %v7212_v42  ;;  %v6959_v37 = vsel %vm3056_vm5, %v6895_v12, %v15714_v58  ;;  %v4546_v51 = vld [vmem:[#allocation2 + $0x320] sm:$0xff]  ;;  %v15717_v19 = vld [vmem:[#allocation124_spill] sm:$0xff]  ;;  %v15727_v12 = vld [vmem:[#allocation190_spill] sm:$0xff] }
 0x8df   :  { %7960 = vst.msk [vmem:[%s14484_s5] sm:$0xff] %vm20_vm0, %v7896_v47  ;;  %v6356_v34 = vpop.permute.xlu1 %6355  ;;  %v7023_v35 = vsel %vm3121_vm6, %v6959_v37, %v15715_v25  ;;  %v6768_v47 = vsel %vm20_vm0, %v8670_v54, %v15716_v27  ;;  %v4548_v37 = vld [vmem:[#allocation2 + $0x338] sm:$0xff]  ;;  %v15729_v54 = vld [vmem:[#allocation320_spill] sm:$0xff]  ;;  %v15739_v61 = vld [vmem:[#allocation93_spill] sm:$0xff] }
 0x8e0   :  { %v6102_v9 = vpop.permute.xlu0 %6101  ;;  %v7149_v0 = vsel %vm3251_vm8, %v7085_v32, %v6356_v34  ;;  %v6832_v5 = vsel %vm2926_vm3, %v6768_v47, %v15717_v19  ;;  %v7838_v19 = vld [vmem:[%s14479_s0 + $0x30] sm:$0xff] }
 0x8e1   :  { %6393 = vrot.lane.b32.xlu1 %v4608_v36, %s8701_s30  ;;  %v7086_v10 = vsel %vm3186_vm7, %v7022_v63, %v6102_v9  ;;  %v6896_v34 = vsel %vm2991_vm4, %v6832_v5, %v15718_v4  ;;  %v4610_v9 = vld [vmem:[#allocation2 + $0x321] sm:$0xff]  ;;  %v15719_v36 = vld [vmem:[#allocation86_spill] sm:$0xff] }
 0x8e2   :  { %6391 = vrot.lane.b32.xlu0 %v4607_v43, %s8701_s30  ;;  %v6960_v1 = vsel %vm3056_vm5, %v6896_v34, %v15719_v36  ;;  %v15730_v36 = vld [vmem:[#allocation117_spill] sm:$0xff] }
 0x8e3   :  { %v6612_v33 = vpop.permute.xlu1 %6611  ;;  %v7024_v32 = vsel %vm3121_vm6, %v6960_v1, %v15720_v52  ;;  %v15731_v52 = vld [vmem:[#allocation356_spill] sm:$0xff] }
 0x8e4   :  { %v7213_v30 = vsel %vm3316_vm9, %v7149_v0, %v6612_v33  ;;  %v6358_v16 = vpop.permute.xlu0 %6357  ;;  %v7836_v0 = vld [vmem:[%s14479_s0 + $0x20] sm:$0xff] }
 0x8e5   :  { %5883 = vrot.lane.b32.xlu1 %v4481_v17, %s8699_s28  ;;  %v8441_v11 = vpop.f32.mrb[2].mxu1  ;;  %8493 = vmatprep.mubr.msk.f32.mxu1 %vm3397_vm10, %v7213_v30  ;;  %v7150_v14 = vsel %vm3251_vm8, %v7086_v10, %v6358_v16 }
 0x8e6   :  { %v7529_v53 = vadd.f32 %v8441_v11, %v13561_v60  ;;  %v7523_v45 = vpop.f32.mrb[3].mxu1  ;;  %6647 = vrot.lane.b32.xlu0 %v4481_v17, %s8702_s1  ;;  %v15721_v11 = vld [vmem:[#allocation289_spill] sm:$0xff] }
 0x8e7   :  { %v7524_v15 = vadd.f32 %v13561_v60, %v7523_v45  ;;  %v6104_v6 = vpop.permute.xlu1 %6103 }
 0x8e8   :  { %v7899_v8 = vadd.f32 %v7835_v29, %v7529_v53  ;;  %v6614_v50 = vpop.permute.xlu0 %6613  ;;  %v7087_v42 = vsel %vm3186_vm7, %v7023_v35, %v6104_v6  ;;  %v6769_v29 = vsel %vm20_vm0, %v8671_v7, %v15721_v11  ;;  %v15722_v53 = vld [vmem:[#allocation125_spill] sm:$0xff]  ;;  %v15724_v6 = vld [vmem:[#allocation87_spill] sm:$0xff]  ;;  %v7839_v35 = vld [vmem:[%s14479_s0 + $0x38] sm:$0xff] }
 0x8e9   :  { %v7898_v55 = vadd.f32 %v7834_v48, %v7524_v15  ;;  %v7214_v23 = vsel %vm3316_vm9, %v7150_v14, %v6614_v50  ;;  %5885 = vrot.lane.b32.xlu1 %v4482_v24, %s8699_s28  ;;  %v6833_v45 = vsel %vm2926_vm3, %v6769_v29, %v15722_v53  ;;  %v15723_v48 = vld [vmem:[#allocation364_spill] sm:$0xff]  ;;  %v15735_v7 = vld [vmem:[#allocation347_spill] sm:$0xff] }
 0x8ea   :  { %7963 = vst.msk [vmem:[%s14484_s5 + $0x18] sm:$0xff] %vm20_vm0, %v7899_v8  ;;  %6649 = vrot.lane.b32.xlu0 %v4482_v24, %s8702_s1  ;;  %8494 = vmatmul.mubr.msk.f32.gmra.mrb[38].mxu1 %vm3397_vm10, %v7214_v23  ;;  %v6897_v10 = vsel %vm2991_vm4, %v6833_v45, %v15723_v48  ;;  %v4484_v50 = vld [vmem:[#allocation2 + $0x322] sm:$0xff] }
 0x8eb   :  { %7962 = vst.msk [vmem:[%s14484_s5 + $0x10] sm:$0xff] %vm20_vm0, %v7898_v55  ;;  %v6360_v56 = vpop.permute.xlu1 %6359  ;;  %v6961_v14 = vsel %vm3056_vm5, %v6897_v10, %v15724_v6  ;;  %v15726_v23 = vld [vmem:[#allocation355_spill] sm:$0xff] }
 0x8ec   :  { %v6106_v49 = vpop.permute.xlu0 %6105  ;;  %v7151_v3 = vsel %vm3251_vm8, %v7087_v42, %v6360_v56  ;;  %v7025_v24 = vsel %vm3121_vm6, %v6961_v14, %v12874_v62  ;;  %v6834_v39 = vsel %vm2926_vm3, %v6770_v18, %v15726_v23  ;;  %v15737_v48 = vld [vmem:[#allocation23_spill] sm:$0xff] }
 0x8ed   :  { %6141 = vrot.lane.b32.xlu1 %v4546_v51, %s8700_s29  ;;  %v7088_v33 = vsel %vm3186_vm7, %v7024_v32, %v6106_v49  ;;  %v6898_v56 = vsel %vm2991_vm4, %v6834_v39, %v15727_v12  ;;  %v15728_v49 = vld [vmem:[#allocation314_spill] sm:$0xff]  ;;  %v7840_v39 = vld [vmem:[%s14479_s0 + $0x40] sm:$0xff] }
 0x8ee   :  { %6139 = vrot.lane.b32.xlu0 %v4545_v41, %s8700_s29  ;;  %v6962_v51 = vsel %vm3056_vm5, %v6898_v56, %v15728_v49  ;;  %v4547_v41 = vld [vmem:[#allocation2 + $0x330] sm:$0xff]  ;;  %v4486_v14 = vld [vmem:[#allocation2 + $0x33a] sm:$0xff] }
 0x8ef   :  { %v6616_v44 = vpop.permute.xlu1 %6615  ;;  %v7026_v27 = vsel %vm3121_vm6, %v6962_v51, %v15729_v54  ;;  %v8675_v51 = vld [vmem:[#allocation2 + $0x258] sm:$0xff] }
 0x8f0   :  { %v7215_v20 = vsel %vm3316_vm9, %v7151_v3, %v6616_v44  ;;  %v6362_v21 = vpop.permute.xlu0 %6361 }
 0x8f1   :  { %6397 = vrot.lane.b32.xlu1 %v4610_v9, %s8701_s30  ;;  %v8444_v43 = vpop.f32.mrb[4].mxu1  ;;  %8496 = vmatprep.mubr.msk.f32.mxu1 %vm3397_vm10, %v7215_v20  ;;  %v7152_v30 = vsel %vm3251_vm8, %v7088_v33, %v6362_v21  ;;  %v4612_v21 = vld [vmem:[#allocation2 + $0x339] sm:$0xff] }
 0x8f2   :  { %v7539_v26 = vadd.f32 %v8444_v43, %v13561_v60  ;;  %6395 = vrot.lane.b32.xlu0 %v4609_v40, %s8701_s30  ;;  %v7533_v22 = vpop.f32.mrb[5].mxu1  ;;  %v8673_v9 = vld [vmem:[#allocation2 + $0x240] sm:$0xff]  ;;  %v4611_v40 = vld [vmem:[#allocation2 + $0x331] sm:$0xff] }
 0x8f3   :  { %v7534_v46 = vadd.f32 %v13561_v60, %v7533_v22  ;;  %v6108_v59 = vpop.permute.xlu1 %6107  ;;  %v6771_v1 = vsel %vm20_vm0, %v8673_v9, %v15730_v36  ;;  %v15733_v33 = vld [vmem:[#allocation315_spill] sm:$0xff] }
 0x8f4   :  { %v7901_v16 = vadd.f32 %v7837_v2, %v7539_v26  ;;  %v6618_v17 = vpop.permute.xlu0 %6617  ;;  %v7089_v55 = vsel %vm3186_vm7, %v7025_v24, %v6108_v59  ;;  %v6835_v32 = vsel %vm2926_vm3, %v6771_v1, %v15731_v52  ;;  %v15732_v26 = vld [vmem:[#allocation191_spill] sm:$0xff]  ;;  %v15745_v1 = vld [vmem:[#allocation174_spill] sm:$0xff] }
 0x8f5   :  { %v7900_v31 = vadd.f32 %v7836_v0, %v7534_v46  ;;  %v7216_v63 = vsel %vm3316_vm9, %v7152_v30, %v6618_v17  ;;  %5887 = vrot.lane.b32.xlu1 %v4483_v38, %s8699_s28  ;;  %v6899_v22 = vsel %vm2991_vm4, %v6835_v32, %v15732_v26  ;;  %v4485_v30 = vld [vmem:[#allocation2 + $0x332] sm:$0xff]  ;;  %v8676_v36 = vld [vmem:[#allocation2 + $0x260] sm:$0xff] }
 0x8f6   :  { %7965 = vst.msk [vmem:[%s14484_s5 + $0x28] sm:$0xff] %vm20_vm0, %v7901_v16  ;;  %6651 = vrot.lane.b32.xlu0 %v4483_v38, %s8702_s1  ;;  %8497 = vmatmul.mubr.msk.f32.gmra.mrb[40].mxu1 %vm3397_vm10, %v7216_v63  ;;  %v6963_v46 = vsel %vm3056_vm5, %v6899_v22, %v15733_v33  ;;  %v15734_v16 = vld [vmem:[#allocation148_spill] sm:$0xff]  ;;  %v15746_v52 = vld [vmem:[#allocation15_spill] sm:$0xff] }
 0x8f7   :  { %7964 = vst.msk [vmem:[%s14484_s5 + $0x20] sm:$0xff] %vm20_vm0, %v7900_v31  ;;  %v6364_v15 = vpop.permute.xlu1 %6363  ;;  %v7027_v17 = vsel %vm3121_vm6, %v6963_v46, %v15734_v16  ;;  %v8674_v38 = vld [vmem:[#allocation2 + $0x248] sm:$0xff]  ;;  %v15736_v31 = vld [vmem:[#allocation182_spill] sm:$0xff]  ;;  %v15748_v16 = vld [vmem:[#allocation373_spill] sm:$0xff] }
 0x8f8   :  { %v6110_v8 = vpop.permute.xlu0 %6109  ;;  %v7153_v28 = vsel %vm3251_vm8, %v7089_v55, %v6364_v15  ;;  %v6772_v11 = vsel %vm20_vm0, %v8674_v38, %v15735_v7  ;;  %v15747_v33 = vld [vmem:[#allocation248_spill] sm:$0xff]  ;;  %v7843_v7 = vld [vmem:[%s14479_s0 + $0x58] sm:$0xff] }
 0x8f9   :  { %5889 = vrot.lane.b32.xlu1 %v4484_v50, %s8699_s28  ;;  %v7090_v5 = vsel %vm3186_vm7, %v7026_v27, %v6110_v8  ;;  %v6836_v63 = vsel %vm2926_vm3, %v6772_v11, %v15736_v31  ;;  %v15738_v8 = vld [vmem:[#allocation142_spill] sm:$0xff]  ;;  %v15741_v27 = vld [vmem:[#allocation183_spill] sm:$0xff]  ;;  %v15749_v11 = vld [vmem:[#allocation321_spill] sm:$0xff] }
 0x8fa   :  { %6653 = vrot.lane.b32.xlu0 %v4484_v50, %s8702_s1  ;;  %v6900_v10 = vsel %vm2991_vm4, %v6836_v63, %v15737_v48 }
 0x8fb   :  { %v6620_v57 = vpop.permute.xlu1 %6619  ;;  %v6964_v50 = vsel %vm3056_vm5, %v6900_v10, %v15738_v8  ;;  %v8677_v8 = vld [vmem:[#allocation2 + $0x270] sm:$0xff] }
 0x8fc   :  { %v7217_v62 = vsel %vm3316_vm9, %v7153_v28, %v6620_v57  ;;  %v6366_v58 = vpop.permute.xlu0 %6365  ;;  %v7028_v18 = vsel %vm3121_vm6, %v6964_v50, %v15739_v61  ;;  %v4550_v28 = vld [vmem:[#allocation2 + $0x350] sm:$0xff]  ;;  %v15750_v50 = vld [vmem:[#allocation175_spill] sm:$0xff] }
 0x8fd   :  { %6145 = vrot.lane.b32.xlu1 %v4548_v37, %s8700_s29  ;;  %v8447_v25 = vpop.f32.mrb[6].mxu1  ;;  %8499 = vmatprep.mubr.msk.f32.mxu1 %vm3397_vm10, %v7217_v62  ;;  %v7154_v4 = vsel %vm3251_vm8, %v7090_v5, %v6366_v58  ;;  %v4549_v62 = vld [vmem:[#allocation2 + $0x348] sm:$0xff] }
 0x8fe   :  { %v7549_v47 = vadd.f32 %v8447_v25, %v13561_v60  ;;  %6143 = vrot.lane.b32.xlu0 %v4547_v41, %s8700_s29  ;;  %v7543_v42 = vpop.f32.mrb[7].mxu1  ;;  %v15740_v25 = vld [vmem:[#allocation348_spill] sm:$0xff] }
 0x8ff   :  { %v7544_v3 = vadd.f32 %v13561_v60, %v7543_v42  ;;  %v6112_v44 = vpop.permute.xlu1 %6111  ;;  %v4614_v42 = vld [vmem:[#allocation2 + $0x351] sm:$0xff] }
 0x900   :  { %v7903_v34 = vadd.f32 %v7839_v35, %v7549_v47  ;;  %v6622_v20 = vpop.permute.xlu0 %6621  ;;  %v7091_v29 = vsel %vm3186_vm7, %v7027_v17, %v6112_v44  ;;  %v6773_v35 = vsel %vm20_vm0, %v8675_v51, %v15740_v25  ;;  %v4613_v44 = vld [vmem:[#allocation2 + $0x349] sm:$0xff] }
 0x901   :  { %v7902_v43 = vadd.f32 %v7838_v19, %v7544_v3  ;;  %v7218_v2 = vsel %vm3316_vm9, %v7154_v4, %v6622_v20  ;;  %6401 = vrot.lane.b32.xlu1 %v4612_v21, %s8701_s30  ;;  %v6837_v47 = vsel %vm2926_vm3, %v6773_v35, %v15741_v27  ;;  %v15742_v19 = vld [vmem:[#allocation24_spill] sm:$0xff]  ;;  %v15743_v4 = vld [vmem:[#allocation143_spill] sm:$0xff] }
 0x902   :  { %7967 = vst.msk [vmem:[%s14484_s5 + $0x38] sm:$0xff] %vm20_vm0, %v7903_v34  ;;  %6399 = vrot.lane.b32.xlu0 %v4611_v40, %s8701_s30  ;;  %8500 = vmatmul.mubr.msk.f32.gmra.mrb[42].mxu1 %vm3397_vm10, %v7218_v2  ;;  %v6901_v5 = vsel %vm2991_vm4, %v6837_v47, %v15742_v19  ;;  %v15744_v21 = vld [vmem:[#allocation379_spill] sm:$0xff]  ;;  %v4678_v40 = vld [vmem:[#allocation2 + $0x352] sm:$0xff]  ;;  %v15756_v35 = vld [vmem:[#allocation240_spill] sm:$0xff] }
 0x903   :  { %7966 = vst.msk [vmem:[%s14484_s5 + $0x30] sm:$0xff] %vm20_vm0, %v7902_v43  ;;  %v6368_v0 = vpop.permute.xlu1 %6367  ;;  %v6965_v34 = vsel %vm3056_vm5, %v6901_v5, %v15743_v4  ;;  %v6774_v43 = vsel %vm20_vm0, %v8676_v36, %v15745_v1  ;;  %v15757_v47 = vld [vmem:[#allocation78_spill] sm:$0xff]  ;;  %v7844_v1 = vld [vmem:[%s14479_s0 + $0x60] sm:$0xff] }
 0x904   :  { %v6114_v59 = vpop.permute.xlu0 %6113  ;;  %v7155_v53 = vsel %vm3251_vm8, %v7091_v29, %v6368_v0  ;;  %v7029_v9 = vsel %vm3121_vm6, %v6965_v34, %v15744_v21  ;;  %v6838_v32 = vsel %vm2926_vm3, %v6774_v43, %v15746_v52  ;;  %v4677_v0 = vld [vmem:[#allocation2 + $0x34a] sm:$0xff] }
 0x905   :  { %5891 = vrot.lane.b32.xlu1 %v4485_v30, %s8699_s28  ;;  %v7092_v57 = vsel %vm3186_vm7, %v7028_v18, %v6114_v59  ;;  %v6902_v46 = vsel %vm2991_vm4, %v6838_v32, %v15747_v33  ;;  %v15751_v18 = vld [vmem:[#allocation16_spill] sm:$0xff] }
 0x906   :  { %6655 = vrot.lane.b32.xlu0 %v4485_v30, %s8702_s1  ;;  %v6966_v17 = vsel %vm3056_vm5, %v6902_v46, %v15748_v16  ;;  %v7845_v34 = vld [vmem:[%s14479_s0 + $0x68] sm:$0xff] }
 0x907   :  { %v6624_v45 = vpop.permute.xlu1 %6623  ;;  %v7030_v29 = vsel %vm3121_vm6, %v6966_v17, %v15749_v11  ;;  %v15762_v17 = vld [vmem:[#allocation79_spill] sm:$0xff]  ;;  %v15763_v11 = vld [vmem:[#allocation201_spill] sm:$0xff] }
 0x908   :  { %v7219_v15 = vsel %vm3316_vm9, %v7155_v53, %v6624_v45  ;;  %v6370_v6 = vpop.permute.xlu0 %6369  ;;  %v7842_v53 = vld [vmem:[%s14479_s0 + $0x50] sm:$0xff] }
 0x909   :  { %5893 = vrot.lane.b32.xlu1 %v4486_v14, %s8699_s28  ;;  %v8450_v24 = vpop.f32.mrb[8].mxu1  ;;  %8502 = vmatprep.mubr.msk.f32.mxu1 %vm3397_vm10, %v7219_v15  ;;  %v7156_v58 = vsel %vm3251_vm8, %v7092_v57, %v6370_v6  ;;  %v15753_v57 = vld [vmem:[#allocation374_spill] sm:$0xff] }
 0x90a   :  { %v7559_v55 = vadd.f32 %v8450_v24, %v13561_v60  ;;  %6657 = vrot.lane.b32.xlu0 %v4486_v14, %s8702_s1  ;;  %v7553_v23 = vpop.f32.mrb[9].mxu1  ;;  %v6775_v24 = vsel %vm20_vm0, %v8677_v8, %v15750_v50 }
 0x90b   :  { %v7554_v12 = vadd.f32 %v13561_v60, %v7553_v23  ;;  %v6116_v56 = vpop.permute.xlu1 %6115  ;;  %v15752_v23 = vld [vmem:[#allocation249_spill] sm:$0xff] }
 0x90c   :  { %v7905_v37 = vadd.f32 %v7841_v13, %v7559_v55  ;;  %v6626_v49 = vpop.permute.xlu0 %6625  ;;  %v7093_v2 = vsel %vm3186_vm7, %v7029_v9, %v6116_v56  ;;  %v6839_v55 = vsel %vm2926_vm3, %v6775_v24, %v15751_v18  ;;  %v15767_v24 = vld [vmem:[#allocation306_spill] sm:$0xff] }
 0x90d   :  { %v7904_v41 = vadd.f32 %v7840_v39, %v7554_v12  ;;  %v7220_v54 = vsel %vm3316_vm9, %v7156_v58, %v6626_v49  ;;  %6149 = vrot.lane.b32.xlu1 %v4550_v28, %s8700_s29  ;;  %v6903_v39 = vsel %vm2991_vm4, %v6839_v55, %v15752_v23  ;;  %v15755_v49 = vld [vmem:[#allocation7_spill] sm:$0xff]  ;;  %v15768_v55 = vld [vmem:[#allocation33_spill] sm:$0xff] }
 0x90e   :  { %7969 = vst.msk [vmem:[%s14484_s5 + $0x48] sm:$0xff] %vm20_vm0, %v7905_v37  ;;  %6147 = vrot.lane.b32.xlu0 %v4549_v62, %s8700_s29  ;;  %8503 = vmatmul.mubr.msk.f32.gmra.mrb[44].mxu1 %vm3397_vm10, %v7220_v54  ;;  %v6967_v12 = vsel %vm3056_vm5, %v6903_v39, %v15753_v57  ;;  %v15754_v62 = vld [vmem:[#allocation206_spill] sm:$0xff]  ;;  %v15769_v57 = vld [vmem:[#allocation380_spill] sm:$0xff] }
 0x90f   :  { %7968 = vst.msk [vmem:[%s14484_s5 + $0x40] sm:$0xff] %vm20_vm0, %v7904_v41  ;;  %v6372_v3 = vpop.permute.xlu1 %6371  ;;  %v7031_v58 = vsel %vm3121_vm6, %v6967_v12, %v15754_v62  ;;  %v8678_v37 = vld [vmem:[#allocation2 + $0x278] sm:$0xff] }
 0x910   :  { %v6118_v20 = vpop.permute.xlu0 %6117  ;;  %v7157_v26 = vsel %vm3251_vm8, %v7093_v2, %v6372_v3  ;;  %v6776_v51 = vsel %vm20_vm0, %v8678_v37, %v15755_v49  ;;  %v15758_v3 = vld [vmem:[#allocation200_spill] sm:$0xff] }
 0x911   :  { %6405 = vrot.lane.b32.xlu1 %v4614_v42, %s8701_s30  ;;  %v7094_v45 = vsel %vm3186_vm7, %v7030_v29, %v6118_v20  ;;  %v6840_v41 = vsel %vm2926_vm3, %v6776_v51, %v15756_v35  ;;  %v15759_v20 = vld [vmem:[#allocation149_spill] sm:$0xff] }
 0x912   :  { %6403 = vrot.lane.b32.xlu0 %v4613_v44, %s8701_s30  ;;  %v6904_v42 = vsel %vm2991_vm4, %v6840_v41, %v15757_v47 }
 0x913   :  { %v6628_v22 = vpop.permute.xlu1 %6627  ;;  %v6968_v44 = vsel %vm3056_vm5, %v6904_v42, %v15758_v3 }
 0x914   :  { %v7221_v59 = vsel %vm3316_vm9, %v7157_v26, %v6628_v22  ;;  %v6374_v30 = vpop.permute.xlu0 %6373  ;;  %v7032_v21 = vsel %vm3121_vm6, %v6968_v44, %v15759_v20  ;;  %v8679_v22 = vld [vmem:[#allocation2 + $0x288] sm:$0xff]  ;;  %v15772_v44 = vld [vmem:[#allocation307_spill] sm:$0xff]  ;;  %v15773_v20 = vld [vmem:[#allocation34_spill] sm:$0xff] }
 0x915   :  { %6661 = vrot.lane.b32.xlu1 %v4678_v40, %s8702_s1  ;;  %v8453_v38 = vpop.f32.mrb[10].mxu1  ;;  %8505 = vmatprep.mubr.msk.f32.mxu1 %vm3397_vm10, %v7221_v59  ;;  %v7158_v15 = vsel %vm3251_vm8, %v7094_v45, %v6374_v30  ;;  %v15761_v30 = vld [vmem:[#allocation241_spill] sm:$0xff] }
 0x916   :  { %v7569_v31 = vadd.f32 %v8453_v38, %v13561_v60  ;;  %6659 = vrot.lane.b32.xlu0 %v4677_v0, %s8702_s1  ;;  %v7563_v63 = vpop.f32.mrb[11].mxu1  ;;  %v15760_v0 = vld [vmem:[#allocation8_spill] sm:$0xff]  ;;  %v8680_v45 = vld [vmem:[#allocation2 + $0x290] sm:$0xff] }
 0x917   :  { %v7564_v48 = vadd.f32 %v13561_v60, %v7563_v63  ;;  %v6120_v10 = vpop.permute.xlu1 %6119  ;;  %v6777_v33 = vsel %vm20_vm0, %v8679_v22, %v15760_v0  ;;  %v15764_v63 = vld [vmem:[#allocation39_spill] sm:$0xff] }
 0x918   :  { %v7907_v6 = vadd.f32 %v7843_v7, %v7569_v31  ;;  %v6630_v14 = vpop.permute.xlu0 %6629  ;;  %v7095_v25 = vsel %vm3186_vm7, %v7031_v58, %v6120_v10  ;;  %v6841_v16 = vsel %vm2926_vm3, %v6777_v33, %v15761_v30  ;;  %v7846_v58 = vld [vmem:[%s14479_s0 + $0x70] sm:$0xff]  ;;  %v15777_v33 = vld [vmem:[#allocation134_spill] sm:$0xff] }
 0x919   :  { %v7906_v13 = vadd.f32 %v7842_v53, %v7564_v48  ;;  %v7222_v61 = vsel %vm3316_vm9, %v7158_v15, %v6630_v14  ;;  %v6905_v38 = vsel %vm2991_vm4, %v6841_v16, %v15762_v17  ;;  %v15765_v48 = vld [vmem:[#allocation232_spill] sm:$0xff]  ;;  %v15778_v16 = vld [vmem:[#allocation258_spill] sm:$0xff] }
 0x91a   :  { %7971 = vst.msk [vmem:[%s14484_s5 + $0x58] sm:$0xff] %vm20_vm0, %v7907_v6  ;;  %8506 = vmatmul.mubr.msk.f32.gmra.mrb[46].mxu1 %vm3397_vm10, %v7222_v61  ;;  %v6969_v29 = vsel %vm3056_vm5, %v6905_v38, %v15763_v11  ;;  %v6778_v10 = vsel %vm20_vm0, %v8680_v45, %v15765_v48  ;;  %v15766_v6 = vld [vmem:[#allocation70_spill] sm:$0xff]  ;;  %v15779_v11 = vld [vmem:[#allocation207_spill] sm:$0xff] }
 0x91b   :  { %7970 = vst.msk [vmem:[%s14484_s5 + $0x50] sm:$0xff] %vm20_vm0, %v7906_v13  ;;  %v6376_v28 = vpop.permute.xlu1 %6375  ;;  %v7033_v53 = vsel %vm3121_vm6, %v6969_v29, %v15764_v63  ;;  %v6842_v14 = vsel %vm2926_vm3, %v6778_v10, %v15766_v6 }
 0x91c   :  { %v6122_v56 = vpop.permute.xlu0 %6121  ;;  %v7159_v54 = vsel %vm3251_vm8, %v7095_v25, %v6376_v28  ;;  %v6906_v13 = vsel %vm2991_vm4, %v6842_v14, %v15767_v24  ;;  %v7847_v28 = vld [vmem:[%s14479_s0 + $0x78] sm:$0xff] }
 0x91d   :  { %v7096_v43 = vsel %vm3186_vm7, %v7032_v21, %v6122_v56  ;;  %v6970_v23 = vsel %vm3056_vm5, %v6906_v13, %v15768_v55 }
 0x91e   :  { %v7034_v12 = vsel %vm3121_vm6, %v6970_v23, %v15769_v57  ;;  %v15781_v23 = vld [vmem:[#allocation299_spill] sm:$0xff] }
 0x91f   :  { %v6632_v27 = vpop.permute.xlu1 %6631  ;;  %v15782_v57 = vld [vmem:[#allocation135_spill] sm:$0xff] }
 0x920   :  { %v7223_v19 = vsel %vm3316_vm9, %v7159_v54, %v6632_v27  ;;  %v6378_v5 = vpop.permute.xlu0 %6377  ;;  %v8681_v54 = vld [vmem:[#allocation2 + $0x2a0] sm:$0xff]  ;;  %v15770_v27 = vld [vmem:[#allocation233_spill] sm:$0xff] }
 0x921   :  { %v8456_v4 = vpop.f32.mrb[12].mxu1  ;;  %8508 = vmatprep.mubr.msk.f32.mxu1 %vm3397_vm10, %v7223_v19  ;;  %v7160_v52 = vsel %vm3251_vm8, %v7096_v43, %v6378_v5  ;;  %v6779_v47 = vsel %vm20_vm0, %v8681_v54, %v15770_v27  ;;  %v15771_v5 = vld [vmem:[#allocation71_spill] sm:$0xff]  ;;  %v8682_v43 = vld [vmem:[#allocation2 + $0x2a8] sm:$0xff] }
 0x922   :  { %v7579_v9 = vadd.f32 %v8456_v4, %v13561_v60  ;;  %v7573_v36 = vpop.f32.mrb[13].mxu1  ;;  %v6843_v3 = vsel %vm2926_vm3, %v6779_v47, %v15771_v5 }
 0x923   :  { %v7574_v2 = vadd.f32 %v13561_v60, %v7573_v36  ;;  %v6124_v40 = vpop.permute.xlu1 %6123  ;;  %v6907_v4 = vsel %vm2991_vm4, %v6843_v3, %v15772_v44  ;;  %v15774_v36 = vld [vmem:[#allocation264_spill] sm:$0xff] }
 0x924   :  { %v7909_v32 = vadd.f32 %v7845_v34, %v7579_v9  ;;  %v6634_v26 = vpop.permute.xlu0 %6633  ;;  %v7097_v15 = vsel %vm3186_vm7, %v7033_v53, %v6124_v40  ;;  %v6971_v21 = vsel %vm3056_vm5, %v6907_v4, %v15773_v20  ;;  %v7848_v53 = vld [vmem:[%s14479_s0 + $0x80] sm:$0xff] }
 0x925   :  { %v7908_v46 = vadd.f32 %v7844_v1, %v7574_v2  ;;  %v7224_v59 = vsel %vm3316_vm9, %v7160_v52, %v6634_v26  ;;  %v7035_v1 = vsel %vm3121_vm6, %v6971_v21, %v15774_v36  ;;  %v15775_v2 = vld [vmem:[#allocation62_spill] sm:$0xff] }
 0x926   :  { %7973 = vst.msk [vmem:[%s14484_s5 + $0x68] sm:$0xff] %vm20_vm0, %v7909_v32  ;;  %8509 = vmatmul.mubr.msk.f32.gmra.mrb[48].mxu1 %vm3397_vm10, %v7224_v59  ;;  %v6780_v40 = vsel %vm20_vm0, %v8682_v43, %v15775_v2  ;;  %v15776_v32 = vld [vmem:[#allocation298_spill] sm:$0xff] }
 0x927   :  { %7972 = vst.msk [vmem:[%s14484_s5 + $0x60] sm:$0xff] %vm20_vm0, %v7908_v46  ;;  %v6380_v7 = vpop.permute.xlu1 %6379  ;;  %v6844_v26 = vsel %vm2926_vm3, %v6780_v40, %v15776_v32 }
 0x928   :  { %v6126_v31 = vpop.permute.xlu0 %6125  ;;  %v7161_v8 = vsel %vm3251_vm8, %v7097_v15, %v6380_v7  ;;  %v6908_v46 = vsel %vm2991_vm4, %v6844_v26, %v15777_v33  ;;  %v7849_v7 = vld [vmem:[%s14479_s0 + $0x88] sm:$0xff] }
 0x929   :  { %v7098_v37 = vsel %vm3186_vm7, %v7034_v12, %v6126_v31  ;;  %v6972_v17 = vsel %vm3056_vm5, %v6908_v46, %v15778_v16  ;;  %v7853_v16 = vld [vmem:[%s14479_s0 + $0xa8] sm:$0xff] }
 0x92a   :  { %v7036_v29 = vsel %vm3121_vm6, %v6972_v17, %v15779_v11  ;;  %v8685_v17 = vld [vmem:[#allocation2 + $0x2d0] sm:$0xff] }
 0x92b   :  { %v6636_v50 = vpop.permute.xlu1 %6635 }
 0x92c   :  { %v7225_v61 = vsel %vm3316_vm9, %v7161_v8, %v6636_v50  ;;  %v6382_v18 = vpop.permute.xlu0 %6381 }
 0x92d   :  { %v8459_v39 = vpop.f32.mrb[14].mxu1  ;;  %8511 = vmatprep.mubr.msk.f32.mxu1 %vm3397_vm10, %v7225_v61  ;;  %v7162_v25 = vsel %vm3251_vm8, %v7098_v37, %v6382_v18  ;;  %v8683_v61 = vld [vmem:[#allocation2 + $0x2b8] sm:$0xff]  ;;  %v15780_v18 = vld [vmem:[#allocation63_spill] sm:$0xff] }
 0x92e   :  { %v7589_v56 = vadd.f32 %v8459_v39, %v13561_v60  ;;  %v7583_v62 = vpop.f32.mrb[15].mxu1  ;;  %v6781_v55 = vsel %vm20_vm0, %v8683_v61, %v15780_v18  ;;  %v15793_v61 = vld [vmem:[#allocation118_spill] sm:$0xff] }
 0x92f   :  { %v7584_v49 = vadd.f32 %v13561_v60, %v7583_v62  ;;  %v6128_v51 = vpop.permute.xlu1 %6127  ;;  %v6845_v39 = vsel %vm2926_vm3, %v6781_v55, %v15781_v23  ;;  %v15783_v62 = vld [vmem:[#allocation259_spill] sm:$0xff]  ;;  %v15794_v23 = vld [vmem:[#allocation357_spill] sm:$0xff] }
 0x930   :  { %v7911_v35 = vadd.f32 %v7847_v28, %v7589_v56  ;;  %v6638_v41 = vpop.permute.xlu0 %6637  ;;  %v7099_v52 = vsel %vm3186_vm7, %v7035_v1, %v6128_v51  ;;  %v6909_v12 = vsel %vm2991_vm4, %v6845_v39, %v15782_v57  ;;  %v8684_v51 = vld [vmem:[#allocation2 + $0x2c0] sm:$0xff]  ;;  %v15788_v1 = vld [vmem:[#allocation88_spill] sm:$0xff] }
 0x931   :  { %v7910_v42 = vadd.f32 %v7846_v58, %v7584_v49  ;;  %v7226_v19 = vsel %vm3316_vm9, %v7162_v25, %v6638_v41  ;;  %v6973_v58 = vsel %vm3056_vm5, %v6909_v12, %v15783_v62  ;;  %v7851_v49 = vld [vmem:[%s14479_s0 + $0x98] sm:$0xff]  ;;  %v15785_v41 = vld [vmem:[#allocation40_spill] sm:$0xff] }
 0x932   :  { %7975 = vst.msk [vmem:[%s14484_s5 + $0x78] sm:$0xff] %vm20_vm0, %v7911_v35  ;;  %8512 = vmatmul.mubr.msk.f32.gmra.mrb[50].mxu1 %vm3397_vm10, %v7226_v19  ;;  %v15784_v25 = vld [vmem:[#allocation290_spill] sm:$0xff]  ;;  %v7037_v54 = vsel %vm3121_vm6, %v6973_v58, %v15785_v41  ;;  %v15795_v12 = vld [vmem:[#allocation192_spill] sm:$0xff] }
 0x933   :  { %7974 = vst.msk [vmem:[%s14484_s5 + $0x70] sm:$0xff] %vm20_vm0, %v7910_v42  ;;  %v6384_v34 = vpop.permute.xlu1 %6383  ;;  %v6782_v35 = vsel %vm20_vm0, %v8684_v51, %v15784_v25  ;;  %v7850_v42 = vld [vmem:[%s14479_s0 + $0x90] sm:$0xff]  ;;  %v15786_v19 = vld [vmem:[#allocation126_spill] sm:$0xff] }
 0x934   :  { %v6130_v9 = vpop.permute.xlu0 %6129  ;;  %v7163_v22 = vsel %vm3251_vm8, %v7099_v52, %v6384_v34  ;;  %v6846_v5 = vsel %vm2926_vm3, %v6782_v35, %v15786_v19  ;;  %v15787_v34 = vld [vmem:[#allocation365_spill] sm:$0xff]  ;;  %v7855_v19 = vld [vmem:[%s14479_s0 + $0xb8] sm:$0xff] }
 0x935   :  { %v7100_v45 = vsel %vm3186_vm7, %v7036_v29, %v6130_v9  ;;  %v6910_v20 = vsel %vm2991_vm4, %v6846_v5, %v15787_v34 }
 0x936   :  { %v6974_v43 = vsel %vm3056_vm5, %v6910_v20, %v15788_v1  ;;  %v15797_v1 = vld [vmem:[#allocation119_spill] sm:$0xff] }
 0x937   :  { %v6640_v0 = vpop.permute.xlu1 %6639 }
 0x938   :  { %v7227_v59 = vsel %vm3316_vm9, %v7163_v22, %v6640_v0  ;;  %v6386_v30 = vpop.permute.xlu0 %6385 }
 0x939   :  { %v8462_v38 = vpop.f32.mrb[16].mxu1  ;;  %8514 = vmatprep.mubr.msk.f32.mxu1 %vm3397_vm10, %v7227_v59  ;;  %v7164_v15 = vsel %vm3251_vm8, %v7100_v45, %v6386_v30 }
 0x93a   :  { %v7599_v31 = vadd.f32 %v8462_v38, %v13561_v60  ;;  %v7593_v63 = vpop.f32.mrb[17].mxu1  ;;  %v15789_v38 = vld [vmem:[#allocation291_spill] sm:$0xff] }
 0x93b   :  { %v7594_v48 = vadd.f32 %v13561_v60, %v7593_v63  ;;  %v5878_v10 = vpop.permute.xlu1 %5877  ;;  %v15790_v63 = vld [vmem:[#allocation127_spill] sm:$0xff] }
 0x93c   :  { %v7913_v6 = vadd.f32 %v7849_v7, %v7599_v31  ;;  %v6642_v14 = vpop.permute.xlu0 %6641  ;;  %v7038_v52 = vsel %vm3121_vm6, %v6974_v43, %v5878_v10  ;;  %v6783_v7 = vsel %vm20_vm0, %v8685_v17, %v15789_v38  ;;  %v7852_v31 = vld [vmem:[%s14479_s0 + $0xa0] sm:$0xff]  ;;  %v15791_v10 = vld [vmem:[#allocation366_spill] sm:$0xff]  ;;  %v15802_v17 = vld [vmem:[#allocation184_spill] sm:$0xff] }
 0x93d   :  { %v7912_v8 = vadd.f32 %v7848_v53, %v7594_v48  ;;  %v7228_v50 = vsel %vm3316_vm9, %v7164_v15, %v6642_v14  ;;  %v6847_v53 = vsel %vm2926_vm3, %v6783_v7, %v15790_v63 }
 0x93e   :  { %7977 = vst.msk [vmem:[%s14484_s5 + $0x88] sm:$0xff] %vm20_vm0, %v7913_v6  ;;  %8515 = vmatmul.mubr.msk.f32.gmra.mrb[52].mxu1 %vm3397_vm10, %v7228_v50  ;;  %v6911_v15 = vsel %vm2991_vm4, %v6847_v53, %v15791_v10 }
 0x93f   :  { %7976 = vst.msk [vmem:[%s14484_s5 + $0x80] sm:$0xff] %vm20_vm0, %v7912_v8  ;;  %v6134_v24 = vpop.permute.xlu1 %6133  ;;  %v15792_v8 = vld [vmem:[#allocation89_spill] sm:$0xff] }
 0x940   :  { %v6132_v13 = vpop.permute.xlu0 %6131  ;;  %v7102_v32 = vsel %vm3186_vm7, %v7038_v52, %v6134_v24  ;;  %v6975_v50 = vsel %vm3056_vm5, %v6911_v15, %v15792_v8 }
 0x941   :  { %v7101_v3 = vsel %vm3186_vm7, %v7037_v54, %v6132_v13  ;;  %v8686_v13 = vld [vmem:[#allocation2 + $0x2d8] sm:$0xff] }
 0x942   :  { %v6784_v18 = vsel %vm20_vm0, %v8686_v13, %v15793_v61 }
 0x943   :  { %v6390_v28 = vpop.permute.xlu1 %6389  ;;  %v6848_v39 = vsel %vm2926_vm3, %v6784_v18, %v15794_v23 }
 0x944   :  { %v6388_v56 = vpop.permute.xlu0 %6387  ;;  %v7166_v22 = vsel %vm3251_vm8, %v7102_v32, %v6390_v28  ;;  %v15799_v32 = vld [vmem:[#allocation193_spill] sm:$0xff] }
 0x945   :  { %v8465_v37 = vpop.f32.mrb[18].mxu1  ;;  %v7165_v21 = vsel %vm3251_vm8, %v7101_v3, %v6388_v56  ;;  %v6912_v56 = vsel %vm2991_vm4, %v6848_v39, %v15795_v12 }
 0x946   :  { %v7609_v27 = vadd.f32 %v8465_v37, %v13561_v60  ;;  %v7603_v47 = vpop.f32.mrb[19].mxu1  ;;  %v15796_v37 = vld [vmem:[#allocation316_spill] sm:$0xff] }
 0x947   :  { %v7604_v44 = vadd.f32 %v13561_v60, %v7603_v47  ;;  %v5880_v4 = vpop.permute.xlu1 %5879 }
 0x948   :  { %v7915_v9 = vadd.f32 %v7851_v49, %v7609_v27  ;;  %v6644_v36 = vpop.permute.xlu0 %6643  ;;  %v7039_v55 = vsel %vm3121_vm6, %v6975_v50, %v5880_v4  ;;  %v6976_v49 = vsel %vm3056_vm5, %v6912_v56, %v15796_v37 }
 0x949   :  { %v7914_v2 = vadd.f32 %v7850_v42, %v7604_v44  ;;  %v7229_v40 = vsel %vm3316_vm9, %v7165_v21, %v6644_v36  ;;  %v7854_v44 = vld [vmem:[%s14479_s0 + $0xb0] sm:$0xff]  ;;  %v8687_v36 = vld [vmem:[#allocation2 + $0x2e8] sm:$0xff] }
 0x94a   :  { %7979 = vst.msk [vmem:[%s14484_s5 + $0x98] sm:$0xff] %vm20_vm0, %v7915_v9  ;;  %8517 = vmatprep.mubr.msk.f32.mxu1 %vm3397_vm10, %v7229_v40  ;;  %v6785_v43 = vsel %vm20_vm0, %v8687_v36, %v15797_v1 }
 0x94b   :  { %7978 = vst.msk [vmem:[%s14484_s5 + $0x90] sm:$0xff] %vm20_vm0, %v7914_v2  ;;  %v5882_v26 = vpop.permute.xlu1 %5881  ;;  %v15798_v2 = vld [vmem:[#allocation358_spill] sm:$0xff] }
 0x94c   :  { %v6646_v0 = vpop.permute.xlu0 %6645  ;;  %v7040_v25 = vsel %vm3121_vm6, %v6976_v49, %v5882_v26  ;;  %v6849_v40 = vsel %vm2926_vm3, %v6785_v43, %v15798_v2  ;;  %v15806_v49 = vld [vmem:[#allocation185_spill] sm:$0xff] }
 0x94d   :  { %v7230_v33 = vsel %vm3316_vm9, %v7166_v22, %v6646_v0  ;;  %v6913_v26 = vsel %vm2991_vm4, %v6849_v40, %v15799_v32  ;;  %v15800_v0 = vld [vmem:[#allocation317_spill] sm:$0xff]  ;;  %v15811_v40 = vld [vmem:[#allocation250_spill] sm:$0xff] }
 0x94e   :  { %8518 = vmatmul.mubr.msk.f32.gmra.mrb[54].mxu1 %vm3397_vm10, %v7230_v33  ;;  %v6977_v33 = vsel %vm3056_vm5, %v6913_v26, %v15800_v0  ;;  %v15812_v0 = vld [vmem:[#allocation375_spill] sm:$0xff] }
 0x94f   :  { %v6138_v46 = vpop.permute.xlu1 %6137 }
 0x950   :  { %v6136_v59 = vpop.permute.xlu0 %6135  ;;  %v7104_v35 = vsel %vm3186_vm7, %v7040_v25, %v6138_v46  ;;  %v8688_v46 = vld [vmem:[#allocation2 + $0x2f0] sm:$0xff] }
 0x951   :  { %v8468_v30 = vpop.f32.mrb[20].mxu1  ;;  %v7103_v28 = vsel %vm3186_vm7, %v7039_v55, %v6136_v59  ;;  %v15801_v59 = vld [vmem:[#allocation349_spill] sm:$0xff] }
 0x952   :  { %v7619_v11 = vadd.f32 %v8468_v30, %v13561_v60  ;;  %v7613_v29 = vpop.f32.mrb[21].mxu1  ;;  %v6786_v30 = vsel %vm20_vm0, %v8688_v46, %v15801_v59 }
 0x953   :  { %v7614_v45 = vadd.f32 %v13561_v60, %v7613_v29  ;;  %v6394_v48 = vpop.permute.xlu1 %6393  ;;  %v6850_v38 = vsel %vm2926_vm3, %v6786_v30, %v15802_v17  ;;  %v15803_v29 = vld [vmem:[#allocation25_spill] sm:$0xff] }
 0x954   :  { %v7917_v6 = vadd.f32 %v7853_v16, %v7619_v11  ;;  %v6392_v14 = vpop.permute.xlu0 %6391  ;;  %v7168_v54 = vsel %vm3251_vm8, %v7104_v35, %v6394_v48  ;;  %v15807_v35 = vld [vmem:[#allocation26_spill] sm:$0xff] }
 0x955   :  { %v7916_v24 = vadd.f32 %v7852_v31, %v7614_v45  ;;  %v7167_v62 = vsel %vm3251_vm8, %v7103_v28, %v6392_v14  ;;  %v6914_v31 = vsel %vm2991_vm4, %v6850_v38, %v15803_v29  ;;  %v15804_v45 = vld [vmem:[#allocation144_spill] sm:$0xff] }
 0x956   :  { %7981 = vst.msk [vmem:[%s14484_s5 + $0xa8] sm:$0xff] %vm20_vm0, %v7917_v6  ;;  %v6978_v48 = vsel %vm3056_vm5, %v6914_v31, %v15804_v45  ;;  %v7857_v6 = vld [vmem:[%s14479_s0 + $0xc8] sm:$0xff]  ;;  %v15813_v45 = vld [vmem:[#allocation177_spill] sm:$0xff] }
 0x957   :  { %7980 = vst.msk [vmem:[%s14484_s5 + $0xa0] sm:$0xff] %vm20_vm0, %v7916_v24  ;;  %v5884_v57 = vpop.permute.xlu1 %5883  ;;  %v7856_v24 = vld [vmem:[%s14479_s0 + $0xc0] sm:$0xff] }
 0x958   :  { %v6648_v58 = vpop.permute.xlu0 %6647  ;;  %v7041_v16 = vsel %vm3121_vm6, %v6977_v33, %v5884_v57 }
 0x959   :  { %v7231_v51 = vsel %vm3316_vm9, %v7167_v62, %v6648_v58  ;;  %v8689_v62 = vld [vmem:[#allocation2 + $0x300] sm:$0xff]  ;;  %v15805_v58 = vld [vmem:[#allocation350_spill] sm:$0xff] }
 0x95a   :  { %8520 = vmatprep.mubr.msk.f32.mxu1 %vm3397_vm10, %v7231_v51  ;;  %v6787_v37 = vsel %vm20_vm0, %v8689_v62, %v15805_v58  ;;  %v15818_v62 = vld [vmem:[#allocation80_spill] sm:$0xff] }
 0x95b   :  { %v5886_v41 = vpop.permute.xlu1 %5885  ;;  %v6851_v51 = vsel %vm2926_vm3, %v6787_v37, %v15806_v49  ;;  %v15819_v37 = vld [vmem:[#allocation376_spill] sm:$0xff] }
 0x95c   :  { %v6650_v27 = vpop.permute.xlu0 %6649  ;;  %v7042_v14 = vsel %vm3121_vm6, %v6978_v48, %v5886_v41  ;;  %v6915_v41 = vsel %vm2991_vm4, %v6851_v51, %v15807_v35 }
 0x95d   :  { %v7232_v47 = vsel %vm3316_vm9, %v7168_v54, %v6650_v27  ;;  %v8471_v42 = vpop.f32.mrb[22].mxu1  ;;  %v15808_v27 = vld [vmem:[#allocation145_spill] sm:$0xff] }
 0x95e   :  { %v7629_v5 = vadd.f32 %v8471_v42, %v13561_v60  ;;  %v7623_v3 = vpop.f32.mrb[23].mxu1  ;;  %8521 = vmatmul.mubr.msk.f32.gmra.mrb[56].mxu1 %vm3397_vm10, %v7232_v47  ;;  %v6979_v47 = vsel %vm3056_vm5, %v6915_v41, %v15808_v27 }
 0x95f   :  { %v7624_v4 = vadd.f32 %v13561_v60, %v7623_v3  ;;  %v6142_v34 = vpop.permute.xlu1 %6141  ;;  %v15809_v3 = vld [vmem:[#allocation176_spill] sm:$0xff] }
 0x960   :  { %v7919_v20 = vadd.f32 %v7855_v19, %v7629_v5  ;;  %v6140_v21 = vpop.permute.xlu0 %6139  ;;  %v7106_v13 = vsel %vm3186_vm7, %v7042_v14, %v6142_v34  ;;  %v7859_v19 = vld [vmem:[%s14479_s0 + $0xd8] sm:$0xff]  ;;  %v8690_v5 = vld [vmem:[#allocation2 + $0x308] sm:$0xff]  ;;  %v7860_v14 = vld [vmem:[%s14479_s0 + $0xe0] sm:$0xff] }
 0x961   :  { %v7918_v9 = vadd.f32 %v7854_v44, %v7624_v4  ;;  %v7105_v7 = vsel %vm3186_vm7, %v7041_v16, %v6140_v21  ;;  %v6788_v44 = vsel %vm20_vm0, %v8690_v5, %v15809_v3  ;;  %v7858_v21 = vld [vmem:[%s14479_s0 + $0xd0] sm:$0xff] }
 0x962   :  { %7983 = vst.msk [vmem:[%s14484_s5 + $0xb8] sm:$0xff] %vm20_vm0, %v7919_v20 }
 0x963   :  { %7982 = vst.msk [vmem:[%s14484_s5 + $0xb0] sm:$0xff] %vm20_vm0, %v7918_v9  ;;  %v6398_v52 = vpop.permute.xlu1 %6397  ;;  %v15810_v9 = vld [vmem:[#allocation17_spill] sm:$0xff] }
 0x964   :  { %v6396_v22 = vpop.permute.xlu0 %6395  ;;  %v7170_v55 = vsel %vm3251_vm8, %v7106_v13, %v6398_v52  ;;  %v6852_v36 = vsel %vm2926_vm3, %v6788_v44, %v15810_v9  ;;  %v15815_v13 = vld [vmem:[#allocation18_spill] sm:$0xff] }
 0x965   :  { %v7169_v63 = vsel %vm3251_vm8, %v7105_v7, %v6396_v22  ;;  %v6916_v52 = vsel %vm2991_vm4, %v6852_v36, %v15811_v40  ;;  %v7862_v36 = vld [vmem:[%s14479_s0 + $0xf0] sm:$0xff] }
 0x966   :  { %v6980_v33 = vsel %vm3056_vm5, %v6916_v52, %v15812_v0  ;;  %v7865_v52 = vld [vmem:[%s14479_s0 + $0x108] sm:$0xff] }
 0x967   :  { %v5888_v11 = vpop.permute.xlu1 %5887 }
 0x968   :  { %v6652_v53 = vpop.permute.xlu0 %6651  ;;  %v7043_v4 = vsel %vm3121_vm6, %v6979_v47, %v5888_v11 }
 0x969   :  { %v7233_v10 = vsel %vm3316_vm9, %v7169_v63, %v6652_v53  ;;  %v8474_v15 = vpop.f32.mrb[24].mxu1  ;;  %v7861_v63 = vld [vmem:[%s14479_s0 + $0xe8] sm:$0xff]  ;;  %v8691_v53 = vld [vmem:[#allocation2 + $0x318] sm:$0xff] }
 0x96a   :  { %v7639_v8 = vadd.f32 %v8474_v15, %v13561_v60  ;;  %v7633_v50 = vpop.f32.mrb[25].mxu1  ;;  %8523 = vmatprep.mubr.msk.f32.mxu1 %vm3397_vm10, %v7233_v10  ;;  %v6789_v48 = vsel %vm20_vm0, %v8691_v53, %v15813_v45  ;;  %v14168_v10 = vld [vmem:[%s14483_s4] ss:$0 sm:$0xff] }
 0x96b   :  { %v7634_v61 = vadd.f32 %v13561_v60, %v7633_v50  ;;  %v5890_v18 = vpop.permute.xlu1 %5889  ;;  %v15814_v50 = vld [vmem:[#allocation9_spill] sm:$0xff]  ;;  %v7868_v45 = vld [vmem:[%s14479_s0 + $0x120] sm:$0xff] }
 0x96c   :  { %v7921_v23 = vadd.f32 %v7857_v6, %v7639_v8  ;;  %v6654_v39 = vpop.permute.xlu0 %6653  ;;  %v7044_v30 = vsel %vm3121_vm6, %v6980_v33, %v5890_v18  ;;  %v8693_v8 = vld [vmem:[#allocation2 + $0x320] sm:$0xff] }
 0x96d   :  { %v7920_v28 = vadd.f32 %v7856_v24, %v7634_v61  ;;  %v7234_v57 = vsel %vm3316_vm9, %v7170_v55, %v6654_v39  ;;  %v6790_v24 = vsel %vm20_vm0, %v8693_v8, %v15814_v50  ;;  %v6853_v61 = vsel %vm2926_vm3, %v6789_v48, %v15815_v13  ;;  %v7871_v8 = vld [vmem:[%s14479_s0 + $0x138] sm:$0xff]  ;;  %v7870_v13 = vld [vmem:[%s14479_s0 + $0x130] sm:$0xff] }
 0x96e   :  { %7985 = vst.msk [vmem:[%s14484_s5 + $0xc8] sm:$0xff] %vm20_vm0, %v7921_v23  ;;  %8524 = vmatmul.mubr.msk.f32.gmra.mrb[58].mxu1 %vm3397_vm10, %v7234_v57  ;;  %v15816_v23 = vld [vmem:[#allocation242_spill] sm:$0xff] }
 0x96f   :  { %7984 = vst.msk [vmem:[%s14484_s5 + $0xc0] sm:$0xff] %vm20_vm0, %v7920_v28  ;;  %v6146_v12 = vpop.permute.xlu1 %6145  ;;  %v6854_v39 = vsel %vm2926_vm3, %v6790_v24, %v15816_v23  ;;  %v15817_v28 = vld [vmem:[#allocation251_spill] sm:$0xff] }
 0x970   :  { %v6144_v56 = vpop.permute.xlu0 %6143  ;;  %v6917_v57 = vsel %vm2991_vm4, %v6853_v61, %v15817_v28  ;;  %v6918_v58 = vsel %vm2991_vm4, %v6854_v39, %v15818_v62  ;;  %v7873_v39 = vld [vmem:[%s14479_s0 + $0x148] sm:$0xff] }
 0x971   :  { %v7107_v1 = vsel %vm3186_vm7, %v7043_v4, %v6144_v56  ;;  %v6981_v49 = vsel %vm3056_vm5, %v6917_v57, %v15819_v37 }
 0x973   :  { %v6402_v25 = vpop.permute.xlu1 %6401 }
 0x974   :  { %v6400_v54 = vpop.permute.xlu0 %6399 }
 0x975   :  { %v8477_v42 = vpop.f32.mrb[26].mxu1  ;;  %v7171_v32 = vsel %vm3251_vm8, %v7107_v1, %v6400_v54 }
 0x976   :  { %v7649_v34 = vadd.f32 %v8477_v42, %v13561_v60  ;;  %v7643_v20 = vpop.f32.mrb[27].mxu1 }
 0x977   :  { %v7644_v43 = vadd.f32 %v13561_v60, %v7643_v20  ;;  %v5892_v2 = vpop.permute.xlu1 %5891  ;;  %v7108_v60 = vsel %vm3186_vm7, %v7044_v30, %v6146_v12  ;;  %v7863_v20 = vld [vmem:[%s14479_s0 + $0xf8] sm:$0xff] }
 0x978   :  { %v7923_v26 = vadd.f32 %v7859_v19, %v7649_v34  ;;  %v6656_v22 = vpop.permute.xlu0 %6655  ;;  %v7172_v17 = vsel %vm3251_vm8, %v7108_v60, %v6402_v25  ;;  %v15820_v25 = vld [vmem:[#allocation202_spill] sm:$0xff]  ;;  %v7045_v41 = vsel %vm3121_vm6, %v6981_v49, %v5892_v2 }
 0x979   :  { %v7922_v46 = vadd.f32 %v7858_v21, %v7644_v43  ;;  %v7235_v59 = vsel %vm3316_vm9, %v7171_v32, %v6656_v22  ;;  %v6982_v35 = vsel %vm3056_vm5, %v6918_v58, %v15820_v25  ;;  %v7864_v22 = vld [vmem:[%s14479_s0 + $0x100] sm:$0xff]  ;;  %v7867_v30 = vld [vmem:[%s14479_s0 + $0x118] sm:$0xff] }
 0x97a   :  { %7987 = vst.msk [vmem:[%s14484_s5 + $0xd8] sm:$0xff] %vm20_vm0, %v7923_v26  ;;  %8526 = vmatprep.mubr.msk.f32.mxu1 %vm3397_vm10, %v7235_v59  ;;  %v7875_v49 = vld [vmem:[%s14479_s0 + $0x158] sm:$0xff] }
 0x97b   :  { %7986 = vst.msk [vmem:[%s14484_s5 + $0xd0] sm:$0xff] %vm20_vm0, %v7922_v46  ;;  %v5894_v16 = vpop.permute.xlu1 %5893 }
 0x97c   :  { %v6658_v38 = vpop.permute.xlu0 %6657  ;;  %v7046_v54 = vsel %vm3121_vm6, %v6982_v35, %v5894_v16  ;;  %v7874_v35 = vld [vmem:[%s14479_s0 + $0x150] sm:$0xff] }
 0x97d   :  { %v7236_v7 = vsel %vm3316_vm9, %v7172_v17, %v6658_v38  ;;  %v7866_v17 = vld [vmem:[%s14479_s0 + $0x110] sm:$0xff] }
 0x97e   :  { %8527 = vmatmul.mubr.msk.f32.gmra.mrb[60].mxu1 %vm3397_vm10, %v7236_v7 }
 0x97f   :  { %v6150_v11 = vpop.permute.xlu1 %6149 }
 0x980   :  { %v6148_v29 = vpop.permute.xlu0 %6147  ;;  %v7110_v42 = vsel %vm3186_vm7, %v7046_v54, %v6150_v11 }
 0x981   :  { %v8480_v31 = vpop.f32.mrb[28].mxu1  ;;  %v7109_v27 = vsel %vm3186_vm7, %v7045_v41, %v6148_v29 }
 0x982   :  { %v7659_v15 = vadd.f32 %v14168_v10, %v8480_v31  ;;  %v7653_v6 = vpop.f32.mrb[29].mxu1  ;;  %v7869_v31 = vld [vmem:[%s14479_s0 + $0x128] sm:$0xff] }
 0x983   :  { %v7654_v18 = vadd.f32 %v14168_v10, %v7653_v6  ;;  %v6406_v55 = vpop.permute.xlu1 %6405 }
 0x984   :  { %v7925_v12 = vadd.f32 %v7861_v63, %v7659_v15  ;;  %v6404_v56 = vpop.permute.xlu0 %6403  ;;  %v7174_v3 = vsel %vm3251_vm8, %v7110_v42, %v6406_v55  ;;  %v7877_v42 = vld [vmem:[%s14479_s0 + $0x168] sm:$0xff] }
 0x985   :  { %v7924_v51 = vadd.f32 %v7860_v14, %v7654_v18  ;;  %v7173_v19 = vsel %vm3251_vm8, %v7109_v27, %v6404_v56 }
 0x986   :  { %7989 = vst.msk [vmem:[%s14484_s5 + $0xe8] sm:$0xff] %vm20_vm0, %v7925_v12  ;;  %v7872_v12 = vld [vmem:[%s14479_s0 + $0x140] sm:$0xff] }
 0x987   :  { %7988 = vst.msk [vmem:[%s14484_s5 + $0xe0] sm:$0xff] %vm20_vm0, %v7924_v51  ;;  %v6662_v47 = vpop.permute.xlu1 %6661 }
 0x988   :  { %v6660_v5 = vpop.permute.xlu0 %6659  ;;  %v7238_v4 = vsel %vm3316_vm9, %v7174_v3, %v6662_v47  ;;  %v7876_v3 = vld [vmem:[%s14479_s0 + $0x160] sm:$0xff] }
 0x989   :  { %v7237_v44 = vsel %vm3316_vm9, %v7173_v19, %v6660_v5 }
 0x98a   :  { %8529 = vmatprep.mubr.msk.f32.mxu1 %vm3397_vm10, %v7237_v44 }
 0x98b   :  { %8530 = vmatmul.mubr.msk.f32.gmra.mrb[62].mxu1 %vm3397_vm10, %v7238_v4 }
 0x98d   :  { %v8483_v34 = vpop.f32.mrb[30].mxu1 }
 0x98e   :  { %v7669_v21 = vadd.f32 %v14168_v10, %v8483_v34  ;;  %v7663_v9 = vpop.f32.mrb[31].mxu1 }
 0x98f   :  { %v7664_v1 = vadd.f32 %v14168_v10, %v7663_v9 }
 0x990   :  { %v7927_v43 = vadd.f32 %v7863_v20, %v7669_v21  ;;  %v7879_v21 = vld [vmem:[%s14479_s0 + $0x178] sm:$0xff] }
 0x991   :  { %v7926_v2 = vadd.f32 %v7862_v36, %v7664_v1  ;;  %v7878_v1 = vld [vmem:[%s14479_s0 + $0x170] sm:$0xff] }
 0x992   :  { %7991 = vst.msk [vmem:[%s14484_s5 + $0xf8] sm:$0xff] %vm20_vm0, %v7927_v43 }
 0x993   :  { %7990 = vst.msk [vmem:[%s14484_s5 + $0xf0] sm:$0xff] %vm20_vm0, %v7926_v2 }
 0x999   :  { %v8486_v40 = vpop.f32.mrb[32].mxu1 }
 0x99a   :  { %v7679_v32 = vadd.f32 %v14168_v10, %v8486_v40  ;;  %v7673_v26 = vpop.f32.mrb[33].mxu1 }
 0x99b   :  { %v7674_v0 = vadd.f32 %v14168_v10, %v7673_v26 }
 0x99c   :  { %v7929_v33 = vadd.f32 %v7865_v52, %v7679_v32  ;;  %v7881_v32 = vld [vmem:[%s14479_s0 + $0x188] sm:$0xff] }
 0x99d   :  { %v7928_v46 = vadd.f32 %v7864_v22, %v7674_v0  ;;  %v7880_v0 = vld [vmem:[%s14479_s0 + $0x180] sm:$0xff] }
 0x99e   :  { %7993 = vst.msk [vmem:[%s14484_s5 + $0x108] sm:$0xff] %vm20_vm0, %v7929_v33 }
 0x99f   :  { %7992 = vst.msk [vmem:[%s14484_s5 + $0x100] sm:$0xff] %vm20_vm0, %v7928_v46 }
 0x9a5   :  { %v8489_v59 = vpop.f32.mrb[34].mxu1 }
 0x9a6   :  { %v7689_v60 = vadd.f32 %v14168_v10, %v8489_v59  ;;  %v7683_v16 = vpop.f32.mrb[35].mxu1 }
 0x9a7   :  { %v7684_v38 = vadd.f32 %v14168_v10, %v7683_v16 }
 0x9a8   :  { %v7931_v7 = vadd.f32 %v7867_v30, %v7689_v60  ;;  %v7883_v60 = vld [vmem:[%s14479_s0 + $0x198] sm:$0xff] }
 0x9a9   :  { %v7930_v11 = vadd.f32 %v7866_v17, %v7684_v38  ;;  %v7882_v38 = vld [vmem:[%s14479_s0 + $0x190] sm:$0xff] }
 0x9aa   :  { %7995 = vst.msk [vmem:[%s14484_s5 + $0x118] sm:$0xff] %vm20_vm0, %v7931_v7 }
 0x9ab   :  { %7994 = vst.msk [vmem:[%s14484_s5 + $0x110] sm:$0xff] %vm20_vm0, %v7930_v11 }
 0x9b1   :  { %v8492_v29 = vpop.f32.mrb[36].mxu1 }
 0x9b2   :  { %v7699_v63 = vadd.f32 %v14168_v10, %v8492_v29  ;;  %v7693_v53 = vpop.f32.mrb[37].mxu1 }
 0x9b3   :  { %v7694_v48 = vadd.f32 %v14168_v10, %v7693_v53 }
 0x9b4   :  { %v7933_v15 = vadd.f32 %v7869_v31, %v7699_v63  ;;  %v7885_v63 = vld [vmem:[%s14479_s0 + $0x1a8] sm:$0xff] }
 0x9b5   :  { %v7932_v6 = vadd.f32 %v7868_v45, %v7694_v48  ;;  %v7884_v48 = vld [vmem:[%s14479_s0 + $0x1a0] sm:$0xff] }
 0x9b6   :  { %7997 = vst.msk [vmem:[%s14484_s5 + $0x128] sm:$0xff] %vm20_vm0, %v7933_v15 }
 0x9b7   :  { %7996 = vst.msk [vmem:[%s14484_s5 + $0x120] sm:$0xff] %vm20_vm0, %v7932_v6 }
 0x9bd   :  { %v8495_v14 = vpop.f32.mrb[38].mxu1 }
 0x9be   :  { %v7709_v50 = vadd.f32 %v14168_v10, %v8495_v14  ;;  %v7703_v24 = vpop.f32.mrb[39].mxu1 }
 0x9bf   :  { %v7704_v61 = vadd.f32 %v14168_v10, %v7703_v24 }
 0x9c0   :  { %v7935_v18 = vadd.f32 %v7871_v8, %v7709_v50  ;;  %v7887_v50 = vld [vmem:[%s14479_s0 + $0x1b8] sm:$0xff] }
 0x9c1   :  { %v7934_v55 = vadd.f32 %v7870_v13, %v7704_v61  ;;  %v7886_v61 = vld [vmem:[%s14479_s0 + $0x1b0] sm:$0xff] }
 0x9c2   :  { %7999 = vst.msk [vmem:[%s14484_s5 + $0x138] sm:$0xff] %vm20_vm0, %v7935_v18 }
 0x9c3   :  { %7998 = vst.msk [vmem:[%s14484_s5 + $0x130] sm:$0xff] %vm20_vm0, %v7934_v55 }
 0x9c9   :  { %v8498_v23 = vpop.f32.mrb[40].mxu1 }
 0x9ca   :  { %v7719_v28 = vadd.f32 %v14168_v10, %v8498_v23  ;;  %v7713_v57 = vpop.f32.mrb[41].mxu1 }
 0x9cb   :  { %v7714_v56 = vadd.f32 %v14168_v10, %v7713_v57 }
 0x9cc   :  { %v7937_v62 = vadd.f32 %v7873_v39, %v7719_v28  ;;  %v7889_v28 = vld [vmem:[%s14479_s0 + $0x1c8] sm:$0xff] }
 0x9cd   :  { %v7936_v58 = vadd.f32 %v7872_v12, %v7714_v56  ;;  %v7888_v56 = vld [vmem:[%s14479_s0 + $0x1c0] sm:$0xff] }
 0x9ce   :  { %8001 = vst.msk [vmem:[%s14484_s5 + $0x148] sm:$0xff] %vm20_vm0, %v7937_v62 }
 0x9cf   :  { %8000 = vst.msk [vmem:[%s14484_s5 + $0x140] sm:$0xff] %vm20_vm0, %v7936_v58 }
 0x9d5   :  { %v8501_v37 = vpop.f32.mrb[42].mxu1 }
 0x9d6   :  { %v7729_v51 = vadd.f32 %v14168_v10, %v8501_v37  ;;  %v7723_v25 = vpop.f32.mrb[43].mxu1 }
 0x9d7   :  { %v7724_v41 = vadd.f32 %v14168_v10, %v7723_v25 }
 0x9d8   :  { %v7939_v54 = vadd.f32 %v7875_v49, %v7729_v51  ;;  %v7891_v51 = vld [vmem:[%s14479_s0 + $0x1d8] sm:$0xff] }
 0x9d9   :  { %v7938_v27 = vadd.f32 %v7874_v35, %v7724_v41  ;;  %v7890_v41 = vld [vmem:[%s14479_s0 + $0x1d0] sm:$0xff] }
 0x9da   :  { %8003 = vst.msk [vmem:[%s14484_s5 + $0x158] sm:$0xff] %vm20_vm0, %v7939_v54 }
 0x9db   :  { %8002 = vst.msk [vmem:[%s14484_s5 + $0x150] sm:$0xff] %vm20_vm0, %v7938_v27 }
 0x9e1   :  { %v8504_v47 = vpop.f32.mrb[44].mxu1 }
 0x9e2   :  { %v7739_v19 = vadd.f32 %v14168_v10, %v8504_v47  ;;  %v7733_v5 = vpop.f32.mrb[45].mxu1 }
 0x9e3   :  { %v7734_v44 = vadd.f32 %v14168_v10, %v7733_v5 }
 0x9e4   :  { %v7941_v4 = vadd.f32 %v7877_v42, %v7739_v19  ;;  %v7893_v19 = vld [vmem:[%s14479_s0 + $0x1e8] sm:$0xff] }
 0x9e5   :  { %v7940_v34 = vadd.f32 %v7876_v3, %v7734_v44  ;;  %v7892_v44 = vld [vmem:[%s14479_s0 + $0x1e0] sm:$0xff] }
 0x9e6   :  { %8005 = vst.msk [vmem:[%s14484_s5 + $0x168] sm:$0xff] %vm20_vm0, %v7941_v4 }
 0x9e7   :  { %8004 = vst.msk [vmem:[%s14484_s5 + $0x160] sm:$0xff] %vm20_vm0, %v7940_v34 }
 0x9ed   :  { %v8507_v20 = vpop.f32.mrb[46].mxu1 }
 0x9ee   :  { %v7749_v9 = vadd.f32 %v14168_v10, %v8507_v20  ;;  %v7743_v36 = vpop.f32.mrb[47].mxu1 }
 0x9ef   :  { %v7744_v43 = vadd.f32 %v14168_v10, %v7743_v36 }
 0x9f0   :  { %v7943_v2 = vadd.f32 %v7879_v21, %v7749_v9  ;;  %v7895_v9 = vld [vmem:[%s14479_s0 + $0x1f8] sm:$0xff] }
 0x9f1   :  { %v7942_v40 = vadd.f32 %v7878_v1, %v7744_v43  ;;  %v7894_v43 = vld [vmem:[%s14479_s0 + $0x1f0] sm:$0xff] }
 0x9f2   :  { %8007 = vst.msk [vmem:[%s14484_s5 + $0x178] sm:$0xff] %vm20_vm0, %v7943_v2 }
 0x9f3   :  { %8006 = vst.msk [vmem:[%s14484_s5 + $0x170] sm:$0xff] %vm20_vm0, %v7942_v40 }
 0x9f9   :  { %v8510_v52 = vpop.f32.mrb[48].mxu1 }
 0x9fa   :  { %v7759_v26 = vadd.f32 %v14168_v10, %v8510_v52  ;;  %v7753_v22 = vpop.f32.mrb[49].mxu1 }
 0x9fb   :  { %v7754_v33 = vadd.f32 %v14168_v10, %v7753_v22 }
 0x9fc   :  { %v7945_v46 = vadd.f32 %v7881_v32, %v7759_v26 }
 0x9fd   :  { %v7944_v59 = vadd.f32 %v7880_v0, %v7754_v33 }
 0x9fe   :  { %8009 = vst.msk [vmem:[%s14484_s5 + $0x188] sm:$0xff] %vm20_vm0, %v7945_v46 }
 0x9ff   :  { %8008 = vst.msk [vmem:[%s14484_s5 + $0x180] sm:$0xff] %vm20_vm0, %v7944_v59 }
 0xa05   :  { %v8513_v30 = vpop.f32.mrb[50].mxu1 }
 0xa06   :  { %v7769_v16 = vadd.f32 %v14168_v10, %v8513_v30  ;;  %v7763_v17 = vpop.f32.mrb[51].mxu1 }
 0xa07   :  { %v7764_v7 = vadd.f32 %v14168_v10, %v7763_v17 }
 0xa08   :  { %v7947_v11 = vadd.f32 %v7883_v60, %v7769_v16 }
 0xa09   :  { %v7946_v29 = vadd.f32 %v7882_v38, %v7764_v7 }
 0xa0a   :  { %8011 = vst.msk [vmem:[%s14484_s5 + $0x198] sm:$0xff] %vm20_vm0, %v7947_v11 }
 0xa0b   :  { %8010 = vst.msk [vmem:[%s14484_s5 + $0x190] sm:$0xff] %vm20_vm0, %v7946_v29 }
 0xa11   :  { %v8516_v31 = vpop.f32.mrb[52].mxu1 }
 0xa12   :  { %v7779_v53 = vadd.f32 %v14168_v10, %v8516_v31  ;;  %v7773_v45 = vpop.f32.mrb[53].mxu1 }
 0xa13   :  { %v7774_v15 = vadd.f32 %v14168_v10, %v7773_v45 }
 0xa14   :  { %v7949_v6 = vadd.f32 %v7885_v63, %v7779_v53 }
 0xa15   :  { %v7948_v14 = vadd.f32 %v7884_v48, %v7774_v15 }
 0xa16   :  { %8013 = vst.msk [vmem:[%s14484_s5 + $0x1a8] sm:$0xff] %vm20_vm0, %v7949_v6 }
 0xa17   :  { %8012 = vst.msk [vmem:[%s14484_s5 + $0x1a0] sm:$0xff] %vm20_vm0, %v7948_v14 }
 0xa21   :  { %v8519_v8 = vpop.f32.mrb[54].mxu1 }
 0xa22   :  { %v7789_v24 = vadd.f32 %v14168_v10, %v8519_v8  ;;  %v7783_v13 = vpop.f32.mrb[55].mxu1 }
 0xa23   :  { %v7784_v18 = vadd.f32 %v14168_v10, %v7783_v13 }
 0xa24   :  { %v7951_v55 = vadd.f32 %v7887_v50, %v7789_v24 }
 0xa25   :  { %v7950_v23 = vadd.f32 %v7886_v61, %v7784_v18 }
 0xa26   :  { %8015 = vst.msk [vmem:[%s14484_s5 + $0x1b8] sm:$0xff] %vm20_vm0, %v7951_v55 }
 0xa27   :  { %8014 = vst.msk [vmem:[%s14484_s5 + $0x1b0] sm:$0xff] %vm20_vm0, %v7950_v23 }
 0xa31   :  { %v8522_v39 = vpop.f32.mrb[56].mxu1 }
 0xa32   :  { %v7799_v57 = vadd.f32 %v14168_v10, %v8522_v39  ;;  %v7793_v12 = vpop.f32.mrb[57].mxu1 }
 0xa33   :  { %v7794_v62 = vadd.f32 %v14168_v10, %v7793_v12 }
 0xa34   :  { %v7953_v58 = vadd.f32 %v7889_v28, %v7799_v57 }
 0xa35   :  { %v7952_v37 = vadd.f32 %v7888_v56, %v7794_v62 }
 0xa36   :  { %8017 = vst.msk [vmem:[%s14484_s5 + $0x1c8] sm:$0xff] %vm20_vm0, %v7953_v58 }
 0xa37   :  { %8016 = vst.msk [vmem:[%s14484_s5 + $0x1c0] sm:$0xff] %vm20_vm0, %v7952_v37 }
 0xa41   :  { %v8525_v49 = vpop.f32.mrb[58].mxu1 }
 0xa42   :  { %v7809_v25 = vadd.f32 %v14168_v10, %v8525_v49  ;;  %v7803_v35 = vpop.f32.mrb[59].mxu1 }
 0xa43   :  { %v7804_v54 = vadd.f32 %v14168_v10, %v7803_v35 }
 0xa44   :  { %v7955_v27 = vadd.f32 %v7891_v51, %v7809_v25 }
 0xa45   :  { %v7954_v47 = vadd.f32 %v7890_v41, %v7804_v54 }
 0xa46   :  { %8019 = vst.msk [vmem:[%s14484_s5 + $0x1d8] sm:$0xff] %vm20_vm0, %v7955_v27 }
 0xa47   :  { %8018 = vst.msk [vmem:[%s14484_s5 + $0x1d0] sm:$0xff] %vm20_vm0, %v7954_v47 }
 0xa51   :  { %v8528_v42 = vpop.f32.mrb[60].mxu1 }
 0xa52   :  { %v7819_v5 = vadd.f32 %v14168_v10, %v8528_v42  ;;  %v7813_v3 = vpop.f32.mrb[61].mxu1 }
 0xa53   :  { %v7814_v4 = vadd.f32 %v14168_v10, %v7813_v3 }
 0xa54   :  { %v7957_v34 = vadd.f32 %v7893_v19, %v7819_v5 }
 0xa55   :  { %v7956_v20 = vadd.f32 %v7892_v44, %v7814_v4 }
 0xa56   :  { %8021 = vst.msk [vmem:[%s14484_s5 + $0x1e8] sm:$0xff] %vm20_vm0, %v7957_v34 }
 0xa57   :  { %8020 = vst.msk [vmem:[%s14484_s5 + $0x1e0] sm:$0xff] %vm20_vm0, %v7956_v20 }
 0xa5e   :  { %v8531_v21 = vpop.f32.mrb[62].mxu1 }
 0xa5f   :  { %v7829_v36 = vadd.f32 %v14168_v10, %v8531_v21  ;;  %v7823_v1 = vpop.f32.mrb[63].mxu1 }
 0xa60   :  { %v7824_v2 = vadd.f32 %v14168_v10, %v7823_v1 }
 0xa61   :  { %v7959_v40 = vadd.f32 %v7895_v9, %v7829_v36 }
 0xa62   :  { %v7958_v52 = vadd.f32 %v7894_v43, %v7824_v2 }
 0xa63   :  { %8023 = vst.msk [vmem:[%s14484_s5 + $0x1f8] sm:$0xff] %vm20_vm0, %v7959_v40 }
 0xa64   :  { %8022 = vst.msk [vmem:[%s14484_s5 + $0x1f0] sm:$0xff] %vm20_vm0, %v7958_v52 }

</bundles_post_ra>
